<compile_context>
chip_gen: v5e
topology: v5e:2x2
jax: 0.10.0
libtpu: 0.0.40
codegen_flags: <defaults>
</compile_context>

<pallas_src>
import math

import jax
import jax.numpy as jnp
from jax.experimental import pallas as pl
from jax.experimental.pallas import tpu as pltpu


def _round_up(x, m):
    return ((x + m - 1) // m) * m


def _layer_norm(x, w, b, eps=1e-5):
    mu = jnp.mean(x, axis=-1, keepdims=True)
    var = jnp.mean((x - mu) * (x - mu), axis=-1, keepdims=True)
    return (x - mu) * jax.lax.rsqrt(var + eps) * w + b


def _make_kernel(S, Bblk, H, L):
    inv_S = 1.0 / S

    def kernel(*refs):
        x_refs = refs[0:S]
        mlp_refs = refs[S:5 * S]
        hmask_r = refs[5 * S]
        (wq_r, bq_r, wk_r, bk_r, wv_r, bv_r, wo_r, bo_r,
         ln1w_r, ln1b_r, wff1_r, bff1_r, wff2_r, bff2_r,
         ln2w_r, ln2b_r) = refs[5 * S + 1:5 * S + 17]
        out_ref = refs[5 * S + 17]

        # ---- per-modality MLP: Linear(D_i,D_i) -> ReLU -> Linear(D_i,H) ----
        hs = []
        for i in range(S):
            x = x_refs[i][...]                       # (Bblk, D_i) bf16 (wrapper cast)
            w1 = mlp_refs[4 * i][...]
            b1 = mlp_refs[4 * i + 1][...]
            w2 = mlp_refs[4 * i + 2][...]
            b2 = mlp_refs[4 * i + 3][...]
            h = jnp.dot(x, w1, preferred_element_type=jnp.float32) + b1
            h = jnp.maximum(h, 0.0)
            h = jnp.dot(h.astype(w2.dtype), w2,
                        preferred_element_type=jnp.float32) + b2
            hs.append(h)

        # seq-major token matrix: row (s, b) -> s*Bblk + b (sublane-aligned concat)
        x_flat = jnp.concatenate(hs, axis=0)         # (S*Bblk, H) f32

        hmask = hmask_r[...]                         # (H, H) f32 block-diag ones

        # ---- nlayers x TransformerEncoderLayer (post-norm) ----
        for l in range(L):
            wq = wq_r[l]; bq = bq_r[l]               # 1/sqrt(hd) folded in (wrapper)
            wk = wk_r[l]; bk = bk_r[l]
            wv = wv_r[l]; bv = bv_r[l]
            wo = wo_r[l]; bo = bo_r[l]
            ln1w = ln1w_r[l]; ln1b = ln1b_r[l]
            wff1 = wff1_r[l]; bff1 = bff1_r[l]
            wff2 = wff2_r[l]; bff2 = bff2_r[l]
            ln2w = ln2w_r[l]; ln2b = ln2b_r[l]

            # q/k/v: lane-aligned (H,H) GEMMs over the full token matrix.
            # (kept as 3 GEMMs: with H=32 the lane ranges of a fused 3H-wide result
            #  would need lane shuffles to consume downstream.)
            xb = x_flat.astype(wq.dtype)
            q = jnp.dot(xb, wq, preferred_element_type=jnp.float32) + bq
            k = jnp.dot(xb, wk, preferred_element_type=jnp.float32) + bk
            v = jnp.dot(xb, wv, preferred_element_type=jnp.float32) + bv

            # heads stay on lanes: per-modality (Bblk, H) row slabs (static,
            # sublane-aligned slices -> no relayout).
            q_s = [q[s * Bblk:(s + 1) * Bblk] for s in range(S)]
            k_s = [k[t * Bblk:(t + 1) * Bblk] for t in range(S)]
            v_s = [v[t * Bblk:(t + 1) * Bblk] for t in range(S)]

            # scores[s][t][b, h*hd+j] = sum_d q_s[b,h*hd+d] * k_t[b,h*hd+d]:
            # VPU elementwise product + per-head sum-and-broadcast via one tiny
            # MXU matmul with the block-diagonal ones matrix.
            scores = [[jnp.dot(q_s[s] * k_s[t], hmask,
                               preferred_element_type=jnp.float32)
                       for t in range(S)] for s in range(S)]

            ctx = []
            for s in range(S):
                row = scores[s]
                m = row[0]
                for t in range(1, S):
                    m = jnp.maximum(m, row[t])
                p = [jnp.exp(row[t] - m) for t in range(S)]
                den = p[0]
                for t in range(1, S):
                    den = den + p[t]
                inv = pl.reciprocal(den, approx=True)   # EUP slot; not bit-exact div
                o = p[0] * inv * v_s[0]
                for t in range(1, S):
                    o = o + p[t] * inv * v_s[t]
                ctx.append(o)
            # TODO(synk): attention / residual / ffn dropout (p=0.1) is identity at inference
            attn = jnp.concatenate(ctx, axis=0)         # (S*Bblk, H)

            attn = jnp.dot(attn.astype(wo.dtype), wo,
                           preferred_element_type=jnp.float32) + bo
            x_flat = _layer_norm(x_flat + attn, ln1w, ln1b)

            ff = jnp.dot(x_flat.astype(wff1.dtype), wff1,
                         preferred_element_type=jnp.float32) + bff1
            # TODO(synk): PyTorch uses exact erf-GELU; Mosaic lacks an erf lowering,
            # tanh-approx deviates by <~1e-3 and is cheaper on the single EUP port.
            ff = jax.nn.gelu(ff, approximate=True)
            ff = jnp.dot(ff.astype(wff2.dtype), wff2,
                         preferred_element_type=jnp.float32) + bff2
            x_flat = _layer_norm(x_flat + ff, ln2w, ln2b)

        # ---- AdaptiveAvgPool1d(1) over modalities: unrolled slab sum ----
        acc = x_flat[0:Bblk]
        for s in range(1, S):
            acc = acc + x_flat[s * Bblk:(s + 1) * Bblk]
        out_ref[...] = acc * inv_S

    return kernel


def attention_fusion_forward(features, params, *, bblk_max=None,
                             mxu_dtype=jnp.bfloat16):
    """Returns (output (B, hidden_dim), 0), matching the PyTorch module."""
    S = len(features)
    B = int(features[0].shape[0])
    H = int(params['wo'].shape[-1])
    F = int(params['wff1'].shape[-1])
    L = int(params['wqkv'].shape[0])
    nheads = int(params['nheads'])
    hd = H // nheads
    input_dims = tuple(int(f.shape[1]) for f in features)

    assert params['wqkv'].shape == (L, H, 3 * H)
    assert params['wo'].shape == (L, H, H)

    # ---- generation-aware VMEM budget / batch-block size ---------------------
    try:
        vmem_cap = int(getattr(pltpu.get_tpu_info(), 'vmem_capacity_bytes',
                               64 * 2**20))
    except Exception:
        vmem_cap = 64 * 2**20                      # conservative (v7x) default
    vmem_limit = int(min(vmem_cap * 3 // 4, 100 * 2**20))
    if bblk_max is None:
        bblk_max = 1024 if vmem_cap >= 96 * 2**20 else 512

    # ---- batch blocking (16-row multiple for bf16 sublane packing) -----------
    Bblk = min(_round_up(B, 16), bblk_max)
    Bpad = _round_up(B, Bblk)
    if Bpad // Bblk < 2 and Bblk > 16:
        # v7x has 2 TensorCores; the "parallel" axis only shards if nblk >= 2.
        Bblk = max(16, _round_up(pl.cdiv(B, 2), 16))
        Bpad = _round_up(B, Bblk)
    nblk = Bpad // Bblk

    # features: bf16 in the wrapper (halves streamed DMA bytes), zero-padded rows
    feats = [f.astype(mxu_dtype) for f in features]
    if Bpad != B:
        feats = [jnp.pad(f, ((0, Bpad - B), (0, 0))) for f in feats]

    # ---- weights: split qkv, fold 1/sqrt(hd) into q, cast MXU operands bf16 ---
    wq, wk, wv = jnp.split(params['wqkv'], 3, axis=-1)      # (L, H, H) each
    bq, bk, bv = jnp.split(params['bqkv'], 3, axis=-1)      # (L, 1, H) each
    scale = 1.0 / math.sqrt(hd)
    wq = wq * scale
    bq = bq * scale

    cast = lambda a: a.astype(mxu_dtype)
    f32 = lambda a: a.astype(jnp.float32)

    # block-diagonal ones: per-head sum-and-broadcast of q*k along lanes
    hmask = jnp.kron(jnp.eye(nheads, dtype=jnp.float32),
                     jnp.ones((hd, hd), jnp.float32))        # (H, H) f32

    const_inputs = []
    for m in params['mlp']:
        const_inputs += [cast(m['w1']), f32(m['b1']), cast(m['w2']), f32(m['b2'])]
    const_inputs.append(hmask)
    const_inputs += [
        cast(wq), f32(bq), cast(wk), f32(bk), cast(wv), f32(bv),
        cast(params['wo']), f32(params['bo']),
        f32(params['ln1w']), f32(params['ln1b']),
        cast(params['wff1']), f32(params['bff1']),
        cast(params['wff2']), f32(params['bff2']),
        f32(params['ln2w']), f32(params['ln2b']),
    ]

    # ---- advisory cost estimate -----------------------------------------------
    flops = int(2 * B * (sum(d * d + d * H for d in input_dims)
                         + L * (S * (4 * H * H + 2 * H * F)
                                + S * S * (H * H + 3 * H))))
    transcendentals = int(B * L * S * (F + S * H))
    bytes_accessed = int(sum(int(a.size) * a.dtype.itemsize
                             for a in feats + const_inputs) + Bpad * H * 4)

    kernel = _make_kernel(S, Bblk, H, L)

    def const_spec(arr, single_buffer):
        nd = arr.ndim
        idx = lambda i, _nd=nd: (0,) * _nd
        if single_buffer:
            # never-changing blocks: single buffer halves weight VMEM footprint
            return pl.BlockSpec(arr.shape, idx, pipeline_mode=pl.Buffered(1))
        return pl.BlockSpec(arr.shape, idx)

    def run(single_buffer_weights):
        in_specs = [pl.BlockSpec((Bblk, d), lambda i: (i, 0)) for d in input_dims]
        in_specs += [const_spec(a, single_buffer_weights) for a in const_inputs]
        return pl.pallas_call(
            kernel,
            out_shape=jax.ShapeDtypeStruct((Bpad, H), jnp.float32),
            grid=(nblk,),
            in_specs=in_specs,
            out_specs=pl.BlockSpec((Bblk, H), lambda i: (i, 0)),
            compiler_params=pltpu.CompilerParams(
                dimension_semantics=("parallel",),
                vmem_limit_bytes=vmem_limit),
            cost_estimate=pl.CostEstimate(
                flops=flops, transcendentals=transcendentals,
                bytes_accessed=bytes_accessed),
        )(*feats, *const_inputs)

    try:
        out = run(True)
    except Exception:
        # pl.Buffered(1) unsupported on this jax version -> default double-buffering
        out = run(False)

    return out[:B], 0


def attention_fusion_reference(features, params, mxu_dtype=jnp.bfloat16):
    """Pure-JAX reference mirroring the kernel's mixed-precision policy."""
    S = len(features)
    H = int(params['wo'].shape[-1])
    L = int(params['wqkv'].shape[0])
    nheads = int(params['nheads'])
    hd = H // nheads
    cast = lambda a: a.astype(mxu_dtype)

    hs = []
    for i, f in enumerate(features):
        m = params['mlp'][i]
        h = jnp.dot(cast(f), cast(m['w1']),
                    preferred_element_type=jnp.float32) + m['b1']
        h = jnp.maximum(h, 0.0)
        h = jnp.dot(cast(h), cast(m['w2']),
                    preferred_element_type=jnp.float32) + m['b2']
        hs.append(h)
    x = jnp.stack(hs, axis=0)                                # (S, B, H)
    B = x.shape[1]

    wq_a, wk_a, wv_a = jnp.split(params['wqkv'], 3, axis=-1)
    bq_a, bk_a, bv_a = jnp.split(params['bqkv'], 3, axis=-1)
    scale = 1.0 / math.sqrt(hd)
    for l in range(L):
        xb = cast(x)
        q = jnp.dot(xb, cast(wq_a[l] * scale),
                    preferred_element_type=jnp.float32) + bq_a[l] * scale
        k = jnp.dot(xb, cast(wk_a[l]),
                    preferred_element_type=jnp.float32) + bk_a[l]
        v = jnp.dot(xb, cast(wv_a[l]),
                    preferred_element_type=jnp.float32) + bv_a[l]
        q = q.reshape(S, B, nheads, hd)
        k = k.reshape(S, B, nheads, hd)
        v = v.reshape(S, B, nheads, hd)
        p = jax.nn.softmax(jnp.einsum('sbhd,tbhd->bhst', q, k), axis=-1)
        ctx = jnp.einsum('bhst,tbhd->sbhd', p, v).reshape(S, B, H)
        attn = jnp.dot(cast(ctx), cast(params['wo'][l]),
                       preferred_element_type=jnp.float32) + params['bo'][l]
        x = _layer_norm(x + attn, params['ln1w'][l], params['ln1b'][l])
        ff = jnp.dot(cast(x), cast(params['wff1'][l]),
                     preferred_element_type=jnp.float32) + params['bff1'][l]
        ff = jax.nn.gelu(ff, approximate=True)
        ff = jnp.dot(cast(ff), cast(params['wff2'][l]),
                     preferred_element_type=jnp.float32) + params['bff2'][l]
        x = _layer_norm(x + ff, params['ln2w'][l], params['ln2b'][l])
    return jnp.mean(x, axis=0)                               # (B, H)


def init_params(key, input_dims, H=32, nheads=4, F=64, L=2, std=0.02):
    """Deterministic synthetic init: weights ~ N(0, 0.02), biases 0, LN = (1, 0)."""
    keys = iter(jax.random.split(key, 8 + 2 * len(input_dims)))
    mlp = []
    for d in input_dims:
        mlp.append(dict(
            w1=jax.random.normal(next(keys), (d, d), jnp.float32) * std,
            b1=jnp.zeros((1, d), jnp.float32),
            w2=jax.random.normal(next(keys), (d, H), jnp.float32) * std,
            b2=jnp.zeros((1, H), jnp.float32),
        ))
    return dict(
        mlp=mlp,
        nheads=nheads,
        wqkv=jax.random.normal(next(keys), (L, H, 3 * H), jnp.float32) * std,
        bqkv=jnp.zeros((L, 1, 3 * H), jnp.float32),
        wo=jax.random.normal(next(keys), (L, H, H), jnp.float32) * std,
        bo=jnp.zeros((L, 1, H), jnp.float32),
        ln1w=jnp.ones((L, 1, H), jnp.float32),
        ln1b=jnp.zeros((L, 1, H), jnp.float32),
        wff1=jax.random.normal(next(keys), (L, H, F), jnp.float32) * std,
        bff1=jnp.zeros((L, 1, F), jnp.float32),
        wff2=jax.random.normal(next(keys), (L, F, H), jnp.float32) * std,
        bff2=jnp.zeros((L, 1, H), jnp.float32),
        ln2w=jnp.ones((L, 1, H), jnp.float32),
        ln2b=jnp.zeros((L, 1, H), jnp.float32),
    )


if __name__ == "__main__":
    key = jax.random.PRNGKey(0)
    input_dims = (16, 32, 8)          # 3 modalities -> sequence length S = 3
    B, H, NHEADS, FF, L = 2, 32, 4, 64, 2

    kp, *fkeys = jax.random.split(key, 1 + len(input_dims))
    features = tuple(
        jax.random.normal(fk, (B, d), jnp.float32)
        for fk, d in zip(fkeys, input_dims))
    params = init_params(kp, input_dims, H=H, nheads=NHEADS, F=FF, L=L)

    out, zero = attention_fusion_forward(features, params)
    out = jax.block_until_ready(out)
    ref = jax.block_until_ready(attention_fusion_reference(features, params))

    assert out.shape == (B, H) and zero == 0
    assert bool(jnp.all(jnp.isfinite(out)))
    assert bool(jnp.allclose(out, ref, atol=3e-2, rtol=3e-2)), \
        float(jnp.max(jnp.abs(out - ref)))
    print("KERNEL_OK")
</pallas_src>

<mosaic_0001>
module attributes {stable_mosaic.version = 11 : i64} {
  func.func @kernel(%arg0: i32, %arg1: memref<16x16xbf16, #tpu.memory_space<vmem>>, %arg2: memref<16x32xbf16, #tpu.memory_space<vmem>>, %arg3: memref<16x8xbf16, #tpu.memory_space<vmem>>, %arg4: memref<16x16xbf16, #tpu.memory_space<vmem>>, %arg5: memref<1x16xf32, #tpu.memory_space<vmem>>, %arg6: memref<16x32xbf16, #tpu.memory_space<vmem>>, %arg7: memref<1x32xf32, #tpu.memory_space<vmem>>, %arg8: memref<32x32xbf16, #tpu.memory_space<vmem>>, %arg9: memref<1x32xf32, #tpu.memory_space<vmem>>, %arg10: memref<32x32xbf16, #tpu.memory_space<vmem>>, %arg11: memref<1x32xf32, #tpu.memory_space<vmem>>, %arg12: memref<8x8xbf16, #tpu.memory_space<vmem>>, %arg13: memref<1x8xf32, #tpu.memory_space<vmem>>, %arg14: memref<8x32xbf16, #tpu.memory_space<vmem>>, %arg15: memref<1x32xf32, #tpu.memory_space<vmem>>, %arg16: memref<32x32xf32, #tpu.memory_space<vmem>>, %arg17: memref<2x32x32xbf16, #tpu.memory_space<vmem>>, %arg18: memref<2x1x32xf32, #tpu.memory_space<vmem>>, %arg19: memref<2x32x32xbf16, #tpu.memory_space<vmem>>, %arg20: memref<2x1x32xf32, #tpu.memory_space<vmem>>, %arg21: memref<2x32x32xbf16, #tpu.memory_space<vmem>>, %arg22: memref<2x1x32xf32, #tpu.memory_space<vmem>>, %arg23: memref<2x32x32xbf16, #tpu.memory_space<vmem>>, %arg24: memref<2x1x32xf32, #tpu.memory_space<vmem>>, %arg25: memref<2x1x32xf32, #tpu.memory_space<vmem>>, %arg26: memref<2x1x32xf32, #tpu.memory_space<vmem>>, %arg27: memref<2x32x64xbf16, #tpu.memory_space<vmem>>, %arg28: memref<2x1x64xf32, #tpu.memory_space<vmem>>, %arg29: memref<2x64x32xbf16, #tpu.memory_space<vmem>>, %arg30: memref<2x1x32xf32, #tpu.memory_space<vmem>>, %arg31: memref<2x1x32xf32, #tpu.memory_space<vmem>>, %arg32: memref<2x1x32xf32, #tpu.memory_space<vmem>>, %arg33: memref<16x32xf32, #tpu.memory_space<vmem>>) attributes {dimension_semantics = [#tpu.dimension_semantics<parallel>], iteration_bounds = array<i64: 1>, scalar_prefetch = 0 : i64, scratch_operands = 0 : i64, tpu.core_type = #tpu.core_type<tc>, window_params = [{transform_indices = @transform_0, window_bounds = array<i64: 16, 16>}, {transform_indices = @transform_1, window_bounds = array<i64: 16, 32>}, {transform_indices = @transform_2, window_bounds = array<i64: 16, 8>}, {pipeline_mode = #tpu.pipeline_mode<synchronous>, transform_indices = @transform_3, window_bounds = array<i64: 16, 16>}, {pipeline_mode = #tpu.pipeline_mode<synchronous>, transform_indices = @transform_4, window_bounds = array<i64: 1, 16>}, {pipeline_mode = #tpu.pipeline_mode<synchronous>, transform_indices = @transform_5, window_bounds = array<i64: 16, 32>}, {pipeline_mode = #tpu.pipeline_mode<synchronous>, transform_indices = @transform_6, window_bounds = array<i64: 1, 32>}, {pipeline_mode = #tpu.pipeline_mode<synchronous>, transform_indices = @transform_7, window_bounds = array<i64: 32, 32>}, {pipeline_mode = #tpu.pipeline_mode<synchronous>, transform_indices = @transform_8, window_bounds = array<i64: 1, 32>}, {pipeline_mode = #tpu.pipeline_mode<synchronous>, transform_indices = @transform_9, window_bounds = array<i64: 32, 32>}, {pipeline_mode = #tpu.pipeline_mode<synchronous>, transform_indices = @transform_10, window_bounds = array<i64: 1, 32>}, {pipeline_mode = #tpu.pipeline_mode<synchronous>, transform_indices = @transform_11, window_bounds = array<i64: 8, 8>}, {pipeline_mode = #tpu.pipeline_mode<synchronous>, transform_indices = @transform_12, window_bounds = array<i64: 1, 8>}, {pipeline_mode = #tpu.pipeline_mode<synchronous>, transform_indices = @transform_13, window_bounds = array<i64: 8, 32>}, {pipeline_mode = #tpu.pipeline_mode<synchronous>, transform_indices = @transform_14, window_bounds = array<i64: 1, 32>}, {pipeline_mode = #tpu.pipeline_mode<synchronous>, transform_indices = @transform_15, window_bounds = array<i64: 32, 32>}, {pipeline_mode = #tpu.pipeline_mode<synchronous>, transform_indices = @transform_16, window_bounds = array<i64: 2, 32, 32>}, {pipeline_mode = #tpu.pipeline_mode<synchronous>, transform_indices = @transform_17, window_bounds = array<i64: 2, 1, 32>}, {pipeline_mode = #tpu.pipeline_mode<synchronous>, transform_indices = @transform_18, window_bounds = array<i64: 2, 32, 32>}, {pipeline_mode = #tpu.pipeline_mode<synchronous>, transform_indices = @transform_19, window_bounds = array<i64: 2, 1, 32>}, {pipeline_mode = #tpu.pipeline_mode<synchronous>, transform_indices = @transform_20, window_bounds = array<i64: 2, 32, 32>}, {pipeline_mode = #tpu.pipeline_mode<synchronous>, transform_indices = @transform_21, window_bounds = array<i64: 2, 1, 32>}, {pipeline_mode = #tpu.pipeline_mode<synchronous>, transform_indices = @transform_22, window_bounds = array<i64: 2, 32, 32>}, {pipeline_mode = #tpu.pipeline_mode<synchronous>, transform_indices = @transform_23, window_bounds = array<i64: 2, 1, 32>}, {pipeline_mode = #tpu.pipeline_mode<synchronous>, transform_indices = @transform_24, window_bounds = array<i64: 2, 1, 32>}, {pipeline_mode = #tpu.pipeline_mode<synchronous>, transform_indices = @transform_25, window_bounds = array<i64: 2, 1, 32>}, {pipeline_mode = #tpu.pipeline_mode<synchronous>, transform_indices = @transform_26, window_bounds = array<i64: 2, 32, 64>}, {pipeline_mode = #tpu.pipeline_mode<synchronous>, transform_indices = @transform_27, window_bounds = array<i64: 2, 1, 64>}, {pipeline_mode = #tpu.pipeline_mode<synchronous>, transform_indices = @transform_28, window_bounds = array<i64: 2, 64, 32>}, {pipeline_mode = #tpu.pipeline_mode<synchronous>, transform_indices = @transform_29, window_bounds = array<i64: 2, 1, 32>}, {pipeline_mode = #tpu.pipeline_mode<synchronous>, transform_indices = @transform_30, window_bounds = array<i64: 2, 1, 32>}, {pipeline_mode = #tpu.pipeline_mode<synchronous>, transform_indices = @transform_31, window_bounds = array<i64: 2, 1, 32>}, {transform_indices = @transform_32, window_bounds = array<i64: 16, 32>}]} {
    %c0 = arith.constant 0 : index
    %c0_0 = arith.constant 0 : index
    %0 = vector.load %arg1[%c0, %c0_0] : memref<16x16xbf16, #tpu.memory_space<vmem>>, vector<16x16xbf16>
    %c0_1 = arith.constant 0 : index
    %c0_2 = arith.constant 0 : index
    %1 = vector.load %arg4[%c0_1, %c0_2] : memref<16x16xbf16, #tpu.memory_space<vmem>>, vector<16x16xbf16>
    %c0_3 = arith.constant 0 : index
    %c0_4 = arith.constant 0 : index
    %2 = vector.load %arg5[%c0_3, %c0_4] : memref<1x16xf32, #tpu.memory_space<vmem>>, vector<1x16xf32>
    %c0_5 = arith.constant 0 : index
    %c0_6 = arith.constant 0 : index
    %3 = vector.load %arg6[%c0_5, %c0_6] : memref<16x32xbf16, #tpu.memory_space<vmem>>, vector<16x32xbf16>
    %c0_7 = arith.constant 0 : index
    %c0_8 = arith.constant 0 : index
    %4 = vector.load %arg7[%c0_7, %c0_8] : memref<1x32xf32, #tpu.memory_space<vmem>>, vector<1x32xf32>
    %cst = arith.constant dense<0.000000e+00> : vector<16x16xf32>
    %5 = tpu.matmul %0, %1, %cst {dimension_numbers = #tpu.dot_dimension_numbers<[1], [0], [0], [1], [0, 0, 1, 1], [], []>} : vector<16x16xbf16>, vector<16x16xbf16>, vector<16x16xf32> -> vector<16x16xf32>
    %6 = vector.broadcast %2 : vector<1x16xf32> to vector<16x16xf32>
    %7 = arith.addf %5, %6 : vector<16x16xf32>
    %cst_9 = arith.constant 0.000000e+00 : f32
    %8 = vector.broadcast %cst_9 : f32 to vector<16x16xf32>
    %9 = arith.maximumf %7, %8 : vector<16x16xf32>
    %10 = arith.truncf %9 : vector<16x16xf32> to vector<16x16xbf16>
    %cst_10 = arith.constant dense<0.000000e+00> : vector<16x32xf32>
    %11 = tpu.matmul %10, %3, %cst_10 {dimension_numbers = #tpu.dot_dimension_numbers<[1], [0], [0], [1], [0, 0, 1, 1], [], []>} : vector<16x16xbf16>, vector<16x32xbf16>, vector<16x32xf32> -> vector<16x32xf32>
    %12 = vector.broadcast %4 : vector<1x32xf32> to vector<16x32xf32>
    %13 = arith.addf %11, %12 : vector<16x32xf32>
    %c0_11 = arith.constant 0 : index
    %c0_12 = arith.constant 0 : index
    %14 = vector.load %arg2[%c0_11, %c0_12] : memref<16x32xbf16, #tpu.memory_space<vmem>>, vector<16x32xbf16>
    %c0_13 = arith.constant 0 : index
    %c0_14 = arith.constant 0 : index
    %15 = vector.load %arg8[%c0_13, %c0_14] : memref<32x32xbf16, #tpu.memory_space<vmem>>, vector<32x32xbf16>
    %c0_15 = arith.constant 0 : index
    %c0_16 = arith.constant 0 : index
    %16 = vector.load %arg9[%c0_15, %c0_16] : memref<1x32xf32, #tpu.memory_space<vmem>>, vector<1x32xf32>
    %c0_17 = arith.constant 0 : index
    %c0_18 = arith.constant 0 : index
    %17 = vector.load %arg10[%c0_17, %c0_18] : memref<32x32xbf16, #tpu.memory_space<vmem>>, vector<32x32xbf16>
    %c0_19 = arith.constant 0 : index
    %c0_20 = arith.constant 0 : index
    %18 = vector.load %arg11[%c0_19, %c0_20] : memref<1x32xf32, #tpu.memory_space<vmem>>, vector<1x32xf32>
    %cst_21 = arith.constant dense<0.000000e+00> : vector<16x32xf32>
    %19 = tpu.matmul %14, %15, %cst_21 {dimension_numbers = #tpu.dot_dimension_numbers<[1], [0], [0], [1], [0, 0, 1, 1], [], []>} : vector<16x32xbf16>, vector<32x32xbf16>, vector<16x32xf32> -> vector<16x32xf32>
    %20 = vector.broadcast %16 : vector<1x32xf32> to vector<16x32xf32>
    %21 = arith.addf %19, %20 : vector<16x32xf32>
    %cst_22 = arith.constant 0.000000e+00 : f32
    %22 = vector.broadcast %cst_22 : f32 to vector<16x32xf32>
    %23 = arith.maximumf %21, %22 : vector<16x32xf32>
    %24 = arith.truncf %23 : vector<16x32xf32> to vector<16x32xbf16>
    %cst_23 = arith.constant dense<0.000000e+00> : vector<16x32xf32>
    %25 = tpu.matmul %24, %17, %cst_23 {dimension_numbers = #tpu.dot_dimension_numbers<[1], [0], [0], [1], [0, 0, 1, 1], [], []>} : vector<16x32xbf16>, vector<32x32xbf16>, vector<16x32xf32> -> vector<16x32xf32>
    %26 = vector.broadcast %18 : vector<1x32xf32> to vector<16x32xf32>
    %27 = arith.addf %25, %26 : vector<16x32xf32>
    %c0_24 = arith.constant 0 : index
    %c0_25 = arith.constant 0 : index
    %28 = vector.load %arg3[%c0_24, %c0_25] : memref<16x8xbf16, #tpu.memory_space<vmem>>, vector<16x8xbf16>
    %c0_26 = arith.constant 0 : index
    %c0_27 = arith.constant 0 : index
    %29 = vector.load %arg12[%c0_26, %c0_27] : memref<8x8xbf16, #tpu.memory_space<vmem>>, vector<8x8xbf16>
    %c0_28 = arith.constant 0 : index
    %c0_29 = arith.constant 0 : index
    %30 = vector.load %arg13[%c0_28, %c0_29] : memref<1x8xf32, #tpu.memory_space<vmem>>, vector<1x8xf32>
    %c0_30 = arith.constant 0 : index
    %c0_31 = arith.constant 0 : index
    %31 = vector.load %arg14[%c0_30, %c0_31] : memref<8x32xbf16, #tpu.memory_space<vmem>>, vector<8x32xbf16>
    %c0_32 = arith.constant 0 : index
    %c0_33 = arith.constant 0 : index
    %32 = vector.load %arg15[%c0_32, %c0_33] : memref<1x32xf32, #tpu.memory_space<vmem>>, vector<1x32xf32>
    %cst_34 = arith.constant dense<0.000000e+00> : vector<16x8xf32>
    %33 = tpu.matmul %28, %29, %cst_34 {dimension_numbers = #tpu.dot_dimension_numbers<[1], [0], [0], [1], [0, 0, 1, 1], [], []>} : vector<16x8xbf16>, vector<8x8xbf16>, vector<16x8xf32> -> vector<16x8xf32>
    %34 = vector.broadcast %30 : vector<1x8xf32> to vector<16x8xf32>
    %35 = arith.addf %33, %34 : vector<16x8xf32>
    %cst_35 = arith.constant 0.000000e+00 : f32
    %36 = vector.broadcast %cst_35 : f32 to vector<16x8xf32>
    %37 = arith.maximumf %35, %36 : vector<16x8xf32>
    %38 = arith.truncf %37 : vector<16x8xf32> to vector<16x8xbf16>
    %cst_36 = arith.constant dense<0.000000e+00> : vector<16x32xf32>
    %39 = tpu.matmul %38, %31, %cst_36 {dimension_numbers = #tpu.dot_dimension_numbers<[1], [0], [0], [1], [0, 0, 1, 1], [], []>} : vector<16x8xbf16>, vector<8x32xbf16>, vector<16x32xf32> -> vector<16x32xf32>
    %40 = vector.broadcast %32 : vector<1x32xf32> to vector<16x32xf32>
    %41 = arith.addf %39, %40 : vector<16x32xf32>
    %42 = tpu.concatenate %13, %27, %41 in 0 : vector<16x32xf32>, vector<16x32xf32>, vector<16x32xf32> -> vector<48x32xf32>
    %c0_37 = arith.constant 0 : index
    %c0_38 = arith.constant 0 : index
    %43 = vector.load %arg16[%c0_37, %c0_38] : memref<32x32xf32, #tpu.memory_space<vmem>>, vector<32x32xf32>
    %c0_39 = arith.constant 0 : index
    %c0_40 = arith.constant 0 : index
    %c0_41 = arith.constant 0 : index
    %44 = vector.load %arg17[%c0_39, %c0_40, %c0_41] : memref<2x32x32xbf16, #tpu.memory_space<vmem>>, vector<1x32x32xbf16>
    %45 = vector.shape_cast %44 : vector<1x32x32xbf16> to vector<32x32xbf16>
    %c0_42 = arith.constant 0 : index
    %c0_43 = arith.constant 0 : index
    %c0_44 = arith.constant 0 : index
    %46 = vector.load %arg18[%c0_42, %c0_43, %c0_44] : memref<2x1x32xf32, #tpu.memory_space<vmem>>, vector<1x1x32xf32>
    %47 = vector.shape_cast %46 : vector<1x1x32xf32> to vector<1x32xf32>
    %c0_45 = arith.constant 0 : index
    %c0_46 = arith.constant 0 : index
    %c0_47 = arith.constant 0 : index
    %48 = vector.load %arg19[%c0_45, %c0_46, %c0_47] : memref<2x32x32xbf16, #tpu.memory_space<vmem>>, vector<1x32x32xbf16>
    %49 = vector.shape_cast %48 : vector<1x32x32xbf16> to vector<32x32xbf16>
    %c0_48 = arith.constant 0 : index
    %c0_49 = arith.constant 0 : index
    %c0_50 = arith.constant 0 : index
    %50 = vector.load %arg20[%c0_48, %c0_49, %c0_50] : memref<2x1x32xf32, #tpu.memory_space<vmem>>, vector<1x1x32xf32>
    %51 = vector.shape_cast %50 : vector<1x1x32xf32> to vector<1x32xf32>
    %c0_51 = arith.constant 0 : index
    %c0_52 = arith.constant 0 : index
    %c0_53 = arith.constant 0 : index
    %52 = vector.load %arg21[%c0_51, %c0_52, %c0_53] : memref<2x32x32xbf16, #tpu.memory_space<vmem>>, vector<1x32x32xbf16>
    %53 = vector.shape_cast %52 : vector<1x32x32xbf16> to vector<32x32xbf16>
    %c0_54 = arith.constant 0 : index
    %c0_55 = arith.constant 0 : index
    %c0_56 = arith.constant 0 : index
    %54 = vector.load %arg22[%c0_54, %c0_55, %c0_56] : memref<2x1x32xf32, #tpu.memory_space<vmem>>, vector<1x1x32xf32>
    %55 = vector.shape_cast %54 : vector<1x1x32xf32> to vector<1x32xf32>
    %c0_57 = arith.constant 0 : index
    %c0_58 = arith.constant 0 : index
    %c0_59 = arith.constant 0 : index
    %56 = vector.load %arg23[%c0_57, %c0_58, %c0_59] : memref<2x32x32xbf16, #tpu.memory_space<vmem>>, vector<1x32x32xbf16>
    %57 = vector.shape_cast %56 : vector<1x32x32xbf16> to vector<32x32xbf16>
    %c0_60 = arith.constant 0 : index
    %c0_61 = arith.constant 0 : index
    %c0_62 = arith.constant 0 : index
    %58 = vector.load %arg24[%c0_60, %c0_61, %c0_62] : memref<2x1x32xf32, #tpu.memory_space<vmem>>, vector<1x1x32xf32>
    %59 = vector.shape_cast %58 : vector<1x1x32xf32> to vector<1x32xf32>
    %c0_63 = arith.constant 0 : index
    %c0_64 = arith.constant 0 : index
    %c0_65 = arith.constant 0 : index
    %60 = vector.load %arg25[%c0_63, %c0_64, %c0_65] : memref<2x1x32xf32, #tpu.memory_space<vmem>>, vector<1x1x32xf32>
    %61 = vector.shape_cast %60 : vector<1x1x32xf32> to vector<1x32xf32>
    %c0_66 = arith.constant 0 : index
    %c0_67 = arith.constant 0 : index
    %c0_68 = arith.constant 0 : index
    %62 = vector.load %arg26[%c0_66, %c0_67, %c0_68] : memref<2x1x32xf32, #tpu.memory_space<vmem>>, vector<1x1x32xf32>
    %63 = vector.shape_cast %62 : vector<1x1x32xf32> to vector<1x32xf32>
    %c0_69 = arith.constant 0 : index
    %c0_70 = arith.constant 0 : index
    %c0_71 = arith.constant 0 : index
    %64 = vector.load %arg27[%c0_69, %c0_70, %c0_71] : memref<2x32x64xbf16, #tpu.memory_space<vmem>>, vector<1x32x64xbf16>
    %65 = vector.shape_cast %64 : vector<1x32x64xbf16> to vector<32x64xbf16>
    %c0_72 = arith.constant 0 : index
    %c0_73 = arith.constant 0 : index
    %c0_74 = arith.constant 0 : index
    %66 = vector.load %arg28[%c0_72, %c0_73, %c0_74] : memref<2x1x64xf32, #tpu.memory_space<vmem>>, vector<1x1x64xf32>
    %67 = vector.shape_cast %66 : vector<1x1x64xf32> to vector<1x64xf32>
    %c0_75 = arith.constant 0 : index
    %c0_76 = arith.constant 0 : index
    %c0_77 = arith.constant 0 : index
    %68 = vector.load %arg29[%c0_75, %c0_76, %c0_77] : memref<2x64x32xbf16, #tpu.memory_space<vmem>>, vector<1x64x32xbf16>
    %69 = vector.shape_cast %68 : vector<1x64x32xbf16> to vector<64x32xbf16>
    %c0_78 = arith.constant 0 : index
    %c0_79 = arith.constant 0 : index
    %c0_80 = arith.constant 0 : index
    %70 = vector.load %arg30[%c0_78, %c0_79, %c0_80] : memref<2x1x32xf32, #tpu.memory_space<vmem>>, vector<1x1x32xf32>
    %71 = vector.shape_cast %70 : vector<1x1x32xf32> to vector<1x32xf32>
    %c0_81 = arith.constant 0 : index
    %c0_82 = arith.constant 0 : index
    %c0_83 = arith.constant 0 : index
    %72 = vector.load %arg31[%c0_81, %c0_82, %c0_83] : memref<2x1x32xf32, #tpu.memory_space<vmem>>, vector<1x1x32xf32>
    %73 = vector.shape_cast %72 : vector<1x1x32xf32> to vector<1x32xf32>
    %c0_84 = arith.constant 0 : index
    %c0_85 = arith.constant 0 : index
    %c0_86 = arith.constant 0 : index
    %74 = vector.load %arg32[%c0_84, %c0_85, %c0_86] : memref<2x1x32xf32, #tpu.memory_space<vmem>>, vector<1x1x32xf32>
    %75 = vector.shape_cast %74 : vector<1x1x32xf32> to vector<1x32xf32>
    %76 = arith.truncf %42 : vector<48x32xf32> to vector<48x32xbf16>
    %cst_87 = arith.constant dense<0.000000e+00> : vector<48x32xf32>
    %77 = tpu.matmul %76, %45, %cst_87 {dimension_numbers = #tpu.dot_dimension_numbers<[1], [0], [0], [1], [0, 0, 1, 1], [], []>} : vector<48x32xbf16>, vector<32x32xbf16>, vector<48x32xf32> -> vector<48x32xf32>
    %78 = vector.broadcast %47 : vector<1x32xf32> to vector<48x32xf32>
    %79 = arith.addf %77, %78 : vector<48x32xf32>
    %cst_88 = arith.constant dense<0.000000e+00> : vector<48x32xf32>
    %80 = tpu.matmul %76, %49, %cst_88 {dimension_numbers = #tpu.dot_dimension_numbers<[1], [0], [0], [1], [0, 0, 1, 1], [], []>} : vector<48x32xbf16>, vector<32x32xbf16>, vector<48x32xf32> -> vector<48x32xf32>
    %81 = vector.broadcast %51 : vector<1x32xf32> to vector<48x32xf32>
    %82 = arith.addf %80, %81 : vector<48x32xf32>
    %cst_89 = arith.constant dense<0.000000e+00> : vector<48x32xf32>
    %83 = tpu.matmul %76, %53, %cst_89 {dimension_numbers = #tpu.dot_dimension_numbers<[1], [0], [0], [1], [0, 0, 1, 1], [], []>} : vector<48x32xbf16>, vector<32x32xbf16>, vector<48x32xf32> -> vector<48x32xf32>
    %84 = vector.broadcast %55 : vector<1x32xf32> to vector<48x32xf32>
    %85 = arith.addf %83, %84 : vector<48x32xf32>
    %86 = vector.extract_strided_slice %79 {offsets = [0, 0], sizes = [16, 32], strides = [1, 1]} : vector<48x32xf32> to vector<16x32xf32>
    %87 = vector.extract_strided_slice %79 {offsets = [16, 0], sizes = [16, 32], strides = [1, 1]} : vector<48x32xf32> to vector<16x32xf32>
    %88 = vector.extract_strided_slice %79 {offsets = [32, 0], sizes = [16, 32], strides = [1, 1]} : vector<48x32xf32> to vector<16x32xf32>
    %89 = vector.extract_strided_slice %82 {offsets = [0, 0], sizes = [16, 32], strides = [1, 1]} : vector<48x32xf32> to vector<16x32xf32>
    %90 = vector.extract_strided_slice %82 {offsets = [16, 0], sizes = [16, 32], strides = [1, 1]} : vector<48x32xf32> to vector<16x32xf32>
    %91 = vector.extract_strided_slice %82 {offsets = [32, 0], sizes = [16, 32], strides = [1, 1]} : vector<48x32xf32> to vector<16x32xf32>
    %92 = vector.extract_strided_slice %85 {offsets = [0, 0], sizes = [16, 32], strides = [1, 1]} : vector<48x32xf32> to vector<16x32xf32>
    %93 = vector.extract_strided_slice %85 {offsets = [16, 0], sizes = [16, 32], strides = [1, 1]} : vector<48x32xf32> to vector<16x32xf32>
    %94 = vector.extract_strided_slice %85 {offsets = [32, 0], sizes = [16, 32], strides = [1, 1]} : vector<48x32xf32> to vector<16x32xf32>
    %95 = arith.mulf %86, %89 : vector<16x32xf32>
    %cst_90 = arith.constant dense<0.000000e+00> : vector<16x32xf32>
    %96 = tpu.matmul %95, %43, %cst_90 {dimension_numbers = #tpu.dot_dimension_numbers<[1], [0], [0], [1], [0, 0, 1, 1], [], []>} : vector<16x32xf32>, vector<32x32xf32>, vector<16x32xf32> -> vector<16x32xf32>
    %97 = arith.mulf %86, %90 : vector<16x32xf32>
    %cst_91 = arith.constant dense<0.000000e+00> : vector<16x32xf32>
    %98 = tpu.matmul %97, %43, %cst_91 {dimension_numbers = #tpu.dot_dimension_numbers<[1], [0], [0], [1], [0, 0, 1, 1], [], []>} : vector<16x32xf32>, vector<32x32xf32>, vector<16x32xf32> -> vector<16x32xf32>
    %99 = arith.mulf %86, %91 : vector<16x32xf32>
    %cst_92 = arith.constant dense<0.000000e+00> : vector<16x32xf32>
    %100 = tpu.matmul %99, %43, %cst_92 {dimension_numbers = #tpu.dot_dimension_numbers<[1], [0], [0], [1], [0, 0, 1, 1], [], []>} : vector<16x32xf32>, vector<32x32xf32>, vector<16x32xf32> -> vector<16x32xf32>
    %101 = arith.mulf %87, %89 : vector<16x32xf32>
    %cst_93 = arith.constant dense<0.000000e+00> : vector<16x32xf32>
    %102 = tpu.matmul %101, %43, %cst_93 {dimension_numbers = #tpu.dot_dimension_numbers<[1], [0], [0], [1], [0, 0, 1, 1], [], []>} : vector<16x32xf32>, vector<32x32xf32>, vector<16x32xf32> -> vector<16x32xf32>
    %103 = arith.mulf %87, %90 : vector<16x32xf32>
    %cst_94 = arith.constant dense<0.000000e+00> : vector<16x32xf32>
    %104 = tpu.matmul %103, %43, %cst_94 {dimension_numbers = #tpu.dot_dimension_numbers<[1], [0], [0], [1], [0, 0, 1, 1], [], []>} : vector<16x32xf32>, vector<32x32xf32>, vector<16x32xf32> -> vector<16x32xf32>
    %105 = arith.mulf %87, %91 : vector<16x32xf32>
    %cst_95 = arith.constant dense<0.000000e+00> : vector<16x32xf32>
    %106 = tpu.matmul %105, %43, %cst_95 {dimension_numbers = #tpu.dot_dimension_numbers<[1], [0], [0], [1], [0, 0, 1, 1], [], []>} : vector<16x32xf32>, vector<32x32xf32>, vector<16x32xf32> -> vector<16x32xf32>
    %107 = arith.mulf %88, %89 : vector<16x32xf32>
    %cst_96 = arith.constant dense<0.000000e+00> : vector<16x32xf32>
    %108 = tpu.matmul %107, %43, %cst_96 {dimension_numbers = #tpu.dot_dimension_numbers<[1], [0], [0], [1], [0, 0, 1, 1], [], []>} : vector<16x32xf32>, vector<32x32xf32>, vector<16x32xf32> -> vector<16x32xf32>
    %109 = arith.mulf %88, %90 : vector<16x32xf32>
    %cst_97 = arith.constant dense<0.000000e+00> : vector<16x32xf32>
    %110 = tpu.matmul %109, %43, %cst_97 {dimension_numbers = #tpu.dot_dimension_numbers<[1], [0], [0], [1], [0, 0, 1, 1], [], []>} : vector<16x32xf32>, vector<32x32xf32>, vector<16x32xf32> -> vector<16x32xf32>
    %111 = arith.mulf %88, %91 : vector<16x32xf32>
    %cst_98 = arith.constant dense<0.000000e+00> : vector<16x32xf32>
    %112 = tpu.matmul %111, %43, %cst_98 {dimension_numbers = #tpu.dot_dimension_numbers<[1], [0], [0], [1], [0, 0, 1, 1], [], []>} : vector<16x32xf32>, vector<32x32xf32>, vector<16x32xf32> -> vector<16x32xf32>
    %113 = arith.maximumf %96, %98 : vector<16x32xf32>
    %114 = arith.maximumf %113, %100 : vector<16x32xf32>
    %115 = arith.subf %96, %114 : vector<16x32xf32>
    %116 = math.exp %115 : vector<16x32xf32>
    %117 = arith.subf %98, %114 : vector<16x32xf32>
    %118 = math.exp %117 : vector<16x32xf32>
    %119 = arith.subf %100, %114 : vector<16x32xf32>
    %120 = math.exp %119 : vector<16x32xf32>
    %121 = arith.addf %116, %118 : vector<16x32xf32>
    %122 = arith.addf %121, %120 : vector<16x32xf32>
    %123 = tpu.reciprocal %122 {approx = true} : vector<16x32xf32> -> vector<16x32xf32>
    %124 = arith.mulf %116, %123 : vector<16x32xf32>
    %125 = arith.mulf %124, %92 : vector<16x32xf32>
    %126 = arith.mulf %118, %123 : vector<16x32xf32>
    %127 = arith.mulf %126, %93 : vector<16x32xf32>
    %128 = arith.addf %125, %127 : vector<16x32xf32>
    %129 = arith.mulf %120, %123 : vector<16x32xf32>
    %130 = arith.mulf %129, %94 : vector<16x32xf32>
    %131 = arith.addf %128, %130 : vector<16x32xf32>
    %132 = arith.maximumf %102, %104 : vector<16x32xf32>
    %133 = arith.maximumf %132, %106 : vector<16x32xf32>
    %134 = arith.subf %102, %133 : vector<16x32xf32>
    %135 = math.exp %134 : vector<16x32xf32>
    %136 = arith.subf %104, %133 : vector<16x32xf32>
    %137 = math.exp %136 : vector<16x32xf32>
    %138 = arith.subf %106, %133 : vector<16x32xf32>
    %139 = math.exp %138 : vector<16x32xf32>
    %140 = arith.addf %135, %137 : vector<16x32xf32>
    %141 = arith.addf %140, %139 : vector<16x32xf32>
    %142 = tpu.reciprocal %141 {approx = true} : vector<16x32xf32> -> vector<16x32xf32>
    %143 = arith.mulf %135, %142 : vector<16x32xf32>
    %144 = arith.mulf %143, %92 : vector<16x32xf32>
    %145 = arith.mulf %137, %142 : vector<16x32xf32>
    %146 = arith.mulf %145, %93 : vector<16x32xf32>
    %147 = arith.addf %144, %146 : vector<16x32xf32>
    %148 = arith.mulf %139, %142 : vector<16x32xf32>
    %149 = arith.mulf %148, %94 : vector<16x32xf32>
    %150 = arith.addf %147, %149 : vector<16x32xf32>
    %151 = arith.maximumf %108, %110 : vector<16x32xf32>
    %152 = arith.maximumf %151, %112 : vector<16x32xf32>
    %153 = arith.subf %108, %152 : vector<16x32xf32>
    %154 = math.exp %153 : vector<16x32xf32>
    %155 = arith.subf %110, %152 : vector<16x32xf32>
    %156 = math.exp %155 : vector<16x32xf32>
    %157 = arith.subf %112, %152 : vector<16x32xf32>
    %158 = math.exp %157 : vector<16x32xf32>
    %159 = arith.addf %154, %156 : vector<16x32xf32>
    %160 = arith.addf %159, %158 : vector<16x32xf32>
    %161 = tpu.reciprocal %160 {approx = true} : vector<16x32xf32> -> vector<16x32xf32>
    %162 = arith.mulf %154, %161 : vector<16x32xf32>
    %163 = arith.mulf %162, %92 : vector<16x32xf32>
    %164 = arith.mulf %156, %161 : vector<16x32xf32>
    %165 = arith.mulf %164, %93 : vector<16x32xf32>
    %166 = arith.addf %163, %165 : vector<16x32xf32>
    %167 = arith.mulf %158, %161 : vector<16x32xf32>
    %168 = arith.mulf %167, %94 : vector<16x32xf32>
    %169 = arith.addf %166, %168 : vector<16x32xf32>
    %170 = tpu.concatenate %131, %150, %169 in 0 : vector<16x32xf32>, vector<16x32xf32>, vector<16x32xf32> -> vector<48x32xf32>
    %171 = arith.truncf %170 : vector<48x32xf32> to vector<48x32xbf16>
    %cst_99 = arith.constant dense<0.000000e+00> : vector<48x32xf32>
    %172 = tpu.matmul %171, %57, %cst_99 {dimension_numbers = #tpu.dot_dimension_numbers<[1], [0], [0], [1], [0, 0, 1, 1], [], []>} : vector<48x32xbf16>, vector<32x32xbf16>, vector<48x32xf32> -> vector<48x32xf32>
    %173 = vector.broadcast %59 : vector<1x32xf32> to vector<48x32xf32>
    %174 = arith.addf %172, %173 : vector<48x32xf32>
    %175 = arith.addf %42, %174 : vector<48x32xf32>
    %cst_100 = arith.constant dense<0.000000e+00> : vector<48xf32>
    %176 = vector.multi_reduction <add>, %175, %cst_100 [1] : vector<48x32xf32> to vector<48xf32>
    %177 = vector.shape_cast %176 : vector<48xf32> to vector<48x1xf32>
    %cst_101 = arith.constant 3.200000e+01 : f32
    %178 = vector.broadcast %cst_101 : f32 to vector<48x1xf32>
    %179 = arith.divf %177, %178 : vector<48x1xf32>
    %180 = vector.broadcast %179 : vector<48x1xf32> to vector<48x32xf32>
    %181 = arith.subf %175, %180 : vector<48x32xf32>
    %182 = vector.broadcast %179 : vector<48x1xf32> to vector<48x32xf32>
    %183 = arith.subf %175, %182 : vector<48x32xf32>
    %184 = arith.mulf %181, %183 : vector<48x32xf32>
    %cst_102 = arith.constant dense<0.000000e+00> : vector<48xf32>
    %185 = vector.multi_reduction <add>, %184, %cst_102 [1] : vector<48x32xf32> to vector<48xf32>
    %186 = vector.shape_cast %185 : vector<48xf32> to vector<48x1xf32>
    %cst_103 = arith.constant 3.200000e+01 : f32
    %187 = vector.broadcast %cst_103 : f32 to vector<48x1xf32>
    %188 = arith.divf %186, %187 : vector<48x1xf32>
    %189 = vector.broadcast %179 : vector<48x1xf32> to vector<48x32xf32>
    %190 = arith.subf %175, %189 : vector<48x32xf32>
    %cst_104 = arith.constant 9.99999974E-6 : f32
    %191 = vector.broadcast %cst_104 : f32 to vector<48x1xf32>
    %192 = arith.addf %188, %191 : vector<48x1xf32>
    %193 = math.rsqrt %192 : vector<48x1xf32>
    %194 = vector.broadcast %193 : vector<48x1xf32> to vector<48x32xf32>
    %195 = arith.mulf %190, %194 : vector<48x32xf32>
    %196 = vector.broadcast %61 : vector<1x32xf32> to vector<48x32xf32>
    %197 = arith.mulf %195, %196 : vector<48x32xf32>
    %198 = vector.broadcast %63 : vector<1x32xf32> to vector<48x32xf32>
    %199 = arith.addf %197, %198 : vector<48x32xf32>
    %200 = arith.truncf %199 : vector<48x32xf32> to vector<48x32xbf16>
    %cst_105 = arith.constant dense<0.000000e+00> : vector<48x64xf32>
    %201 = tpu.matmul %200, %65, %cst_105 {dimension_numbers = #tpu.dot_dimension_numbers<[1], [0], [0], [1], [0, 0, 1, 1], [], []>} : vector<48x32xbf16>, vector<32x64xbf16>, vector<48x64xf32> -> vector<48x64xf32>
    %202 = vector.broadcast %67 : vector<1x64xf32> to vector<48x64xf32>
    %203 = arith.addf %201, %202 : vector<48x64xf32>
    %204 = arith.mulf %203, %203 : vector<48x64xf32>
    %205 = arith.mulf %203, %204 : vector<48x64xf32>
    %cst_106 = arith.constant 4.471500e-02 : f32
    %206 = vector.broadcast %cst_106 : f32 to vector<48x64xf32>
    %207 = arith.mulf %206, %205 : vector<48x64xf32>
    %208 = arith.addf %203, %207 : vector<48x64xf32>
    %cst_107 = arith.constant 0.797884583 : f32
    %209 = vector.broadcast %cst_107 : f32 to vector<48x64xf32>
    %210 = arith.mulf %209, %208 : vector<48x64xf32>
    %211 = math.tanh %210 : vector<48x64xf32>
    %cst_108 = arith.constant 1.000000e+00 : f32
    %212 = vector.broadcast %cst_108 : f32 to vector<48x64xf32>
    %213 = arith.addf %212, %211 : vector<48x64xf32>
    %cst_109 = arith.constant 5.000000e-01 : f32
    %214 = vector.broadcast %cst_109 : f32 to vector<48x64xf32>
    %215 = arith.mulf %214, %213 : vector<48x64xf32>
    %216 = arith.mulf %203, %215 : vector<48x64xf32>
    %217 = arith.truncf %216 : vector<48x64xf32> to vector<48x64xbf16>
    %cst_110 = arith.constant dense<0.000000e+00> : vector<48x32xf32>
    %218 = tpu.matmul %217, %69, %cst_110 {dimension_numbers = #tpu.dot_dimension_numbers<[1], [0], [0], [1], [0, 0, 1, 1], [], []>} : vector<48x64xbf16>, vector<64x32xbf16>, vector<48x32xf32> -> vector<48x32xf32>
    %219 = vector.broadcast %71 : vector<1x32xf32> to vector<48x32xf32>
    %220 = arith.addf %218, %219 : vector<48x32xf32>
    %221 = arith.addf %199, %220 : vector<48x32xf32>
    %cst_111 = arith.constant dense<0.000000e+00> : vector<48xf32>
    %222 = vector.multi_reduction <add>, %221, %cst_111 [1] : vector<48x32xf32> to vector<48xf32>
    %223 = vector.shape_cast %222 : vector<48xf32> to vector<48x1xf32>
    %cst_112 = arith.constant 3.200000e+01 : f32
    %224 = vector.broadcast %cst_112 : f32 to vector<48x1xf32>
    %225 = arith.divf %223, %224 : vector<48x1xf32>
    %226 = vector.broadcast %225 : vector<48x1xf32> to vector<48x32xf32>
    %227 = arith.subf %221, %226 : vector<48x32xf32>
    %228 = vector.broadcast %225 : vector<48x1xf32> to vector<48x32xf32>
    %229 = arith.subf %221, %228 : vector<48x32xf32>
    %230 = arith.mulf %227, %229 : vector<48x32xf32>
    %cst_113 = arith.constant dense<0.000000e+00> : vector<48xf32>
    %231 = vector.multi_reduction <add>, %230, %cst_113 [1] : vector<48x32xf32> to vector<48xf32>
    %232 = vector.shape_cast %231 : vector<48xf32> to vector<48x1xf32>
    %cst_114 = arith.constant 3.200000e+01 : f32
    %233 = vector.broadcast %cst_114 : f32 to vector<48x1xf32>
    %234 = arith.divf %232, %233 : vector<48x1xf32>
    %235 = vector.broadcast %225 : vector<48x1xf32> to vector<48x32xf32>
    %236 = arith.subf %221, %235 : vector<48x32xf32>
    %cst_115 = arith.constant 9.99999974E-6 : f32
    %237 = vector.broadcast %cst_115 : f32 to vector<48x1xf32>
    %238 = arith.addf %234, %237 : vector<48x1xf32>
    %239 = math.rsqrt %238 : vector<48x1xf32>
    %240 = vector.broadcast %239 : vector<48x1xf32> to vector<48x32xf32>
    %241 = arith.mulf %236, %240 : vector<48x32xf32>
    %242 = vector.broadcast %73 : vector<1x32xf32> to vector<48x32xf32>
    %243 = arith.mulf %241, %242 : vector<48x32xf32>
    %244 = vector.broadcast %75 : vector<1x32xf32> to vector<48x32xf32>
    %245 = arith.addf %243, %244 : vector<48x32xf32>
    %c1 = arith.constant 1 : index
    %c0_116 = arith.constant 0 : index
    %c0_117 = arith.constant 0 : index
    %246 = vector.load %arg17[%c1, %c0_116, %c0_117] : memref<2x32x32xbf16, #tpu.memory_space<vmem>>, vector<1x32x32xbf16>
    %247 = vector.shape_cast %246 : vector<1x32x32xbf16> to vector<32x32xbf16>
    %c1_118 = arith.constant 1 : index
    %c0_119 = arith.constant 0 : index
    %c0_120 = arith.constant 0 : index
    %248 = vector.load %arg18[%c1_118, %c0_119, %c0_120] : memref<2x1x32xf32, #tpu.memory_space<vmem>>, vector<1x1x32xf32>
    %249 = vector.shape_cast %248 : vector<1x1x32xf32> to vector<1x32xf32>
    %c1_121 = arith.constant 1 : index
    %c0_122 = arith.constant 0 : index
    %c0_123 = arith.constant 0 : index
    %250 = vector.load %arg19[%c1_121, %c0_122, %c0_123] : memref<2x32x32xbf16, #tpu.memory_space<vmem>>, vector<1x32x32xbf16>
    %251 = vector.shape_cast %250 : vector<1x32x32xbf16> to vector<32x32xbf16>
    %c1_124 = arith.constant 1 : index
    %c0_125 = arith.constant 0 : index
    %c0_126 = arith.constant 0 : index
    %252 = vector.load %arg20[%c1_124, %c0_125, %c0_126] : memref<2x1x32xf32, #tpu.memory_space<vmem>>, vector<1x1x32xf32>
    %253 = vector.shape_cast %252 : vector<1x1x32xf32> to vector<1x32xf32>
    %c1_127 = arith.constant 1 : index
    %c0_128 = arith.constant 0 : index
    %c0_129 = arith.constant 0 : index
    %254 = vector.load %arg21[%c1_127, %c0_128, %c0_129] : memref<2x32x32xbf16, #tpu.memory_space<vmem>>, vector<1x32x32xbf16>
    %255 = vector.shape_cast %254 : vector<1x32x32xbf16> to vector<32x32xbf16>
    %c1_130 = arith.constant 1 : index
    %c0_131 = arith.constant 0 : index
    %c0_132 = arith.constant 0 : index
    %256 = vector.load %arg22[%c1_130, %c0_131, %c0_132] : memref<2x1x32xf32, #tpu.memory_space<vmem>>, vector<1x1x32xf32>
    %257 = vector.shape_cast %256 : vector<1x1x32xf32> to vector<1x32xf32>
    %c1_133 = arith.constant 1 : index
    %c0_134 = arith.constant 0 : index
    %c0_135 = arith.constant 0 : index
    %258 = vector.load %arg23[%c1_133, %c0_134, %c0_135] : memref<2x32x32xbf16, #tpu.memory_space<vmem>>, vector<1x32x32xbf16>
    %259 = vector.shape_cast %258 : vector<1x32x32xbf16> to vector<32x32xbf16>
    %c1_136 = arith.constant 1 : index
    %c0_137 = arith.constant 0 : index
    %c0_138 = arith.constant 0 : index
    %260 = vector.load %arg24[%c1_136, %c0_137, %c0_138] : memref<2x1x32xf32, #tpu.memory_space<vmem>>, vector<1x1x32xf32>
    %261 = vector.shape_cast %260 : vector<1x1x32xf32> to vector<1x32xf32>
    %c1_139 = arith.constant 1 : index
    %c0_140 = arith.constant 0 : index
    %c0_141 = arith.constant 0 : index
    %262 = vector.load %arg25[%c1_139, %c0_140, %c0_141] : memref<2x1x32xf32, #tpu.memory_space<vmem>>, vector<1x1x32xf32>
    %263 = vector.shape_cast %262 : vector<1x1x32xf32> to vector<1x32xf32>
    %c1_142 = arith.constant 1 : index
    %c0_143 = arith.constant 0 : index
    %c0_144 = arith.constant 0 : index
    %264 = vector.load %arg26[%c1_142, %c0_143, %c0_144] : memref<2x1x32xf32, #tpu.memory_space<vmem>>, vector<1x1x32xf32>
    %265 = vector.shape_cast %264 : vector<1x1x32xf32> to vector<1x32xf32>
    %c1_145 = arith.constant 1 : index
    %c0_146 = arith.constant 0 : index
    %c0_147 = arith.constant 0 : index
    %266 = vector.load %arg27[%c1_145, %c0_146, %c0_147] : memref<2x32x64xbf16, #tpu.memory_space<vmem>>, vector<1x32x64xbf16>
    %267 = vector.shape_cast %266 : vector<1x32x64xbf16> to vector<32x64xbf16>
    %c1_148 = arith.constant 1 : index
    %c0_149 = arith.constant 0 : index
    %c0_150 = arith.constant 0 : index
    %268 = vector.load %arg28[%c1_148, %c0_149, %c0_150] : memref<2x1x64xf32, #tpu.memory_space<vmem>>, vector<1x1x64xf32>
    %269 = vector.shape_cast %268 : vector<1x1x64xf32> to vector<1x64xf32>
    %c1_151 = arith.constant 1 : index
    %c0_152 = arith.constant 0 : index
    %c0_153 = arith.constant 0 : index
    %270 = vector.load %arg29[%c1_151, %c0_152, %c0_153] : memref<2x64x32xbf16, #tpu.memory_space<vmem>>, vector<1x64x32xbf16>
    %271 = vector.shape_cast %270 : vector<1x64x32xbf16> to vector<64x32xbf16>
    %c1_154 = arith.constant 1 : index
    %c0_155 = arith.constant 0 : index
    %c0_156 = arith.constant 0 : index
    %272 = vector.load %arg30[%c1_154, %c0_155, %c0_156] : memref<2x1x32xf32, #tpu.memory_space<vmem>>, vector<1x1x32xf32>
    %273 = vector.shape_cast %272 : vector<1x1x32xf32> to vector<1x32xf32>
    %c1_157 = arith.constant 1 : index
    %c0_158 = arith.constant 0 : index
    %c0_159 = arith.constant 0 : index
    %274 = vector.load %arg31[%c1_157, %c0_158, %c0_159] : memref<2x1x32xf32, #tpu.memory_space<vmem>>, vector<1x1x32xf32>
    %275 = vector.shape_cast %274 : vector<1x1x32xf32> to vector<1x32xf32>
    %c1_160 = arith.constant 1 : index
    %c0_161 = arith.constant 0 : index
    %c0_162 = arith.constant 0 : index
    %276 = vector.load %arg32[%c1_160, %c0_161, %c0_162] : memref<2x1x32xf32, #tpu.memory_space<vmem>>, vector<1x1x32xf32>
    %277 = vector.shape_cast %276 : vector<1x1x32xf32> to vector<1x32xf32>
    %278 = arith.truncf %245 : vector<48x32xf32> to vector<48x32xbf16>
    %cst_163 = arith.constant dense<0.000000e+00> : vector<48x32xf32>
    %279 = tpu.matmul %278, %247, %cst_163 {dimension_numbers = #tpu.dot_dimension_numbers<[1], [0], [0], [1], [0, 0, 1, 1], [], []>} : vector<48x32xbf16>, vector<32x32xbf16>, vector<48x32xf32> -> vector<48x32xf32>
    %280 = vector.broadcast %249 : vector<1x32xf32> to vector<48x32xf32>
    %281 = arith.addf %279, %280 : vector<48x32xf32>
    %cst_164 = arith.constant dense<0.000000e+00> : vector<48x32xf32>
    %282 = tpu.matmul %278, %251, %cst_164 {dimension_numbers = #tpu.dot_dimension_numbers<[1], [0], [0], [1], [0, 0, 1, 1], [], []>} : vector<48x32xbf16>, vector<32x32xbf16>, vector<48x32xf32> -> vector<48x32xf32>
    %283 = vector.broadcast %253 : vector<1x32xf32> to vector<48x32xf32>
    %284 = arith.addf %282, %283 : vector<48x32xf32>
    %cst_165 = arith.constant dense<0.000000e+00> : vector<48x32xf32>
    %285 = tpu.matmul %278, %255, %cst_165 {dimension_numbers = #tpu.dot_dimension_numbers<[1], [0], [0], [1], [0, 0, 1, 1], [], []>} : vector<48x32xbf16>, vector<32x32xbf16>, vector<48x32xf32> -> vector<48x32xf32>
    %286 = vector.broadcast %257 : vector<1x32xf32> to vector<48x32xf32>
    %287 = arith.addf %285, %286 : vector<48x32xf32>
    %288 = vector.extract_strided_slice %281 {offsets = [0, 0], sizes = [16, 32], strides = [1, 1]} : vector<48x32xf32> to vector<16x32xf32>
    %289 = vector.extract_strided_slice %281 {offsets = [16, 0], sizes = [16, 32], strides = [1, 1]} : vector<48x32xf32> to vector<16x32xf32>
    %290 = vector.extract_strided_slice %281 {offsets = [32, 0], sizes = [16, 32], strides = [1, 1]} : vector<48x32xf32> to vector<16x32xf32>
    %291 = vector.extract_strided_slice %284 {offsets = [0, 0], sizes = [16, 32], strides = [1, 1]} : vector<48x32xf32> to vector<16x32xf32>
    %292 = vector.extract_strided_slice %284 {offsets = [16, 0], sizes = [16, 32], strides = [1, 1]} : vector<48x32xf32> to vector<16x32xf32>
    %293 = vector.extract_strided_slice %284 {offsets = [32, 0], sizes = [16, 32], strides = [1, 1]} : vector<48x32xf32> to vector<16x32xf32>
    %294 = vector.extract_strided_slice %287 {offsets = [0, 0], sizes = [16, 32], strides = [1, 1]} : vector<48x32xf32> to vector<16x32xf32>
    %295 = vector.extract_strided_slice %287 {offsets = [16, 0], sizes = [16, 32], strides = [1, 1]} : vector<48x32xf32> to vector<16x32xf32>
    %296 = vector.extract_strided_slice %287 {offsets = [32, 0], sizes = [16, 32], strides = [1, 1]} : vector<48x32xf32> to vector<16x32xf32>
    %297 = arith.mulf %288, %291 : vector<16x32xf32>
    %cst_166 = arith.constant dense<0.000000e+00> : vector<16x32xf32>
    %298 = tpu.matmul %297, %43, %cst_166 {dimension_numbers = #tpu.dot_dimension_numbers<[1], [0], [0], [1], [0, 0, 1, 1], [], []>} : vector<16x32xf32>, vector<32x32xf32>, vector<16x32xf32> -> vector<16x32xf32>
    %299 = arith.mulf %288, %292 : vector<16x32xf32>
    %cst_167 = arith.constant dense<0.000000e+00> : vector<16x32xf32>
    %300 = tpu.matmul %299, %43, %cst_167 {dimension_numbers = #tpu.dot_dimension_numbers<[1], [0], [0], [1], [0, 0, 1, 1], [], []>} : vector<16x32xf32>, vector<32x32xf32>, vector<16x32xf32> -> vector<16x32xf32>
    %301 = arith.mulf %288, %293 : vector<16x32xf32>
    %cst_168 = arith.constant dense<0.000000e+00> : vector<16x32xf32>
    %302 = tpu.matmul %301, %43, %cst_168 {dimension_numbers = #tpu.dot_dimension_numbers<[1], [0], [0], [1], [0, 0, 1, 1], [], []>} : vector<16x32xf32>, vector<32x32xf32>, vector<16x32xf32> -> vector<16x32xf32>
    %303 = arith.mulf %289, %291 : vector<16x32xf32>
    %cst_169 = arith.constant dense<0.000000e+00> : vector<16x32xf32>
    %304 = tpu.matmul %303, %43, %cst_169 {dimension_numbers = #tpu.dot_dimension_numbers<[1], [0], [0], [1], [0, 0, 1, 1], [], []>} : vector<16x32xf32>, vector<32x32xf32>, vector<16x32xf32> -> vector<16x32xf32>
    %305 = arith.mulf %289, %292 : vector<16x32xf32>
    %cst_170 = arith.constant dense<0.000000e+00> : vector<16x32xf32>
    %306 = tpu.matmul %305, %43, %cst_170 {dimension_numbers = #tpu.dot_dimension_numbers<[1], [0], [0], [1], [0, 0, 1, 1], [], []>} : vector<16x32xf32>, vector<32x32xf32>, vector<16x32xf32> -> vector<16x32xf32>
    %307 = arith.mulf %289, %293 : vector<16x32xf32>
    %cst_171 = arith.constant dense<0.000000e+00> : vector<16x32xf32>
    %308 = tpu.matmul %307, %43, %cst_171 {dimension_numbers = #tpu.dot_dimension_numbers<[1], [0], [0], [1], [0, 0, 1, 1], [], []>} : vector<16x32xf32>, vector<32x32xf32>, vector<16x32xf32> -> vector<16x32xf32>
    %309 = arith.mulf %290, %291 : vector<16x32xf32>
    %cst_172 = arith.constant dense<0.000000e+00> : vector<16x32xf32>
    %310 = tpu.matmul %309, %43, %cst_172 {dimension_numbers = #tpu.dot_dimension_numbers<[1], [0], [0], [1], [0, 0, 1, 1], [], []>} : vector<16x32xf32>, vector<32x32xf32>, vector<16x32xf32> -> vector<16x32xf32>
    %311 = arith.mulf %290, %292 : vector<16x32xf32>
    %cst_173 = arith.constant dense<0.000000e+00> : vector<16x32xf32>
    %312 = tpu.matmul %311, %43, %cst_173 {dimension_numbers = #tpu.dot_dimension_numbers<[1], [0], [0], [1], [0, 0, 1, 1], [], []>} : vector<16x32xf32>, vector<32x32xf32>, vector<16x32xf32> -> vector<16x32xf32>
    %313 = arith.mulf %290, %293 : vector<16x32xf32>
    %cst_174 = arith.constant dense<0.000000e+00> : vector<16x32xf32>
    %314 = tpu.matmul %313, %43, %cst_174 {dimension_numbers = #tpu.dot_dimension_numbers<[1], [0], [0], [1], [0, 0, 1, 1], [], []>} : vector<16x32xf32>, vector<32x32xf32>, vector<16x32xf32> -> vector<16x32xf32>
    %315 = arith.maximumf %298, %300 : vector<16x32xf32>
    %316 = arith.maximumf %315, %302 : vector<16x32xf32>
    %317 = arith.subf %298, %316 : vector<16x32xf32>
    %318 = math.exp %317 : vector<16x32xf32>
    %319 = arith.subf %300, %316 : vector<16x32xf32>
    %320 = math.exp %319 : vector<16x32xf32>
    %321 = arith.subf %302, %316 : vector<16x32xf32>
    %322 = math.exp %321 : vector<16x32xf32>
    %323 = arith.addf %318, %320 : vector<16x32xf32>
    %324 = arith.addf %323, %322 : vector<16x32xf32>
    %325 = tpu.reciprocal %324 {approx = true} : vector<16x32xf32> -> vector<16x32xf32>
    %326 = arith.mulf %318, %325 : vector<16x32xf32>
    %327 = arith.mulf %326, %294 : vector<16x32xf32>
    %328 = arith.mulf %320, %325 : vector<16x32xf32>
    %329 = arith.mulf %328, %295 : vector<16x32xf32>
    %330 = arith.addf %327, %329 : vector<16x32xf32>
    %331 = arith.mulf %322, %325 : vector<16x32xf32>
    %332 = arith.mulf %331, %296 : vector<16x32xf32>
    %333 = arith.addf %330, %332 : vector<16x32xf32>
    %334 = arith.maximumf %304, %306 : vector<16x32xf32>
    %335 = arith.maximumf %334, %308 : vector<16x32xf32>
    %336 = arith.subf %304, %335 : vector<16x32xf32>
    %337 = math.exp %336 : vector<16x32xf32>
    %338 = arith.subf %306, %335 : vector<16x32xf32>
    %339 = math.exp %338 : vector<16x32xf32>
    %340 = arith.subf %308, %335 : vector<16x32xf32>
    %341 = math.exp %340 : vector<16x32xf32>
    %342 = arith.addf %337, %339 : vector<16x32xf32>
    %343 = arith.addf %342, %341 : vector<16x32xf32>
    %344 = tpu.reciprocal %343 {approx = true} : vector<16x32xf32> -> vector<16x32xf32>
    %345 = arith.mulf %337, %344 : vector<16x32xf32>
    %346 = arith.mulf %345, %294 : vector<16x32xf32>
    %347 = arith.mulf %339, %344 : vector<16x32xf32>
    %348 = arith.mulf %347, %295 : vector<16x32xf32>
    %349 = arith.addf %346, %348 : vector<16x32xf32>
    %350 = arith.mulf %341, %344 : vector<16x32xf32>
    %351 = arith.mulf %350, %296 : vector<16x32xf32>
    %352 = arith.addf %349, %351 : vector<16x32xf32>
    %353 = arith.maximumf %310, %312 : vector<16x32xf32>
    %354 = arith.maximumf %353, %314 : vector<16x32xf32>
    %355 = arith.subf %310, %354 : vector<16x32xf32>
    %356 = math.exp %355 : vector<16x32xf32>
    %357 = arith.subf %312, %354 : vector<16x32xf32>
    %358 = math.exp %357 : vector<16x32xf32>
    %359 = arith.subf %314, %354 : vector<16x32xf32>
    %360 = math.exp %359 : vector<16x32xf32>
    %361 = arith.addf %356, %358 : vector<16x32xf32>
    %362 = arith.addf %361, %360 : vector<16x32xf32>
    %363 = tpu.reciprocal %362 {approx = true} : vector<16x32xf32> -> vector<16x32xf32>
    %364 = arith.mulf %356, %363 : vector<16x32xf32>
    %365 = arith.mulf %364, %294 : vector<16x32xf32>
    %366 = arith.mulf %358, %363 : vector<16x32xf32>
    %367 = arith.mulf %366, %295 : vector<16x32xf32>
    %368 = arith.addf %365, %367 : vector<16x32xf32>
    %369 = arith.mulf %360, %363 : vector<16x32xf32>
    %370 = arith.mulf %369, %296 : vector<16x32xf32>
    %371 = arith.addf %368, %370 : vector<16x32xf32>
    %372 = tpu.concatenate %333, %352, %371 in 0 : vector<16x32xf32>, vector<16x32xf32>, vector<16x32xf32> -> vector<48x32xf32>
    %373 = arith.truncf %372 : vector<48x32xf32> to vector<48x32xbf16>
    %cst_175 = arith.constant dense<0.000000e+00> : vector<48x32xf32>
    %374 = tpu.matmul %373, %259, %cst_175 {dimension_numbers = #tpu.dot_dimension_numbers<[1], [0], [0], [1], [0, 0, 1, 1], [], []>} : vector<48x32xbf16>, vector<32x32xbf16>, vector<48x32xf32> -> vector<48x32xf32>
    %375 = vector.broadcast %261 : vector<1x32xf32> to vector<48x32xf32>
    %376 = arith.addf %374, %375 : vector<48x32xf32>
    %377 = arith.addf %245, %376 : vector<48x32xf32>
    %cst_176 = arith.constant dense<0.000000e+00> : vector<48xf32>
    %378 = vector.multi_reduction <add>, %377, %cst_176 [1] : vector<48x32xf32> to vector<48xf32>
    %379 = vector.shape_cast %378 : vector<48xf32> to vector<48x1xf32>
    %cst_177 = arith.constant 3.200000e+01 : f32
    %380 = vector.broadcast %cst_177 : f32 to vector<48x1xf32>
    %381 = arith.divf %379, %380 : vector<48x1xf32>
    %382 = vector.broadcast %381 : vector<48x1xf32> to vector<48x32xf32>
    %383 = arith.subf %377, %382 : vector<48x32xf32>
    %384 = vector.broadcast %381 : vector<48x1xf32> to vector<48x32xf32>
    %385 = arith.subf %377, %384 : vector<48x32xf32>
    %386 = arith.mulf %383, %385 : vector<48x32xf32>
    %cst_178 = arith.constant dense<0.000000e+00> : vector<48xf32>
    %387 = vector.multi_reduction <add>, %386, %cst_178 [1] : vector<48x32xf32> to vector<48xf32>
    %388 = vector.shape_cast %387 : vector<48xf32> to vector<48x1xf32>
    %cst_179 = arith.constant 3.200000e+01 : f32
    %389 = vector.broadcast %cst_179 : f32 to vector<48x1xf32>
    %390 = arith.divf %388, %389 : vector<48x1xf32>
    %391 = vector.broadcast %381 : vector<48x1xf32> to vector<48x32xf32>
    %392 = arith.subf %377, %391 : vector<48x32xf32>
    %cst_180 = arith.constant 9.99999974E-6 : f32
    %393 = vector.broadcast %cst_180 : f32 to vector<48x1xf32>
    %394 = arith.addf %390, %393 : vector<48x1xf32>
    %395 = math.rsqrt %394 : vector<48x1xf32>
    %396 = vector.broadcast %395 : vector<48x1xf32> to vector<48x32xf32>
    %397 = arith.mulf %392, %396 : vector<48x32xf32>
    %398 = vector.broadcast %263 : vector<1x32xf32> to vector<48x32xf32>
    %399 = arith.mulf %397, %398 : vector<48x32xf32>
    %400 = vector.broadcast %265 : vector<1x32xf32> to vector<48x32xf32>
    %401 = arith.addf %399, %400 : vector<48x32xf32>
    %402 = arith.truncf %401 : vector<48x32xf32> to vector<48x32xbf16>
    %cst_181 = arith.constant dense<0.000000e+00> : vector<48x64xf32>
    %403 = tpu.matmul %402, %267, %cst_181 {dimension_numbers = #tpu.dot_dimension_numbers<[1], [0], [0], [1], [0, 0, 1, 1], [], []>} : vector<48x32xbf16>, vector<32x64xbf16>, vector<48x64xf32> -> vector<48x64xf32>
    %404 = vector.broadcast %269 : vector<1x64xf32> to vector<48x64xf32>
    %405 = arith.addf %403, %404 : vector<48x64xf32>
    %406 = arith.mulf %405, %405 : vector<48x64xf32>
    %407 = arith.mulf %405, %406 : vector<48x64xf32>
    %cst_182 = arith.constant 4.471500e-02 : f32
    %408 = vector.broadcast %cst_182 : f32 to vector<48x64xf32>
    %409 = arith.mulf %408, %407 : vector<48x64xf32>
    %410 = arith.addf %405, %409 : vector<48x64xf32>
    %cst_183 = arith.constant 0.797884583 : f32
    %411 = vector.broadcast %cst_183 : f32 to vector<48x64xf32>
    %412 = arith.mulf %411, %410 : vector<48x64xf32>
    %413 = math.tanh %412 : vector<48x64xf32>
    %cst_184 = arith.constant 1.000000e+00 : f32
    %414 = vector.broadcast %cst_184 : f32 to vector<48x64xf32>
    %415 = arith.addf %414, %413 : vector<48x64xf32>
    %cst_185 = arith.constant 5.000000e-01 : f32
    %416 = vector.broadcast %cst_185 : f32 to vector<48x64xf32>
    %417 = arith.mulf %416, %415 : vector<48x64xf32>
    %418 = arith.mulf %405, %417 : vector<48x64xf32>
    %419 = arith.truncf %418 : vector<48x64xf32> to vector<48x64xbf16>
    %cst_186 = arith.constant dense<0.000000e+00> : vector<48x32xf32>
    %420 = tpu.matmul %419, %271, %cst_186 {dimension_numbers = #tpu.dot_dimension_numbers<[1], [0], [0], [1], [0, 0, 1, 1], [], []>} : vector<48x64xbf16>, vector<64x32xbf16>, vector<48x32xf32> -> vector<48x32xf32>
    %421 = vector.broadcast %273 : vector<1x32xf32> to vector<48x32xf32>
    %422 = arith.addf %420, %421 : vector<48x32xf32>
    %423 = arith.addf %401, %422 : vector<48x32xf32>
    %cst_187 = arith.constant dense<0.000000e+00> : vector<48xf32>
    %424 = vector.multi_reduction <add>, %423, %cst_187 [1] : vector<48x32xf32> to vector<48xf32>
    %425 = vector.shape_cast %424 : vector<48xf32> to vector<48x1xf32>
    %cst_188 = arith.constant 3.200000e+01 : f32
    %426 = vector.broadcast %cst_188 : f32 to vector<48x1xf32>
    %427 = arith.divf %425, %426 : vector<48x1xf32>
    %428 = vector.broadcast %427 : vector<48x1xf32> to vector<48x32xf32>
    %429 = arith.subf %423, %428 : vector<48x32xf32>
    %430 = vector.broadcast %427 : vector<48x1xf32> to vector<48x32xf32>
    %431 = arith.subf %423, %430 : vector<48x32xf32>
    %432 = arith.mulf %429, %431 : vector<48x32xf32>
    %cst_189 = arith.constant dense<0.000000e+00> : vector<48xf32>
    %433 = vector.multi_reduction <add>, %432, %cst_189 [1] : vector<48x32xf32> to vector<48xf32>
    %434 = vector.shape_cast %433 : vector<48xf32> to vector<48x1xf32>
    %cst_190 = arith.constant 3.200000e+01 : f32
    %435 = vector.broadcast %cst_190 : f32 to vector<48x1xf32>
    %436 = arith.divf %434, %435 : vector<48x1xf32>
    %437 = vector.broadcast %427 : vector<48x1xf32> to vector<48x32xf32>
    %438 = arith.subf %423, %437 : vector<48x32xf32>
    %cst_191 = arith.constant 9.99999974E-6 : f32
    %439 = vector.broadcast %cst_191 : f32 to vector<48x1xf32>
    %440 = arith.addf %436, %439 : vector<48x1xf32>
    %441 = math.rsqrt %440 : vector<48x1xf32>
    %442 = vector.broadcast %441 : vector<48x1xf32> to vector<48x32xf32>
    %443 = arith.mulf %438, %442 : vector<48x32xf32>
    %444 = vector.broadcast %275 : vector<1x32xf32> to vector<48x32xf32>
    %445 = arith.mulf %443, %444 : vector<48x32xf32>
    %446 = vector.broadcast %277 : vector<1x32xf32> to vector<48x32xf32>
    %447 = arith.addf %445, %446 : vector<48x32xf32>
    %448 = vector.extract_strided_slice %447 {offsets = [0, 0], sizes = [16, 32], strides = [1, 1]} : vector<48x32xf32> to vector<16x32xf32>
    %449 = vector.extract_strided_slice %447 {offsets = [16, 0], sizes = [16, 32], strides = [1, 1]} : vector<48x32xf32> to vector<16x32xf32>
    %450 = arith.addf %448, %449 : vector<16x32xf32>
    %451 = vector.extract_strided_slice %447 {offsets = [32, 0], sizes = [16, 32], strides = [1, 1]} : vector<48x32xf32> to vector<16x32xf32>
    %452 = arith.addf %450, %451 : vector<16x32xf32>
    %cst_192 = arith.constant 0.333333343 : f32
    %453 = vector.broadcast %cst_192 : f32 to vector<16x32xf32>
    %454 = arith.mulf %452, %453 : vector<16x32xf32>
    %c0_193 = arith.constant 0 : index
    %c0_194 = arith.constant 0 : index
    %455 = vector.load %arg33[%c0_193, %c0_194] : memref<16x32xf32, #tpu.memory_space<vmem>>, vector<16x32xf32>
    tpu.vector_store %arg33[%c0_193, %c0_194], %454 {strides = array<i32>} : memref<16x32xf32, #tpu.memory_space<vmem>>, vector<16x32xf32>,
    return
  }
  func.func @transform_0(%arg0: i32) -> (i32, i32) {
    %c0_i32 = arith.constant 0 : i32
    %c0_i32_0 = arith.constant 0 : i32
    return %arg0, %c0_i32 : i32, i32
  }
  func.func @transform_1(%arg0: i32) -> (i32, i32) {
    %c0_i32 = arith.constant 0 : i32
    %c0_i32_0 = arith.constant 0 : i32
    return %arg0, %c0_i32 : i32, i32
  }
  func.func @transform_2(%arg0: i32) -> (i32, i32) {
    %c0_i32 = arith.constant 0 : i32
    %c0_i32_0 = arith.constant 0 : i32
    return %arg0, %c0_i32 : i32, i32
  }
  func.func @transform_3(%arg0: i32) -> (i32, i32) {
    %c0_i32 = arith.constant 0 : i32
    %c0_i32_0 = arith.constant 0 : i32
    %c0_i32_1 = arith.constant 0 : i32
    return %c0_i32, %c0_i32_0 : i32, i32
  }
  func.func @transform_4(%arg0: i32) -> (i32, i32) {
    %c0_i32 = arith.constant 0 : i32
    %c0_i32_0 = arith.constant 0 : i32
    %c0_i32_1 = arith.constant 0 : i32
    return %c0_i32, %c0_i32_0 : i32, i32
  }
  func.func @transform_5(%arg0: i32) -> (i32, i32) {
    %c0_i32 = arith.constant 0 : i32
    %c0_i32_0 = arith.constant 0 : i32
    %c0_i32_1 = arith.constant 0 : i32
    return %c0_i32, %c0_i32_0 : i32, i32
  }
  func.func @transform_6(%arg0: i32) -> (i32, i32) {
    %c0_i32 = arith.constant 0 : i32
    %c0_i32_0 = arith.constant 0 : i32
    %c0_i32_1 = arith.constant 0 : i32
    return %c0_i32, %c0_i32_0 : i32, i32
  }
  func.func @transform_7(%arg0: i32) -> (i32, i32) {
    %c0_i32 = arith.constant 0 : i32
    %c0_i32_0 = arith.constant 0 : i32
    %c0_i32_1 = arith.constant 0 : i32
    return %c0_i32, %c0_i32_0 : i32, i32
  }
  func.func @transform_8(%arg0: i32) -> (i32, i32) {
    %c0_i32 = arith.constant 0 : i32
    %c0_i32_0 = arith.constant 0 : i32
    %c0_i32_1 = arith.constant 0 : i32
    return %c0_i32, %c0_i32_0 : i32, i32
  }
  func.func @transform_9(%arg0: i32) -> (i32, i32) {
    %c0_i32 = arith.constant 0 : i32
    %c0_i32_0 = arith.constant 0 : i32
    %c0_i32_1 = arith.constant 0 : i32
    return %c0_i32, %c0_i32_0 : i32, i32
  }
  func.func @transform_10(%arg0: i32) -> (i32, i32) {
    %c0_i32 = arith.constant 0 : i32
    %c0_i32_0 = arith.constant 0 : i32
    %c0_i32_1 = arith.constant 0 : i32
    return %c0_i32, %c0_i32_0 : i32, i32
  }
  func.func @transform_11(%arg0: i32) -> (i32, i32) {
    %c0_i32 = arith.constant 0 : i32
    %c0_i32_0 = arith.constant 0 : i32
    %c0_i32_1 = arith.constant 0 : i32
    return %c0_i32, %c0_i32_0 : i32, i32
  }
  func.func @transform_12(%arg0: i32) -> (i32, i32) {
    %c0_i32 = arith.constant 0 : i32
    %c0_i32_0 = arith.constant 0 : i32
    %c0_i32_1 = arith.constant 0 : i32
    return %c0_i32, %c0_i32_0 : i32, i32
  }
  func.func @transform_13(%arg0: i32) -> (i32, i32) {
    %c0_i32 = arith.constant 0 : i32
    %c0_i32_0 = arith.constant 0 : i32
    %c0_i32_1 = arith.constant 0 : i32
    return %c0_i32, %c0_i32_0 : i32, i32
  }
  func.func @transform_14(%arg0: i32) -> (i32, i32) {
    %c0_i32 = arith.constant 0 : i32
    %c0_i32_0 = arith.constant 0 : i32
    %c0_i32_1 = arith.constant 0 : i32
    return %c0_i32, %c0_i32_0 : i32, i32
  }
  func.func @transform_15(%arg0: i32) -> (i32, i32) {
    %c0_i32 = arith.constant 0 : i32
    %c0_i32_0 = arith.constant 0 : i32
    %c0_i32_1 = arith.constant 0 : i32
    return %c0_i32, %c0_i32_0 : i32, i32
  }
  func.func @transform_16(%arg0: i32) -> (i32, i32, i32) {
    %c0_i32 = arith.constant 0 : i32
    %c0_i32_0 = arith.constant 0 : i32
    %c0_i32_1 = arith.constant 0 : i32
    %c0_i32_2 = arith.constant 0 : i32
    return %c0_i32, %c0_i32_0, %c0_i32_1 : i32, i32, i32
  }
  func.func @transform_17(%arg0: i32) -> (i32, i32, i32) {
    %c0_i32 = arith.constant 0 : i32
    %c0_i32_0 = arith.constant 0 : i32
    %c0_i32_1 = arith.constant 0 : i32
    %c0_i32_2 = arith.constant 0 : i32
    return %c0_i32, %c0_i32_0, %c0_i32_1 : i32, i32, i32
  }
  func.func @transform_18(%arg0: i32) -> (i32, i32, i32) {
    %c0_i32 = arith.constant 0 : i32
    %c0_i32_0 = arith.constant 0 : i32
    %c0_i32_1 = arith.constant 0 : i32
    %c0_i32_2 = arith.constant 0 : i32
    return %c0_i32, %c0_i32_0, %c0_i32_1 : i32, i32, i32
  }
  func.func @transform_19(%arg0: i32) -> (i32, i32, i32) {
    %c0_i32 = arith.constant 0 : i32
    %c0_i32_0 = arith.constant 0 : i32
    %c0_i32_1 = arith.constant 0 : i32
    %c0_i32_2 = arith.constant 0 : i32
    return %c0_i32, %c0_i32_0, %c0_i32_1 : i32, i32, i32
  }
  func.func @transform_20(%arg0: i32) -> (i32, i32, i32) {
    %c0_i32 = arith.constant 0 : i32
    %c0_i32_0 = arith.constant 0 : i32
    %c0_i32_1 = arith.constant 0 : i32
    %c0_i32_2 = arith.constant 0 : i32
    return %c0_i32, %c0_i32_0, %c0_i32_1 : i32, i32, i32
  }
  func.func @transform_21(%arg0: i32) -> (i32, i32, i32) {
    %c0_i32 = arith.constant 0 : i32
    %c0_i32_0 = arith.constant 0 : i32
    %c0_i32_1 = arith.constant 0 : i32
    %c0_i32_2 = arith.constant 0 : i32
    return %c0_i32, %c0_i32_0, %c0_i32_1 : i32, i32, i32
  }
  func.func @transform_22(%arg0: i32) -> (i32, i32, i32) {
    %c0_i32 = arith.constant 0 : i32
    %c0_i32_0 = arith.constant 0 : i32
    %c0_i32_1 = arith.constant 0 : i32
    %c0_i32_2 = arith.constant 0 : i32
    return %c0_i32, %c0_i32_0, %c0_i32_1 : i32, i32, i32
  }
  func.func @transform_23(%arg0: i32) -> (i32, i32, i32) {
    %c0_i32 = arith.constant 0 : i32
    %c0_i32_0 = arith.constant 0 : i32
    %c0_i32_1 = arith.constant 0 : i32
    %c0_i32_2 = arith.constant 0 : i32
    return %c0_i32, %c0_i32_0, %c0_i32_1 : i32, i32, i32
  }
  func.func @transform_24(%arg0: i32) -> (i32, i32, i32) {
    %c0_i32 = arith.constant 0 : i32
    %c0_i32_0 = arith.constant 0 : i32
    %c0_i32_1 = arith.constant 0 : i32
    %c0_i32_2 = arith.constant 0 : i32
    return %c0_i32, %c0_i32_0, %c0_i32_1 : i32, i32, i32
  }
  func.func @transform_25(%arg0: i32) -> (i32, i32, i32) {
    %c0_i32 = arith.constant 0 : i32
    %c0_i32_0 = arith.constant 0 : i32
    %c0_i32_1 = arith.constant 0 : i32
    %c0_i32_2 = arith.constant 0 : i32
    return %c0_i32, %c0_i32_0, %c0_i32_1 : i32, i32, i32
  }
  func.func @transform_26(%arg0: i32) -> (i32, i32, i32) {
    %c0_i32 = arith.constant 0 : i32
    %c0_i32_0 = arith.constant 0 : i32
    %c0_i32_1 = arith.constant 0 : i32
    %c0_i32_2 = arith.constant 0 : i32
    return %c0_i32, %c0_i32_0, %c0_i32_1 : i32, i32, i32
  }
  func.func @transform_27(%arg0: i32) -> (i32, i32, i32) {
    %c0_i32 = arith.constant 0 : i32
    %c0_i32_0 = arith.constant 0 : i32
    %c0_i32_1 = arith.constant 0 : i32
    %c0_i32_2 = arith.constant 0 : i32
    return %c0_i32, %c0_i32_0, %c0_i32_1 : i32, i32, i32
  }
  func.func @transform_28(%arg0: i32) -> (i32, i32, i32) {
    %c0_i32 = arith.constant 0 : i32
    %c0_i32_0 = arith.constant 0 : i32
    %c0_i32_1 = arith.constant 0 : i32
    %c0_i32_2 = arith.constant 0 : i32
    return %c0_i32, %c0_i32_0, %c0_i32_1 : i32, i32, i32
  }
  func.func @transform_29(%arg0: i32) -> (i32, i32, i32) {
    %c0_i32 = arith.constant 0 : i32
    %c0_i32_0 = arith.constant 0 : i32
    %c0_i32_1 = arith.constant 0 : i32
    %c0_i32_2 = arith.constant 0 : i32
    return %c0_i32, %c0_i32_0, %c0_i32_1 : i32, i32, i32
  }
  func.func @transform_30(%arg0: i32) -> (i32, i32, i32) {
    %c0_i32 = arith.constant 0 : i32
    %c0_i32_0 = arith.constant 0 : i32
    %c0_i32_1 = arith.constant 0 : i32
    %c0_i32_2 = arith.constant 0 : i32
    return %c0_i32, %c0_i32_0, %c0_i32_1 : i32, i32, i32
  }
  func.func @transform_31(%arg0: i32) -> (i32, i32, i32) {
    %c0_i32 = arith.constant 0 : i32
    %c0_i32_0 = arith.constant 0 : i32
    %c0_i32_1 = arith.constant 0 : i32
    %c0_i32_2 = arith.constant 0 : i32
    return %c0_i32, %c0_i32_0, %c0_i32_1 : i32, i32, i32
  }
  func.func @transform_32(%arg0: i32) -> (i32, i32) {
    %c0_i32 = arith.constant 0 : i32
    %c0_i32_0 = arith.constant 0 : i32
    return %arg0, %c0_i32 : i32, i32
  }
}

module attributes {stable_mosaic.version = 11 : i64} {
  func.func @kernel(%arg0: i32, %arg1: memref<16x16xbf16, #tpu.memory_space<vmem>>, %arg2: memref<16x32xbf16, #tpu.memory_space<vmem>>, %arg3: memref<16x8xbf16, #tpu.memory_space<vmem>>, %arg4: memref<16x16xbf16, #tpu.memory_space<vmem>>, %arg5: memref<1x16xf32, #tpu.memory_space<vmem>>, %arg6: memref<16x32xbf16, #tpu.memory_space<vmem>>, %arg7: memref<1x32xf32, #tpu.memory_space<vmem>>, %arg8: memref<32x32xbf16, #tpu.memory_space<vmem>>, %arg9: memref<1x32xf32, #tpu.memory_space<vmem>>, %arg10: memref<32x32xbf16, #tpu.memory_space<vmem>>, %arg11: memref<1x32xf32, #tpu.memory_space<vmem>>, %arg12: memref<8x8xbf16, #tpu.memory_space<vmem>>, %arg13: memref<1x8xf32, #tpu.memory_space<vmem>>, %arg14: memref<8x32xbf16, #tpu.memory_space<vmem>>, %arg15: memref<1x32xf32, #tpu.memory_space<vmem>>, %arg16: memref<32x32xf32, #tpu.memory_space<vmem>>, %arg17: memref<2x32x32xbf16, #tpu.memory_space<vmem>>, %arg18: memref<2x1x32xf32, #tpu.memory_space<vmem>>, %arg19: memref<2x32x32xbf16, #tpu.memory_space<vmem>>, %arg20: memref<2x1x32xf32, #tpu.memory_space<vmem>>, %arg21: memref<2x32x32xbf16, #tpu.memory_space<vmem>>, %arg22: memref<2x1x32xf32, #tpu.memory_space<vmem>>, %arg23: memref<2x32x32xbf16, #tpu.memory_space<vmem>>, %arg24: memref<2x1x32xf32, #tpu.memory_space<vmem>>, %arg25: memref<2x1x32xf32, #tpu.memory_space<vmem>>, %arg26: memref<2x1x32xf32, #tpu.memory_space<vmem>>, %arg27: memref<2x32x64xbf16, #tpu.memory_space<vmem>>, %arg28: memref<2x1x64xf32, #tpu.memory_space<vmem>>, %arg29: memref<2x64x32xbf16, #tpu.memory_space<vmem>>, %arg30: memref<2x1x32xf32, #tpu.memory_space<vmem>>, %arg31: memref<2x1x32xf32, #tpu.memory_space<vmem>>, %arg32: memref<2x1x32xf32, #tpu.memory_space<vmem>>, %arg33: memref<16x32xf32, #tpu.memory_space<vmem>>) attributes {dimension_semantics = [#tpu.dimension_semantics<parallel>], iteration_bounds = array<i64: 1>, scalar_prefetch = 0 : i64, scratch_operands = 0 : i64, tpu.core_type = #tpu.core_type<tc>, window_params = [{transform_indices = @transform_0, window_bounds = array<i64: 16, 16>}, {transform_indices = @transform_1, window_bounds = array<i64: 16, 32>}, {transform_indices = @transform_2, window_bounds = array<i64: 16, 8>}, {pipeline_mode = #tpu.pipeline_mode<synchronous>, transform_indices = @transform_3, window_bounds = array<i64: 16, 16>}, {pipeline_mode = #tpu.pipeline_mode<synchronous>, transform_indices = @transform_4, window_bounds = array<i64: 1, 16>}, {pipeline_mode = #tpu.pipeline_mode<synchronous>, transform_indices = @transform_5, window_bounds = array<i64: 16, 32>}, {pipeline_mode = #tpu.pipeline_mode<synchronous>, transform_indices = @transform_6, window_bounds = array<i64: 1, 32>}, {pipeline_mode = #tpu.pipeline_mode<synchronous>, transform_indices = @transform_7, window_bounds = array<i64: 32, 32>}, {pipeline_mode = #tpu.pipeline_mode<synchronous>, transform_indices = @transform_8, window_bounds = array<i64: 1, 32>}, {pipeline_mode = #tpu.pipeline_mode<synchronous>, transform_indices = @transform_9, window_bounds = array<i64: 32, 32>}, {pipeline_mode = #tpu.pipeline_mode<synchronous>, transform_indices = @transform_10, window_bounds = array<i64: 1, 32>}, {pipeline_mode = #tpu.pipeline_mode<synchronous>, transform_indices = @transform_11, window_bounds = array<i64: 8, 8>}, {pipeline_mode = #tpu.pipeline_mode<synchronous>, transform_indices = @transform_12, window_bounds = array<i64: 1, 8>}, {pipeline_mode = #tpu.pipeline_mode<synchronous>, transform_indices = @transform_13, window_bounds = array<i64: 8, 32>}, {pipeline_mode = #tpu.pipeline_mode<synchronous>, transform_indices = @transform_14, window_bounds = array<i64: 1, 32>}, {pipeline_mode = #tpu.pipeline_mode<synchronous>, transform_indices = @transform_15, window_bounds = array<i64: 32, 32>}, {pipeline_mode = #tpu.pipeline_mode<synchronous>, transform_indices = @transform_16, window_bounds = array<i64: 2, 32, 32>}, {pipeline_mode = #tpu.pipeline_mode<synchronous>, transform_indices = @transform_17, window_bounds = array<i64: 2, 1, 32>}, {pipeline_mode = #tpu.pipeline_mode<synchronous>, transform_indices = @transform_18, window_bounds = array<i64: 2, 32, 32>}, {pipeline_mode = #tpu.pipeline_mode<synchronous>, transform_indices = @transform_19, window_bounds = array<i64: 2, 1, 32>}, {pipeline_mode = #tpu.pipeline_mode<synchronous>, transform_indices = @transform_20, window_bounds = array<i64: 2, 32, 32>}, {pipeline_mode = #tpu.pipeline_mode<synchronous>, transform_indices = @transform_21, window_bounds = array<i64: 2, 1, 32>}, {pipeline_mode = #tpu.pipeline_mode<synchronous>, transform_indices = @transform_22, window_bounds = array<i64: 2, 32, 32>}, {pipeline_mode = #tpu.pipeline_mode<synchronous>, transform_indices = @transform_23, window_bounds = array<i64: 2, 1, 32>}, {pipeline_mode = #tpu.pipeline_mode<synchronous>, transform_indices = @transform_24, window_bounds = array<i64: 2, 1, 32>}, {pipeline_mode = #tpu.pipeline_mode<synchronous>, transform_indices = @transform_25, window_bounds = array<i64: 2, 1, 32>}, {pipeline_mode = #tpu.pipeline_mode<synchronous>, transform_indices = @transform_26, window_bounds = array<i64: 2, 32, 64>}, {pipeline_mode = #tpu.pipeline_mode<synchronous>, transform_indices = @transform_27, window_bounds = array<i64: 2, 1, 64>}, {pipeline_mode = #tpu.pipeline_mode<synchronous>, transform_indices = @transform_28, window_bounds = array<i64: 2, 64, 32>}, {pipeline_mode = #tpu.pipeline_mode<synchronous>, transform_indices = @transform_29, window_bounds = array<i64: 2, 1, 32>}, {pipeline_mode = #tpu.pipeline_mode<synchronous>, transform_indices = @transform_30, window_bounds = array<i64: 2, 1, 32>}, {pipeline_mode = #tpu.pipeline_mode<synchronous>, transform_indices = @transform_31, window_bounds = array<i64: 2, 1, 32>}, {transform_indices = @transform_32, window_bounds = array<i64: 16, 32>}]} {
    %c0 = arith.constant 0 : index
    %c0_0 = arith.constant 0 : index
    %0 = vector.load %arg1[%c0, %c0_0] : memref<16x16xbf16, #tpu.memory_space<vmem>>, vector<16x16xbf16>
    %c0_1 = arith.constant 0 : index
    %c0_2 = arith.constant 0 : index
    %1 = vector.load %arg4[%c0_1, %c0_2] : memref<16x16xbf16, #tpu.memory_space<vmem>>, vector<16x16xbf16>
    %c0_3 = arith.constant 0 : index
    %c0_4 = arith.constant 0 : index
    %2 = vector.load %arg5[%c0_3, %c0_4] : memref<1x16xf32, #tpu.memory_space<vmem>>, vector<1x16xf32>
    %c0_5 = arith.constant 0 : index
    %c0_6 = arith.constant 0 : index
    %3 = vector.load %arg6[%c0_5, %c0_6] : memref<16x32xbf16, #tpu.memory_space<vmem>>, vector<16x32xbf16>
    %c0_7 = arith.constant 0 : index
    %c0_8 = arith.constant 0 : index
    %4 = vector.load %arg7[%c0_7, %c0_8] : memref<1x32xf32, #tpu.memory_space<vmem>>, vector<1x32xf32>
    %cst = arith.constant dense<0.000000e+00> : vector<16x16xf32>
    %5 = tpu.matmul %0, %1, %cst {dimension_numbers = #tpu.dot_dimension_numbers<[1], [0], [0], [1], [0, 0, 1, 1], [], []>} : vector<16x16xbf16>, vector<16x16xbf16>, vector<16x16xf32> -> vector<16x16xf32>
    %6 = vector.broadcast %2 : vector<1x16xf32> to vector<16x16xf32>
    %7 = arith.addf %5, %6 : vector<16x16xf32>
    %cst_9 = arith.constant 0.000000e+00 : f32
    %8 = vector.broadcast %cst_9 : f32 to vector<16x16xf32>
    %9 = arith.maximumf %7, %8 : vector<16x16xf32>
    %10 = arith.truncf %9 : vector<16x16xf32> to vector<16x16xbf16>
    %cst_10 = arith.constant dense<0.000000e+00> : vector<16x32xf32>
    %11 = tpu.matmul %10, %3, %cst_10 {dimension_numbers = #tpu.dot_dimension_numbers<[1], [0], [0], [1], [0, 0, 1, 1], [], []>} : vector<16x16xbf16>, vector<16x32xbf16>, vector<16x32xf32> -> vector<16x32xf32>
    %12 = vector.broadcast %4 : vector<1x32xf32> to vector<16x32xf32>
    %13 = arith.addf %11, %12 : vector<16x32xf32>
    %c0_11 = arith.constant 0 : index
    %c0_12 = arith.constant 0 : index
    %14 = vector.load %arg2[%c0_11, %c0_12] : memref<16x32xbf16, #tpu.memory_space<vmem>>, vector<16x32xbf16>
    %c0_13 = arith.constant 0 : index
    %c0_14 = arith.constant 0 : index
    %15 = vector.load %arg8[%c0_13, %c0_14] : memref<32x32xbf16, #tpu.memory_space<vmem>>, vector<32x32xbf16>
    %c0_15 = arith.constant 0 : index
    %c0_16 = arith.constant 0 : index
    %16 = vector.load %arg9[%c0_15, %c0_16] : memref<1x32xf32, #tpu.memory_space<vmem>>, vector<1x32xf32>
    %c0_17 = arith.constant 0 : index
    %c0_18 = arith.constant 0 : index
    %17 = vector.load %arg10[%c0_17, %c0_18] : memref<32x32xbf16, #tpu.memory_space<vmem>>, vector<32x32xbf16>
    %c0_19 = arith.constant 0 : index
    %c0_20 = arith.constant 0 : index
    %18 = vector.load %arg11[%c0_19, %c0_20] : memref<1x32xf32, #tpu.memory_space<vmem>>, vector<1x32xf32>
    %cst_21 = arith.constant dense<0.000000e+00> : vector<16x32xf32>
    %19 = tpu.matmul %14, %15, %cst_21 {dimension_numbers = #tpu.dot_dimension_numbers<[1], [0], [0], [1], [0, 0, 1, 1], [], []>} : vector<16x32xbf16>, vector<32x32xbf16>, vector<16x32xf32> -> vector<16x32xf32>
    %20 = vector.broadcast %16 : vector<1x32xf32> to vector<16x32xf32>
    %21 = arith.addf %19, %20 : vector<16x32xf32>
    %cst_22 = arith.constant 0.000000e+00 : f32
    %22 = vector.broadcast %cst_22 : f32 to vector<16x32xf32>
    %23 = arith.maximumf %21, %22 : vector<16x32xf32>
    %24 = arith.truncf %23 : vector<16x32xf32> to vector<16x32xbf16>
    %cst_23 = arith.constant dense<0.000000e+00> : vector<16x32xf32>
    %25 = tpu.matmul %24, %17, %cst_23 {dimension_numbers = #tpu.dot_dimension_numbers<[1], [0], [0], [1], [0, 0, 1, 1], [], []>} : vector<16x32xbf16>, vector<32x32xbf16>, vector<16x32xf32> -> vector<16x32xf32>
    %26 = vector.broadcast %18 : vector<1x32xf32> to vector<16x32xf32>
    %27 = arith.addf %25, %26 : vector<16x32xf32>
    %c0_24 = arith.constant 0 : index
    %c0_25 = arith.constant 0 : index
    %28 = vector.load %arg3[%c0_24, %c0_25] : memref<16x8xbf16, #tpu.memory_space<vmem>>, vector<16x8xbf16>
    %c0_26 = arith.constant 0 : index
    %c0_27 = arith.constant 0 : index
    %29 = vector.load %arg12[%c0_26, %c0_27] : memref<8x8xbf16, #tpu.memory_space<vmem>>, vector<8x8xbf16>
    %c0_28 = arith.constant 0 : index
    %c0_29 = arith.constant 0 : index
    %30 = vector.load %arg13[%c0_28, %c0_29] : memref<1x8xf32, #tpu.memory_space<vmem>>, vector<1x8xf32>
    %c0_30 = arith.constant 0 : index
    %c0_31 = arith.constant 0 : index
    %31 = vector.load %arg14[%c0_30, %c0_31] : memref<8x32xbf16, #tpu.memory_space<vmem>>, vector<8x32xbf16>
    %c0_32 = arith.constant 0 : index
    %c0_33 = arith.constant 0 : index
    %32 = vector.load %arg15[%c0_32, %c0_33] : memref<1x32xf32, #tpu.memory_space<vmem>>, vector<1x32xf32>
    %cst_34 = arith.constant dense<0.000000e+00> : vector<16x8xf32>
    %33 = tpu.matmul %28, %29, %cst_34 {dimension_numbers = #tpu.dot_dimension_numbers<[1], [0], [0], [1], [0, 0, 1, 1], [], []>} : vector<16x8xbf16>, vector<8x8xbf16>, vector<16x8xf32> -> vector<16x8xf32>
    %34 = vector.broadcast %30 : vector<1x8xf32> to vector<16x8xf32>
    %35 = arith.addf %33, %34 : vector<16x8xf32>
    %cst_35 = arith.constant 0.000000e+00 : f32
    %36 = vector.broadcast %cst_35 : f32 to vector<16x8xf32>
    %37 = arith.maximumf %35, %36 : vector<16x8xf32>
    %38 = arith.truncf %37 : vector<16x8xf32> to vector<16x8xbf16>
    %cst_36 = arith.constant dense<0.000000e+00> : vector<16x32xf32>
    %39 = tpu.matmul %38, %31, %cst_36 {dimension_numbers = #tpu.dot_dimension_numbers<[1], [0], [0], [1], [0, 0, 1, 1], [], []>} : vector<16x8xbf16>, vector<8x32xbf16>, vector<16x32xf32> -> vector<16x32xf32>
    %40 = vector.broadcast %32 : vector<1x32xf32> to vector<16x32xf32>
    %41 = arith.addf %39, %40 : vector<16x32xf32>
    %42 = tpu.concatenate %13, %27, %41 in 0 : vector<16x32xf32>, vector<16x32xf32>, vector<16x32xf32> -> vector<48x32xf32>
    %c0_37 = arith.constant 0 : index
    %c0_38 = arith.constant 0 : index
    %43 = vector.load %arg16[%c0_37, %c0_38] : memref<32x32xf32, #tpu.memory_space<vmem>>, vector<32x32xf32>
    %c0_39 = arith.constant 0 : index
    %c0_40 = arith.constant 0 : index
    %c0_41 = arith.constant 0 : index
    %44 = vector.load %arg17[%c0_39, %c0_40, %c0_41] : memref<2x32x32xbf16, #tpu.memory_space<vmem>>, vector<1x32x32xbf16>
    %45 = vector.shape_cast %44 : vector<1x32x32xbf16> to vector<32x32xbf16>
    %c0_42 = arith.constant 0 : index
    %c0_43 = arith.constant 0 : index
    %c0_44 = arith.constant 0 : index
    %46 = vector.load %arg18[%c0_42, %c0_43, %c0_44] : memref<2x1x32xf32, #tpu.memory_space<vmem>>, vector<1x1x32xf32>
    %47 = vector.shape_cast %46 : vector<1x1x32xf32> to vector<1x32xf32>
    %c0_45 = arith.constant 0 : index
    %c0_46 = arith.constant 0 : index
    %c0_47 = arith.constant 0 : index
    %48 = vector.load %arg19[%c0_45, %c0_46, %c0_47] : memref<2x32x32xbf16, #tpu.memory_space<vmem>>, vector<1x32x32xbf16>
    %49 = vector.shape_cast %48 : vector<1x32x32xbf16> to vector<32x32xbf16>
    %c0_48 = arith.constant 0 : index
    %c0_49 = arith.constant 0 : index
    %c0_50 = arith.constant 0 : index
    %50 = vector.load %arg20[%c0_48, %c0_49, %c0_50] : memref<2x1x32xf32, #tpu.memory_space<vmem>>, vector<1x1x32xf32>
    %51 = vector.shape_cast %50 : vector<1x1x32xf32> to vector<1x32xf32>
    %c0_51 = arith.constant 0 : index
    %c0_52 = arith.constant 0 : index
    %c0_53 = arith.constant 0 : index
    %52 = vector.load %arg21[%c0_51, %c0_52, %c0_53] : memref<2x32x32xbf16, #tpu.memory_space<vmem>>, vector<1x32x32xbf16>
    %53 = vector.shape_cast %52 : vector<1x32x32xbf16> to vector<32x32xbf16>
    %c0_54 = arith.constant 0 : index
    %c0_55 = arith.constant 0 : index
    %c0_56 = arith.constant 0 : index
    %54 = vector.load %arg22[%c0_54, %c0_55, %c0_56] : memref<2x1x32xf32, #tpu.memory_space<vmem>>, vector<1x1x32xf32>
    %55 = vector.shape_cast %54 : vector<1x1x32xf32> to vector<1x32xf32>
    %c0_57 = arith.constant 0 : index
    %c0_58 = arith.constant 0 : index
    %c0_59 = arith.constant 0 : index
    %56 = vector.load %arg23[%c0_57, %c0_58, %c0_59] : memref<2x32x32xbf16, #tpu.memory_space<vmem>>, vector<1x32x32xbf16>
    %57 = vector.shape_cast %56 : vector<1x32x32xbf16> to vector<32x32xbf16>
    %c0_60 = arith.constant 0 : index
    %c0_61 = arith.constant 0 : index
    %c0_62 = arith.constant 0 : index
    %58 = vector.load %arg24[%c0_60, %c0_61, %c0_62] : memref<2x1x32xf32, #tpu.memory_space<vmem>>, vector<1x1x32xf32>
    %59 = vector.shape_cast %58 : vector<1x1x32xf32> to vector<1x32xf32>
    %c0_63 = arith.constant 0 : index
    %c0_64 = arith.constant 0 : index
    %c0_65 = arith.constant 0 : index
    %60 = vector.load %arg25[%c0_63, %c0_64, %c0_65] : memref<2x1x32xf32, #tpu.memory_space<vmem>>, vector<1x1x32xf32>
    %61 = vector.shape_cast %60 : vector<1x1x32xf32> to vector<1x32xf32>
    %c0_66 = arith.constant 0 : index
    %c0_67 = arith.constant 0 : index
    %c0_68 = arith.constant 0 : index
    %62 = vector.load %arg26[%c0_66, %c0_67, %c0_68] : memref<2x1x32xf32, #tpu.memory_space<vmem>>, vector<1x1x32xf32>
    %63 = vector.shape_cast %62 : vector<1x1x32xf32> to vector<1x32xf32>
    %c0_69 = arith.constant 0 : index
    %c0_70 = arith.constant 0 : index
    %c0_71 = arith.constant 0 : index
    %64 = vector.load %arg27[%c0_69, %c0_70, %c0_71] : memref<2x32x64xbf16, #tpu.memory_space<vmem>>, vector<1x32x64xbf16>
    %65 = vector.shape_cast %64 : vector<1x32x64xbf16> to vector<32x64xbf16>
    %c0_72 = arith.constant 0 : index
    %c0_73 = arith.constant 0 : index
    %c0_74 = arith.constant 0 : index
    %66 = vector.load %arg28[%c0_72, %c0_73, %c0_74] : memref<2x1x64xf32, #tpu.memory_space<vmem>>, vector<1x1x64xf32>
    %67 = vector.shape_cast %66 : vector<1x1x64xf32> to vector<1x64xf32>
    %c0_75 = arith.constant 0 : index
    %c0_76 = arith.constant 0 : index
    %c0_77 = arith.constant 0 : index
    %68 = vector.load %arg29[%c0_75, %c0_76, %c0_77] : memref<2x64x32xbf16, #tpu.memory_space<vmem>>, vector<1x64x32xbf16>
    %69 = vector.shape_cast %68 : vector<1x64x32xbf16> to vector<64x32xbf16>
    %c0_78 = arith.constant 0 : index
    %c0_79 = arith.constant 0 : index
    %c0_80 = arith.constant 0 : index
    %70 = vector.load %arg30[%c0_78, %c0_79, %c0_80] : memref<2x1x32xf32, #tpu.memory_space<vmem>>, vector<1x1x32xf32>
    %71 = vector.shape_cast %70 : vector<1x1x32xf32> to vector<1x32xf32>
    %c0_81 = arith.constant 0 : index
    %c0_82 = arith.constant 0 : index
    %c0_83 = arith.constant 0 : index
    %72 = vector.load %arg31[%c0_81, %c0_82, %c0_83] : memref<2x1x32xf32, #tpu.memory_space<vmem>>, vector<1x1x32xf32>
    %73 = vector.shape_cast %72 : vector<1x1x32xf32> to vector<1x32xf32>
    %c0_84 = arith.constant 0 : index
    %c0_85 = arith.constant 0 : index
    %c0_86 = arith.constant 0 : index
    %74 = vector.load %arg32[%c0_84, %c0_85, %c0_86] : memref<2x1x32xf32, #tpu.memory_space<vmem>>, vector<1x1x32xf32>
    %75 = vector.shape_cast %74 : vector<1x1x32xf32> to vector<1x32xf32>
    %76 = arith.truncf %42 : vector<48x32xf32> to vector<48x32xbf16>
    %cst_87 = arith.constant dense<0.000000e+00> : vector<48x32xf32>
    %77 = tpu.matmul %76, %45, %cst_87 {dimension_numbers = #tpu.dot_dimension_numbers<[1], [0], [0], [1], [0, 0, 1, 1], [], []>} : vector<48x32xbf16>, vector<32x32xbf16>, vector<48x32xf32> -> vector<48x32xf32>
    %78 = vector.broadcast %47 : vector<1x32xf32> to vector<48x32xf32>
    %79 = arith.addf %77, %78 : vector<48x32xf32>
    %cst_88 = arith.constant dense<0.000000e+00> : vector<48x32xf32>
    %80 = tpu.matmul %76, %49, %cst_88 {dimension_numbers = #tpu.dot_dimension_numbers<[1], [0], [0], [1], [0, 0, 1, 1], [], []>} : vector<48x32xbf16>, vector<32x32xbf16>, vector<48x32xf32> -> vector<48x32xf32>
    %81 = vector.broadcast %51 : vector<1x32xf32> to vector<48x32xf32>
    %82 = arith.addf %80, %81 : vector<48x32xf32>
    %cst_89 = arith.constant dense<0.000000e+00> : vector<48x32xf32>
    %83 = tpu.matmul %76, %53, %cst_89 {dimension_numbers = #tpu.dot_dimension_numbers<[1], [0], [0], [1], [0, 0, 1, 1], [], []>} : vector<48x32xbf16>, vector<32x32xbf16>, vector<48x32xf32> -> vector<48x32xf32>
    %84 = vector.broadcast %55 : vector<1x32xf32> to vector<48x32xf32>
    %85 = arith.addf %83, %84 : vector<48x32xf32>
    %86 = vector.extract_strided_slice %79 {offsets = [0, 0], sizes = [16, 32], strides = [1, 1]} : vector<48x32xf32> to vector<16x32xf32>
    %87 = vector.extract_strided_slice %79 {offsets = [16, 0], sizes = [16, 32], strides = [1, 1]} : vector<48x32xf32> to vector<16x32xf32>
    %88 = vector.extract_strided_slice %79 {offsets = [32, 0], sizes = [16, 32], strides = [1, 1]} : vector<48x32xf32> to vector<16x32xf32>
    %89 = vector.extract_strided_slice %82 {offsets = [0, 0], sizes = [16, 32], strides = [1, 1]} : vector<48x32xf32> to vector<16x32xf32>
    %90 = vector.extract_strided_slice %82 {offsets = [16, 0], sizes = [16, 32], strides = [1, 1]} : vector<48x32xf32> to vector<16x32xf32>
    %91 = vector.extract_strided_slice %82 {offsets = [32, 0], sizes = [16, 32], strides = [1, 1]} : vector<48x32xf32> to vector<16x32xf32>
    %92 = vector.extract_strided_slice %85 {offsets = [0, 0], sizes = [16, 32], strides = [1, 1]} : vector<48x32xf32> to vector<16x32xf32>
    %93 = vector.extract_strided_slice %85 {offsets = [16, 0], sizes = [16, 32], strides = [1, 1]} : vector<48x32xf32> to vector<16x32xf32>
    %94 = vector.extract_strided_slice %85 {offsets = [32, 0], sizes = [16, 32], strides = [1, 1]} : vector<48x32xf32> to vector<16x32xf32>
    %95 = arith.mulf %86, %89 : vector<16x32xf32>
    %cst_90 = arith.constant dense<0.000000e+00> : vector<16x32xf32>
    %96 = tpu.matmul %95, %43, %cst_90 {dimension_numbers = #tpu.dot_dimension_numbers<[1], [0], [0], [1], [0, 0, 1, 1], [], []>} : vector<16x32xf32>, vector<32x32xf32>, vector<16x32xf32> -> vector<16x32xf32>
    %97 = arith.mulf %86, %90 : vector<16x32xf32>
    %cst_91 = arith.constant dense<0.000000e+00> : vector<16x32xf32>
    %98 = tpu.matmul %97, %43, %cst_91 {dimension_numbers = #tpu.dot_dimension_numbers<[1], [0], [0], [1], [0, 0, 1, 1], [], []>} : vector<16x32xf32>, vector<32x32xf32>, vector<16x32xf32> -> vector<16x32xf32>
    %99 = arith.mulf %86, %91 : vector<16x32xf32>
    %cst_92 = arith.constant dense<0.000000e+00> : vector<16x32xf32>
    %100 = tpu.matmul %99, %43, %cst_92 {dimension_numbers = #tpu.dot_dimension_numbers<[1], [0], [0], [1], [0, 0, 1, 1], [], []>} : vector<16x32xf32>, vector<32x32xf32>, vector<16x32xf32> -> vector<16x32xf32>
    %101 = arith.mulf %87, %89 : vector<16x32xf32>
    %cst_93 = arith.constant dense<0.000000e+00> : vector<16x32xf32>
    %102 = tpu.matmul %101, %43, %cst_93 {dimension_numbers = #tpu.dot_dimension_numbers<[1], [0], [0], [1], [0, 0, 1, 1], [], []>} : vector<16x32xf32>, vector<32x32xf32>, vector<16x32xf32> -> vector<16x32xf32>
    %103 = arith.mulf %87, %90 : vector<16x32xf32>
    %cst_94 = arith.constant dense<0.000000e+00> : vector<16x32xf32>
    %104 = tpu.matmul %103, %43, %cst_94 {dimension_numbers = #tpu.dot_dimension_numbers<[1], [0], [0], [1], [0, 0, 1, 1], [], []>} : vector<16x32xf32>, vector<32x32xf32>, vector<16x32xf32> -> vector<16x32xf32>
    %105 = arith.mulf %87, %91 : vector<16x32xf32>
    %cst_95 = arith.constant dense<0.000000e+00> : vector<16x32xf32>
    %106 = tpu.matmul %105, %43, %cst_95 {dimension_numbers = #tpu.dot_dimension_numbers<[1], [0], [0], [1], [0, 0, 1, 1], [], []>} : vector<16x32xf32>, vector<32x32xf32>, vector<16x32xf32> -> vector<16x32xf32>
    %107 = arith.mulf %88, %89 : vector<16x32xf32>
    %cst_96 = arith.constant dense<0.000000e+00> : vector<16x32xf32>
    %108 = tpu.matmul %107, %43, %cst_96 {dimension_numbers = #tpu.dot_dimension_numbers<[1], [0], [0], [1], [0, 0, 1, 1], [], []>} : vector<16x32xf32>, vector<32x32xf32>, vector<16x32xf32> -> vector<16x32xf32>
    %109 = arith.mulf %88, %90 : vector<16x32xf32>
    %cst_97 = arith.constant dense<0.000000e+00> : vector<16x32xf32>
    %110 = tpu.matmul %109, %43, %cst_97 {dimension_numbers = #tpu.dot_dimension_numbers<[1], [0], [0], [1], [0, 0, 1, 1], [], []>} : vector<16x32xf32>, vector<32x32xf32>, vector<16x32xf32> -> vector<16x32xf32>
    %111 = arith.mulf %88, %91 : vector<16x32xf32>
    %cst_98 = arith.constant dense<0.000000e+00> : vector<16x32xf32>
    %112 = tpu.matmul %111, %43, %cst_98 {dimension_numbers = #tpu.dot_dimension_numbers<[1], [0], [0], [1], [0, 0, 1, 1], [], []>} : vector<16x32xf32>, vector<32x32xf32>, vector<16x32xf32> -> vector<16x32xf32>
    %113 = arith.maximumf %96, %98 : vector<16x32xf32>
    %114 = arith.maximumf %113, %100 : vector<16x32xf32>
    %115 = arith.subf %96, %114 : vector<16x32xf32>
    %116 = math.exp %115 : vector<16x32xf32>
    %117 = arith.subf %98, %114 : vector<16x32xf32>
    %118 = math.exp %117 : vector<16x32xf32>
    %119 = arith.subf %100, %114 : vector<16x32xf32>
    %120 = math.exp %119 : vector<16x32xf32>
    %121 = arith.addf %116, %118 : vector<16x32xf32>
    %122 = arith.addf %121, %120 : vector<16x32xf32>
    %123 = tpu.reciprocal %122 {approx = true} : vector<16x32xf32> -> vector<16x32xf32>
    %124 = arith.mulf %116, %123 : vector<16x32xf32>
    %125 = arith.mulf %124, %92 : vector<16x32xf32>
    %126 = arith.mulf %118, %123 : vector<16x32xf32>
    %127 = arith.mulf %126, %93 : vector<16x32xf32>
    %128 = arith.addf %125, %127 : vector<16x32xf32>
    %129 = arith.mulf %120, %123 : vector<16x32xf32>
    %130 = arith.mulf %129, %94 : vector<16x32xf32>
    %131 = arith.addf %128, %130 : vector<16x32xf32>
    %132 = arith.maximumf %102, %104 : vector<16x32xf32>
    %133 = arith.maximumf %132, %106 : vector<16x32xf32>
    %134 = arith.subf %102, %133 : vector<16x32xf32>
    %135 = math.exp %134 : vector<16x32xf32>
    %136 = arith.subf %104, %133 : vector<16x32xf32>
    %137 = math.exp %136 : vector<16x32xf32>
    %138 = arith.subf %106, %133 : vector<16x32xf32>
    %139 = math.exp %138 : vector<16x32xf32>
    %140 = arith.addf %135, %137 : vector<16x32xf32>
    %141 = arith.addf %140, %139 : vector<16x32xf32>
    %142 = tpu.reciprocal %141 {approx = true} : vector<16x32xf32> -> vector<16x32xf32>
    %143 = arith.mulf %135, %142 : vector<16x32xf32>
    %144 = arith.mulf %143, %92 : vector<16x32xf32>
    %145 = arith.mulf %137, %142 : vector<16x32xf32>
    %146 = arith.mulf %145, %93 : vector<16x32xf32>
    %147 = arith.addf %144, %146 : vector<16x32xf32>
    %148 = arith.mulf %139, %142 : vector<16x32xf32>
    %149 = arith.mulf %148, %94 : vector<16x32xf32>
    %150 = arith.addf %147, %149 : vector<16x32xf32>
    %151 = arith.maximumf %108, %110 : vector<16x32xf32>
    %152 = arith.maximumf %151, %112 : vector<16x32xf32>
    %153 = arith.subf %108, %152 : vector<16x32xf32>
    %154 = math.exp %153 : vector<16x32xf32>
    %155 = arith.subf %110, %152 : vector<16x32xf32>
    %156 = math.exp %155 : vector<16x32xf32>
    %157 = arith.subf %112, %152 : vector<16x32xf32>
    %158 = math.exp %157 : vector<16x32xf32>
    %159 = arith.addf %154, %156 : vector<16x32xf32>
    %160 = arith.addf %159, %158 : vector<16x32xf32>
    %161 = tpu.reciprocal %160 {approx = true} : vector<16x32xf32> -> vector<16x32xf32>
    %162 = arith.mulf %154, %161 : vector<16x32xf32>
    %163 = arith.mulf %162, %92 : vector<16x32xf32>
    %164 = arith.mulf %156, %161 : vector<16x32xf32>
    %165 = arith.mulf %164, %93 : vector<16x32xf32>
    %166 = arith.addf %163, %165 : vector<16x32xf32>
    %167 = arith.mulf %158, %161 : vector<16x32xf32>
    %168 = arith.mulf %167, %94 : vector<16x32xf32>
    %169 = arith.addf %166, %168 : vector<16x32xf32>
    %170 = tpu.concatenate %131, %150, %169 in 0 : vector<16x32xf32>, vector<16x32xf32>, vector<16x32xf32> -> vector<48x32xf32>
    %171 = arith.truncf %170 : vector<48x32xf32> to vector<48x32xbf16>
    %cst_99 = arith.constant dense<0.000000e+00> : vector<48x32xf32>
    %172 = tpu.matmul %171, %57, %cst_99 {dimension_numbers = #tpu.dot_dimension_numbers<[1], [0], [0], [1], [0, 0, 1, 1], [], []>} : vector<48x32xbf16>, vector<32x32xbf16>, vector<48x32xf32> -> vector<48x32xf32>
    %173 = vector.broadcast %59 : vector<1x32xf32> to vector<48x32xf32>
    %174 = arith.addf %172, %173 : vector<48x32xf32>
    %175 = arith.addf %42, %174 : vector<48x32xf32>
    %cst_100 = arith.constant dense<0.000000e+00> : vector<48xf32>
    %176 = vector.multi_reduction <add>, %175, %cst_100 [1] : vector<48x32xf32> to vector<48xf32>
    %177 = vector.shape_cast %176 : vector<48xf32> to vector<48x1xf32>
    %cst_101 = arith.constant 3.200000e+01 : f32
    %178 = vector.broadcast %cst_101 : f32 to vector<48x1xf32>
    %179 = arith.divf %177, %178 : vector<48x1xf32>
    %180 = vector.broadcast %179 : vector<48x1xf32> to vector<48x32xf32>
    %181 = arith.subf %175, %180 : vector<48x32xf32>
    %182 = vector.broadcast %179 : vector<48x1xf32> to vector<48x32xf32>
    %183 = arith.subf %175, %182 : vector<48x32xf32>
    %184 = arith.mulf %181, %183 : vector<48x32xf32>
    %cst_102 = arith.constant dense<0.000000e+00> : vector<48xf32>
    %185 = vector.multi_reduction <add>, %184, %cst_102 [1] : vector<48x32xf32> to vector<48xf32>
    %186 = vector.shape_cast %185 : vector<48xf32> to vector<48x1xf32>
    %cst_103 = arith.constant 3.200000e+01 : f32
    %187 = vector.broadcast %cst_103 : f32 to vector<48x1xf32>
    %188 = arith.divf %186, %187 : vector<48x1xf32>
    %189 = vector.broadcast %179 : vector<48x1xf32> to vector<48x32xf32>
    %190 = arith.subf %175, %189 : vector<48x32xf32>
    %cst_104 = arith.constant 9.99999974E-6 : f32
    %191 = vector.broadcast %cst_104 : f32 to vector<48x1xf32>
    %192 = arith.addf %188, %191 : vector<48x1xf32>
    %193 = math.rsqrt %192 : vector<48x1xf32>
    %194 = vector.broadcast %193 : vector<48x1xf32> to vector<48x32xf32>
    %195 = arith.mulf %190, %194 : vector<48x32xf32>
    %196 = vector.broadcast %61 : vector<1x32xf32> to vector<48x32xf32>
    %197 = arith.mulf %195, %196 : vector<48x32xf32>
    %198 = vector.broadcast %63 : vector<1x32xf32> to vector<48x32xf32>
    %199 = arith.addf %197, %198 : vector<48x32xf32>
    %200 = arith.truncf %199 : vector<48x32xf32> to vector<48x32xbf16>
    %cst_105 = arith.constant dense<0.000000e+00> : vector<48x64xf32>
    %201 = tpu.matmul %200, %65, %cst_105 {dimension_numbers = #tpu.dot_dimension_numbers<[1], [0], [0], [1], [0, 0, 1, 1], [], []>} : vector<48x32xbf16>, vector<32x64xbf16>, vector<48x64xf32> -> vector<48x64xf32>
    %202 = vector.broadcast %67 : vector<1x64xf32> to vector<48x64xf32>
    %203 = arith.addf %201, %202 : vector<48x64xf32>
    %204 = arith.mulf %203, %203 : vector<48x64xf32>
    %205 = arith.mulf %203, %204 : vector<48x64xf32>
    %cst_106 = arith.constant 4.471500e-02 : f32
    %206 = vector.broadcast %cst_106 : f32 to vector<48x64xf32>
    %207 = arith.mulf %206, %205 : vector<48x64xf32>
    %208 = arith.addf %203, %207 : vector<48x64xf32>
    %cst_107 = arith.constant 0.797884583 : f32
    %209 = vector.broadcast %cst_107 : f32 to vector<48x64xf32>
    %210 = arith.mulf %209, %208 : vector<48x64xf32>
    %211 = math.tanh %210 : vector<48x64xf32>
    %cst_108 = arith.constant 1.000000e+00 : f32
    %212 = vector.broadcast %cst_108 : f32 to vector<48x64xf32>
    %213 = arith.addf %212, %211 : vector<48x64xf32>
    %cst_109 = arith.constant 5.000000e-01 : f32
    %214 = vector.broadcast %cst_109 : f32 to vector<48x64xf32>
    %215 = arith.mulf %214, %213 : vector<48x64xf32>
    %216 = arith.mulf %203, %215 : vector<48x64xf32>
    %217 = arith.truncf %216 : vector<48x64xf32> to vector<48x64xbf16>
    %cst_110 = arith.constant dense<0.000000e+00> : vector<48x32xf32>
    %218 = tpu.matmul %217, %69, %cst_110 {dimension_numbers = #tpu.dot_dimension_numbers<[1], [0], [0], [1], [0, 0, 1, 1], [], []>} : vector<48x64xbf16>, vector<64x32xbf16>, vector<48x32xf32> -> vector<48x32xf32>
    %219 = vector.broadcast %71 : vector<1x32xf32> to vector<48x32xf32>
    %220 = arith.addf %218, %219 : vector<48x32xf32>
    %221 = arith.addf %199, %220 : vector<48x32xf32>
    %cst_111 = arith.constant dense<0.000000e+00> : vector<48xf32>
    %222 = vector.multi_reduction <add>, %221, %cst_111 [1] : vector<48x32xf32> to vector<48xf32>
    %223 = vector.shape_cast %222 : vector<48xf32> to vector<48x1xf32>
    %cst_112 = arith.constant 3.200000e+01 : f32
    %224 = vector.broadcast %cst_112 : f32 to vector<48x1xf32>
    %225 = arith.divf %223, %224 : vector<48x1xf32>
    %226 = vector.broadcast %225 : vector<48x1xf32> to vector<48x32xf32>
    %227 = arith.subf %221, %226 : vector<48x32xf32>
    %228 = vector.broadcast %225 : vector<48x1xf32> to vector<48x32xf32>
    %229 = arith.subf %221, %228 : vector<48x32xf32>
    %230 = arith.mulf %227, %229 : vector<48x32xf32>
    %cst_113 = arith.constant dense<0.000000e+00> : vector<48xf32>
    %231 = vector.multi_reduction <add>, %230, %cst_113 [1] : vector<48x32xf32> to vector<48xf32>
    %232 = vector.shape_cast %231 : vector<48xf32> to vector<48x1xf32>
    %cst_114 = arith.constant 3.200000e+01 : f32
    %233 = vector.broadcast %cst_114 : f32 to vector<48x1xf32>
    %234 = arith.divf %232, %233 : vector<48x1xf32>
    %235 = vector.broadcast %225 : vector<48x1xf32> to vector<48x32xf32>
    %236 = arith.subf %221, %235 : vector<48x32xf32>
    %cst_115 = arith.constant 9.99999974E-6 : f32
    %237 = vector.broadcast %cst_115 : f32 to vector<48x1xf32>
    %238 = arith.addf %234, %237 : vector<48x1xf32>
    %239 = math.rsqrt %238 : vector<48x1xf32>
    %240 = vector.broadcast %239 : vector<48x1xf32> to vector<48x32xf32>
    %241 = arith.mulf %236, %240 : vector<48x32xf32>
    %242 = vector.broadcast %73 : vector<1x32xf32> to vector<48x32xf32>
    %243 = arith.mulf %241, %242 : vector<48x32xf32>
    %244 = vector.broadcast %75 : vector<1x32xf32> to vector<48x32xf32>
    %245 = arith.addf %243, %244 : vector<48x32xf32>
    %c1 = arith.constant 1 : index
    %c0_116 = arith.constant 0 : index
    %c0_117 = arith.constant 0 : index
    %246 = vector.load %arg17[%c1, %c0_116, %c0_117] : memref<2x32x32xbf16, #tpu.memory_space<vmem>>, vector<1x32x32xbf16>
    %247 = vector.shape_cast %246 : vector<1x32x32xbf16> to vector<32x32xbf16>
    %c1_118 = arith.constant 1 : index
    %c0_119 = arith.constant 0 : index
    %c0_120 = arith.constant 0 : index
    %248 = vector.load %arg18[%c1_118, %c0_119, %c0_120] : memref<2x1x32xf32, #tpu.memory_space<vmem>>, vector<1x1x32xf32>
    %249 = vector.shape_cast %248 : vector<1x1x32xf32> to vector<1x32xf32>
    %c1_121 = arith.constant 1 : index
    %c0_122 = arith.constant 0 : index
    %c0_123 = arith.constant 0 : index
    %250 = vector.load %arg19[%c1_121, %c0_122, %c0_123] : memref<2x32x32xbf16, #tpu.memory_space<vmem>>, vector<1x32x32xbf16>
    %251 = vector.shape_cast %250 : vector<1x32x32xbf16> to vector<32x32xbf16>
    %c1_124 = arith.constant 1 : index
    %c0_125 = arith.constant 0 : index
    %c0_126 = arith.constant 0 : index
    %252 = vector.load %arg20[%c1_124, %c0_125, %c0_126] : memref<2x1x32xf32, #tpu.memory_space<vmem>>, vector<1x1x32xf32>
    %253 = vector.shape_cast %252 : vector<1x1x32xf32> to vector<1x32xf32>
    %c1_127 = arith.constant 1 : index
    %c0_128 = arith.constant 0 : index
    %c0_129 = arith.constant 0 : index
    %254 = vector.load %arg21[%c1_127, %c0_128, %c0_129] : memref<2x32x32xbf16, #tpu.memory_space<vmem>>, vector<1x32x32xbf16>
    %255 = vector.shape_cast %254 : vector<1x32x32xbf16> to vector<32x32xbf16>
    %c1_130 = arith.constant 1 : index
    %c0_131 = arith.constant 0 : index
    %c0_132 = arith.constant 0 : index
    %256 = vector.load %arg22[%c1_130, %c0_131, %c0_132] : memref<2x1x32xf32, #tpu.memory_space<vmem>>, vector<1x1x32xf32>
    %257 = vector.shape_cast %256 : vector<1x1x32xf32> to vector<1x32xf32>
    %c1_133 = arith.constant 1 : index
    %c0_134 = arith.constant 0 : index
    %c0_135 = arith.constant 0 : index
    %258 = vector.load %arg23[%c1_133, %c0_134, %c0_135] : memref<2x32x32xbf16, #tpu.memory_space<vmem>>, vector<1x32x32xbf16>
    %259 = vector.shape_cast %258 : vector<1x32x32xbf16> to vector<32x32xbf16>
    %c1_136 = arith.constant 1 : index
    %c0_137 = arith.constant 0 : index
    %c0_138 = arith.constant 0 : index
    %260 = vector.load %arg24[%c1_136, %c0_137, %c0_138] : memref<2x1x32xf32, #tpu.memory_space<vmem>>, vector<1x1x32xf32>
    %261 = vector.shape_cast %260 : vector<1x1x32xf32> to vector<1x32xf32>
    %c1_139 = arith.constant 1 : index
    %c0_140 = arith.constant 0 : index
    %c0_141 = arith.constant 0 : index
    %262 = vector.load %arg25[%c1_139, %c0_140, %c0_141] : memref<2x1x32xf32, #tpu.memory_space<vmem>>, vector<1x1x32xf32>
    %263 = vector.shape_cast %262 : vector<1x1x32xf32> to vector<1x32xf32>
    %c1_142 = arith.constant 1 : index
    %c0_143 = arith.constant 0 : index
    %c0_144 = arith.constant 0 : index
    %264 = vector.load %arg26[%c1_142, %c0_143, %c0_144] : memref<2x1x32xf32, #tpu.memory_space<vmem>>, vector<1x1x32xf32>
    %265 = vector.shape_cast %264 : vector<1x1x32xf32> to vector<1x32xf32>
    %c1_145 = arith.constant 1 : index
    %c0_146 = arith.constant 0 : index
    %c0_147 = arith.constant 0 : index
    %266 = vector.load %arg27[%c1_145, %c0_146, %c0_147] : memref<2x32x64xbf16, #tpu.memory_space<vmem>>, vector<1x32x64xbf16>
    %267 = vector.shape_cast %266 : vector<1x32x64xbf16> to vector<32x64xbf16>
    %c1_148 = arith.constant 1 : index
    %c0_149 = arith.constant 0 : index
    %c0_150 = arith.constant 0 : index
    %268 = vector.load %arg28[%c1_148, %c0_149, %c0_150] : memref<2x1x64xf32, #tpu.memory_space<vmem>>, vector<1x1x64xf32>
    %269 = vector.shape_cast %268 : vector<1x1x64xf32> to vector<1x64xf32>
    %c1_151 = arith.constant 1 : index
    %c0_152 = arith.constant 0 : index
    %c0_153 = arith.constant 0 : index
    %270 = vector.load %arg29[%c1_151, %c0_152, %c0_153] : memref<2x64x32xbf16, #tpu.memory_space<vmem>>, vector<1x64x32xbf16>
    %271 = vector.shape_cast %270 : vector<1x64x32xbf16> to vector<64x32xbf16>
    %c1_154 = arith.constant 1 : index
    %c0_155 = arith.constant 0 : index
    %c0_156 = arith.constant 0 : index
    %272 = vector.load %arg30[%c1_154, %c0_155, %c0_156] : memref<2x1x32xf32, #tpu.memory_space<vmem>>, vector<1x1x32xf32>
    %273 = vector.shape_cast %272 : vector<1x1x32xf32> to vector<1x32xf32>
    %c1_157 = arith.constant 1 : index
    %c0_158 = arith.constant 0 : index
    %c0_159 = arith.constant 0 : index
    %274 = vector.load %arg31[%c1_157, %c0_158, %c0_159] : memref<2x1x32xf32, #tpu.memory_space<vmem>>, vector<1x1x32xf32>
    %275 = vector.shape_cast %274 : vector<1x1x32xf32> to vector<1x32xf32>
    %c1_160 = arith.constant 1 : index
    %c0_161 = arith.constant 0 : index
    %c0_162 = arith.constant 0 : index
    %276 = vector.load %arg32[%c1_160, %c0_161, %c0_162] : memref<2x1x32xf32, #tpu.memory_space<vmem>>, vector<1x1x32xf32>
    %277 = vector.shape_cast %276 : vector<1x1x32xf32> to vector<1x32xf32>
    %278 = arith.truncf %245 : vector<48x32xf32> to vector<48x32xbf16>
    %cst_163 = arith.constant dense<0.000000e+00> : vector<48x32xf32>
    %279 = tpu.matmul %278, %247, %cst_163 {dimension_numbers = #tpu.dot_dimension_numbers<[1], [0], [0], [1], [0, 0, 1, 1], [], []>} : vector<48x32xbf16>, vector<32x32xbf16>, vector<48x32xf32> -> vector<48x32xf32>
    %280 = vector.broadcast %249 : vector<1x32xf32> to vector<48x32xf32>
    %281 = arith.addf %279, %280 : vector<48x32xf32>
    %cst_164 = arith.constant dense<0.000000e+00> : vector<48x32xf32>
    %282 = tpu.matmul %278, %251, %cst_164 {dimension_numbers = #tpu.dot_dimension_numbers<[1], [0], [0], [1], [0, 0, 1, 1], [], []>} : vector<48x32xbf16>, vector<32x32xbf16>, vector<48x32xf32> -> vector<48x32xf32>
    %283 = vector.broadcast %253 : vector<1x32xf32> to vector<48x32xf32>
    %284 = arith.addf %282, %283 : vector<48x32xf32>
    %cst_165 = arith.constant dense<0.000000e+00> : vector<48x32xf32>
    %285 = tpu.matmul %278, %255, %cst_165 {dimension_numbers = #tpu.dot_dimension_numbers<[1], [0], [0], [1], [0, 0, 1, 1], [], []>} : vector<48x32xbf16>, vector<32x32xbf16>, vector<48x32xf32> -> vector<48x32xf32>
    %286 = vector.broadcast %257 : vector<1x32xf32> to vector<48x32xf32>
    %287 = arith.addf %285, %286 : vector<48x32xf32>
    %288 = vector.extract_strided_slice %281 {offsets = [0, 0], sizes = [16, 32], strides = [1, 1]} : vector<48x32xf32> to vector<16x32xf32>
    %289 = vector.extract_strided_slice %281 {offsets = [16, 0], sizes = [16, 32], strides = [1, 1]} : vector<48x32xf32> to vector<16x32xf32>
    %290 = vector.extract_strided_slice %281 {offsets = [32, 0], sizes = [16, 32], strides = [1, 1]} : vector<48x32xf32> to vector<16x32xf32>
    %291 = vector.extract_strided_slice %284 {offsets = [0, 0], sizes = [16, 32], strides = [1, 1]} : vector<48x32xf32> to vector<16x32xf32>
    %292 = vector.extract_strided_slice %284 {offsets = [16, 0], sizes = [16, 32], strides = [1, 1]} : vector<48x32xf32> to vector<16x32xf32>
    %293 = vector.extract_strided_slice %284 {offsets = [32, 0], sizes = [16, 32], strides = [1, 1]} : vector<48x32xf32> to vector<16x32xf32>
    %294 = vector.extract_strided_slice %287 {offsets = [0, 0], sizes = [16, 32], strides = [1, 1]} : vector<48x32xf32> to vector<16x32xf32>
    %295 = vector.extract_strided_slice %287 {offsets = [16, 0], sizes = [16, 32], strides = [1, 1]} : vector<48x32xf32> to vector<16x32xf32>
    %296 = vector.extract_strided_slice %287 {offsets = [32, 0], sizes = [16, 32], strides = [1, 1]} : vector<48x32xf32> to vector<16x32xf32>
    %297 = arith.mulf %288, %291 : vector<16x32xf32>
    %cst_166 = arith.constant dense<0.000000e+00> : vector<16x32xf32>
    %298 = tpu.matmul %297, %43, %cst_166 {dimension_numbers = #tpu.dot_dimension_numbers<[1], [0], [0], [1], [0, 0, 1, 1], [], []>} : vector<16x32xf32>, vector<32x32xf32>, vector<16x32xf32> -> vector<16x32xf32>
    %299 = arith.mulf %288, %292 : vector<16x32xf32>
    %cst_167 = arith.constant dense<0.000000e+00> : vector<16x32xf32>
    %300 = tpu.matmul %299, %43, %cst_167 {dimension_numbers = #tpu.dot_dimension_numbers<[1], [0], [0], [1], [0, 0, 1, 1], [], []>} : vector<16x32xf32>, vector<32x32xf32>, vector<16x32xf32> -> vector<16x32xf32>
    %301 = arith.mulf %288, %293 : vector<16x32xf32>
    %cst_168 = arith.constant dense<0.000000e+00> : vector<16x32xf32>
    %302 = tpu.matmul %301, %43, %cst_168 {dimension_numbers = #tpu.dot_dimension_numbers<[1], [0], [0], [1], [0, 0, 1, 1], [], []>} : vector<16x32xf32>, vector<32x32xf32>, vector<16x32xf32> -> vector<16x32xf32>
    %303 = arith.mulf %289, %291 : vector<16x32xf32>
    %cst_169 = arith.constant dense<0.000000e+00> : vector<16x32xf32>
    %304 = tpu.matmul %303, %43, %cst_169 {dimension_numbers = #tpu.dot_dimension_numbers<[1], [0], [0], [1], [0, 0, 1, 1], [], []>} : vector<16x32xf32>, vector<32x32xf32>, vector<16x32xf32> -> vector<16x32xf32>
    %305 = arith.mulf %289, %292 : vector<16x32xf32>
    %cst_170 = arith.constant dense<0.000000e+00> : vector<16x32xf32>
    %306 = tpu.matmul %305, %43, %cst_170 {dimension_numbers = #tpu.dot_dimension_numbers<[1], [0], [0], [1], [0, 0, 1, 1], [], []>} : vector<16x32xf32>, vector<32x32xf32>, vector<16x32xf32> -> vector<16x32xf32>
    %307 = arith.mulf %289, %293 : vector<16x32xf32>
    %cst_171 = arith.constant dense<0.000000e+00> : vector<16x32xf32>
    %308 = tpu.matmul %307, %43, %cst_171 {dimension_numbers = #tpu.dot_dimension_numbers<[1], [0], [0], [1], [0, 0, 1, 1], [], []>} : vector<16x32xf32>, vector<32x32xf32>, vector<16x32xf32> -> vector<16x32xf32>
    %309 = arith.mulf %290, %291 : vector<16x32xf32>
    %cst_172 = arith.constant dense<0.000000e+00> : vector<16x32xf32>
    %310 = tpu.matmul %309, %43, %cst_172 {dimension_numbers = #tpu.dot_dimension_numbers<[1], [0], [0], [1], [0, 0, 1, 1], [], []>} : vector<16x32xf32>, vector<32x32xf32>, vector<16x32xf32> -> vector<16x32xf32>
    %311 = arith.mulf %290, %292 : vector<16x32xf32>
    %cst_173 = arith.constant dense<0.000000e+00> : vector<16x32xf32>
    %312 = tpu.matmul %311, %43, %cst_173 {dimension_numbers = #tpu.dot_dimension_numbers<[1], [0], [0], [1], [0, 0, 1, 1], [], []>} : vector<16x32xf32>, vector<32x32xf32>, vector<16x32xf32> -> vector<16x32xf32>
    %313 = arith.mulf %290, %293 : vector<16x32xf32>
    %cst_174 = arith.constant dense<0.000000e+00> : vector<16x32xf32>
    %314 = tpu.matmul %313, %43, %cst_174 {dimension_numbers = #tpu.dot_dimension_numbers<[1], [0], [0], [1], [0, 0, 1, 1], [], []>} : vector<16x32xf32>, vector<32x32xf32>, vector<16x32xf32> -> vector<16x32xf32>
    %315 = arith.maximumf %298, %300 : vector<16x32xf32>
    %316 = arith.maximumf %315, %302 : vector<16x32xf32>
    %317 = arith.subf %298, %316 : vector<16x32xf32>
    %318 = math.exp %317 : vector<16x32xf32>
    %319 = arith.subf %300, %316 : vector<16x32xf32>
    %320 = math.exp %319 : vector<16x32xf32>
    %321 = arith.subf %302, %316 : vector<16x32xf32>
    %322 = math.exp %321 : vector<16x32xf32>
    %323 = arith.addf %318, %320 : vector<16x32xf32>
    %324 = arith.addf %323, %322 : vector<16x32xf32>
    %325 = tpu.reciprocal %324 {approx = true} : vector<16x32xf32> -> vector<16x32xf32>
    %326 = arith.mulf %318, %325 : vector<16x32xf32>
    %327 = arith.mulf %326, %294 : vector<16x32xf32>
    %328 = arith.mulf %320, %325 : vector<16x32xf32>
    %329 = arith.mulf %328, %295 : vector<16x32xf32>
    %330 = arith.addf %327, %329 : vector<16x32xf32>
    %331 = arith.mulf %322, %325 : vector<16x32xf32>
    %332 = arith.mulf %331, %296 : vector<16x32xf32>
    %333 = arith.addf %330, %332 : vector<16x32xf32>
    %334 = arith.maximumf %304, %306 : vector<16x32xf32>
    %335 = arith.maximumf %334, %308 : vector<16x32xf32>
    %336 = arith.subf %304, %335 : vector<16x32xf32>
    %337 = math.exp %336 : vector<16x32xf32>
    %338 = arith.subf %306, %335 : vector<16x32xf32>
    %339 = math.exp %338 : vector<16x32xf32>
    %340 = arith.subf %308, %335 : vector<16x32xf32>
    %341 = math.exp %340 : vector<16x32xf32>
    %342 = arith.addf %337, %339 : vector<16x32xf32>
    %343 = arith.addf %342, %341 : vector<16x32xf32>
    %344 = tpu.reciprocal %343 {approx = true} : vector<16x32xf32> -> vector<16x32xf32>
    %345 = arith.mulf %337, %344 : vector<16x32xf32>
    %346 = arith.mulf %345, %294 : vector<16x32xf32>
    %347 = arith.mulf %339, %344 : vector<16x32xf32>
    %348 = arith.mulf %347, %295 : vector<16x32xf32>
    %349 = arith.addf %346, %348 : vector<16x32xf32>
    %350 = arith.mulf %341, %344 : vector<16x32xf32>
    %351 = arith.mulf %350, %296 : vector<16x32xf32>
    %352 = arith.addf %349, %351 : vector<16x32xf32>
    %353 = arith.maximumf %310, %312 : vector<16x32xf32>
    %354 = arith.maximumf %353, %314 : vector<16x32xf32>
    %355 = arith.subf %310, %354 : vector<16x32xf32>
    %356 = math.exp %355 : vector<16x32xf32>
    %357 = arith.subf %312, %354 : vector<16x32xf32>
    %358 = math.exp %357 : vector<16x32xf32>
    %359 = arith.subf %314, %354 : vector<16x32xf32>
    %360 = math.exp %359 : vector<16x32xf32>
    %361 = arith.addf %356, %358 : vector<16x32xf32>
    %362 = arith.addf %361, %360 : vector<16x32xf32>
    %363 = tpu.reciprocal %362 {approx = true} : vector<16x32xf32> -> vector<16x32xf32>
    %364 = arith.mulf %356, %363 : vector<16x32xf32>
    %365 = arith.mulf %364, %294 : vector<16x32xf32>
    %366 = arith.mulf %358, %363 : vector<16x32xf32>
    %367 = arith.mulf %366, %295 : vector<16x32xf32>
    %368 = arith.addf %365, %367 : vector<16x32xf32>
    %369 = arith.mulf %360, %363 : vector<16x32xf32>
    %370 = arith.mulf %369, %296 : vector<16x32xf32>
    %371 = arith.addf %368, %370 : vector<16x32xf32>
    %372 = tpu.concatenate %333, %352, %371 in 0 : vector<16x32xf32>, vector<16x32xf32>, vector<16x32xf32> -> vector<48x32xf32>
    %373 = arith.truncf %372 : vector<48x32xf32> to vector<48x32xbf16>
    %cst_175 = arith.constant dense<0.000000e+00> : vector<48x32xf32>
    %374 = tpu.matmul %373, %259, %cst_175 {dimension_numbers = #tpu.dot_dimension_numbers<[1], [0], [0], [1], [0, 0, 1, 1], [], []>} : vector<48x32xbf16>, vector<32x32xbf16>, vector<48x32xf32> -> vector<48x32xf32>
    %375 = vector.broadcast %261 : vector<1x32xf32> to vector<48x32xf32>
    %376 = arith.addf %374, %375 : vector<48x32xf32>
    %377 = arith.addf %245, %376 : vector<48x32xf32>
    %cst_176 = arith.constant dense<0.000000e+00> : vector<48xf32>
    %378 = vector.multi_reduction <add>, %377, %cst_176 [1] : vector<48x32xf32> to vector<48xf32>
    %379 = vector.shape_cast %378 : vector<48xf32> to vector<48x1xf32>
    %cst_177 = arith.constant 3.200000e+01 : f32
    %380 = vector.broadcast %cst_177 : f32 to vector<48x1xf32>
    %381 = arith.divf %379, %380 : vector<48x1xf32>
    %382 = vector.broadcast %381 : vector<48x1xf32> to vector<48x32xf32>
    %383 = arith.subf %377, %382 : vector<48x32xf32>
    %384 = vector.broadcast %381 : vector<48x1xf32> to vector<48x32xf32>
    %385 = arith.subf %377, %384 : vector<48x32xf32>
    %386 = arith.mulf %383, %385 : vector<48x32xf32>
    %cst_178 = arith.constant dense<0.000000e+00> : vector<48xf32>
    %387 = vector.multi_reduction <add>, %386, %cst_178 [1] : vector<48x32xf32> to vector<48xf32>
    %388 = vector.shape_cast %387 : vector<48xf32> to vector<48x1xf32>
    %cst_179 = arith.constant 3.200000e+01 : f32
    %389 = vector.broadcast %cst_179 : f32 to vector<48x1xf32>
    %390 = arith.divf %388, %389 : vector<48x1xf32>
    %391 = vector.broadcast %381 : vector<48x1xf32> to vector<48x32xf32>
    %392 = arith.subf %377, %391 : vector<48x32xf32>
    %cst_180 = arith.constant 9.99999974E-6 : f32
    %393 = vector.broadcast %cst_180 : f32 to vector<48x1xf32>
    %394 = arith.addf %390, %393 : vector<48x1xf32>
    %395 = math.rsqrt %394 : vector<48x1xf32>
    %396 = vector.broadcast %395 : vector<48x1xf32> to vector<48x32xf32>
    %397 = arith.mulf %392, %396 : vector<48x32xf32>
    %398 = vector.broadcast %263 : vector<1x32xf32> to vector<48x32xf32>
    %399 = arith.mulf %397, %398 : vector<48x32xf32>
    %400 = vector.broadcast %265 : vector<1x32xf32> to vector<48x32xf32>
    %401 = arith.addf %399, %400 : vector<48x32xf32>
    %402 = arith.truncf %401 : vector<48x32xf32> to vector<48x32xbf16>
    %cst_181 = arith.constant dense<0.000000e+00> : vector<48x64xf32>
    %403 = tpu.matmul %402, %267, %cst_181 {dimension_numbers = #tpu.dot_dimension_numbers<[1], [0], [0], [1], [0, 0, 1, 1], [], []>} : vector<48x32xbf16>, vector<32x64xbf16>, vector<48x64xf32> -> vector<48x64xf32>
    %404 = vector.broadcast %269 : vector<1x64xf32> to vector<48x64xf32>
    %405 = arith.addf %403, %404 : vector<48x64xf32>
    %406 = arith.mulf %405, %405 : vector<48x64xf32>
    %407 = arith.mulf %405, %406 : vector<48x64xf32>
    %cst_182 = arith.constant 4.471500e-02 : f32
    %408 = vector.broadcast %cst_182 : f32 to vector<48x64xf32>
    %409 = arith.mulf %408, %407 : vector<48x64xf32>
    %410 = arith.addf %405, %409 : vector<48x64xf32>
    %cst_183 = arith.constant 0.797884583 : f32
    %411 = vector.broadcast %cst_183 : f32 to vector<48x64xf32>
    %412 = arith.mulf %411, %410 : vector<48x64xf32>
    %413 = math.tanh %412 : vector<48x64xf32>
    %cst_184 = arith.constant 1.000000e+00 : f32
    %414 = vector.broadcast %cst_184 : f32 to vector<48x64xf32>
    %415 = arith.addf %414, %413 : vector<48x64xf32>
    %cst_185 = arith.constant 5.000000e-01 : f32
    %416 = vector.broadcast %cst_185 : f32 to vector<48x64xf32>
    %417 = arith.mulf %416, %415 : vector<48x64xf32>
    %418 = arith.mulf %405, %417 : vector<48x64xf32>
    %419 = arith.truncf %418 : vector<48x64xf32> to vector<48x64xbf16>
    %cst_186 = arith.constant dense<0.000000e+00> : vector<48x32xf32>
    %420 = tpu.matmul %419, %271, %cst_186 {dimension_numbers = #tpu.dot_dimension_numbers<[1], [0], [0], [1], [0, 0, 1, 1], [], []>} : vector<48x64xbf16>, vector<64x32xbf16>, vector<48x32xf32> -> vector<48x32xf32>
    %421 = vector.broadcast %273 : vector<1x32xf32> to vector<48x32xf32>
    %422 = arith.addf %420, %421 : vector<48x32xf32>
    %423 = arith.addf %401, %422 : vector<48x32xf32>
    %cst_187 = arith.constant dense<0.000000e+00> : vector<48xf32>
    %424 = vector.multi_reduction <add>, %423, %cst_187 [1] : vector<48x32xf32> to vector<48xf32>
    %425 = vector.shape_cast %424 : vector<48xf32> to vector<48x1xf32>
    %cst_188 = arith.constant 3.200000e+01 : f32
    %426 = vector.broadcast %cst_188 : f32 to vector<48x1xf32>
    %427 = arith.divf %425, %426 : vector<48x1xf32>
    %428 = vector.broadcast %427 : vector<48x1xf32> to vector<48x32xf32>
    %429 = arith.subf %423, %428 : vector<48x32xf32>
    %430 = vector.broadcast %427 : vector<48x1xf32> to vector<48x32xf32>
    %431 = arith.subf %423, %430 : vector<48x32xf32>
    %432 = arith.mulf %429, %431 : vector<48x32xf32>
    %cst_189 = arith.constant dense<0.000000e+00> : vector<48xf32>
    %433 = vector.multi_reduction <add>, %432, %cst_189 [1] : vector<48x32xf32> to vector<48xf32>
    %434 = vector.shape_cast %433 : vector<48xf32> to vector<48x1xf32>
    %cst_190 = arith.constant 3.200000e+01 : f32
    %435 = vector.broadcast %cst_190 : f32 to vector<48x1xf32>
    %436 = arith.divf %434, %435 : vector<48x1xf32>
    %437 = vector.broadcast %427 : vector<48x1xf32> to vector<48x32xf32>
    %438 = arith.subf %423, %437 : vector<48x32xf32>
    %cst_191 = arith.constant 9.99999974E-6 : f32
    %439 = vector.broadcast %cst_191 : f32 to vector<48x1xf32>
    %440 = arith.addf %436, %439 : vector<48x1xf32>
    %441 = math.rsqrt %440 : vector<48x1xf32>
    %442 = vector.broadcast %441 : vector<48x1xf32> to vector<48x32xf32>
    %443 = arith.mulf %438, %442 : vector<48x32xf32>
    %444 = vector.broadcast %275 : vector<1x32xf32> to vector<48x32xf32>
    %445 = arith.mulf %443, %444 : vector<48x32xf32>
    %446 = vector.broadcast %277 : vector<1x32xf32> to vector<48x32xf32>
    %447 = arith.addf %445, %446 : vector<48x32xf32>
    %448 = vector.extract_strided_slice %447 {offsets = [0, 0], sizes = [16, 32], strides = [1, 1]} : vector<48x32xf32> to vector<16x32xf32>
    %449 = vector.extract_strided_slice %447 {offsets = [16, 0], sizes = [16, 32], strides = [1, 1]} : vector<48x32xf32> to vector<16x32xf32>
    %450 = arith.addf %448, %449 : vector<16x32xf32>
    %451 = vector.extract_strided_slice %447 {offsets = [32, 0], sizes = [16, 32], strides = [1, 1]} : vector<48x32xf32> to vector<16x32xf32>
    %452 = arith.addf %450, %451 : vector<16x32xf32>
    %cst_192 = arith.constant 0.333333343 : f32
    %453 = vector.broadcast %cst_192 : f32 to vector<16x32xf32>
    %454 = arith.mulf %452, %453 : vector<16x32xf32>
    %c0_193 = arith.constant 0 : index
    %c0_194 = arith.constant 0 : index
    %455 = vector.load %arg33[%c0_193, %c0_194] : memref<16x32xf32, #tpu.memory_space<vmem>>, vector<16x32xf32>
    tpu.vector_store %arg33[%c0_193, %c0_194], %454 {strides = array<i32>} : memref<16x32xf32, #tpu.memory_space<vmem>>, vector<16x32xf32>,
    return
  }
  func.func @transform_0(%arg0: i32) -> (i32, i32) {
    %c0_i32 = arith.constant 0 : i32
    %c0_i32_0 = arith.constant 0 : i32
    return %arg0, %c0_i32 : i32, i32
  }
  func.func @transform_1(%arg0: i32) -> (i32, i32) {
    %c0_i32 = arith.constant 0 : i32
    %c0_i32_0 = arith.constant 0 : i32
    return %arg0, %c0_i32 : i32, i32
  }
  func.func @transform_2(%arg0: i32) -> (i32, i32) {
    %c0_i32 = arith.constant 0 : i32
    %c0_i32_0 = arith.constant 0 : i32
    return %arg0, %c0_i32 : i32, i32
  }
  func.func @transform_3(%arg0: i32) -> (i32, i32) {
    %c0_i32 = arith.constant 0 : i32
    %c0_i32_0 = arith.constant 0 : i32
    %c0_i32_1 = arith.constant 0 : i32
    return %c0_i32, %c0_i32_0 : i32, i32
  }
  func.func @transform_4(%arg0: i32) -> (i32, i32) {
    %c0_i32 = arith.constant 0 : i32
    %c0_i32_0 = arith.constant 0 : i32
    %c0_i32_1 = arith.constant 0 : i32
    return %c0_i32, %c0_i32_0 : i32, i32
  }
  func.func @transform_5(%arg0: i32) -> (i32, i32) {
    %c0_i32 = arith.constant 0 : i32
    %c0_i32_0 = arith.constant 0 : i32
    %c0_i32_1 = arith.constant 0 : i32
    return %c0_i32, %c0_i32_0 : i32, i32
  }
  func.func @transform_6(%arg0: i32) -> (i32, i32) {
    %c0_i32 = arith.constant 0 : i32
    %c0_i32_0 = arith.constant 0 : i32
    %c0_i32_1 = arith.constant 0 : i32
    return %c0_i32, %c0_i32_0 : i32, i32
  }
  func.func @transform_7(%arg0: i32) -> (i32, i32) {
    %c0_i32 = arith.constant 0 : i32
    %c0_i32_0 = arith.constant 0 : i32
    %c0_i32_1 = arith.constant 0 : i32
    return %c0_i32, %c0_i32_0 : i32, i32
  }
  func.func @transform_8(%arg0: i32) -> (i32, i32) {
    %c0_i32 = arith.constant 0 : i32
    %c0_i32_0 = arith.constant 0 : i32
    %c0_i32_1 = arith.constant 0 : i32
    return %c0_i32, %c0_i32_0 : i32, i32
  }
  func.func @transform_9(%arg0: i32) -> (i32, i32) {
    %c0_i32 = arith.constant 0 : i32
    %c0_i32_0 = arith.constant 0 : i32
    %c0_i32_1 = arith.constant 0 : i32
    return %c0_i32, %c0_i32_0 : i32, i32
  }
  func.func @transform_10(%arg0: i32) -> (i32, i32) {
    %c0_i32 = arith.constant 0 : i32
    %c0_i32_0 = arith.constant 0 : i32
    %c0_i32_1 = arith.constant 0 : i32
    return %c0_i32, %c0_i32_0 : i32, i32
  }
  func.func @transform_11(%arg0: i32) -> (i32, i32) {
    %c0_i32 = arith.constant 0 : i32
    %c0_i32_0 = arith.constant 0 : i32
    %c0_i32_1 = arith.constant 0 : i32
    return %c0_i32, %c0_i32_0 : i32, i32
  }
  func.func @transform_12(%arg0: i32) -> (i32, i32) {
    %c0_i32 = arith.constant 0 : i32
    %c0_i32_0 = arith.constant 0 : i32
    %c0_i32_1 = arith.constant 0 : i32
    return %c0_i32, %c0_i32_0 : i32, i32
  }
  func.func @transform_13(%arg0: i32) -> (i32, i32) {
    %c0_i32 = arith.constant 0 : i32
    %c0_i32_0 = arith.constant 0 : i32
    %c0_i32_1 = arith.constant 0 : i32
    return %c0_i32, %c0_i32_0 : i32, i32
  }
  func.func @transform_14(%arg0: i32) -> (i32, i32) {
    %c0_i32 = arith.constant 0 : i32
    %c0_i32_0 = arith.constant 0 : i32
    %c0_i32_1 = arith.constant 0 : i32
    return %c0_i32, %c0_i32_0 : i32, i32
  }
  func.func @transform_15(%arg0: i32) -> (i32, i32) {
    %c0_i32 = arith.constant 0 : i32
    %c0_i32_0 = arith.constant 0 : i32
    %c0_i32_1 = arith.constant 0 : i32
    return %c0_i32, %c0_i32_0 : i32, i32
  }
  func.func @transform_16(%arg0: i32) -> (i32, i32, i32) {
    %c0_i32 = arith.constant 0 : i32
    %c0_i32_0 = arith.constant 0 : i32
    %c0_i32_1 = arith.constant 0 : i32
    %c0_i32_2 = arith.constant 0 : i32
    return %c0_i32, %c0_i32_0, %c0_i32_1 : i32, i32, i32
  }
  func.func @transform_17(%arg0: i32) -> (i32, i32, i32) {
    %c0_i32 = arith.constant 0 : i32
    %c0_i32_0 = arith.constant 0 : i32
    %c0_i32_1 = arith.constant 0 : i32
    %c0_i32_2 = arith.constant 0 : i32
    return %c0_i32, %c0_i32_0, %c0_i32_1 : i32, i32, i32
  }
  func.func @transform_18(%arg0: i32) -> (i32, i32, i32) {
    %c0_i32 = arith.constant 0 : i32
    %c0_i32_0 = arith.constant 0 : i32
    %c0_i32_1 = arith.constant 0 : i32
    %c0_i32_2 = arith.constant 0 : i32
    return %c0_i32, %c0_i32_0, %c0_i32_1 : i32, i32, i32
  }
  func.func @transform_19(%arg0: i32) -> (i32, i32, i32) {
    %c0_i32 = arith.constant 0 : i32
    %c0_i32_0 = arith.constant 0 : i32
    %c0_i32_1 = arith.constant 0 : i32
    %c0_i32_2 = arith.constant 0 : i32
    return %c0_i32, %c0_i32_0, %c0_i32_1 : i32, i32, i32
  }
  func.func @transform_20(%arg0: i32) -> (i32, i32, i32) {
    %c0_i32 = arith.constant 0 : i32
    %c0_i32_0 = arith.constant 0 : i32
    %c0_i32_1 = arith.constant 0 : i32
    %c0_i32_2 = arith.constant 0 : i32
    return %c0_i32, %c0_i32_0, %c0_i32_1 : i32, i32, i32
  }
  func.func @transform_21(%arg0: i32) -> (i32, i32, i32) {
    %c0_i32 = arith.constant 0 : i32
    %c0_i32_0 = arith.constant 0 : i32
    %c0_i32_1 = arith.constant 0 : i32
    %c0_i32_2 = arith.constant 0 : i32
    return %c0_i32, %c0_i32_0, %c0_i32_1 : i32, i32, i32
  }
  func.func @transform_22(%arg0: i32) -> (i32, i32, i32) {
    %c0_i32 = arith.constant 0 : i32
    %c0_i32_0 = arith.constant 0 : i32
    %c0_i32_1 = arith.constant 0 : i32
    %c0_i32_2 = arith.constant 0 : i32
    return %c0_i32, %c0_i32_0, %c0_i32_1 : i32, i32, i32
  }
  func.func @transform_23(%arg0: i32) -> (i32, i32, i32) {
    %c0_i32 = arith.constant 0 : i32
    %c0_i32_0 = arith.constant 0 : i32
    %c0_i32_1 = arith.constant 0 : i32
    %c0_i32_2 = arith.constant 0 : i32
    return %c0_i32, %c0_i32_0, %c0_i32_1 : i32, i32, i32
  }
  func.func @transform_24(%arg0: i32) -> (i32, i32, i32) {
    %c0_i32 = arith.constant 0 : i32
    %c0_i32_0 = arith.constant 0 : i32
    %c0_i32_1 = arith.constant 0 : i32
    %c0_i32_2 = arith.constant 0 : i32
    return %c0_i32, %c0_i32_0, %c0_i32_1 : i32, i32, i32
  }
  func.func @transform_25(%arg0: i32) -> (i32, i32, i32) {
    %c0_i32 = arith.constant 0 : i32
    %c0_i32_0 = arith.constant 0 : i32
    %c0_i32_1 = arith.constant 0 : i32
    %c0_i32_2 = arith.constant 0 : i32
    return %c0_i32, %c0_i32_0, %c0_i32_1 : i32, i32, i32
  }
  func.func @transform_26(%arg0: i32) -> (i32, i32, i32) {
    %c0_i32 = arith.constant 0 : i32
    %c0_i32_0 = arith.constant 0 : i32
    %c0_i32_1 = arith.constant 0 : i32
    %c0_i32_2 = arith.constant 0 : i32
    return %c0_i32, %c0_i32_0, %c0_i32_1 : i32, i32, i32
  }
  func.func @transform_27(%arg0: i32) -> (i32, i32, i32) {
    %c0_i32 = arith.constant 0 : i32
    %c0_i32_0 = arith.constant 0 : i32
    %c0_i32_1 = arith.constant 0 : i32
    %c0_i32_2 = arith.constant 0 : i32
    return %c0_i32, %c0_i32_0, %c0_i32_1 : i32, i32, i32
  }
  func.func @transform_28(%arg0: i32) -> (i32, i32, i32) {
    %c0_i32 = arith.constant 0 : i32
    %c0_i32_0 = arith.constant 0 : i32
    %c0_i32_1 = arith.constant 0 : i32
    %c0_i32_2 = arith.constant 0 : i32
    return %c0_i32, %c0_i32_0, %c0_i32_1 : i32, i32, i32
  }
  func.func @transform_29(%arg0: i32) -> (i32, i32, i32) {
    %c0_i32 = arith.constant 0 : i32
    %c0_i32_0 = arith.constant 0 : i32
    %c0_i32_1 = arith.constant 0 : i32
    %c0_i32_2 = arith.constant 0 : i32
    return %c0_i32, %c0_i32_0, %c0_i32_1 : i32, i32, i32
  }
  func.func @transform_30(%arg0: i32) -> (i32, i32, i32) {
    %c0_i32 = arith.constant 0 : i32
    %c0_i32_0 = arith.constant 0 : i32
    %c0_i32_1 = arith.constant 0 : i32
    %c0_i32_2 = arith.constant 0 : i32
    return %c0_i32, %c0_i32_0, %c0_i32_1 : i32, i32, i32
  }
  func.func @transform_31(%arg0: i32) -> (i32, i32, i32) {
    %c0_i32 = arith.constant 0 : i32
    %c0_i32_0 = arith.constant 0 : i32
    %c0_i32_1 = arith.constant 0 : i32
    %c0_i32_2 = arith.constant 0 : i32
    return %c0_i32, %c0_i32_0, %c0_i32_1 : i32, i32, i32
  }
  func.func @transform_32(%arg0: i32) -> (i32, i32) {
    %c0_i32 = arith.constant 0 : i32
    %c0_i32_0 = arith.constant 0 : i32
    return %arg0, %c0_i32 : i32, i32
  }
}

</mosaic_0001>

<bundles_post_ra>
// kernel: tpu_custom_call.1
= control target key start
LH: loop header
LB: loop body
LE: loop exit
PB: predicated region body
PF: predicated region fallthrough
CT: control target
= control target key end

     0   :  { %s4201_s6 = smov 1   ;;  %s4202_s10 = smov 2   ;;  %s5343_s0 = inlined_call_operand.smem [shape: u32[33], index: -1, kind: input, shape index: {}] }
   0x1   :  { %s4273_s5 = sld [smem:[%s5343_s0]]   ;;  %s4203_s14 = smov 3  }
   0x2   :  { %s4278_s9 = sld [smem:[%s5343_s0 + %s4201_s6]]   ;;  %s4204_s18 = smov 4  }
   0x3   :  { %s4283_s13 = sld [smem:[%s5343_s0 + %s4202_s10]]   ;;  %s4205_s22 = smov 5  }
   0x4   :  { %s4288_s17 = sld [smem:[%s5343_s0 + %s4203_s14]]   ;;  %s4206_s26 = smov 6  }
   0x5   :  { %s4293_s21 = sld [smem:[%s5343_s0 + %s4204_s18]]   ;;  %s4207_s30 = smov 7  }
   0x6   :  { %s4298_s25 = sld [smem:[%s5343_s0 + %s4205_s22]]   ;;  %s4208_s4 = smov 8  }
   0x7   :  { %s4303_s29 = sld [smem:[%s5343_s0 + %s4206_s26]]   ;;  %s4209_s10 = smov 9  }
   0x8   :  { %s4308_s3 = sld [smem:[%s5343_s0 + %s4207_s30]]   ;;  %s4210_s15 = smov 10  }
   0x9   :  { %5357 = sst [smem:[#allocation55_spill]] %s4283_s13  ;;  %s4211_s20 = smov 11  }
   0xa   :  { %s4313_s8 = sld [smem:[%s5343_s0 + %s4208_s4]]   ;;  %s4212_s26 = smov 12  }
   0xb   :  { %s4318_s14 = sld [smem:[%s5343_s0 + %s4209_s10]]   ;;  %s4213_s1 = smov 13  }
   0xc   :  { %s4323_s19 = sld [smem:[%s5343_s0 + %s4210_s15]]   ;;  %s4214_s7 = smov 14  }
   0xd   :  { %s4328_s24 = sld [smem:[%s5343_s0 + %s4211_s20]]   ;;  %s4215_s15 = smov 15  }
   0xe   :  { %5358 = sst [smem:[#allocation56_spill]] %s4308_s3  ;;  %s4216_s22 = smov 16  }
   0xf   :  { %s4333_s30 = sld [smem:[%s5343_s0 + %s4212_s26]]   ;;  %s4217_s28 = smov 17  }
  0x10   :  { %s4338_s6 = sld [smem:[%s5343_s0 + %s4213_s1]]  }
  0x11   :  { %5359 = sst [smem:[#allocation57_spill]] %s4318_s14 }
  0x12   :  { %s4343_s12 = sld [smem:[%s5343_s0 + %s4214_s7]]   ;;  %s4218_s7 = smov 18  }
  0x13   :  { %5360 = sst [smem:[#allocation58_spill]] %s4328_s24 }
  0x14   :  { %s4348_s20 = sld [smem:[%s5343_s0 + %s4215_s15]]   ;;  %s4219_s15 = smov 19  }
  0x15   :  { %5361 = sst [smem:[#allocation59_spill]] %s4333_s30 }
  0x16   :  { %s4353_s27 = sld [smem:[%s5343_s0 + %s4216_s22]]   ;;  %s4220_s22 = smov 20  }
  0x17   :  { %s4358_s4 = sld [smem:[%s5343_s0 + %s4217_s28]]   ;;  %s4221_s28 = smov 21  }
  0x18   :  { %5362 = sst [smem:[#allocation60_spill]] %s4343_s12 }
  0x19   :  { %s4363_s13 = sld [smem:[%s5343_s0 + %s4218_s7]]   ;;  %s4222_s7 = smov 22  }
  0x1a   :  { %5363 = sst [smem:[#allocation61_spill]] %s4348_s20 }
  0x1b   :  { %s4368_s20 = sld [smem:[%s5343_s0 + %s4219_s15]]   ;;  %s4223_s15 = smov 23  }
  0x1c   :  { %5364 = sst [smem:[#allocation62_spill]] %s4353_s27 }
  0x1d   :  { %5365 = sst [smem:[#allocation63_spill]] %s4358_s4 }
  0x1e   :  { %s4373_s27 = sld [smem:[%s5343_s0 + %s4220_s22]]   ;;  %s4224_s22 = smov 24  }
  0x1f   :  { %5366 = sst [smem:[#allocation64_spill]] %s4363_s13 }
  0x20   :  { %s4378_s4 = sld [smem:[%s5343_s0 + %s4221_s28]]   ;;  %s4225_s28 = smov 25  }
  0x21   :  { %s4383_s13 = sld [smem:[%s5343_s0 + %s4222_s7]]   ;;  %s4226_s7 = smov 26  }
  0x22   :  { %s4388_s24 = sld [smem:[%s5343_s0 + %s4223_s15]]   ;;  %s4227_s15 = smov 27  }
  0x23   :  { %s4398_s12 = sld [smem:[%s5343_s0 + %s4225_s28]]   ;;  %s4229_s28 = smov 29  }
  0x24   :  { %5367 = sst [smem:[#allocation65_spill]] %s4373_s27 }
  0x25   :  { %s4393_s27 = sld [smem:[%s5343_s0 + %s4224_s22]]   ;;  %s4228_s22 = smov 28  }
  0x26   :  { %s4408_s30 = sld [smem:[%s5343_s0 + %s4227_s15]]   ;;  %s4231_s15 = smov 31  }
  0x27   :  { %5368 = sst [smem:[#allocation66_spill]] %s4383_s13 }
  0x28   :  { %s4403_s13 = sld [smem:[%s5343_s0 + %s4226_s7]]   ;;  %s4230_s7 = smov 30  }
  0x29   :  { %s4418_s14 = sld [smem:[%s5343_s0 + %s4229_s28]]  }
  0x2a   :  { %s4428_s3 = sld [smem:[%s5343_s0 + %s4231_s15]]  }
  0x2b   :  { %5369 = sst [smem:[#allocation67_spill]] %s4393_s27 }
  0x2c   :  { %s4413_s27 = sld [smem:[%s5343_s0 + %s4228_s22]]   ;;  %s4232_s22 = smov 32  }
  0x2e   :  { %5370 = sst [smem:[#allocation68_spill]] %s4403_s13 }
  0x2f   :  { %s4423_s13 = sld [smem:[%s5343_s0 + %s4230_s7]]  }
  0x32   :  { %5371 = sst [smem:[#allocation69_spill]] %s4413_s27 }
  0x33   :  { %s4433_s27 = sld [smem:[%s5343_s0 + %s4232_s22]]  }
  0x34   :  { %70 = vsyncpa [#allocation3], 0 }
  0x35   :  { %71 = vsyncpa [#allocation6], 0 }
  0x36   :  { %72 = vsyncpa [#allocation9], 0 }
  0x37   :  { %73 = vsyncpa [#allocation12], 0 }
  0x38   :  { %74 = vsyncpa [#allocation15], 0 }
  0x39   :  { %75 = vsyncpa [#allocation18], 0 }
  0x3a   :  { %76 = vsyncpa [#allocation21], 0 }
  0x3b   :  { %77 = vsyncpa [#allocation24], 0 }
  0x3c   :  { %78 = vsyncpa [#allocation27], 0 }
  0x3d   :  { %79 = vsyncpa [#allocation30], 0 }
  0x3e   :  { %80 = vsyncpa [#allocation33], 0 }
  0x3f   :  { %81 = vsyncpa [#allocation36], 0 }
  0x40   :  { %82 = vsyncpa [#allocation39], 0 }
  0x41   :  { %83 = vsyncpa [#allocation4], 0  ;;  %s101_s0 = sshll.u32 %s4278_s9, 4  ;;  %s4233_s28 = smov [#allocation5]   ;;  %s102_s0 = int_to_ptr.hbm [resolvable:$true] %s101_s0 }
  0x42   :  { %s103_s1 = sshll.u32 %s4233_s28, 4  ;;  %s130_s2 = sshll.u32 %s4293_s21, 4  ;;  %s104_s1 = int_to_ptr.vmem [resolvable:$true] %s103_s1  ;;  %s131_s2 = int_to_ptr.hbm [resolvable:$true] %s130_s2 }
  0x43   :  { %s3573_s7 = sshra.s32 %s102_s0, 4  ;;  %s3577_s11 = scalar_lea.hbm %s4278_s9, 8  ;;  %s3574_s7 = int_to_ptr.hbm [resolvable:$true] %s3573_s7 }
  0x44   :  { %s3575_s10 = scalar_lea.hbm %s3574_s7, 8  ;;  %p3578_p1 = scmp.lt.s32.totalorder %s3574_s7, %s4278_s9 }
  0x45   :  { %p3576_p0 = scmp.ne.s32.totalorder %s3574_s7, %s3575_s10  ;;  %p3579_p2 = scmp.lt.s32.totalorder %s3577_s11, %s3575_s10 }
  0x47   :  { %p3580_p3 = por %p3579_p2, %p3578_p1 }
  0x49   :  { %p3581_p4 = pnand %p3580_p3, %p3576_p0 }
  0x4b   :  { %3584 = shalt.err (!%p3581_p4)
}
  0x4c   :  { %s4234_s15 = smov 64   ;;  %s4235_s16 = smov 4  }
  0x4d   :  { %109 = dma.hbm_to_vmem [thread:$0]  %s102_s0, 128, %s104_s1, [#allocation6], %s4234_s15, %s4234_s15, %s4235_s16  }
  0x4e   :  { %s4236_s18 = smov [#allocation8]   ;;  %s154_s23 = sshll.u32 %s4303_s29, 4  ;;  %s155_s23 = int_to_ptr.hbm [resolvable:$true] %s154_s23 }
  0x4f   :  { %s132_s22 = sshll.u32 %s4236_s18, 4  ;;  %s3597_s9 = sshra.s32 %s131_s2, 4  ;;  %s133_s22 = int_to_ptr.vmem [resolvable:$true] %s132_s22  ;;  %s3598_s9 = int_to_ptr.hbm [resolvable:$true] %s3597_s9 }
  0x50   :  { %s3599_s26 = scalar_lea.hbm %s3598_s9, 1  ;;  %s3601_s28 = scalar_lea.hbm %s4293_s21, 1 }
  0x51   :  { %p3600_p5 = scmp.ne.s32.totalorder %s3598_s9, %s3599_s26  ;;  %p3602_p6 = scmp.lt.s32.totalorder %s3598_s9, %s4293_s21 }
  0x52   :  { %p3603_p7 = scmp.lt.s32.totalorder %s3601_s28, %s3599_s26 }
  0x54   :  { %p3604_p8 = por %p3603_p7, %p3602_p6 }
  0x56   :  { %p3605_p9 = pnand %p3604_p8, %p3600_p5 }
  0x58   :  { %3608 = shalt.err (!%p3605_p9)
}
  0x59   :  { %135 = dma.hbm_to_vmem [thread:$0]  %s131_s2, 16, %s133_s22, [#allocation9]  }
  0x5a   :  { %s178_s0 = sshll.u32 %s4313_s8, 4  ;;  %s4237_s1 = smov [#allocation11]   ;;  %s179_s0 = int_to_ptr.hbm [resolvable:$true] %s178_s0 }
  0x5b   :  { %s156_s7 = sshll.u32 %s4237_s1, 4  ;;  %s3621_s10 = sshra.s32 %s155_s23, 4  ;;  %s157_s7 = int_to_ptr.vmem [resolvable:$true] %s156_s7  ;;  %s3622_s10 = int_to_ptr.hbm [resolvable:$true] %s3621_s10 }
  0x5c   :  { %s3623_s11 = scalar_lea.hbm %s3622_s10, 1  ;;  %s3625_s18 = scalar_lea.hbm %s4303_s29, 1 }
  0x5d   :  { %p3624_p10 = scmp.ne.s32.totalorder %s3622_s10, %s3623_s11  ;;  %p3626_p11 = scmp.lt.s32.totalorder %s3622_s10, %s4303_s29 }
  0x5e   :  { %p3627_p12 = scmp.lt.s32.totalorder %s3625_s18, %s3623_s11 }
  0x60   :  { %p3628_p13 = por %p3627_p12, %p3626_p11 }
  0x62   :  { %p3629_p0 = pnand %p3628_p13, %p3624_p10 }
  0x64   :  { %3632 = shalt.err (!%p3629_p0)
}
  0x65   :  { %159 = dma.hbm_to_vmem [thread:$0]  %s155_s23, 16, %s157_s7, [#allocation12]  }
  0x66   :  { %s4238_s21 = smov [#allocation14]   ;;  %s202_s22 = sshll.u32 %s4323_s19, 4  ;;  %s203_s22 = int_to_ptr.hbm [resolvable:$true] %s202_s22 }
  0x67   :  { %s180_s2 = sshll.u32 %s4238_s21, 4  ;;  %s3645_s9 = sshra.s32 %s179_s0, 4  ;;  %s181_s2 = int_to_ptr.vmem [resolvable:$true] %s180_s2  ;;  %s3646_s9 = int_to_ptr.hbm [resolvable:$true] %s3645_s9 }
  0x68   :  { %s3647_s26 = scalar_lea.hbm %s3646_s9, 1  ;;  %s3649_s28 = scalar_lea.hbm %s4313_s8, 1 }
  0x69   :  { %p3648_p1 = scmp.ne.s32.totalorder %s3646_s9, %s3647_s26  ;;  %p3650_p2 = scmp.lt.s32.totalorder %s3646_s9, %s4313_s8 }
  0x6a   :  { %p3651_p3 = scmp.lt.s32.totalorder %s3649_s28, %s3647_s26 }
  0x6c   :  { %p3652_p4 = por %p3651_p3, %p3650_p2 }
  0x6e   :  { %p3653_p5 = pnand %p3652_p4, %p3648_p1 }
  0x70   :  { %3656 = shalt.err (!%p3653_p5)
}
  0x71   :  { %183 = dma.hbm_to_vmem [thread:$0]  %s179_s0, 16, %s181_s2, [#allocation15]  }
  0x72   :  { %s226_s29 = sshll.u32 %s4338_s6, 4  ;;  %s4239_s23 = smov [#allocation17]   ;;  %s227_s29 = int_to_ptr.hbm [resolvable:$true] %s226_s29 }
  0x73   :  { %s204_s1 = sshll.u32 %s4239_s23, 4  ;;  %s3669_s7 = sshra.s32 %s203_s22, 4  ;;  %s205_s1 = int_to_ptr.vmem [resolvable:$true] %s204_s1  ;;  %s3670_s7 = int_to_ptr.hbm [resolvable:$true] %s3669_s7 }
  0x74   :  { %s3671_s10 = scalar_lea.hbm %s3670_s7, 1  ;;  %s3673_s11 = scalar_lea.hbm %s4323_s19, 1 }
  0x75   :  { %p3672_p6 = scmp.ne.s32.totalorder %s3670_s7, %s3671_s10  ;;  %p3674_p7 = scmp.lt.s32.totalorder %s3670_s7, %s4323_s19 }
  0x76   :  { %p3675_p8 = scmp.lt.s32.totalorder %s3673_s11, %s3671_s10 }
  0x78   :  { %p3676_p9 = por %p3675_p8, %p3674_p7 }
  0x7a   :  { %p3677_p10 = pnand %p3676_p9, %p3672_p6 }
  0x7c   :  { %3680 = shalt.err (!%p3677_p10)
}
  0x7d   :  { %207 = dma.hbm_to_vmem [thread:$0]  %s203_s22, 16, %s205_s1, [#allocation18]  }
  0x7e   :  { %s4240_s8 = smov [#allocation20]   ;;  %s255_s18 = sshll.u32 %s4368_s20, 4  ;;  %s4455_s18 = int_to_ptr.hbm [resolvable:$true] %s255_s18 }
  0x7f   :  { %s228_s0 = sshll.u32 %s4240_s8, 4  ;;  %s3693_s21 = sshra.s32 %s227_s29, 4  ;;  %s229_s0 = int_to_ptr.vmem [resolvable:$true] %s228_s0  ;;  %s3694_s21 = int_to_ptr.hbm [resolvable:$true] %s3693_s21 }
  0x80   :  { %s3695_s2 = scalar_lea.hbm %s3694_s21, 4  ;;  %s3697_s9 = scalar_lea.hbm %s4338_s6, 4 }
  0x81   :  { %p3696_p11 = scmp.ne.s32.totalorder %s3694_s21, %s3695_s2  ;;  %p3698_p12 = scmp.lt.s32.totalorder %s3694_s21, %s4338_s6 }
  0x82   :  { %p3699_p13 = scmp.lt.s32.totalorder %s3697_s9, %s3695_s2 }
  0x84   :  { %p3700_p0 = por %p3699_p13, %p3698_p12 }
  0x86   :  { %p3701_p1 = pnand %p3700_p0, %p3696_p11 }
  0x88   :  { %3704 = shalt.err (!%p3701_p1)
}
  0x89   :  { %231 = dma.hbm_to_vmem [thread:$0]  %s227_s29, 64, %s229_s0, [#allocation21]  }
  0x8a   :  { %s4241_s19 = smov [#allocation23]   ;;  %s281_s26 = sshll.u32 %s4378_s4, 4  ;;  %s282_s26 = int_to_ptr.hbm [resolvable:$true] %s281_s26 }
  0x8b   :  { %s257_s22 = sshll.u32 %s4241_s19, 4  ;;  %s3717_s28 = sshra.s32 %s4455_s18, 4  ;;  %s258_s22 = int_to_ptr.vmem [resolvable:$true] %s257_s22  ;;  %s3718_s28 = int_to_ptr.hbm [resolvable:$true] %s3717_s28 }
  0x8c   :  { %s3719_s23 = scalar_lea.hbm %s3718_s28, 2  ;;  %s3721_s1 = scalar_lea.hbm %s4368_s20, 2 }
  0x8d   :  { %p3720_p2 = scmp.ne.s32.totalorder %s3718_s28, %s3719_s23  ;;  %p3722_p3 = scmp.lt.s32.totalorder %s3718_s28, %s4368_s20 }
  0x8e   :  { %p3723_p4 = scmp.lt.s32.totalorder %s3721_s1, %s3719_s23 }
  0x90   :  { %p3724_p5 = por %p3723_p4, %p3722_p3 }
  0x92   :  { %p3725_p6 = pnand %p3724_p5, %p3720_p2 }
  0x94   :  { %3728 = shalt.err (!%p3725_p6)
}
  0x95   :  { %s4242_s6 = smov 16   ;;  %s4243_s29 = smov 1  }
  0x96   :  { %263 = dma.hbm_to_vmem [thread:$0]  %s4455_s18, 32, %s258_s22, [#allocation24], %s4242_s6, %s4242_s6, %s4243_s29  }
  0x97   :  { %s4244_s7 = smov [#allocation26]   ;;  %s307_s11 = sshll.u32 %s4388_s24, 4  ;;  %s4468_s11 = int_to_ptr.hbm [resolvable:$true] %s307_s11 }
  0x98   :  { %s283_s10 = sshll.u32 %s4244_s7, 4  ;;  %s3741_s20 = sshra.s32 %s282_s26, 4  ;;  %s284_s10 = int_to_ptr.vmem [resolvable:$true] %s283_s10  ;;  %s3742_s20 = int_to_ptr.hbm [resolvable:$true] %s3741_s20 }
  0x99   :  { %s3743_s8 = scalar_lea.hbm %s3742_s20, 2  ;;  %s3745_s0 = scalar_lea.hbm %s4378_s4, 2 }
  0x9a   :  { %p3744_p7 = scmp.ne.s32.totalorder %s3742_s20, %s3743_s8  ;;  %p3746_p8 = scmp.lt.s32.totalorder %s3742_s20, %s4378_s4 }
  0x9b   :  { %p3747_p9 = scmp.lt.s32.totalorder %s3745_s0, %s3743_s8 }
  0x9d   :  { %p3748_p10 = por %p3747_p9, %p3746_p8 }
  0x9f   :  { %p3749_p11 = pnand %p3748_p10, %p3744_p7 }
  0xa1   :  { %3752 = shalt.err (!%p3749_p11)
}
  0xa2   :  { %289 = dma.hbm_to_vmem [thread:$0]  %s282_s26, 32, %s284_s10, [#allocation27], %s4242_s6, %s4242_s6, %s4243_s29  }
  0xa3   :  { %s333_s18 = sshll.u32 %s4398_s12, 4  ;;  %s4245_s21 = smov [#allocation29]   ;;  %s4476_s18 = int_to_ptr.hbm [resolvable:$true] %s333_s18 }
  0xa4   :  { %s309_s2 = sshll.u32 %s4245_s21, 4  ;;  %s3765_s9 = sshra.s32 %s4468_s11, 4  ;;  %s310_s2 = int_to_ptr.vmem [resolvable:$true] %s309_s2  ;;  %s3766_s9 = int_to_ptr.hbm [resolvable:$true] %s3765_s9 }
  0xa5   :  { %s3767_s4 = scalar_lea.hbm %s3766_s9, 2  ;;  %s3769_s19 = scalar_lea.hbm %s4388_s24, 2 }
  0xa6   :  { %p3768_p12 = scmp.ne.s32.totalorder %s3766_s9, %s3767_s4  ;;  %p3770_p13 = scmp.lt.s32.totalorder %s3766_s9, %s4388_s24 }
  0xa7   :  { %p3771_p0 = scmp.lt.s32.totalorder %s3769_s19, %s3767_s4 }
  0xa9   :  { %p3772_p1 = por %p3771_p0, %p3770_p13 }
  0xab   :  { %p3773_p2 = pnand %p3772_p1, %p3768_p12 }
  0xad   :  { %3776 = shalt.err (!%p3773_p2)
}
  0xae   :  { %315 = dma.hbm_to_vmem [thread:$0]  %s4468_s11, 32, %s310_s2, [#allocation30], %s4242_s6, %s4242_s6, %s4243_s29  }
  0xaf   :  { %s4246_s22 = smov [#allocation32]   ;;  %s359_s28 = sshll.u32 %s4408_s30, 4  ;;  %s4486_s28 = int_to_ptr.hbm [resolvable:$true] %s359_s28 }
  0xb0   :  { %s335_s26 = sshll.u32 %s4246_s22, 4  ;;  %s3789_s24 = sshra.s32 %s4476_s18, 4  ;;  %s336_s26 = int_to_ptr.vmem [resolvable:$true] %s335_s26  ;;  %s3790_s24 = int_to_ptr.hbm [resolvable:$true] %s3789_s24 }
  0xb1   :  { %s3791_s23 = scalar_lea.hbm %s3790_s24, 2  ;;  %s3793_s1 = scalar_lea.hbm %s4398_s12, 2 }
  0xb2   :  { %p3792_p3 = scmp.ne.s32.totalorder %s3790_s24, %s3791_s23  ;;  %p3794_p4 = scmp.lt.s32.totalorder %s3790_s24, %s4398_s12 }
  0xb3   :  { %p3795_p5 = scmp.lt.s32.totalorder %s3793_s1, %s3791_s23 }
  0xb5   :  { %p3796_p6 = por %p3795_p5, %p3794_p4 }
  0xb7   :  { %p3797_p7 = pnand %p3796_p6, %p3792_p3 }
  0xb9   :  { %3800 = shalt.err (!%p3797_p7)
}
  0xba   :  { %341 = dma.hbm_to_vmem [thread:$0]  %s4476_s18, 32, %s336_s26, [#allocation33], %s4242_s6, %s4242_s6, %s4243_s29  }
  0xbb   :  { %s88_s7 = sshll.u32 %s4273_s5, 4  ;;  %s4247_s10 = smov [#allocation35]   ;;  %s4496_s7 = int_to_ptr.hbm [resolvable:$true] %s88_s7 }
  0xbc   :  { %s361_s11 = sshll.u32 %s4247_s10, 4  ;;  %s3813_s12 = sshra.s32 %s4486_s28, 4  ;;  %s362_s11 = int_to_ptr.vmem [resolvable:$true] %s361_s11  ;;  %s3814_s12 = int_to_ptr.hbm [resolvable:$true] %s3813_s12 }
  0xbd   :  { %s3815_s20 = scalar_lea.hbm %s3814_s12, 2  ;;  %s3817_s8 = scalar_lea.hbm %s4408_s30, 2 }
  0xbe   :  { %p3816_p8 = scmp.ne.s32.totalorder %s3814_s12, %s3815_s20  ;;  %p3818_p9 = scmp.lt.s32.totalorder %s3814_s12, %s4408_s30 }
  0xbf   :  { %p3819_p10 = scmp.lt.s32.totalorder %s3817_s8, %s3815_s20 }
  0xc1   :  { %p3820_p11 = por %p3819_p10, %p3818_p9 }
  0xc3   :  { %p3821_p12 = pnand %p3820_p11, %p3816_p8 }
  0xc5   :  { %3824 = shalt.err (!%p3821_p12)
}
  0xc6   :  { %367 = dma.hbm_to_vmem [thread:$0]  %s4486_s28, 32, %s362_s11, [#allocation36], %s4242_s6, %s4242_s6, %s4243_s29  }
  0xc7   :  { %s4248_s0 = smov [#allocation2]   ;;  %s116_s21 = sshll.u32 %s4288_s17, 4  ;;  %s4506_s21 = int_to_ptr.hbm [resolvable:$true] %s116_s21 }
  0xc8   :  { %s90_s18 = sshll.u32 %s4248_s0, 4  ;;  %s3837_s30 = sshra.s32 %s4496_s7, 4  ;;  %s91_s18 = int_to_ptr.vmem [resolvable:$true] %s90_s18  ;;  %s3838_s30 = int_to_ptr.hbm [resolvable:$true] %s3837_s30 }
  0xc9   :  { %s3839_s2 = scalar_lea.hbm %s3838_s30, 8  ;;  %s3841_s9 = scalar_lea.hbm %s4273_s5, 8 }
  0xca   :  { %p3840_p13 = scmp.ne.s32.totalorder %s3838_s30, %s3839_s2  ;;  %p3842_p0 = scmp.lt.s32.totalorder %s3838_s30, %s4273_s5 }
  0xcb   :  { %p3843_p1 = scmp.lt.s32.totalorder %s3841_s9, %s3839_s2 }
  0xcd   :  { %p3844_p2 = por %p3843_p1, %p3842_p0 }
  0xcf   :  { %p3845_p3 = pnand %p3844_p2, %p3840_p13 }
  0xd1   :  { %3848 = shalt.err (!%p3845_p3)
}
  0xd2   :  { %96 = dma.hbm_to_vmem [thread:$0]  %s4496_s7, 128, %s91_s18, [#allocation3], %s4234_s15, %s4234_s15, %s4235_s16  }
  0xd3   :  { %s140_s4 = sshll.u32 %s4298_s25, 4  ;;  %s4249_s19 = smov [#allocation7]   ;;  %s4516_s4 = int_to_ptr.hbm [resolvable:$true] %s140_s4 }
  0xd4   :  { %s118_s22 = sshll.u32 %s4249_s19, 4  ;;  %s3861_s5 = sshra.s32 %s4506_s21, 4  ;;  %s119_s22 = int_to_ptr.vmem [resolvable:$true] %s118_s22  ;;  %s3862_s5 = int_to_ptr.hbm [resolvable:$true] %s3861_s5 }
  0xd5   :  { %s3863_s26 = scalar_lea.hbm %s3862_s5, 8  ;;  %s3865_s28 = scalar_lea.hbm %s4288_s17, 8 }
  0xd6   :  { %p3864_p4 = scmp.ne.s32.totalorder %s3862_s5, %s3863_s26  ;;  %p3866_p5 = scmp.lt.s32.totalorder %s3862_s5, %s4288_s17 }
  0xd7   :  { %p3867_p6 = scmp.lt.s32.totalorder %s3865_s28, %s3863_s26 }
  0xd9   :  { %p3868_p7 = por %p3867_p6, %p3866_p5 }
  0xdb   :  { %p3869_p8 = pnand %p3868_p7, %p3864_p4 }
  0xdd   :  { %3872 = shalt.err (!%p3869_p8)
}
  0xde   :  { %s5372_s24 = sld [smem:[#allocation56_spill]]  ;;  %s4250_s23 = smov [#allocation10]  }
  0xdf   :  { %124 = dma.hbm_to_vmem [thread:$0]  %s4506_s21, 128, %s119_s22, [#allocation6], %s4234_s15, %s4234_s15, %s4235_s16  }
  0xe0   :  { %s142_s1 = sshll.u32 %s4250_s23, 4  ;;  %s3885_s17 = sshra.s32 %s4516_s4, 4  ;;  %s143_s1 = int_to_ptr.vmem [resolvable:$true] %s142_s1  ;;  %s3886_s17 = int_to_ptr.hbm [resolvable:$true] %s3885_s17 }
  0xe1   :  { %s3887_s10 = scalar_lea.hbm %s3886_s17, 8  ;;  %s3889_s11 = scalar_lea.hbm %s4298_s25, 8 }
  0xe2   :  { %p3888_p9 = scmp.ne.s32.totalorder %s3886_s17, %s3887_s10  ;;  %p3890_p10 = scmp.lt.s32.totalorder %s3886_s17, %s4298_s25 }
  0xe3   :  { %p3891_p11 = scmp.lt.s32.totalorder %s3889_s11, %s3887_s10 }
  0xe4   :  { %s164_s7 = sshll.u32 %s5372_s24, 4  ;;  %s4526_s7 = int_to_ptr.hbm [resolvable:$true] %s164_s7 }
  0xe5   :  { %p3892_p12 = por %p3891_p11, %p3890_p10 }
  0xe7   :  { %p3893_p13 = pnand %p3892_p12, %p3888_p9 }
  0xe9   :  { %3896 = shalt.err (!%p3893_p13)
}
  0xea   :  { %s5373_s12 = sld [smem:[#allocation57_spill]]  ;;  %s4251_s8 = smov [#allocation13]  }
  0xeb   :  { %148 = dma.hbm_to_vmem [thread:$0]  %s4516_s4, 128, %s143_s1, [#allocation9], %s4234_s15, %s4234_s15, %s4235_s16  }
  0xec   :  { %s166_s0 = sshll.u32 %s4251_s8, 4  ;;  %s3909_s25 = sshra.s32 %s4526_s7, 4  ;;  %s167_s0 = int_to_ptr.vmem [resolvable:$true] %s166_s0  ;;  %s3910_s25 = int_to_ptr.hbm [resolvable:$true] %s3909_s25 }
  0xed   :  { %s3911_s18 = scalar_lea.hbm %s3910_s25, 16  ;;  %s3913_s21 = scalar_lea.hbm %s5372_s24, 16 }
  0xee   :  { %p3912_p0 = scmp.ne.s32.totalorder %s3910_s25, %s3911_s18  ;;  %p3914_p1 = scmp.lt.s32.totalorder %s3910_s25, %s5372_s24 }
  0xef   :  { %p3915_p2 = scmp.lt.s32.totalorder %s3913_s21, %s3911_s18 }
  0xf0   :  { %s188_s20 = sshll.u32 %s5373_s12, 4  ;;  %s4536_s20 = int_to_ptr.hbm [resolvable:$true] %s188_s20 }
  0xf1   :  { %p3916_p3 = por %p3915_p2, %p3914_p1 }
  0xf3   :  { %p3917_p4 = pnand %p3916_p3, %p3912_p0 }
  0xf5   :  { %3920 = shalt.err (!%p3917_p4)
}
  0xf6   :  { %s5374_s30 = sld [smem:[#allocation59_spill]]  ;;  %s4252_s2 = smov [#allocation16]  }
  0xf7   :  { %172 = dma.hbm_to_vmem [thread:$0]  %s4526_s7, 256, %s167_s0, [#allocation12], %s4234_s15, %s4234_s15, %s4235_s16  }
  0xf8   :  { %s190_s9 = sshll.u32 %s4252_s2, 4  ;;  %s3933_s19 = sshra.s32 %s4536_s20, 4  ;;  %s191_s9 = int_to_ptr.vmem [resolvable:$true] %s190_s9  ;;  %s3934_s19 = int_to_ptr.hbm [resolvable:$true] %s3933_s19 }
  0xf9   :  { %s3935_s22 = scalar_lea.hbm %s3934_s19, 16  ;;  %s3937_s5 = scalar_lea.hbm %s5373_s12, 16 }
  0xfa   :  { %p3936_p5 = scmp.ne.s32.totalorder %s3934_s19, %s3935_s22  ;;  %p3938_p6 = scmp.lt.s32.totalorder %s3934_s19, %s5373_s12 }
  0xfb   :  { %p3939_p7 = scmp.lt.s32.totalorder %s3937_s5, %s3935_s22 }
  0xfc   :  { %s215_s4 = sshll.u32 %s5374_s30, 4  ;;  %s216_s4 = int_to_ptr.hbm [resolvable:$true] %s215_s4 }
  0xfd   :  { %p3940_p8 = por %p3939_p7, %p3938_p6 }
  0xff   :  { %p3941_p9 = pnand %p3940_p8, %p3936_p5 }
 0x101   :  { %3944 = shalt.err (!%p3941_p9)
}
 0x102   :  { %s5375_s26 = sld [smem:[#allocation60_spill]]  ;;  %s4253_s24 = smov [#allocation19]  }
 0x103   :  { %196 = dma.hbm_to_vmem [thread:$0]  %s4536_s20, 256, %s191_s9, [#allocation15], %s4234_s15, %s4234_s15, %s4235_s16  }
 0x104   :  { %s217_s23 = sshll.u32 %s4253_s24, 4  ;;  %s3957_s1 = sshra.s32 %s216_s4, 4  ;;  %s218_s23 = int_to_ptr.vmem [resolvable:$true] %s217_s23  ;;  %s3958_s1 = int_to_ptr.hbm [resolvable:$true] %s3957_s1 }
 0x105   :  { %s3959_s7 = scalar_lea.hbm %s3958_s1, 1  ;;  %s3961_s17 = scalar_lea.hbm %s5374_s30, 1 }
 0x106   :  { %p3960_p10 = scmp.ne.s32.totalorder %s3958_s1, %s3959_s7  ;;  %p3962_p11 = scmp.lt.s32.totalorder %s3958_s1, %s5374_s30 }
 0x107   :  { %p3963_p12 = scmp.lt.s32.totalorder %s3961_s17, %s3959_s7 }
 0x108   :  { %s237_s28 = sshll.u32 %s5375_s26, 4  ;;  %s238_s28 = int_to_ptr.hbm [resolvable:$true] %s237_s28 }
 0x109   :  { %p3964_p13 = por %p3963_p12, %p3962_p11 }
 0x10b   :  { %p3965_p0 = pnand %p3964_p13, %p3960_p10 }
 0x10d   :  { %3968 = shalt.err (!%p3965_p0)
}
 0x10e   :  { %220 = dma.hbm_to_vmem [thread:$0]  %s216_s4, 16, %s218_s23, [#allocation18]  }
 0x10f   :  { %s5376_s10 = sld [smem:[#allocation65_spill]]  ;;  %s4254_s11 = smov [#allocation22]  }
 0x110   :  { %s239_s12 = sshll.u32 %s4254_s11, 4  ;;  %s3981_s8 = sshra.s32 %s238_s28, 4  ;;  %s240_s12 = int_to_ptr.vmem [resolvable:$true] %s239_s12  ;;  %s3982_s8 = int_to_ptr.hbm [resolvable:$true] %s3981_s8 }
 0x111   :  { %s3983_s0 = scalar_lea.hbm %s3982_s8, 1  ;;  %s3985_s25 = scalar_lea.hbm %s5375_s26, 1 }
 0x112   :  { %p3984_p1 = scmp.ne.s32.totalorder %s3982_s8, %s3983_s0  ;;  %p3986_p2 = scmp.lt.s32.totalorder %s3982_s8, %s5375_s26 }
 0x113   :  { %p3987_p3 = scmp.lt.s32.totalorder %s3985_s25, %s3983_s0 }
 0x115   :  { %s268_s20 = sshll.u32 %s5376_s10, 4  ;;  %p3988_p4 = por %p3987_p3, %p3986_p2  ;;  %s4557_s20 = int_to_ptr.hbm [resolvable:$true] %s268_s20 }
 0x117   :  { %p3989_p5 = pnand %p3988_p4, %p3984_p1 }
 0x119   :  { %3992 = shalt.err (!%p3989_p5)
}
 0x11a   :  { %242 = dma.hbm_to_vmem [thread:$0]  %s238_s28, 16, %s240_s12, [#allocation21]  }
 0x11b   :  { %s5377_s18 = sld [smem:[#allocation66_spill]]  ;;  %s4255_s30 = smov [#allocation25]  }
 0x11c   :  { %s270_s2 = sshll.u32 %s4255_s30, 4  ;;  %s4005_s9 = sshra.s32 %s4557_s20, 4  ;;  %s271_s2 = int_to_ptr.vmem [resolvable:$true] %s270_s2  ;;  %s4006_s9 = int_to_ptr.hbm [resolvable:$true] %s4005_s9 }
 0x11d   :  { %s4007_s4 = scalar_lea.hbm %s4006_s9, 32  ;;  %s4009_s19 = scalar_lea.hbm %s5376_s10, 32 }
 0x11e   :  { %p4008_p6 = scmp.ne.s32.totalorder %s4006_s9, %s4007_s4  ;;  %p4010_p7 = scmp.lt.s32.totalorder %s4006_s9, %s5376_s10 }
 0x11f   :  { %p4011_p8 = scmp.lt.s32.totalorder %s4009_s19, %s4007_s4 }
 0x121   :  { %s294_s21 = sshll.u32 %s5377_s18, 4  ;;  %p4012_p9 = por %p4011_p8, %p4010_p7  ;;  %s4562_s21 = int_to_ptr.hbm [resolvable:$true] %s294_s21 }
 0x123   :  { %p4013_p10 = pnand %p4012_p9, %p4008_p6 }
 0x125   :  { %4016 = shalt.err (!%p4013_p10)
}
 0x126   :  { %s5378_s22 = sld [smem:[#allocation67_spill]]  ;;  %s4256_s5 = smov [#allocation28]  }
 0x127   :  { %276 = dma.hbm_to_vmem [thread:$0]  %s4557_s20, 512, %s271_s2, [#allocation24], %s4234_s15, %s4234_s15, %s4235_s16  }
 0x128   :  { %s296_s26 = sshll.u32 %s4256_s5, 4  ;;  %s4029_s24 = sshra.s32 %s4562_s21, 4  ;;  %s297_s26 = int_to_ptr.vmem [resolvable:$true] %s296_s26  ;;  %s4030_s24 = int_to_ptr.hbm [resolvable:$true] %s4029_s24 }
 0x129   :  { %s4031_s23 = scalar_lea.hbm %s4030_s24, 32  ;;  %s4033_s1 = scalar_lea.hbm %s5377_s18, 32 }
 0x12a   :  { %p4032_p11 = scmp.ne.s32.totalorder %s4030_s24, %s4031_s23  ;;  %p4034_p12 = scmp.lt.s32.totalorder %s4030_s24, %s5377_s18 }
 0x12b   :  { %p4035_p13 = scmp.lt.s32.totalorder %s4033_s1, %s4031_s23 }
 0x12c   :  { %s320_s28 = sshll.u32 %s5378_s22, 4  ;;  %s4572_s28 = int_to_ptr.hbm [resolvable:$true] %s320_s28 }
 0x12d   :  { %p4036_p0 = por %p4035_p13, %p4034_p12 }
 0x12f   :  { %p4037_p1 = pnand %p4036_p0, %p4032_p11 }
 0x131   :  { %4040 = shalt.err (!%p4037_p1)
}
 0x132   :  { %s5379_s7 = sld [smem:[#allocation68_spill]]  ;;  %s4257_s10 = smov [#allocation31]  }
 0x133   :  { %302 = dma.hbm_to_vmem [thread:$0]  %s4562_s21, 512, %s297_s26, [#allocation27], %s4234_s15, %s4234_s15, %s4235_s16  }
 0x134   :  { %s322_s11 = sshll.u32 %s4257_s10, 4  ;;  %s4053_s12 = sshra.s32 %s4572_s28, 4  ;;  %s323_s11 = int_to_ptr.vmem [resolvable:$true] %s322_s11  ;;  %s4054_s12 = int_to_ptr.hbm [resolvable:$true] %s4053_s12 }
 0x135   :  { %s4055_s20 = scalar_lea.hbm %s4054_s12, 2  ;;  %s4057_s8 = scalar_lea.hbm %s5378_s22, 2 }
 0x136   :  { %p4056_p2 = scmp.ne.s32.totalorder %s4054_s12, %s4055_s20  ;;  %p4058_p3 = scmp.lt.s32.totalorder %s4054_s12, %s5378_s22 }
 0x137   :  { %p4059_p4 = scmp.lt.s32.totalorder %s4057_s8, %s4055_s20 }
 0x138   :  { %s346_s17 = sshll.u32 %s5379_s7, 4  ;;  %s4582_s17 = int_to_ptr.hbm [resolvable:$true] %s346_s17 }
 0x139   :  { %p4060_p5 = por %p4059_p4, %p4058_p3 }
 0x13b   :  { %p4061_p6 = pnand %p4060_p5, %p4056_p2 }
 0x13d   :  { %4064 = shalt.err (!%p4061_p6)
}
 0x13e   :  { %328 = dma.hbm_to_vmem [thread:$0]  %s4572_s28, 32, %s323_s11, [#allocation30], %s4242_s6, %s4242_s6, %s4243_s29  }
 0x13f   :  { %s4258_s0 = smov [#allocation34]   ;;  %s374_s18 = sshll.u32 %s4418_s14, 4  ;;  %s4592_s18 = int_to_ptr.hbm [resolvable:$true] %s374_s18 }
 0x140   :  { %s348_s25 = sshll.u32 %s4258_s0, 4  ;;  %s4077_s21 = sshra.s32 %s4582_s17, 4  ;;  %s349_s25 = int_to_ptr.vmem [resolvable:$true] %s348_s25  ;;  %s4078_s21 = int_to_ptr.hbm [resolvable:$true] %s4077_s21 }
 0x141   :  { %s4079_s30 = scalar_lea.hbm %s4078_s21, 32  ;;  %s4081_s2 = scalar_lea.hbm %s5379_s7, 32 }
 0x142   :  { %p4080_p7 = scmp.ne.s32.totalorder %s4078_s21, %s4079_s30  ;;  %p4082_p8 = scmp.lt.s32.totalorder %s4078_s21, %s5379_s7 }
 0x143   :  { %p4083_p9 = scmp.lt.s32.totalorder %s4081_s2, %s4079_s30 }
 0x145   :  { %p4084_p10 = por %p4083_p9, %p4082_p8 }
 0x147   :  { %p4085_p11 = pnand %p4084_p10, %p4080_p7 }
 0x149   :  { %4088 = shalt.err (!%p4085_p11)
}
 0x14a   :  { %354 = dma.hbm_to_vmem [thread:$0]  %s4582_s17, 512, %s349_s25, [#allocation33], %s4234_s15, %s4234_s15, %s4235_s16  }
 0x14b   :  { %s389_s9 = sshll.u32 %s4428_s3, 4  ;;  %s4259_s4 = smov [#allocation37]   ;;  %s4602_s9 = int_to_ptr.hbm [resolvable:$true] %s389_s9 }
 0x14c   :  { %s376_s19 = sshll.u32 %s4259_s4, 4  ;;  %s4101_s22 = sshra.s32 %s4592_s18, 4  ;;  %s377_s19 = int_to_ptr.vmem [resolvable:$true] %s376_s19  ;;  %s4102_s22 = int_to_ptr.hbm [resolvable:$true] %s4101_s22 }
 0x14d   :  { %s4103_s5 = scalar_lea.hbm %s4102_s22, 2  ;;  %s4105_s26 = scalar_lea.hbm %s4418_s14, 2 }
 0x14e   :  { %p4104_p12 = scmp.ne.s32.totalorder %s4102_s22, %s4103_s5  ;;  %p4106_p13 = scmp.lt.s32.totalorder %s4102_s22, %s4418_s14 }
 0x14f   :  { %p4107_p0 = scmp.lt.s32.totalorder %s4105_s26, %s4103_s5 }
 0x151   :  { %p4108_p1 = por %p4107_p0, %p4106_p13 }
 0x153   :  { %p4109_p2 = pnand %p4108_p1, %p4104_p12 }
 0x155   :  { %4112 = shalt.err (!%p4109_p2)
}
 0x156   :  { %382 = dma.hbm_to_vmem [thread:$0]  %s4592_s18, 32, %s377_s19, [#allocation36], %s4242_s6, %s4242_s6, %s4243_s29  }
 0x157   :  { %s4260_s15 = smov [#allocation38]   ;;  %s4125_s28 = sshra.s32 %s4602_s9, 4  ;;  %s4126_s28 = int_to_ptr.hbm [resolvable:$true] %s4125_s28 }
 0x158   :  { %s391_s16 = sshll.u32 %s4260_s15, 4  ;;  %s4127_s24 = scalar_lea.hbm %s4126_s28, 2  ;;  %s392_s16 = int_to_ptr.vmem [resolvable:$true] %s391_s16 }
 0x159   :  { %p4128_p3 = scmp.ne.s32.totalorder %s4126_s28, %s4127_s24  ;;  %s4129_s14 = scalar_lea.hbm %s4428_s3, 2 }
 0x15a   :  { %p4130_p4 = scmp.lt.s32.totalorder %s4126_s28, %s4428_s3  ;;  %p4131_p5 = scmp.lt.s32.totalorder %s4129_s14, %s4127_s24 }
 0x15c   :  { %p4132_p6 = por %p4131_p5, %p4130_p4 }
 0x15e   :  { %p4133_p7 = pnand %p4132_p6, %p4128_p3 }
 0x160   :  { %4136 = shalt.err (!%p4133_p7)
}
 0x161   :  { %397 = dma.hbm_to_vmem [thread:$0]  %s4602_s9, 32, %s392_s16, [#allocation39], %s4242_s6, %s4242_s6, %s4243_s29  }
 0x162   :  { %4173 = dma.done.wait [#allocation3], 128  }
 0x163   :  { %4174 = vsyncadd [#allocation3], 4294967168 }
 0x164   :  { %4175 = dma.done.wait [#allocation6], 256  }
 0x165   :  { %4176 = vsyncadd [#allocation6], 4294967040 }
 0x166   :  { %4177 = dma.done.wait [#allocation9], 144  }
 0x167   :  { %4178 = vsyncadd [#allocation9], 4294967152 }
 0x168   :  { %4179 = dma.done.wait [#allocation12], 272  }
 0x169   :  { %4180 = vsyncadd [#allocation12], 4294967024 }
 0x16a   :  { %4181 = dma.done.wait [#allocation15], 272  }
 0x16b   :  { %4182 = vsyncadd [#allocation15], 4294967024 }
 0x16c   :  { %4183 = dma.done.wait [#allocation18], 32  }
 0x16d   :  { %4184 = vsyncadd [#allocation18], 4294967264 }
 0x16e   :  { %4185 = dma.done.wait [#allocation21], 80  }
 0x16f   :  { %4186 = vsyncadd [#allocation21], 4294967216 }
 0x170   :  { %4187 = dma.done.wait [#allocation24], 544  }
 0x171   :  { %4188 = vsyncadd [#allocation24], 4294966752 }
 0x172   :  { %4189 = dma.done.wait [#allocation27], 544  }
 0x173   :  { %4190 = vsyncadd [#allocation27], 4294966752 }
 0x174   :  { %4191 = dma.done.wait [#allocation30], 64  }
 0x175   :  { %4192 = vsyncadd [#allocation30], 4294967232 }
 0x176   :  { %4193 = dma.done.wait [#allocation33], 544  }
 0x177   :  { %4194 = vsyncadd [#allocation33], 4294966752 }
 0x178   :  { %4195 = dma.done.wait [#allocation36], 64  }
 0x179   :  { %4196 = vsyncadd [#allocation36], 4294967232 }
 0x17a   :  { %4197 = dma.done.wait [#allocation39], 32  }
 0x17b   :  { %4198 = vsyncadd [#allocation39], 4294967264  ;;  %s5380_s3 = sld [smem:[#allocation58_spill]]  ;;  %v3273_v0 = vld [vmem:[#allocation7] sm:$0xff]  ;;  %v3274_v1 = vld [vmem:[#allocation10] sm:$0xff]  ;;  %vm517_vm0 = vcmask 130048  }
 0x17c   :  { %s5381_s6 = sld [smem:[#allocation55_spill]]  ;;  %v3272_v2 = vld [vmem:[#allocation2] sm:$0xff]  ;;  %528 = vmatpush.bf16.msra.mxu2 %v3273_v0  ;;  %v3277_v3 = vld [vmem:[#allocation13 + $0x8] sm:$0xff]  ;;  %vm667_vm1 = vcmask 1043456   ;;  %vm663_vm2 = vcmask 64512   ;;  %vm596_vm3 = vcmask 261120  }
 0x17d   :  { %v3276_v4 = vld [vmem:[#allocation13] sm:$0xff]  ;;  %s5382_s29 = sld [smem:[#allocation62_spill]]  ;;  %v3373_v9 = vld [vmem:[#allocation8] ss:$0 sm:$0xff]  ;;  %v3286_v18 = vld [vmem:[#allocation25 + $0x8] sm:$0xff]  ;;  %s2971_s11 = sshll.u32 %s4433_s27, 4  ;;  %s2972_s11 = int_to_ptr.hbm [resolvable:$true] %s2971_s11 }
 0x17e   :  { %v3275_v16 = vld [vmem:[#allocation5] sm:$0xff]  ;;  %s5383_s23 = sld [smem:[#allocation64_spill]]  ;;  %v3285_v20 = vld [vmem:[#allocation25] sm:$0xff]  ;;  %v3279_v23 = vld [vmem:[#allocation16 + $0x8] sm:$0xff]  ;;  %s4161_s12 = sshra.s32 %s2972_s11, 4  ;;  %s4162_s12 = int_to_ptr.hbm [resolvable:$true] %s4161_s12 }
 0x17f   :  { %3036 = vmatmul.msk.bf16.vlgmr.msra.gmra.mxu2 %vm517_vm0, %v3272_v2  ;;  %v3376_v22 = vld [vmem:[#allocation19] ss:$0 sm:$0xff]  ;;  %641 = vmatpush.bf16.msra.mxu3 %v3279_v23  ;;  %v3278_v25 = vld [vmem:[#allocation16] sm:$0xff]  ;;  %v653_v30 = vld [vmem:[#allocation20] sm:$0xf]  ;;  %s5384_s1 = sld [smem:[#allocation61_spill]]  ;;  %p4166_p9 = scmp.lt.s32.totalorder %s4162_s12, %s4433_s27 }
 0x180   :  { %557 = vmatpush.bf16.msrb.mxu2 %v3274_v1  ;;  %v695_v33 = vsel %vm667_vm1, %v653_v30, 0  ;;  %v3374_v36 = vld [vmem:[#allocation11] ss:$0 sm:$0xff]  ;;  %v3375_v42 = vld [vmem:[#allocation14] ss:$0 sm:$0xff]  ;;  %s5385_s7 = sld [smem:[#allocation63_spill]] }
 0x181   :  { %v651_v5 = vld [vmem:[%s5380_s3] sm:$0xf]  ;;  %704 = vmatpush.bf16.msra.mxu1 %v695_v33  ;;  %v3379_v54 = vld [vmem:[#allocation17] ss:$0 sm:$0xff]  ;;  %v4692_v62 = vld [vmem:[#allocation23] ss:$0 sm:$0xff] }
 0x182   :  { %v669_v7 = vsel %vm667_vm1, %v651_v5, 0  ;;  %v3280_v8 = vld [vmem:[%s5381_s6] sm:$0xff]  ;;  %v3380_v2 = vld [vmem:[#allocation22] ss:$0 sm:$0xff]  ;;  %s5386_s17 = sld [smem:[#allocation69_spill]]  ;;  %s4163_s20 = scalar_lea.hbm %s4162_s12, 16 }
 0x183   :  { %678 = vmatpush.bf16.msra.mxu0 %v669_v7  ;;  %v3282_v17 = vld [vmem:[%s5382_s29 + $0x8] sm:$0xff]  ;;  %v3281_v19 = vld [vmem:[%s5382_s29] sm:$0xff]  ;;  %642 = vmatpush.bf16.msra.mxu3 %v3278_v25  ;;  %p4164_p8 = scmp.ne.s32.totalorder %s4162_s12, %s4163_s20  ;;  %s4165_s8 = scalar_lea.hbm %s4433_s27, 16 }
 0x184   :  { %606 = vmatpush.bf16.msra.mxu2 %v3277_v3  ;;  %v3284_v31 = vld [vmem:[%s5383_s23 + $0x8] sm:$0xff]  ;;  %v3283_v35 = vld [vmem:[%s5383_s23] sm:$0xff]  ;;  %p4167_p10 = scmp.lt.s32.totalorder %s4165_s8, %s4163_s20 }
 0x185   :  { %v4642_v49 = vld [vmem:[%s5384_s1 + $0x18] sm:$0xff]  ;;  %v4647_v50 = vld [vmem:[%s5384_s1 + $0x10] sm:$0xff]  ;;  %v4654_v51 = vld [vmem:[%s5384_s1 + $0x8] sm:$0xff] }
 0x186   :  { %3068 = vmatmul.msk.bf16.vlgmr.msra.gmra.mxu0 %vm663_vm2, %v3280_v8  ;;  %902 = vmatpush.msrb.mxu1 %v4642_v49  ;;  %v4660_v52 = vld [vmem:[%s5384_s1] sm:$0xff]  ;;  %p4168_p11 = por %p4167_p10, %p4166_p9 }
 0x187   :  { %864 = vmatpush.bf16.msrb.mxu0 %v3286_v18  ;;  %825 = vmatpush.bf16.msrb.mxu3 %v3284_v31  ;;  %v4688_v61 = vld [vmem:[%s5385_s7] ss:$0 sm:$0xff] }
 0x188   :  { %607 = vmatpush.bf16.msra.mxu2 %v3276_v4  ;;  %903 = vmatpush.msrb.mxu1 %v4647_v50  ;;  %p4169_p12 = pnand %p4168_p11, %p4164_p8 }
 0x18a   :  { %904 = vmatpush.msrb.mxu1 %v4654_v51 }
 0x18b   :  { %865 = vmatpush.bf16.msrb.mxu0 %v3285_v20  ;;  %826 = vmatpush.bf16.msrb.mxu3 %v3283_v35 }
 0x18c   :  { %905 = vmatpush.msrb.mxu1 %v4660_v52 }
 0x18f   :  { %1057 = vmatpush.msra.mxu0 %v4642_v49 }
 0x191   :  { %1058 = vmatpush.msra.mxu0 %v4647_v50 }
 0x193   :  { %1059 = vmatpush.msra.mxu0 %v4654_v51 }
 0x195   :  { %1060 = vmatpush.msra.mxu0 %v4660_v52 }
 0x202   :  { %v530_v6 = vpop.f32.mrf.mxu2 }
 0x203   :  { %v531_v10 = vadd.f32 %v3373_v9, %v530_v6  ;;  %v680_v21 = vpop.f32.mrf.mxu0 }
 0x204   :  { %v681_v24 = vadd.f32 %v3376_v22, %v680_v21 }
 0x205   :  { %v535_v13 = vmax.f32 %v531_v10, 0.0 }
 0x206   :  { %v685_v27 = vmax.f32 %v681_v24, 0.0 }
 0x20a   :  { %v532_v11 = vpop.f32.mrf.mxu2 }
 0x20b   :  { %v533_v12 = vadd.f32 %v3373_v9, %v532_v11  ;;  %v682_v26 = vpop.f32.mrf.mxu0 }
 0x20c   :  { %v683_v28 = vadd.f32 %v3376_v22, %v682_v26 }
 0x20d   :  { %v536_v14 = vmax.f32 %v533_v12, 0.0 }
 0x20e   :  { %v686_v29 = vmax.f32 %v683_v28, 0.0 }
 0x20f   :  { %v537_v15 = vpack.c.bf16 %v536_v14, %v535_v13 }
 0x210   :  { %v687_v34 = vpack.c.bf16 %v686_v29, %v685_v27 }
 0x211   :  { %3041 = vmatmul.msk.bf16.vlgmr.msrb.gmra.mxu2 %vm517_vm0, %v537_v15 }
 0x212   :  { %786 = vmatpush.bf16.msrb.mxu2 %v3282_v17  ;;  %3069 = vmatmul.msk.bf16.vlgmr.msra.gmra.mxu1 %vm663_vm2, %v687_v34 }
 0x213   :  { %933 = vmatpush.msra.mxu1 %v4642_v49 }
 0x215   :  { %934 = vmatpush.msra.mxu1 %v4647_v50 }
 0x216   :  { %787 = vmatpush.bf16.msrb.mxu2 %v3281_v19 }
 0x217   :  { %935 = vmatpush.msra.mxu1 %v4654_v51 }
 0x219   :  { %936 = vmatpush.msra.mxu1 %v4660_v52 }
 0x221   :  { %3054 = vmatmul.msk.bf16.vlgmr.msra.gmra.mxu2 %vm596_vm3, %v3275_v16 }
 0x222   :  { %995 = vmatpush.msra.mxu2 %v4642_v49 }
 0x224   :  { %996 = vmatpush.msra.mxu2 %v4647_v50 }
 0x226   :  { %997 = vmatpush.msra.mxu2 %v4654_v51 }
 0x228   :  { %998 = vmatpush.msra.mxu2 %v4660_v52 }
 0x28f   :  { %v706_v58 = vpop.f32.mrf.mxu1 }
 0x290   :  { %v4702_v6 = vadd.f32 %v3380_v2, %v706_v58 }
 0x294   :  { %v559_v32 = vpop.f32.mrf.mxu2 }
 0x295   :  { %v4631_v38 = vadd.f32 %v3374_v36, %v559_v32 }
 0x297   :  { %v708_v4 = vpop.f32.mrf.mxu1 }
 0x298   :  { %v4704_v7 = vadd.f32 %v3380_v2, %v708_v4 }
 0x29a   :  { %v755_v11 = vpack.c.bf16 %v4704_v7, %v4702_v6 }
 0x29c   :  { %v561_v37 = vpop.f32.mrf.mxu2 }
 0x29d   :  { %v4633_v39 = vadd.f32 %v3374_v36, %v561_v37 }
 0x29f   :  { %v753_v40 = vpack.c.bf16 %v4633_v39, %v4631_v38 }
 0x2a1   :  { %3078 = vmatmul.msk.bf16.vlgmr.msrb.gmra.mxu2 %vm596_vm3, %v753_v40  ;;  %3100 = vmatmul.msk.bf16.vlgmr.msrb.gmra.mxu0 %vm596_vm3, %v753_v40 }
 0x2a2   :  { %1119 = vmatpush.msrb.mxu2 %v4642_v49 }
 0x2a4   :  { %v609_v41 = vpop.f32.mrf.mxu2  ;;  %1120 = vmatpush.msrb.mxu2 %v4647_v50 }
 0x2a5   :  { %v610_v43 = vadd.f32 %v3375_v42, %v609_v41 }
 0x2a6   :  { %1121 = vmatpush.msrb.mxu2 %v4654_v51 }
 0x2a7   :  { %v614_v46 = vmax.f32 %v610_v43, 0.0 }
 0x2a8   :  { %1122 = vmatpush.msrb.mxu2 %v4660_v52 }
 0x2ac   :  { %v611_v44 = vpop.f32.mrf.mxu2 }
 0x2ad   :  { %v612_v45 = vadd.f32 %v3375_v42, %v611_v44 }
 0x2af   :  { %v615_v47 = vmax.f32 %v612_v45, 0.0 }
 0x2b1   :  { %v616_v48 = vpack.c.bf16 %v615_v47, %v614_v46 }
 0x2b3   :  { %3063 = vmatmul.msk.bf16.vlgmr.msra.gmra.mxu3 %vm596_vm3, %v616_v48 }
 0x2b4   :  { %1026 = vmatpush.msra.mxu3 %v4642_v49 }
 0x2b6   :  { %1027 = vmatpush.msra.mxu3 %v4647_v50 }
 0x2b8   :  { %1028 = vmatpush.msra.mxu3 %v4654_v51 }
 0x2ba   :  { %1029 = vmatpush.msra.mxu3 %v4660_v52 }
 0x2c3   :  { %3089 = vmatmul.msk.bf16.vlgmr.msrb.gmra.mxu3 %vm596_vm3, %v753_v40 }
 0x2c4   :  { %1150 = vmatpush.msrb.mxu3 %v4642_v49 }
 0x2c6   :  { %1151 = vmatpush.msrb.mxu3 %v4647_v50 }
 0x2c8   :  { %1152 = vmatpush.msrb.mxu3 %v4654_v51 }
 0x2ca   :  { %1153 = vmatpush.msrb.mxu3 %v4660_v52 }
 0x31e   :  { %v4747_v47 = vpop.f32.mrf.mxu0 }
 0x324   :  { %v789_v60 = vpop.f32.mrf.mxu2 }
 0x325   :  { %v790_v0 = vadd.f32 %v4688_v61, %v789_v60 }
 0x326   :  { %v4749_v48 = vpop.f32.mrf.mxu0 }
 0x32c   :  { %v791_v5 = vpop.f32.mrf.mxu2 }
 0x32d   :  { %v792_v9 = vadd.f32 %v4688_v61, %v791_v5 }
 0x336   :  { %v644_v53 = vpop.f32.mrf.mxu3 }
 0x337   :  { %v4681_v56 = vadd.f32 %v3379_v54, %v644_v53 }
 0x33e   :  { %v646_v55 = vpop.f32.mrf.mxu3 }
 0x33f   :  { %v4683_v57 = vadd.f32 %v3379_v54, %v646_v55 }
 0x341   :  { %v754_v59 = vpack.c.bf16 %v4683_v57, %v4681_v56 }
 0x343   :  { %3079 = vmatmul.msk.bf16.gmra.mxu2 %vm596_vm3, %v754_v59  ;;  %3090 = vmatmul.msk.bf16.gmra.mxu3 %vm596_vm3, %v754_v59 }
 0x344   :  { %3101 = vmatmul.msk.bf16.gmra.mxu0 %vm596_vm3, %v754_v59 }
 0x346   :  { %v828_v63 = vpop.f32.mrf.mxu3 }
 0x347   :  { %v4697_v1 = vadd.f32 %v4692_v62, %v828_v63 }
 0x349   :  { %v882_v3 = vmul.f32 %v4697_v1, %v790_v0 }
 0x34b   :  { %3103 = vmatmul.msk.f32.vlgmr.msrb.gmra.mxu1 %vm596_vm3, %v882_v3 }
 0x34c   :  { %964 = vmatpush.msrb.mxu1 %v4642_v49 }
 0x34e   :  { %v830_v8 = vpop.f32.mrf.mxu3  ;;  %965 = vmatpush.msrb.mxu1 %v4647_v50 }
 0x34f   :  { %v831_v10 = vadd.f32 %v4692_v62, %v830_v8 }
 0x350   :  { %966 = vmatpush.msrb.mxu1 %v4654_v51 }
 0x351   :  { %v883_v12 = vmul.f32 %v831_v10, %v792_v9 }
 0x352   :  { %967 = vmatpush.msrb.mxu1 %v4660_v52 }
 0x353   :  { %3080 = vmatmul.msk.bf16.gmra.mxu2 %vm596_vm3, %v755_v11  ;;  %3091 = vmatmul.msk.bf16.gmra.mxu3 %vm596_vm3, %v755_v11 }
 0x354   :  { %3102 = vmatmul.msk.bf16.gmra.mxu0 %vm596_vm3, %v755_v11  ;;  %3104 = vmatmul.msk.f32.gmra.mxu1 %vm596_vm3, %v883_v12 }
 0x3c6   :  { %v794_v13 = vpop.f32.mrf.mxu2  ;;  %v833_v14 = vpop.f32.mrf.mxu3 }
 0x3c7   :  { %v795_v15 = vadd.f32 %v4688_v61, %v794_v13  ;;  %v834_v16 = vadd.f32 %v4692_v62, %v833_v14 }
 0x3c9   :  { %v975_v17 = vmul.f32 %v4697_v1, %v795_v15  ;;  %v913_v18 = vmul.f32 %v834_v16, %v790_v0  ;;  %v1006_v19 = vmul.f32 %v834_v16, %v795_v15 }
 0x3cb   :  { %3105 = vmatmul.msk.f32.vlgmr.msra.gmra.mxu1 %vm596_vm3, %v913_v18  ;;  %3109 = vmatmul.msk.f32.vlgmr.msra.gmra.mxu2 %vm596_vm3, %v975_v17 }
 0x3cc   :  { %3111 = vmatmul.msk.f32.vlgmr.msra.gmra.mxu3 %vm596_vm3, %v1006_v19  ;;  %1088 = vmatpush.msra.mxu1 %v4642_v49  ;;  %v4751_v49 = vpop.f32.mrf.mxu0  ;;  %v3288_v19 = vld [vmem:[#allocation28 + $0x8] sm:$0xff] }
 0x3cd   :  { %1326 = vmatpush.bf16.msrb.mxu0 %v3288_v19 }
 0x3ce   :  { %v796_v20 = vpop.f32.mrf.mxu2  ;;  %v835_v21 = vpop.f32.mrf.mxu3  ;;  %1089 = vmatpush.msra.mxu1 %v4647_v50 }
 0x3cf   :  { %v797_v22 = vadd.f32 %v4688_v61, %v796_v20  ;;  %v836_v23 = vadd.f32 %v4692_v62, %v835_v21  ;;  %v907_v50 = vpop.f32.mrf.mxu1 }
 0x3d0   :  { %1090 = vmatpush.msra.mxu1 %v4654_v51 }
 0x3d1   :  { %v914_v24 = vmul.f32 %v836_v23, %v792_v9  ;;  %v976_v25 = vmul.f32 %v831_v10, %v797_v22  ;;  %v1007_v26 = vmul.f32 %v836_v23, %v797_v22 }
 0x3d2   :  { %1091 = vmatpush.msra.mxu1 %v4660_v52 }
 0x3d3   :  { %3106 = vmatmul.msk.f32.gmra.mxu1 %vm596_vm3, %v914_v24  ;;  %3110 = vmatmul.msk.f32.gmra.mxu2 %vm596_vm3, %v976_v25 }
 0x3d4   :  { %3112 = vmatmul.msk.f32.gmra.mxu3 %vm596_vm3, %v1007_v26  ;;  %v4753_v51 = vpop.f32.mrf.mxu0 }
 0x3d6   :  { %v799_v27 = vpop.f32.mrf.mxu2  ;;  %v838_v28 = vpop.f32.mrf.mxu3 }
 0x3d7   :  { %v800_v29 = vadd.f32 %v4688_v61, %v799_v27  ;;  %v839_v30 = vadd.f32 %v4692_v62, %v838_v28  ;;  %v910_v52 = vpop.f32.mrf.mxu1 }
 0x3d9   :  { %v1099_v31 = vmul.f32 %v834_v16, %v800_v29  ;;  %v944_v32 = vmul.f32 %v839_v30, %v790_v0  ;;  %v1037_v33 = vmul.f32 %v839_v30, %v795_v15  ;;  %v1130_v34 = vmul.f32 %v839_v30, %v800_v29 }
 0x3da   :  { %v1068_v45 = vmul.f32 %v4697_v1, %v800_v29  ;;  %v3287_v29 = vld [vmem:[#allocation28] sm:$0xff] }
 0x3db   :  { %3107 = vmatmul.msk.f32.vlgmr.msrb.gmra.mxu1 %vm596_vm3, %v944_v32  ;;  %3113 = vmatmul.msk.f32.vlgmr.msra.gmra.mxu0 %vm596_vm3, %v1037_v33 }
 0x3dc   :  { %3117 = vmatmul.msk.f32.vlgmr.msrb.gmra.mxu2 %vm596_vm3, %v1099_v31  ;;  %3119 = vmatmul.msk.f32.vlgmr.msrb.gmra.mxu3 %vm596_vm3, %v1130_v34  ;;  %v4755_v53 = vpop.f32.mrf.mxu0 }
 0x3dd   :  { %1327 = vmatpush.bf16.msrb.mxu0 %v3287_v29 }
 0x3de   :  { %v801_v35 = vpop.f32.mrf.mxu2  ;;  %v840_v36 = vpop.f32.mrf.mxu3 }
 0x3df   :  { %v802_v37 = vadd.f32 %v4688_v61, %v801_v35  ;;  %v841_v40 = vadd.f32 %v4692_v62, %v840_v36 }
 0x3e1   :  { %v945_v41 = vmul.f32 %v841_v40, %v792_v9  ;;  %v1038_v42 = vmul.f32 %v841_v40, %v797_v22  ;;  %v1100_v43 = vmul.f32 %v836_v23, %v802_v37  ;;  %v1131_v44 = vmul.f32 %v841_v40, %v802_v37 }
 0x3e2   :  { %v1069_v46 = vmul.f32 %v831_v10, %v802_v37 }
 0x3e3   :  { %3108 = vmatmul.msk.f32.gmra.mxu1 %vm596_vm3, %v945_v41  ;;  %3114 = vmatmul.msk.f32.gmra.mxu0 %vm596_vm3, %v1038_v42 }
 0x3e4   :  { %3118 = vmatmul.msk.f32.gmra.mxu2 %vm596_vm3, %v1100_v43  ;;  %3120 = vmatmul.msk.f32.gmra.mxu3 %vm596_vm3, %v1131_v44  ;;  %v4757_v55 = vpop.f32.mrf.mxu0 }
 0x3eb   :  { %3115 = vmatmul.msk.f32.vlgmr.msra.gmra.mxu1 %vm596_vm3, %v1068_v45 }
 0x3f3   :  { %3116 = vmatmul.msk.f32.gmra.mxu1 %vm596_vm3, %v1069_v46 }
 0x448   :  { %v938_v54 = vpop.f32.mrf.mxu1 }
 0x449   :  { %v1161_v61 = vmax.f32 %v907_v50, %v938_v54 }
 0x44e   :  { %v1000_v59 = vpop.f32.mrf.mxu2 }
 0x44f   :  { %v1031_v60 = vpop.f32.mrf.mxu3 }
 0x450   :  { %v941_v58 = vpop.f32.mrf.mxu1  ;;  %v1205_v62 = vmax.f32 %v1000_v59, %v1031_v60 }
 0x451   :  { %v1162_v15 = vmax.f32 %v910_v52, %v941_v58 }
 0x456   :  { %v1003_v8 = vpop.f32.mrf.mxu2 }
 0x457   :  { %v1034_v9 = vpop.f32.mrf.mxu3 }
 0x458   :  { %v969_v63 = vpop.f32.mrf.mxu1  ;;  %v1062_v0 = vpop.f32.mrf.mxu0  ;;  %v1206_v16 = vmax.f32 %v1003_v8, %v1034_v9 }
 0x459   :  { %v1163_v1 = vmax.f32 %v1161_v61, %v969_v63  ;;  %v1207_v2 = vmax.f32 %v1205_v62, %v1062_v0 }
 0x45b   :  { %v1165_v3 = vsub.f32 %v907_v50, %v1163_v1  ;;  %v1171_v4 = vsub.f32 %v938_v54, %v1163_v1  ;;  %v1177_v5 = vsub.f32 %v969_v63, %v1163_v1  ;;  %v1209_v12 = vsub.f32 %v1000_v59, %v1207_v2 }
 0x45c   :  { %v1215_v14 = vsub.f32 %v1031_v60, %v1207_v2  ;;  %v1221_v42 = vsub.f32 %v1062_v0, %v1207_v2 }
 0x45d   :  { %v1167_v10 = vmul.f32 1.442695, %v1165_v3  ;;  %v1173_v11 = vmul.f32 1.442695, %v1171_v4  ;;  %v1179_v13 = vmul.f32 1.442695, %v1177_v5 }
 0x45e   :  { %v1211_v20 = vmul.f32 1.442695, %v1209_v12  ;;  %v1217_v23 = vmul.f32 1.442695, %v1215_v14  ;;  %v1223_v60 = vmul.f32 1.442695, %v1221_v42 }
 0x45f   :  { %3399 = vpow2.f32 %v1167_v10  ;;  %v1124_v35 = vpop.f32.mrf.mxu2  ;;  %v4759_v43 = vpop.f32.mrf.mxu3 }
 0x460   :  { %3401 = vpow2.f32 %v1173_v11  ;;  %v972_v17 = vpop.f32.mrf.mxu1  ;;  %v1065_v18 = vpop.f32.mrf.mxu0 }
 0x461   :  { %v1164_v21 = vmax.f32 %v1162_v15, %v972_v17  ;;  %v1208_v22 = vmax.f32 %v1206_v16, %v1065_v18  ;;  %3403 = vpow2.f32 %v1179_v13 }
 0x462   :  { %3405 = vpow2.f32 %v1211_v20 }
 0x463   :  { %v1166_v24 = vsub.f32 %v910_v52, %v1164_v21  ;;  %v1172_v25 = vsub.f32 %v941_v58, %v1164_v21  ;;  %v1178_v26 = vsub.f32 %v972_v17, %v1164_v21  ;;  %v1210_v27 = vsub.f32 %v1003_v8, %v1208_v22 }
 0x464   :  { %v1216_v28 = vsub.f32 %v1034_v9, %v1208_v22  ;;  %3407 = vpow2.f32 %v1217_v23  ;;  %v1222_v37 = vsub.f32 %v1065_v18, %v1208_v22  ;;  %v3377_v9 = vld [vmem:[#allocation26] ss:$0 sm:$0xff] }
 0x465   :  { %v3400_v30 = vpop.eup %3399  ;;  %v1169_v31 = vmul.f32 1.442695, %v1166_v24  ;;  %v1175_v32 = vmul.f32 1.442695, %v1172_v25  ;;  %v1181_v33 = vmul.f32 1.442695, %v1178_v26  ;;  %v4778_v22 = vadd.f32 %v3377_v9, %v4747_v47 }
 0x466   :  { %v3402_v34 = vpop.eup %3401  ;;  %v1213_v36 = vmul.f32 1.442695, %v1210_v27  ;;  %v1219_v44 = vmul.f32 1.442695, %v1216_v28  ;;  %v1225_v52 = vmul.f32 1.442695, %v1222_v37  ;;  %v4782_v27 = vadd.f32 %v3377_v9, %v4749_v48 }
 0x467   :  { %v1183_v40 = vadd.f32 %v3402_v34, %v3400_v30  ;;  %3409 = vpow2.f32 %v1169_v31  ;;  %v3404_v41 = vpop.eup %3403  ;;  %v1127_v4 = vpop.f32.mrf.mxu2  ;;  %v4785_v28 = vadd.f32 %v3377_v9, %v4751_v49  ;;  %v4792_v48 = vadd.f32 %v3377_v9, %v4753_v51 }
 0x468   :  { %3411 = vpow2.f32 %v1175_v32  ;;  %v1093_v45 = vpop.f32.mrf.mxu1  ;;  %v4761_v54 = vpop.eup %3405 }
 0x469   :  { %v1185_v46 = vadd.f32 %v3404_v41, %v1183_v40  ;;  %3413 = vpow2.f32 %v1181_v33  ;;  %v1249_v50 = vmax.f32 %v1093_v45, %v1124_v35  ;;  %v1158_v14 = vpop.f32.mrf.mxu3 }
 0x46a   :  { %3415 = vpow2.f32 %v1213_v36  ;;  %v4766_v59 = vpop.eup %3407 }
 0x46b   :  { %3417 = vrcp.f32 %v1185_v46  ;;  %v4764_v58 = vmax.f32 %v1249_v50, %v4759_v43  ;;  %v1227_v13 = vadd.f32 %v4766_v59, %v4761_v54 }
 0x46c   :  { %3419 = vpow2.f32 %v1219_v44  ;;  %v4795_v44 = vadd.f32 %v3377_v9, %v4755_v53 }
 0x46d   :  { %v3410_v61 = vpop.eup %3409  ;;  %3421 = vpow2.f32 %v1225_v52  ;;  %v1253_v63 = vsub.f32 %v1093_v45, %v4764_v58  ;;  %v1259_v2 = vsub.f32 %v1124_v35, %v4764_v58  ;;  %v880_v45 = vadd.f32 %v3377_v9, %v4757_v55 }
 0x46e   :  { %v3412_v62 = vpop.eup %3411  ;;  %3423 = vpow2.f32 %v1223_v60 }
 0x46f   :  { %v3414_v0 = vpop.eup %3413  ;;  %v1184_v1 = vadd.f32 %v3412_v62, %v3410_v61  ;;  %v1255_v15 = vmul.f32 1.442695, %v1253_v63  ;;  %v1261_v17 = vmul.f32 1.442695, %v1259_v2 }
 0x470   :  { %v4770_v3 = vpop.eup %3415  ;;  %v1096_v5 = vpop.f32.mrf.mxu1 }
 0x471   :  { %v3418_v8 = vpop.eup %3417  ;;  %v1186_v10 = vadd.f32 %v3414_v0, %v1184_v1  ;;  %v1250_v11 = vmax.f32 %v1096_v5, %v1127_v4 }
 0x472   :  { %v3420_v12 = vpop.eup %3419  ;;  %v1189_v20 = vmul.f32 %v3418_v8, %v3400_v30  ;;  %v1193_v21 = vmul.f32 %v3418_v8, %v3402_v34  ;;  %v1265_v34 = vsub.f32 %v4759_v43, %v4764_v58  ;;  %v1199_v49 = vmul.f32 %v3418_v8, %v3404_v41 }
 0x473   :  { %3425 = vrcp.f32 %v1186_v10  ;;  %v1228_v16 = vadd.f32 %v3420_v12, %v4770_v3  ;;  %v1252_v18 = vmax.f32 %v1250_v11, %v1158_v14  ;;  %v4775_v19 = vpop.eup %3421 }
 0x474   :  { %v3424_v26 = vpop.eup %3423  ;;  %3427 = vpow2.f32 %v1255_v15  ;;  %v1191_v47 = vmul.f32 %v1189_v20, %v4778_v22  ;;  %v1195_v33 = vmul.f32 %v1193_v21, %v4785_v28  ;;  %v1267_v52 = vmul.f32 1.442695, %v1265_v34 }
 0x475   :  { %v1230_v23 = vadd.f32 %v4775_v19, %v1228_v16  ;;  %v1254_v24 = vsub.f32 %v1096_v5, %v1252_v18  ;;  %v1260_v25 = vsub.f32 %v1127_v4, %v1252_v18  ;;  %v1266_v29 = vsub.f32 %v1158_v14, %v1252_v18 }
 0x476   :  { %v1229_v31 = vadd.f32 %v3424_v26, %v1227_v13  ;;  %3429 = vpow2.f32 %v1261_v17  ;;  %v1197_v50 = vadd.f32 %v1195_v33, %v1191_v47  ;;  %v1201_v60 = vmul.f32 %v1199_v49, %v4795_v44 }
 0x477   :  { %v1257_v30 = vmul.f32 1.442695, %v1254_v24  ;;  %v1263_v32 = vmul.f32 1.442695, %v1260_v25  ;;  %3431 = vrcp.f32 %v1230_v23  ;;  %v1269_v36 = vmul.f32 1.442695, %v1266_v29 }
 0x479   :  { %v3426_v35 = vpop.eup %3425  ;;  %3433 = vpow2.f32 %v1257_v30 }
 0x47a   :  { %v1190_v37 = vmul.f32 %v3426_v35, %v3410_v61  ;;  %v1194_v40 = vmul.f32 %v3426_v35, %v3412_v62  ;;  %v1200_v42 = vmul.f32 %v3426_v35, %v3414_v0  ;;  %3435 = vpow2.f32 %v1263_v32  ;;  %v3428_v46 = vpop.eup %3427 }
 0x47b   :  { %3437 = vrcp.f32 %v1229_v31  ;;  %v1203_v0 = vadd.f32 %v1201_v60, %v1197_v50 }
 0x47c   :  { %v1192_v43 = vmul.f32 %v1190_v37, %v4782_v27  ;;  %v1196_v51 = vmul.f32 %v1194_v40, %v4792_v48  ;;  %v3430_v41 = vpop.eup %3429  ;;  %v1202_v62 = vmul.f32 %v1200_v42, %v880_v45  ;;  %3439 = vpow2.f32 %v1269_v36 }
 0x47d   :  { %v3432_v58 = vpop.eup %3431  ;;  %3441 = vpow2.f32 %v1267_v52  ;;  %v1271_v9 = vadd.f32 %v3430_v41, %v3428_v46 }
 0x47e   :  { %v1198_v61 = vadd.f32 %v1196_v51, %v1192_v43  ;;  %v1234_v5 = vmul.f32 %v3432_v58, %v4770_v3  ;;  %v1238_v8 = vmul.f32 %v3432_v58, %v3420_v12  ;;  %v1244_v20 = vmul.f32 %v3432_v58, %v4775_v19 }
 0x47f   :  { %v3434_v63 = vpop.eup %3433 }
 0x480   :  { %v3436_v53 = vpop.eup %3435  ;;  %v1204_v1 = vadd.f32 %v1202_v62, %v1198_v61  ;;  %v1236_v16 = vmul.f32 %v1234_v5, %v4782_v27  ;;  %v1240_v17 = vmul.f32 %v1238_v8, %v4792_v48  ;;  %v1246_v24 = vmul.f32 %v1244_v20, %v880_v45 }
 0x481   :  { %v3438_v55 = vpop.eup %3437  ;;  %v1272_v2 = vadd.f32 %v3436_v53, %v3434_v63 }
 0x482   :  { %v1293_v4 = vpack.c.bf16 %v1204_v1, %v1203_v0  ;;  %v3440_v10 = vpop.eup %3439  ;;  %v1233_v11 = vmul.f32 %v3438_v55, %v4761_v54  ;;  %v1237_v13 = vmul.f32 %v3438_v55, %v4766_v59  ;;  %v1243_v21 = vmul.f32 %v3438_v55, %v3424_v26 }
 0x483   :  { %v1274_v14 = vadd.f32 %v3440_v10, %v1272_v2  ;;  %v3442_v15 = vpop.eup %3441  ;;  %v1242_v23 = vadd.f32 %v1240_v17, %v1236_v16 }
 0x484   :  { %3129 = vmatmul.msk.bf16.vlgmr.msrb.gmra.mxu0 %vm596_vm3, %v1293_v4  ;;  %v1273_v18 = vadd.f32 %v3442_v15, %v1271_v9  ;;  %v1235_v3 = vmul.f32 %v1233_v11, %v4778_v22  ;;  %v1239_v12 = vmul.f32 %v1237_v13, %v4785_v28  ;;  %v1245_v59 = vmul.f32 %v1243_v21, %v4795_v44 }
 0x485   :  { %3443 = vrcp.f32 %v1274_v14  ;;  %v1248_v25 = vadd.f32 %v1246_v24, %v1242_v23  ;;  %v4261_v13 = vmov 32.0  }
 0x486   :  { %3445 = vrcp.f32 %v1273_v18  ;;  %v1241_v54 = vadd.f32 %v1239_v12, %v1235_v3 }
 0x487   :  { %3447 = vrcp.f32 %v4261_v13 }
 0x488   :  { %v1247_v31 = vadd.f32 %v1245_v59, %v1241_v54 }
 0x48a   :  { %v1294_v47 = vpack.c.bf16 %v1248_v25, %v1247_v31 }
 0x48b   :  { %v3444_v29 = vpop.eup %3443 }
 0x48c   :  { %v3446_v30 = vpop.eup %3445  ;;  %v1278_v32 = vmul.f32 %v3444_v29, %v3434_v63  ;;  %v1282_v33 = vmul.f32 %v3444_v29, %v3436_v53  ;;  %v1288_v37 = vmul.f32 %v3444_v29, %v3440_v10 }
 0x48d   :  { %v1277_v19 = vmul.f32 %v3446_v30, %v3428_v46  ;;  %v1281_v34 = vmul.f32 %v3446_v30, %v3430_v41  ;;  %v1287_v42 = vmul.f32 %v3446_v30, %v3442_v15  ;;  %v3382_v41 = vld [vmem:[#allocation29] ss:$0 sm:$0xff] }
 0x48e   :  { %v1280_v35 = vmul.f32 %v1278_v32, %v4782_v27  ;;  %v1284_v26 = vmul.f32 %v1282_v33, %v4792_v48  ;;  %v1290_v43 = vmul.f32 %v1288_v37, %v880_v45 }
 0x48f   :  { %v1279_v49 = vmul.f32 %v1277_v19, %v4778_v22  ;;  %v1283_v36 = vmul.f32 %v1281_v34, %v4785_v28  ;;  %v1289_v51 = vmul.f32 %v1287_v42, %v4795_v44 }
 0x490   :  { %v1286_v40 = vadd.f32 %v1284_v26, %v1280_v35 }
 0x491   :  { %v1285_v50 = vadd.f32 %v1283_v36, %v1279_v49 }
 0x492   :  { %v1292_v52 = vadd.f32 %v1290_v43, %v1286_v40 }
 0x493   :  { %v1291_v46 = vadd.f32 %v1289_v51, %v1285_v50 }
 0x494   :  { %3130 = vmatmul.msk.bf16.gmra.mxu0 %vm596_vm3, %v1294_v47 }
 0x495   :  { %v1295_v58 = vpack.c.bf16 %v1292_v52, %v1291_v46 }
 0x4a4   :  { %3131 = vmatmul.msk.bf16.gmra.mxu0 %vm596_vm3, %v1295_v58 }
 0x501   :  { %v1329_v27 = vpop.f32.mrf.mxu0 }
 0x502   :  { %v1330_v60 = vadd.f32 %v3382_v41, %v1329_v27  ;;  %v3290_v27 = vld [vmem:[#allocation34 + $0x8] sm:$0xff] }
 0x503   :  { %1540 = vmatpush.bf16.msrb.mxu1 %v3290_v27 }
 0x504   :  { %v1344_v48 = vadd.f32 %v1330_v60, %v4631_v38  ;;  %v3289_v60 = vld [vmem:[#allocation34] sm:$0xff] }
 0x506   :  { %v1350_v22 = vsel %vm596_vm3, %v1344_v48, 0.0 }
 0x507   :  { %1351 = vadd.xlane.f32.xlu0 %v1350_v22  ;;  %1541 = vmatpush.bf16.msrb.mxu1 %v3289_v60 }
 0x509   :  { %v1331_v28 = vpop.f32.mrf.mxu0 }
 0x50a   :  { %v1332_v61 = vadd.f32 %v3382_v41, %v1331_v28 }
 0x50c   :  { %v1345_v62 = vadd.f32 %v1332_v61, %v4633_v39 }
 0x50e   :  { %v1353_v45 = vsel %vm596_vm3, %v1345_v62, 0.0 }
 0x50f   :  { %1354 = vadd.xlane.f32.xlu0 %v1353_v45 }
 0x511   :  { %v1334_v44 = vpop.f32.mrf.mxu0 }
 0x512   :  { %v1335_v63 = vadd.f32 %v3382_v41, %v1334_v44 }
 0x514   :  { %v1346_v53 = vadd.f32 %v1335_v63, %v4681_v56 }
 0x516   :  { %v1356_v0 = vsel %vm596_vm3, %v1346_v53, 0.0 }
 0x517   :  { %1357 = vadd.xlane.f32.xlu1 %v1356_v0 }
 0x519   :  { %v1336_v1 = vpop.f32.mrf.mxu0 }
 0x51a   :  { %v1337_v55 = vadd.f32 %v3382_v41, %v1336_v1 }
 0x51c   :  { %v1347_v38 = vadd.f32 %v1337_v55, %v4683_v57  ;;  %v3448_v57 = vpop.eup %3447 }
 0x51d   :  { %v1369_v14 = vmul.f32 32.0, %v3448_v57  ;;  %vm1373_vm4 = vweird.f32 %v3448_v57 }
 0x51e   :  { %v1359_v2 = vsel %vm596_vm3, %v1347_v38, 0.0 }
 0x51f   :  { %1360 = vadd.xlane.f32.xlu1 %v1359_v2  ;;  %v1370_v15 = vsub.f32 1.0, %v1369_v14 }
 0x521   :  { %v1339_v4 = vpop.f32.mrf.mxu0  ;;  %v1371_v16 = vmul.f32 %v3448_v57, %v1370_v15 }
 0x522   :  { %v1340_v5 = vadd.f32 %v3382_v41, %v1339_v4 }
 0x523   :  { %v1372_v17 = vadd.f32 %v3448_v57, %v1371_v16 }
 0x524   :  { %v1348_v39 = vadd.f32 %v1340_v5, %v4702_v6 }
 0x525   :  { %v4830_v18 = vsel %vm1373_vm4, %v3448_v57, %v1372_v17 }
 0x526   :  { %v1362_v8 = vsel %vm596_vm3, %v1348_v39, 0.0 }
 0x527   :  { %1363 = vadd.xlane.f32.xlu2 %v1362_v8 }
 0x529   :  { %v1341_v9 = vpop.f32.mrf.mxu0 }
 0x52a   :  { %v1342_v10 = vadd.f32 %v3382_v41, %v1341_v9 }
 0x52c   :  { %v1349_v56 = vadd.f32 %v1342_v10, %v4704_v7 }
 0x52e   :  { %v1365_v11 = vsel %vm596_vm3, %v1349_v56, 0.0 }
 0x52f   :  { %1366 = vadd.xlane.f32.xlu2 %v1365_v11  ;;  %v4872_v11 = vld [vmem:[#allocation31] ss:$0 sm:$0xff] }
 0x57a   :  { %v1352_v6 = vpop.xlane.xlu0 %1351 }
 0x57b   :  { %v1375_v20 = vmul.f32 %v4830_v18, %v1352_v6  ;;  %v4875_v6 = vld [vmem:[#allocation32] ss:$0 sm:$0xff] }
 0x57d   :  { %v4833_v3 = vsub.f32 %v1344_v48, %v1375_v20 }
 0x57f   :  { %v1387_v7 = vmul.f32 %v4833_v3, %v4833_v3 }
 0x581   :  { %v1393_v12 = vsel %vm596_vm3, %v1387_v7, 0.0 }
 0x582   :  { %1394 = vadd.xlane.f32.xlu0 %v1393_v12  ;;  %v1355_v21 = vpop.xlane.xlu0 %1354 }
 0x583   :  { %v1376_v23 = vmul.f32 %v4830_v18, %v1355_v21 }
 0x585   :  { %v4839_v54 = vsub.f32 %v1345_v62, %v1376_v23 }
 0x587   :  { %v1388_v24 = vmul.f32 %v4839_v54, %v4839_v54 }
 0x589   :  { %v1396_v59 = vsel %vm596_vm3, %v1388_v24, 0.0 }
 0x58a   :  { %v1358_v25 = vpop.xlane.xlu1 %1357  ;;  %1397 = vadd.xlane.f32.xlu1 %v1396_v59 }
 0x58b   :  { %v1377_v29 = vmul.f32 %v4830_v18, %v1358_v25 }
 0x58d   :  { %v4845_v31 = vsub.f32 %v1346_v53, %v1377_v29 }
 0x58f   :  { %v1389_v30 = vmul.f32 %v4845_v31, %v4845_v31 }
 0x591   :  { %v1399_v32 = vsel %vm596_vm3, %v1389_v30, 0.0 }
 0x592   :  { %v1361_v47 = vpop.xlane.xlu1 %1360  ;;  %1400 = vadd.xlane.f32.xlu2 %v1399_v32 }
 0x593   :  { %v1378_v33 = vmul.f32 %v4830_v18, %v1361_v47 }
 0x595   :  { %v4851_v19 = vsub.f32 %v1347_v38, %v1378_v33 }
 0x597   :  { %v1390_v34 = vmul.f32 %v4851_v19, %v4851_v19 }
 0x599   :  { %v1402_v35 = vsel %vm596_vm3, %v1390_v34, 0.0 }
 0x59a   :  { %1403 = vadd.xlane.f32.xlu0 %v1402_v35  ;;  %v1364_v26 = vpop.xlane.xlu2 %1363 }
 0x59b   :  { %v1379_v49 = vmul.f32 %v4830_v18, %v1364_v26 }
 0x59d   :  { %v4857_v36 = vsub.f32 %v1348_v39, %v1379_v49 }
 0x59f   :  { %v1391_v37 = vmul.f32 %v4857_v36, %v4857_v36 }
 0x5a1   :  { %v1405_v40 = vsel %vm596_vm3, %v1391_v37, 0.0 }
 0x5a2   :  { %1406 = vadd.xlane.f32.xlu1 %v1405_v40  ;;  %v1367_v42 = vpop.xlane.xlu2 %1366 }
 0x5a3   :  { %v1380_v50 = vmul.f32 %v4830_v18, %v1367_v42 }
 0x5a5   :  { %v4863_v43 = vsub.f32 %v1349_v56, %v1380_v50 }
 0x5a7   :  { %v1392_v51 = vmul.f32 %v4863_v43, %v4863_v43 }
 0x5a9   :  { %v1408_v52 = vsel %vm596_vm3, %v1392_v51, 0.0 }
 0x5aa   :  { %1409 = vadd.xlane.f32.xlu2 %v1408_v52 }
 0x5f5   :  { %v1395_v46 = vpop.xlane.xlu0 %1394 }
 0x5f6   :  { %v1411_v58 = vmul.f32 %v1395_v46, %v4830_v18 }
 0x5f8   :  { %v1417_v41 = vadd.f32 1e-05, %v1411_v58 }
 0x5fa   :  { %3449 = vrsqrt.f32 %v1417_v41  ;;  %vm1429_vm6 = vweird.f32 %v1417_v41 }
 0x5fd   :  { %v1398_v48 = vpop.xlane.xlu1 %1397 }
 0x5fe   :  { %v1412_v22 = vmul.f32 %v1398_v48, %v4830_v18 }
 0x600   :  { %v3450_v28 = vpop.eup %3449  ;;  %v1418_v61 = vadd.f32 1e-05, %v1412_v22 }
 0x601   :  { %v1424_v62 = vmul.f32 %v3450_v28, %v1417_v41  ;;  %vm1430_vm5 = vweird.f32 %v3450_v28 }
 0x602   :  { %3451 = vrsqrt.f32 %v1418_v61  ;;  %vm1431_vm7 = vmor %vm1429_vm6, %vm1430_vm5  ;;  %vm1439_vm9 = vweird.f32 %v1418_v61 }
 0x603   :  { %v1425_v45 = vmul.f32 %v3450_v28, %v1424_v62 }
 0x605   :  { %v1426_v44 = vmul.f32 0.5, %v1425_v45  ;;  %v1401_v63 = vpop.xlane.xlu2 %1400 }
 0x606   :  { %v1413_v53 = vmul.f32 %v1401_v63, %v4830_v18 }
 0x607   :  { %v1427_v0 = vsub.f32 1.5, %v1426_v44 }
 0x608   :  { %v3452_v1 = vpop.eup %3451  ;;  %v1419_v55 = vadd.f32 1e-05, %v1413_v53 }
 0x609   :  { %v1428_v38 = vmul.f32 %v3450_v28, %v1427_v0  ;;  %v1434_v2 = vmul.f32 %v3452_v1, %v1418_v61  ;;  %vm1440_vm8 = vweird.f32 %v3452_v1 }
 0x60a   :  { %3453 = vrsqrt.f32 %v1419_v55  ;;  %vm1441_vm10 = vmor %vm1439_vm9, %vm1440_vm8  ;;  %vm1449_vm12 = vweird.f32 %v1419_v55  ;;  %vm1642_vm8 = vcmask 523264  }
 0x60b   :  { %v1435_v4 = vmul.f32 %v3452_v1, %v1434_v2  ;;  %v1432_v5 = vsel %vm1431_vm7, %v3450_v28, %v1428_v38 }
 0x60c   :  { %v1483_v13 = vmul.f32 %v1432_v5, %v4833_v3 }
 0x60d   :  { %v1436_v39 = vmul.f32 0.5, %v1435_v4  ;;  %v1404_v8 = vpop.xlane.xlu0 %1403 }
 0x60e   :  { %v1414_v9 = vmul.f32 %v1404_v8, %v4830_v18  ;;  %v1492_v20 = vmul.f32 %v4872_v11, %v1483_v13 }
 0x60f   :  { %v1437_v10 = vsub.f32 1.5, %v1436_v39 }
 0x610   :  { %v3454_v56 = vpop.eup %3453  ;;  %v1420_v57 = vadd.f32 1e-05, %v1414_v9  ;;  %v4882_v25 = vadd.f32 %v4875_v6, %v1492_v20  ;;  %v3294_v9 = vld [vmem:[%s5386_s17 + $0x18] sm:$0xff] }
 0x611   :  { %v1438_v14 = vmul.f32 %v3452_v1, %v1437_v10  ;;  %v1444_v15 = vmul.f32 %v3454_v56, %v1419_v55  ;;  %vm1450_vm11 = vweird.f32 %v3454_v56  ;;  %1656 = vmatpush.bf16.msra.mxu2 %v3294_v9  ;;  %v4919_v10 = vld [vmem:[#allocation35] ss:$0 sm:$0xff] }
 0x612   :  { %3455 = vrsqrt.f32 %v1420_v57  ;;  %vm1451_vm13 = vmor %vm1449_vm12, %vm1450_vm11  ;;  %vm1459_vm15 = vweird.f32 %v1420_v57 }
 0x613   :  { %v1442_v16 = vsel %vm1441_vm10, %v3452_v1, %v1438_v14  ;;  %v1445_v17 = vmul.f32 %v3454_v56, %v1444_v15  ;;  %v3291_v14 = vld [vmem:[%s5386_s17] sm:$0xff] }
 0x614   :  { %v1484_v7 = vmul.f32 %v1442_v16, %v4839_v54 }
 0x615   :  { %v1446_v12 = vmul.f32 0.5, %v1445_v17  ;;  %v1407_v21 = vpop.xlane.xlu1 %1406  ;;  %v4925_v17 = vld [vmem:[%s5384_s1 + $0x18] sm:$0xff] }
 0x616   :  { %v1493_v23 = vmul.f32 %v4872_v11, %v1484_v7  ;;  %v1415_v3 = vmul.f32 %v1407_v21, %v4830_v18 }
 0x617   :  { %v1447_v24 = vsub.f32 1.5, %v1446_v12  ;;  %v4930_v12 = vld [vmem:[%s5384_s1 + $0x10] sm:$0xff] }
 0x618   :  { %v3456_v59 = vpop.eup %3455  ;;  %v4885_v29 = vadd.f32 %v4875_v6, %v1493_v23  ;;  %v1421_v30 = vadd.f32 1e-05, %v1415_v3  ;;  %v4934_v3 = vld [vmem:[%s5384_s1 + $0x8] sm:$0xff] }
 0x619   :  { %v1448_v32 = vmul.f32 %v3454_v56, %v1447_v24  ;;  %v1454_v47 = vmul.f32 %v3456_v59, %v1420_v57  ;;  %vm1460_vm14 = vweird.f32 %v3456_v59 }
 0x61a   :  { %3457 = vrsqrt.f32 %v1421_v30  ;;  %v1507_v54 = vpack.c.bf16 %v4885_v29, %v4882_v25  ;;  %vm1461_vm0 = vmor %vm1459_vm15, %vm1460_vm14  ;;  %vm1469_vm2 = vweird.f32 %v1421_v30 }
 0x61b   :  { %v1455_v33 = vmul.f32 %v3456_v59, %v1454_v47  ;;  %v1452_v34 = vsel %vm1451_vm13, %v3454_v56, %v1448_v32 }
 0x61c   :  { %3140 = vmatmul.msk.bf16.vlgmr.msrb.gmra.mxu1 %vm596_vm3, %v1507_v54  ;;  %v1485_v42 = vmul.f32 %v1452_v34, %v4845_v31 }
 0x61d   :  { %v1456_v35 = vmul.f32 0.5, %v1455_v33  ;;  %v1410_v26 = vpop.xlane.xlu2 %1409 }
 0x61e   :  { %v1416_v49 = vmul.f32 %v1410_v26, %v4830_v18  ;;  %v1494_v27 = vmul.f32 %v4872_v11, %v1485_v42 }
 0x61f   :  { %v1457_v37 = vsub.f32 1.5, %v1456_v35 }
 0x620   :  { %v3458_v40 = vpop.eup %3457  ;;  %v1422_v50 = vadd.f32 1e-05, %v1416_v49  ;;  %v4896_v61 = vadd.f32 %v4875_v6, %v1494_v27 }
 0x621   :  { %v1458_v51 = vmul.f32 %v3456_v59, %v1457_v37  ;;  %v1464_v52 = vmul.f32 %v3458_v40, %v1421_v30  ;;  %vm1470_vm1 = vweird.f32 %v3458_v40 }
 0x622   :  { %3459 = vrsqrt.f32 %v1422_v50  ;;  %vm1471_vm4 = vmor %vm1469_vm2, %vm1470_vm1  ;;  %vm1479_vm6 = vweird.f32 %v1422_v50 }
 0x623   :  { %v1462_v46 = vsel %vm1461_vm0, %v3456_v59, %v1458_v51  ;;  %v1465_v58 = vmul.f32 %v3458_v40, %v1464_v52  ;;  %v4938_v59 = vld [vmem:[%s5384_s1] sm:$0xff] }
 0x624   :  { %v1486_v41 = vmul.f32 %v1462_v46, %v4851_v19 }
 0x625   :  { %v1466_v60 = vmul.f32 0.5, %v1465_v58 }
 0x626   :  { %v1495_v48 = vmul.f32 %v4872_v11, %v1486_v41 }
 0x627   :  { %v1467_v22 = vsub.f32 1.5, %v1466_v60 }
 0x628   :  { %v3460_v28 = vpop.eup %3459  ;;  %v4899_v31 = vadd.f32 %v4875_v6, %v1495_v48 }
 0x629   :  { %v1468_v62 = vmul.f32 %v3458_v40, %v1467_v22  ;;  %v1474_v45 = vmul.f32 %v3460_v28, %v1422_v50  ;;  %vm1480_vm5 = vweird.f32 %v3460_v28 }
 0x62a   :  { %v1508_v44 = vpack.c.bf16 %v4899_v31, %v4896_v61  ;;  %vm1481_vm7 = vmor %vm1479_vm6, %vm1480_vm5 }
 0x62b   :  { %v1475_v19 = vmul.f32 %v3460_v28, %v1474_v45  ;;  %v1472_v63 = vsel %vm1471_vm4, %v3458_v40, %v1468_v62 }
 0x62c   :  { %3141 = vmatmul.msk.bf16.gmra.mxu1 %vm596_vm3, %v1508_v44  ;;  %v1487_v1 = vmul.f32 %v1472_v63, %v4857_v36 }
 0x62d   :  { %v1476_v53 = vmul.f32 0.5, %v1475_v19 }
 0x62e   :  { %v1496_v4 = vmul.f32 %v4872_v11, %v1487_v1 }
 0x62f   :  { %v1477_v0 = vsub.f32 1.5, %v1476_v53 }
 0x630   :  { %v4909_v39 = vadd.f32 %v4875_v6, %v1496_v4 }
 0x631   :  { %v1478_v55 = vmul.f32 %v3460_v28, %v1477_v0 }
 0x633   :  { %v1482_v38 = vsel %vm1481_vm7, %v3460_v28, %v1478_v55 }
 0x634   :  { %v1488_v2 = vmul.f32 %v1482_v38, %v4863_v43  ;;  %v3293_v43 = vld [vmem:[%s5386_s17 + $0x10] sm:$0xff] }
 0x635   :  { %1657 = vmatpush.bf16.msra.mxu2 %v3293_v43 }
 0x636   :  { %v1497_v5 = vmul.f32 %v4872_v11, %v1488_v2  ;;  %v3292_v11 = vld [vmem:[%s5386_s17 + $0x8] sm:$0xff] }
 0x638   :  { %v4912_v8 = vadd.f32 %v4875_v6, %v1497_v5 }
 0x639   :  { %1658 = vmatpush.bf16.msra.mxu2 %v3292_v11 }
 0x63a   :  { %v1509_v36 = vpack.c.bf16 %v4912_v8, %v4909_v39 }
 0x63c   :  { %3142 = vmatmul.msk.bf16.gmra.mxu1 %vm596_vm3, %v1509_v36 }
 0x63d   :  { %1659 = vmatpush.bf16.msra.mxu2 %v3291_v14 }
 0x641   :  { %2035 = vmatpush.msrb.mxu2 %v4925_v17 }
 0x643   :  { %2036 = vmatpush.msrb.mxu2 %v4930_v12 }
 0x645   :  { %2037 = vmatpush.msrb.mxu2 %v4934_v3 }
 0x647   :  { %2038 = vmatpush.msrb.mxu2 %v4938_v59 }
 0x699   :  { %v1543_v56 = vpop.f32.mrf.mxu1 }
 0x69a   :  { %v1544_v13 = vadd.f32 %v4919_v10, %v1543_v56 }
 0x69c   :  { %v1558_v57 = vmul.f32 %v1544_v13, %v1544_v13 }
 0x69e   :  { %v1564_v15 = vmul.f32 %v1558_v57, %v1544_v13 }
 0x6a0   :  { %v1570_v16 = vmul.f32 0.044715, %v1564_v15 }
 0x6a1   :  { %v1545_v6 = vpop.f32.mrf.mxu1 }
 0x6a2   :  { %v1576_v20 = vadd.f32 %v1570_v16, %v1544_v13  ;;  %v1546_v7 = vadd.f32 %v4919_v10, %v1545_v6 }
 0x6a4   :  { %v1582_v21 = vmul.f32 0.7978846, %v1576_v20  ;;  %v1559_v23 = vmul.f32 %v1546_v7, %v1546_v7 }
 0x6a6   :  { %v1565_v24 = vmul.f32 %v1559_v23, %v1546_v7  ;;  %3461 = vtanh.f32 %v1582_v21 }
 0x6a8   :  { %v1571_v30 = vmul.f32 0.044715, %v1565_v24 }
 0x6a9   :  { %v1548_v32 = vpop.f32.mrf.mxu1 }
 0x6aa   :  { %v1577_v47 = vadd.f32 %v1571_v30, %v1546_v7  ;;  %v1549_v54 = vadd.f32 %v4919_v10, %v1548_v32 }
 0x6ac   :  { %v1583_v33 = vmul.f32 0.7978846, %v1577_v47  ;;  %v1560_v34 = vmul.f32 %v1549_v54, %v1549_v54  ;;  %v3462_v35 = vpop.eup %3461 }
 0x6ad   :  { %v1594_v37 = vadd.f32 1.0, %v3462_v35  ;;  %v3386_v35 = vld [vmem:[#allocation37] ss:$0 sm:$0xff] }
 0x6ae   :  { %3463 = vtanh.f32 %v1583_v33  ;;  %v1566_v26 = vmul.f32 %v1560_v34, %v1549_v54 }
 0x6af   :  { %v1600_v58 = vmul.f32 0.5, %v1594_v37 }
 0x6b0   :  { %v1572_v49 = vmul.f32 0.044715, %v1566_v26 }
 0x6b1   :  { %v1550_v40 = vpop.f32.mrf.mxu1  ;;  %v1606_v22 = vmul.f32 %v1600_v58, %v1544_v13 }
 0x6b2   :  { %v1578_v42 = vadd.f32 %v1572_v49, %v1549_v54  ;;  %v1551_v50 = vadd.f32 %v4919_v10, %v1550_v40 }
 0x6b4   :  { %v3464_v51 = vpop.eup %3463  ;;  %v1584_v52 = vmul.f32 0.7978846, %v1578_v42  ;;  %v1561_v46 = vmul.f32 %v1551_v50, %v1551_v50 }
 0x6b5   :  { %v1595_v41 = vadd.f32 1.0, %v3464_v51 }
 0x6b6   :  { %v1567_v27 = vmul.f32 %v1561_v46, %v1551_v50  ;;  %3465 = vtanh.f32 %v1584_v52 }
 0x6b7   :  { %v1601_v60 = vmul.f32 0.5, %v1595_v41 }
 0x6b8   :  { %v1573_v48 = vmul.f32 0.044715, %v1567_v27 }
 0x6b9   :  { %v1607_v28 = vmul.f32 %v1601_v60, %v1546_v7  ;;  %v1553_v62 = vpop.f32.mrf.mxu1 }
 0x6ba   :  { %v1579_v45 = vadd.f32 %v1573_v48, %v1551_v50  ;;  %v1554_v44 = vadd.f32 %v4919_v10, %v1553_v62 }
 0x6bb   :  { %v1612_v19 = vpack.c.bf16 %v1607_v28, %v1606_v22 }
 0x6bc   :  { %v1585_v63 = vmul.f32 0.7978846, %v1579_v45  ;;  %v1562_v53 = vmul.f32 %v1554_v44, %v1554_v44  ;;  %v3466_v0 = vpop.eup %3465 }
 0x6bd   :  { %3159 = vmatmul.msk.bf16.vlgmr.msra.gmra.mxu2 %vm1642_vm8, %v1612_v19  ;;  %v1596_v2 = vadd.f32 1.0, %v3466_v0 }
 0x6be   :  { %3467 = vtanh.f32 %v1585_v63  ;;  %v1568_v1 = vmul.f32 %v1562_v53, %v1554_v44  ;;  %2097 = vmatpush.msra.mxu2 %v4925_v17 }
 0x6bf   :  { %v1602_v11 = vmul.f32 0.5, %v1596_v2 }
 0x6c0   :  { %v1574_v55 = vmul.f32 0.044715, %v1568_v1  ;;  %2098 = vmatpush.msra.mxu2 %v4930_v12 }
 0x6c1   :  { %v1555_v38 = vpop.f32.mrf.mxu1  ;;  %v1608_v15 = vmul.f32 %v1602_v11, %v1549_v54 }
 0x6c2   :  { %v1580_v4 = vadd.f32 %v1574_v55, %v1554_v44  ;;  %v1556_v5 = vadd.f32 %v4919_v10, %v1555_v38  ;;  %2099 = vmatpush.msra.mxu2 %v4934_v3 }
 0x6c4   :  { %v3468_v36 = vpop.eup %3467  ;;  %v1586_v9 = vmul.f32 0.7978846, %v1580_v4  ;;  %v1563_v43 = vmul.f32 %v1556_v5, %v1556_v5  ;;  %2100 = vmatpush.msra.mxu2 %v4938_v59 }
 0x6c5   :  { %v1597_v56 = vadd.f32 1.0, %v3468_v36 }
 0x6c6   :  { %v1569_v13 = vmul.f32 %v1563_v43, %v1556_v5  ;;  %3469 = vtanh.f32 %v1586_v9 }
 0x6c7   :  { %v1603_v57 = vmul.f32 0.5, %v1597_v56 }
 0x6c8   :  { %v1575_v14 = vmul.f32 0.044715, %v1569_v13 }
 0x6c9   :  { %v1609_v16 = vmul.f32 %v1603_v57, %v1551_v50 }
 0x6ca   :  { %v1581_v6 = vadd.f32 %v1575_v14, %v1556_v5 }
 0x6cb   :  { %v1613_v20 = vpack.c.bf16 %v1609_v16, %v1608_v15 }
 0x6cc   :  { %v1587_v7 = vmul.f32 0.7978846, %v1581_v6  ;;  %v3470_v10 = vpop.eup %3469 }
 0x6cd   :  { %3160 = vmatmul.msk.bf16.gmra.mxu2 %vm1642_vm8, %v1613_v20  ;;  %v1598_v21 = vadd.f32 1.0, %v3470_v10 }
 0x6ce   :  { %3471 = vtanh.f32 %v1587_v7 }
 0x6cf   :  { %v1604_v30 = vmul.f32 0.5, %v1598_v21 }
 0x6d1   :  { %v1610_v47 = vmul.f32 %v1604_v30, %v1554_v44 }
 0x6d4   :  { %v3472_v23 = vpop.eup %3471 }
 0x6d5   :  { %v1599_v24 = vadd.f32 1.0, %v3472_v23 }
 0x6d7   :  { %v1605_v32 = vmul.f32 0.5, %v1599_v24 }
 0x6d9   :  { %v1611_v33 = vmul.f32 %v1605_v32, %v1556_v5  ;;  %v3298_v5 = vld [vmem:[%s5383_s23 + $0x18] sm:$0xff] }
 0x6da   :  { %1958 = vmatpush.bf16.msra.mxu0 %v3298_v5 }
 0x6db   :  { %v1614_v34 = vpack.c.bf16 %v1611_v33, %v1610_v47 }
 0x6dd   :  { %3161 = vmatmul.msk.bf16.gmra.mxu2 %vm1642_vm8, %v1614_v34 }
 0x740   :  { %v1661_v54 = vpop.f32.mrf.mxu2 }
 0x741   :  { %v1662_v26 = vadd.f32 %v3386_v35, %v1661_v54  ;;  %v3296_v54 = vld [vmem:[%s5382_s29 + $0x18] sm:$0xff] }
 0x742   :  { %1919 = vmatpush.bf16.msra.mxu3 %v3296_v54 }
 0x743   :  { %v1676_v49 = vadd.f32 %v1662_v26, %v4882_v25  ;;  %v3300_v26 = vld [vmem:[#allocation25 + $0x18] sm:$0xff] }
 0x744   :  { %1997 = vmatpush.bf16.msra.mxu1 %v3300_v26 }
 0x745   :  { %v1682_v37 = vsel %vm596_vm3, %v1676_v49, 0.0 }
 0x746   :  { %1683 = vadd.xlane.f32.xlu0 %v1682_v37  ;;  %v3299_v37 = vld [vmem:[#allocation25 + $0x10] sm:$0xff] }
 0x748   :  { %v1663_v40 = vpop.f32.mrf.mxu2  ;;  %1998 = vmatpush.bf16.msra.mxu1 %v3299_v37 }
 0x749   :  { %v1664_v42 = vadd.f32 %v3386_v35, %v1663_v40 }
 0x74b   :  { %v1677_v50 = vadd.f32 %v1664_v42, %v4885_v29 }
 0x74c   :  { %2252 = vmatpush.msrb.mxu1 %v4925_v17 }
 0x74d   :  { %v1685_v51 = vsel %vm596_vm3, %v1677_v50, 0.0 }
 0x74e   :  { %1686 = vadd.xlane.f32.xlu1 %v1685_v51  ;;  %2253 = vmatpush.msrb.mxu1 %v4930_v12 }
 0x750   :  { %v1666_v52 = vpop.f32.mrf.mxu2  ;;  %2254 = vmatpush.msrb.mxu1 %v4934_v3 }
 0x751   :  { %v1667_v46 = vadd.f32 %v3386_v35, %v1666_v52 }
 0x752   :  { %2255 = vmatpush.msrb.mxu1 %v4938_v59 }
 0x753   :  { %v1678_v58 = vadd.f32 %v1667_v46, %v4896_v61 }
 0x755   :  { %v1688_v41 = vsel %vm596_vm3, %v1678_v58, 0.0 }
 0x756   :  { %1689 = vadd.xlane.f32.xlu2 %v1688_v41 }
 0x758   :  { %v1668_v27 = vpop.f32.mrf.mxu2 }
 0x759   :  { %v1669_v60 = vadd.f32 %v3386_v35, %v1668_v27 }
 0x75b   :  { %v1679_v25 = vadd.f32 %v1669_v60, %v4899_v31 }
 0x75d   :  { %v1691_v48 = vsel %vm596_vm3, %v1679_v25, 0.0 }
 0x75e   :  { %1692 = vadd.xlane.f32.xlu0 %v1691_v48 }
 0x760   :  { %v1671_v22 = vpop.f32.mrf.mxu2 }
 0x761   :  { %v1672_v28 = vadd.f32 %v3386_v35, %v1671_v22 }
 0x763   :  { %v1680_v29 = vadd.f32 %v1672_v28, %v4909_v39 }
 0x765   :  { %v1694_v62 = vsel %vm596_vm3, %v1680_v29, 0.0 }
 0x766   :  { %1695 = vadd.xlane.f32.xlu1 %v1694_v62 }
 0x768   :  { %v1673_v45 = vpop.f32.mrf.mxu2 }
 0x769   :  { %v1674_v44 = vadd.f32 %v3386_v35, %v1673_v45  ;;  %v3297_v35 = vld [vmem:[%s5383_s23 + $0x10] sm:$0xff] }
 0x76a   :  { %1959 = vmatpush.bf16.msra.mxu0 %v3297_v35 }
 0x76b   :  { %v1681_v61 = vadd.f32 %v1674_v44, %v4912_v8 }
 0x76d   :  { %v1697_v19 = vsel %vm596_vm3, %v1681_v61, 0.0 }
 0x76e   :  { %1698 = vadd.xlane.f32.xlu2 %v1697_v19  ;;  %2221 = vmatpush.msrb.mxu0 %v4925_v17 }
 0x770   :  { %2222 = vmatpush.msrb.mxu0 %v4930_v12 }
 0x772   :  { %2223 = vmatpush.msrb.mxu0 %v4934_v3 }
 0x774   :  { %2224 = vmatpush.msrb.mxu0 %v4938_v59 }
 0x7b9   :  { %v1684_v63 = vpop.xlane.xlu0 %1683 }
 0x7ba   :  { %v1700_v31 = vmul.f32 %v1684_v63, %v4830_v18 }
 0x7bc   :  { %v4965_v53 = vsub.f32 %v1676_v49, %v1700_v31  ;;  %v3295_v49 = vld [vmem:[%s5382_s29 + $0x10] sm:$0xff]  ;;  %v5021_v31 = vld [vmem:[%s4423_s13] ss:$0 sm:$0xff] }
 0x7bd   :  { %1920 = vmatpush.bf16.msra.mxu3 %v3295_v49 }
 0x7be   :  { %v1712_v0 = vmul.f32 %v4965_v53, %v4965_v53 }
 0x7c0   :  { %v1718_v39 = vsel %vm596_vm3, %v1712_v0, 0.0 }
 0x7c1   :  { %v1687_v1 = vpop.xlane.xlu1 %1686  ;;  %1719 = vadd.xlane.f32.xlu0 %v1718_v39  ;;  %2066 = vmatpush.msrb.mxu3 %v4925_v17 }
 0x7c2   :  { %v1701_v55 = vmul.f32 %v1687_v1, %v4830_v18 }
 0x7c3   :  { %2067 = vmatpush.msrb.mxu3 %v4930_v12 }
 0x7c4   :  { %v4971_v38 = vsub.f32 %v1677_v50, %v1701_v55 }
 0x7c5   :  { %2068 = vmatpush.msrb.mxu3 %v4934_v3 }
 0x7c6   :  { %v1713_v8 = vmul.f32 %v4971_v38, %v4971_v38 }
 0x7c7   :  { %2069 = vmatpush.msrb.mxu3 %v4938_v59 }
 0x7c8   :  { %v1721_v2 = vsel %vm596_vm3, %v1713_v8, 0.0 }
 0x7c9   :  { %1722 = vadd.xlane.f32.xlu1 %v1721_v2  ;;  %v1690_v4 = vpop.xlane.xlu2 %1689 }
 0x7ca   :  { %v1702_v36 = vmul.f32 %v1690_v4, %v4830_v18  ;;  %v5024_v4 = vld [vmem:[#allocation38] ss:$0 sm:$0xff] }
 0x7cc   :  { %v4978_v9 = vsub.f32 %v1678_v58, %v1702_v36 }
 0x7ce   :  { %v1714_v43 = vmul.f32 %v4978_v9, %v4978_v9 }
 0x7d0   :  { %v1724_v56 = vsel %vm596_vm3, %v1714_v43, 0.0 }
 0x7d1   :  { %v1693_v11 = vpop.xlane.xlu0 %1692  ;;  %1725 = vadd.xlane.f32.xlu2 %v1724_v56 }
 0x7d2   :  { %v1703_v13 = vmul.f32 %v1693_v11, %v4830_v18 }
 0x7d4   :  { %v4984_v57 = vsub.f32 %v1679_v25, %v1703_v13 }
 0x7d6   :  { %v1715_v14 = vmul.f32 %v4984_v57, %v4984_v57 }
 0x7d8   :  { %v1727_v15 = vsel %vm596_vm3, %v1715_v14, 0.0 }
 0x7d9   :  { %1728 = vadd.xlane.f32.xlu0 %v1727_v15  ;;  %v1696_v16 = vpop.xlane.xlu1 %1695 }
 0x7da   :  { %v1704_v6 = vmul.f32 %v1696_v16, %v4830_v18 }
 0x7dc   :  { %v4990_v20 = vsub.f32 %v1680_v29, %v1704_v6 }
 0x7de   :  { %v1716_v7 = vmul.f32 %v4990_v20, %v4990_v20 }
 0x7e0   :  { %v1730_v10 = vsel %vm596_vm3, %v1716_v7, 0.0 }
 0x7e1   :  { %1731 = vadd.xlane.f32.xlu1 %v1730_v10  ;;  %v1699_v21 = vpop.xlane.xlu2 %1698 }
 0x7e2   :  { %v1705_v23 = vmul.f32 %v1699_v21, %v4830_v18 }
 0x7e4   :  { %v4996_v24 = vsub.f32 %v1681_v61, %v1705_v23 }
 0x7e6   :  { %v1717_v30 = vmul.f32 %v4996_v24, %v4996_v24 }
 0x7e8   :  { %v1733_v32 = vsel %vm596_vm3, %v1717_v30, 0.0 }
 0x7e9   :  { %1734 = vadd.xlane.f32.xlu2 %v1733_v32 }
 0x834   :  { %v1720_v47 = vpop.xlane.xlu0 %1719 }
 0x835   :  { %v1736_v33 = vmul.f32 %v1720_v47, %v4830_v18 }
 0x837   :  { %v1742_v34 = vadd.f32 1e-05, %v1736_v33 }
 0x839   :  { %3473 = vrsqrt.f32 %v1742_v34  ;;  %vm1754_vm10 = vweird.f32 %v1742_v34 }
 0x83c   :  { %v1723_v40 = vpop.xlane.xlu1 %1722 }
 0x83d   :  { %v1737_v42 = vmul.f32 %v1723_v40, %v4830_v18 }
 0x83f   :  { %v3474_v50 = vpop.eup %3473  ;;  %v1743_v51 = vadd.f32 1e-05, %v1737_v42 }
 0x840   :  { %v1749_v52 = vmul.f32 %v3474_v50, %v1742_v34  ;;  %vm1755_vm9 = vweird.f32 %v3474_v50 }
 0x841   :  { %3475 = vrsqrt.f32 %v1743_v51  ;;  %vm1756_vm11 = vmor %vm1754_vm10, %vm1755_vm9  ;;  %vm1764_vm13 = vweird.f32 %v1743_v51 }
 0x842   :  { %v1750_v46 = vmul.f32 %v3474_v50, %v1749_v52 }
 0x844   :  { %v1751_v58 = vmul.f32 0.5, %v1750_v46  ;;  %v1726_v41 = vpop.xlane.xlu2 %1725 }
 0x845   :  { %v1738_v27 = vmul.f32 %v1726_v41, %v4830_v18 }
 0x846   :  { %v1752_v60 = vsub.f32 1.5, %v1751_v58 }
 0x847   :  { %v3476_v25 = vpop.eup %3475  ;;  %v1744_v48 = vadd.f32 1e-05, %v1738_v27 }
 0x848   :  { %v1753_v22 = vmul.f32 %v3474_v50, %v1752_v60  ;;  %v1759_v28 = vmul.f32 %v3476_v25, %v1743_v51  ;;  %vm1765_vm12 = vweird.f32 %v3476_v25 }
 0x849   :  { %3477 = vrsqrt.f32 %v1744_v48  ;;  %vm1766_vm14 = vmor %vm1764_vm13, %vm1765_vm12  ;;  %vm1774_vm0 = vweird.f32 %v1744_v48 }
 0x84a   :  { %v1760_v29 = vmul.f32 %v3476_v25, %v1759_v28  ;;  %v1757_v62 = vsel %vm1756_vm11, %v3474_v50, %v1753_v22 }
 0x84b   :  { %v1808_v0 = vmul.f32 %v1757_v62, %v4965_v53 }
 0x84c   :  { %v1761_v45 = vmul.f32 0.5, %v1760_v29  ;;  %v1729_v44 = vpop.xlane.xlu0 %1728 }
 0x84d   :  { %v1739_v61 = vmul.f32 %v1729_v44, %v4830_v18  ;;  %v1817_v5 = vmul.f32 %v5021_v31, %v1808_v0 }
 0x84e   :  { %v1762_v19 = vsub.f32 1.5, %v1761_v45 }
 0x84f   :  { %v3478_v63 = vpop.eup %3477  ;;  %v1745_v39 = vadd.f32 1e-05, %v1739_v61  ;;  %v5031_v15 = vadd.f32 %v5024_v4, %v1817_v5 }
 0x850   :  { %v1763_v1 = vmul.f32 %v3476_v25, %v1762_v19  ;;  %v1769_v55 = vmul.f32 %v3478_v63, %v1744_v48  ;;  %vm1775_vm15 = vweird.f32 %v3478_v63 }
 0x851   :  { %3479 = vrsqrt.f32 %v1745_v39  ;;  %vm1776_vm1 = vmor %vm1774_vm0, %vm1775_vm15  ;;  %vm1784_vm4 = vweird.f32 %v1745_v39 }
 0x852   :  { %v1767_v8 = vsel %vm1766_vm14, %v3476_v25, %v1763_v1  ;;  %v1770_v2 = vmul.f32 %v3478_v63, %v1769_v55  ;;  %v3391_v1 = vld [vmem:[%s5385_s7 + $0x1] ss:$0 sm:$0xff] }
 0x853   :  { %v1809_v36 = vmul.f32 %v1767_v8, %v4971_v38 }
 0x854   :  { %v1771_v43 = vmul.f32 0.5, %v1770_v2  ;;  %v1732_v56 = vpop.xlane.xlu1 %1731 }
 0x855   :  { %v1818_v11 = vmul.f32 %v5021_v31, %v1809_v36  ;;  %v1740_v53 = vmul.f32 %v1732_v56, %v4830_v18 }
 0x856   :  { %v1772_v13 = vsub.f32 1.5, %v1771_v43 }
 0x857   :  { %v3480_v14 = vpop.eup %3479  ;;  %v5034_v16 = vadd.f32 %v5024_v4, %v1818_v11  ;;  %v1746_v6 = vadd.f32 1e-05, %v1740_v53 }
 0x858   :  { %v1773_v7 = vmul.f32 %v3478_v63, %v1772_v13  ;;  %v1779_v10 = vmul.f32 %v3480_v14, %v1745_v39  ;;  %vm1785_vm2 = vweird.f32 %v3480_v14  ;;  %v3389_v39 = vld [vmem:[#allocation23 + $0x1] ss:$0 sm:$0xff] }
 0x859   :  { %3481 = vrsqrt.f32 %v1746_v6  ;;  %v1886_v38 = vpack.c.bf16 %v5034_v16, %v5031_v15  ;;  %vm1786_vm5 = vmor %vm1784_vm4, %vm1785_vm2  ;;  %vm1794_vm7 = vweird.f32 %v1746_v6 }
 0x85a   :  { %v1780_v21 = vmul.f32 %v3480_v14, %v1779_v10  ;;  %v1777_v23 = vsel %vm1776_vm1, %v3478_v63, %v1773_v7 }
 0x85b   :  { %3188 = vmatmul.msk.bf16.vlgmr.msra.gmra.mxu3 %vm596_vm3, %v1886_v38  ;;  %3199 = vmatmul.msk.bf16.vlgmr.msra.gmra.mxu0 %vm596_vm3, %v1886_v38  ;;  %v1810_v35 = vmul.f32 %v1777_v23, %v4978_v9 }
 0x85c   :  { %v1781_v30 = vmul.f32 0.5, %v1780_v21  ;;  %3210 = vmatmul.msk.bf16.vlgmr.msra.gmra.mxu1 %vm596_vm3, %v1886_v38  ;;  %v1735_v32 = vpop.xlane.xlu2 %1734  ;;  %2128 = vmatpush.msra.mxu3 %v4925_v17 }
 0x85d   :  { %v1741_v47 = vmul.f32 %v1735_v32, %v4830_v18  ;;  %v1819_v50 = vmul.f32 %v5021_v31, %v1810_v35 }
 0x85e   :  { %v1782_v33 = vsub.f32 1.5, %v1781_v30  ;;  %2129 = vmatpush.msra.mxu3 %v4930_v12 }
 0x85f   :  { %v3482_v34 = vpop.eup %3481  ;;  %v1747_v54 = vadd.f32 1e-05, %v1741_v47  ;;  %v5051_v58 = vadd.f32 %v5024_v4, %v1819_v50 }
 0x860   :  { %v1783_v26 = vmul.f32 %v3480_v14, %v1782_v33  ;;  %v1789_v49 = vmul.f32 %v3482_v34, %v1746_v6  ;;  %2130 = vmatpush.msra.mxu3 %v4934_v3  ;;  %vm1795_vm6 = vweird.f32 %v3482_v34 }
 0x861   :  { %3483 = vrsqrt.f32 %v1747_v54  ;;  %vm1796_vm9 = vmor %vm1794_vm7, %vm1795_vm6  ;;  %vm1804_vm11 = vweird.f32 %v1747_v54 }
 0x862   :  { %v1787_v37 = vsel %vm1786_vm5, %v3480_v14, %v1783_v26  ;;  %v1790_v40 = vmul.f32 %v3482_v34, %v1789_v49  ;;  %2131 = vmatpush.msra.mxu3 %v4938_v59 }
 0x863   :  { %v1811_v42 = vmul.f32 %v1787_v37, %v4984_v57 }
 0x864   :  { %v1791_v51 = vmul.f32 0.5, %v1790_v40 }
 0x865   :  { %v1820_v52 = vmul.f32 %v5021_v31, %v1811_v42 }
 0x866   :  { %v1792_v9 = vsub.f32 1.5, %v1791_v51 }
 0x867   :  { %v3484_v46 = vpop.eup %3483  ;;  %v5054_v41 = vadd.f32 %v5024_v4, %v1820_v52 }
 0x868   :  { %v1793_v27 = vmul.f32 %v3482_v34, %v1792_v9  ;;  %v1799_v60 = vmul.f32 %v3484_v46, %v1747_v54  ;;  %vm1805_vm10 = vweird.f32 %v3484_v46 }
 0x869   :  { %v1887_v25 = vpack.c.bf16 %v5054_v41, %v5051_v58  ;;  %vm1806_vm12 = vmor %vm1804_vm11, %vm1805_vm10 }
 0x86a   :  { %v1800_v57 = vmul.f32 %v3484_v46, %v1799_v60  ;;  %v1797_v48 = vsel %vm1796_vm9, %v3482_v34, %v1793_v27 }
 0x86b   :  { %3189 = vmatmul.msk.bf16.gmra.mxu3 %vm596_vm3, %v1887_v25  ;;  %3200 = vmatmul.msk.bf16.gmra.mxu0 %vm596_vm3, %v1887_v25  ;;  %v1812_v29 = vmul.f32 %v1797_v48, %v4990_v20 }
 0x86c   :  { %v1801_v22 = vmul.f32 0.5, %v1800_v57  ;;  %3211 = vmatmul.msk.bf16.gmra.mxu1 %vm596_vm3, %v1887_v25 }
 0x86d   :  { %v1821_v61 = vmul.f32 %v5021_v31, %v1812_v29 }
 0x86e   :  { %v1802_v28 = vsub.f32 1.5, %v1801_v22 }
 0x86f   :  { %v5066_v63 = vadd.f32 %v5024_v4, %v1821_v61 }
 0x870   :  { %v1803_v62 = vmul.f32 %v3484_v46, %v1802_v28 }
 0x872   :  { %v1807_v45 = vsel %vm1806_vm12, %v3484_v46, %v1803_v62 }
 0x873   :  { %v1813_v44 = vmul.f32 %v1807_v45, %v4996_v24 }
 0x875   :  { %v1822_v19 = vmul.f32 %v5021_v31, %v1813_v44 }
 0x877   :  { %v5069_v0 = vadd.f32 %v5024_v4, %v1822_v19 }
 0x879   :  { %v1888_v20 = vpack.c.bf16 %v5069_v0, %v5066_v63 }
 0x87b   :  { %3190 = vmatmul.msk.bf16.gmra.mxu3 %vm596_vm3, %v1888_v20  ;;  %3201 = vmatmul.msk.bf16.gmra.mxu0 %vm596_vm3, %v1888_v20 }
 0x87c   :  { %3212 = vmatmul.msk.bf16.gmra.mxu1 %vm596_vm3, %v1888_v20 }
 0x8d8   :  { %v1961_v24 = vpop.f32.mrf.mxu0 }
 0x8d9   :  { %v1962_v31 = vadd.f32 %v3389_v39, %v1961_v24  ;;  %v5107_v60 = vpop.f32.mrf.mxu1 }
 0x8de   :  { %v1922_v55 = vpop.f32.mrf.mxu3 }
 0x8df   :  { %v1923_v8 = vadd.f32 %v3391_v1, %v1922_v55 }
 0x8e0   :  { %v1963_v2 = vpop.f32.mrf.mxu0 }
 0x8e1   :  { %v2015_v5 = vmul.f32 %v1962_v31, %v1923_v8  ;;  %v1964_v36 = vadd.f32 %v3389_v39, %v1963_v2  ;;  %v5109_v25 = vpop.f32.mrf.mxu1 }
 0x8e3   :  { %3213 = vmatmul.msk.f32.vlgmr.msrb.gmra.mxu2 %vm596_vm3, %v2015_v5  ;;  %v3302_v5 = vld [vmem:[#allocation28 + $0x18] sm:$0xff] }
 0x8e4   :  { %2159 = vmatpush.msrb.mxu2 %v4925_v17 }
 0x8e6   :  { %v1924_v4 = vpop.f32.mrf.mxu3  ;;  %2160 = vmatpush.msrb.mxu2 %v4930_v12 }
 0x8e7   :  { %v1925_v43 = vadd.f32 %v3391_v1, %v1924_v4 }
 0x8e8   :  { %v1966_v56 = vpop.f32.mrf.mxu0  ;;  %2161 = vmatpush.msrb.mxu2 %v4934_v3 }
 0x8e9   :  { %v1967_v11 = vadd.f32 %v3389_v39, %v1966_v56  ;;  %v2016_v53 = vmul.f32 %v1964_v36, %v1925_v43  ;;  %v5111_v22 = vpop.f32.mrf.mxu1 }
 0x8ea   :  { %2162 = vmatpush.msrb.mxu2 %v4938_v59 }
 0x8eb   :  { %v2046_v13 = vmul.f32 %v1967_v11, %v1923_v8  ;;  %3214 = vmatmul.msk.f32.gmra.mxu2 %vm596_vm3, %v2016_v53 }
 0x8ed   :  { %3215 = vmatmul.msk.f32.vlgmr.msrb.gmra.mxu3 %vm596_vm3, %v2046_v13  ;;  %v3301_v13 = vld [vmem:[#allocation28 + $0x10] sm:$0xff] }
 0x8ee   :  { %v1927_v14 = vpop.f32.mrf.mxu3  ;;  %2190 = vmatpush.msrb.mxu3 %v4925_v17 }
 0x8ef   :  { %v1928_v21 = vadd.f32 %v3391_v1, %v1927_v14 }
 0x8f0   :  { %v1968_v6 = vpop.f32.mrf.mxu0  ;;  %2191 = vmatpush.msrb.mxu3 %v4930_v12 }
 0x8f1   :  { %v1969_v7 = vadd.f32 %v3389_v39, %v1968_v6  ;;  %v2108_v32 = vmul.f32 %v1962_v31, %v1928_v21  ;;  %v2139_v52 = vmul.f32 %v1967_v11, %v1928_v21  ;;  %v5113_v62 = vpop.f32.mrf.mxu1 }
 0x8f2   :  { %2192 = vmatpush.msrb.mxu3 %v4934_v3 }
 0x8f3   :  { %v2047_v10 = vmul.f32 %v1969_v7, %v1925_v43 }
 0x8f4   :  { %2193 = vmatpush.msrb.mxu3 %v4938_v59 }
 0x8f5   :  { %3216 = vmatmul.msk.f32.gmra.mxu3 %vm596_vm3, %v2047_v10 }
 0x8f6   :  { %v1929_v38 = vpop.f32.mrf.mxu3 }
 0x8f7   :  { %v1930_v34 = vadd.f32 %v3391_v1, %v1929_v38 }
 0x8f8   :  { %v1971_v23 = vpop.f32.mrf.mxu0 }
 0x8f9   :  { %v1972_v30 = vadd.f32 %v3389_v39, %v1971_v23  ;;  %v2109_v42 = vmul.f32 %v1964_v36, %v1930_v34 }
 0x8fb   :  { %v2077_v47 = vmul.f32 %v1972_v30, %v1923_v8  ;;  %v2170_v9 = vmul.f32 %v1972_v30, %v1928_v21  ;;  %v5115_v8 = vpop.f32.mrf.mxu1 }
 0x8fd   :  { %3217 = vmatmul.msk.f32.vlgmr.msra.gmra.mxu2 %vm596_vm3, %v2077_v47  ;;  %3219 = vmatmul.msk.f32.vlgmr.msra.gmra.mxu3 %vm596_vm3, %v2108_v32 }
 0x8fe   :  { %v1932_v33 = vpop.f32.mrf.mxu3  ;;  %2283 = vmatpush.msra.mxu2 %v4925_v17  ;;  %2459 = vmatpush.bf16.msra.mxu3 %v3302_v5 }
 0x8ff   :  { %v1933_v35 = vadd.f32 %v3391_v1, %v1932_v33 }
 0x900   :  { %v1973_v54 = vpop.f32.mrf.mxu0  ;;  %2284 = vmatpush.msra.mxu2 %v4930_v12 }
 0x901   :  { %v2201_v26 = vmul.f32 %v1962_v31, %v1933_v35  ;;  %v2232_v49 = vmul.f32 %v1967_v11, %v1933_v35  ;;  %v1974_v37 = vadd.f32 %v3389_v39, %v1973_v54  ;;  %v2263_v46 = vmul.f32 %v1972_v30, %v1933_v35 }
 0x902   :  { %2285 = vmatpush.msra.mxu2 %v4934_v3  ;;  %v2140_v3 = vmul.f32 %v1969_v7, %v1930_v34  ;;  %2460 = vmatpush.bf16.msra.mxu3 %v3301_v13 }
 0x903   :  { %v2078_v40 = vmul.f32 %v1974_v37, %v1925_v43  ;;  %3225 = vmatmul.msk.f32.vlgmr.msrb.gmra.mxu0 %vm596_vm3, %v2201_v26  ;;  %3227 = vmatmul.msk.f32.vlgmr.msrb.gmra.mxu1 %vm596_vm3, %v2232_v49 }
 0x904   :  { %2286 = vmatpush.msra.mxu2 %v4938_v59  ;;  %v2171_v59 = vmul.f32 %v1974_v37, %v1930_v34  ;;  %v2012_v34 = vpop.f32.mrf.mxu1 }
 0x905   :  { %3218 = vmatmul.msk.f32.gmra.mxu2 %vm596_vm3, %v2078_v40  ;;  %3220 = vmatmul.msk.f32.gmra.mxu3 %vm596_vm3, %v2109_v42 }
 0x906   :  { %v1934_v17 = vpop.f32.mrf.mxu3 }
 0x907   :  { %v1935_v50 = vadd.f32 %v3391_v1, %v1934_v17 }
 0x909   :  { %v2202_v12 = vmul.f32 %v1964_v36, %v1935_v50  ;;  %v2233_v51 = vmul.f32 %v1969_v7, %v1935_v50  ;;  %v2264_v27 = vmul.f32 %v1974_v37, %v1935_v50 }
 0x90b   :  { %3226 = vmatmul.msk.f32.gmra.mxu0 %vm596_vm3, %v2202_v12  ;;  %3228 = vmatmul.msk.f32.gmra.mxu1 %vm596_vm3, %v2233_v51  ;;  %v3390_v51 = vld [vmem:[#allocation26 + $0x1] ss:$0 sm:$0xff] }
 0x90d   :  { %3221 = vmatmul.msk.f32.vlgmr.msrb.gmra.mxu2 %vm596_vm3, %v2139_v52  ;;  %3223 = vmatmul.msk.f32.vlgmr.msrb.gmra.mxu3 %vm596_vm3, %v2170_v9 }
 0x915   :  { %3222 = vmatmul.msk.f32.gmra.mxu2 %vm596_vm3, %v2140_v3  ;;  %3224 = vmatmul.msk.f32.gmra.mxu3 %vm596_vm3, %v2171_v59 }
 0x91d   :  { %3229 = vmatmul.msk.f32.vlgmr.msra.gmra.mxu2 %vm596_vm3, %v2263_v46 }
 0x925   :  { %3230 = vmatmul.msk.f32.gmra.mxu2 %vm596_vm3, %v2264_v27 }
 0x966   :  { %v2040_v57 = vpop.f32.mrf.mxu2 }
 0x96e   :  { %v2043_v28 = vpop.f32.mrf.mxu2 }
 0x970   :  { %v2071_v48 = vpop.f32.mrf.mxu3 }
 0x971   :  { %v2294_v45 = vmax.f32 %v2040_v57, %v2071_v48 }
 0x978   :  { %v2074_v29 = vpop.f32.mrf.mxu3 }
 0x979   :  { %v2295_v2 = vmax.f32 %v2043_v28, %v2074_v29 }
 0x980   :  { %v2102_v44 = vpop.f32.mrf.mxu2  ;;  %v2133_v61 = vpop.f32.mrf.mxu3 }
 0x981   :  { %v2296_v19 = vmax.f32 %v2294_v45, %v2102_v44  ;;  %v2226_v59 = vpop.f32.mrf.mxu0 }
 0x983   :  { %v2298_v20 = vsub.f32 %v2040_v57, %v2296_v19  ;;  %v2304_v24 = vsub.f32 %v2071_v48, %v2296_v19  ;;  %v2310_v39 = vsub.f32 %v2102_v44, %v2296_v19  ;;  %v2257_v57 = vpop.f32.mrf.mxu1  ;;  %v5118_v44 = vadd.f32 %v3390_v51, %v5107_v60 }
 0x985   :  { %v2300_v1 = vmul.f32 1.442695, %v2298_v20  ;;  %v2306_v55 = vmul.f32 1.442695, %v2304_v24  ;;  %v2312_v31 = vmul.f32 1.442695, %v2310_v39  ;;  %v5124_v39 = vadd.f32 %v3390_v51, %v5109_v25 }
 0x987   :  { %3485 = vpow2.f32 %v2300_v1  ;;  %v2382_v1 = vmax.f32 %v2226_v59, %v2257_v57 }
 0x988   :  { %3487 = vpow2.f32 %v2306_v55  ;;  %v2105_v4 = vpop.f32.mrf.mxu2  ;;  %v2136_v36 = vpop.f32.mrf.mxu3 }
 0x989   :  { %v2297_v43 = vmax.f32 %v2295_v2, %v2105_v4  ;;  %3489 = vpow2.f32 %v2312_v31 }
 0x98b   :  { %v2299_v56 = vsub.f32 %v2043_v28, %v2297_v43  ;;  %v2305_v11 = vsub.f32 %v2074_v29, %v2297_v43  ;;  %v2311_v53 = vsub.f32 %v2105_v4, %v2297_v43  ;;  %v5129_v43 = vadd.f32 %v3390_v51, %v5113_v62 }
 0x98d   :  { %v3486_v14 = vpop.eup %3485  ;;  %v2302_v6 = vmul.f32 1.442695, %v2299_v56  ;;  %v2308_v7 = vmul.f32 1.442695, %v2305_v11  ;;  %v2314_v38 = vmul.f32 1.442695, %v2311_v53 }
 0x98e   :  { %v3488_v10 = vpop.eup %3487 }
 0x98f   :  { %v2316_v21 = vadd.f32 %v3488_v10, %v3486_v14  ;;  %3491 = vpow2.f32 %v2302_v6  ;;  %v3490_v23 = vpop.eup %3489 }
 0x990   :  { %3493 = vpow2.f32 %v2308_v7  ;;  %v2164_v30 = vpop.f32.mrf.mxu2  ;;  %v2195_v32 = vpop.f32.mrf.mxu3 }
 0x991   :  { %v2318_v47 = vadd.f32 %v3490_v23, %v2316_v21  ;;  %v2338_v33 = vmax.f32 %v2133_v61, %v2164_v30  ;;  %3495 = vpow2.f32 %v2314_v38 }
 0x993   :  { %3497 = vrcp.f32 %v2318_v47  ;;  %v2340_v35 = vmax.f32 %v2338_v33, %v2195_v32  ;;  %v2229_v33 = vpop.f32.mrf.mxu0 }
 0x995   :  { %v3492_v54 = vpop.eup %3491  ;;  %v2342_v26 = vsub.f32 %v2133_v61, %v2340_v35  ;;  %v2348_v49 = vsub.f32 %v2164_v30, %v2340_v35  ;;  %v2354_v37 = vsub.f32 %v2195_v32, %v2340_v35  ;;  %v5121_v61 = vadd.f32 %v3390_v51, %v5111_v22 }
 0x996   :  { %v3494_v40 = vpop.eup %3493  ;;  %v5132_v22 = vadd.f32 %v3390_v51, %v5115_v8 }
 0x997   :  { %v2317_v42 = vadd.f32 %v3494_v40, %v3492_v54  ;;  %v2344_v17 = vmul.f32 1.442695, %v2342_v26  ;;  %v2350_v50 = vmul.f32 1.442695, %v2348_v49  ;;  %v3496_v12 = vpop.eup %3495  ;;  %v2356_v52 = vmul.f32 1.442695, %v2354_v37 }
 0x998   :  { %v2167_v9 = vpop.f32.mrf.mxu2  ;;  %v2198_v48 = vpop.f32.mrf.mxu3 }
 0x999   :  { %v3498_v3 = vpop.eup %3497  ;;  %v2319_v46 = vadd.f32 %v3496_v12, %v2317_v42  ;;  %3499 = vpow2.f32 %v2344_v17  ;;  %v2339_v27 = vmax.f32 %v2136_v36, %v2167_v9 }
 0x99a   :  { %3501 = vpow2.f32 %v2350_v50  ;;  %v2322_v28 = vmul.f32 %v3498_v3, %v3486_v14  ;;  %v2326_v29 = vmul.f32 %v3498_v3, %v3488_v10  ;;  %v2332_v53 = vmul.f32 %v3498_v3, %v3490_v23 }
 0x99b   :  { %3503 = vrcp.f32 %v2319_v46  ;;  %v2341_v45 = vmax.f32 %v2339_v27, %v2198_v48 }
 0x99c   :  { %3505 = vpow2.f32 %v2356_v52  ;;  %v2324_v31 = vmul.f32 %v2322_v28, %v5118_v44  ;;  %v2328_v2 = vmul.f32 %v2326_v29, %v5121_v61 }
 0x99d   :  { %v2343_v19 = vsub.f32 %v2136_v36, %v2341_v45  ;;  %v2349_v20 = vsub.f32 %v2167_v9, %v2341_v45  ;;  %v2355_v24 = vsub.f32 %v2198_v48, %v2341_v45  ;;  %v5134_v36 = vadd.f32 %v3390_v51, %v2012_v34  ;;  %v2260_v34 = vpop.f32.mrf.mxu1 }
 0x99e   :  { %v2330_v21 = vadd.f32 %v2328_v2, %v2324_v31  ;;  %v2383_v17 = vmax.f32 %v2229_v33, %v2260_v34 }
 0x99f   :  { %v3500_v55 = vpop.eup %3499  ;;  %v2346_v5 = vmul.f32 1.442695, %v2343_v19  ;;  %v2352_v4 = vmul.f32 1.442695, %v2349_v20  ;;  %v2358_v56 = vmul.f32 1.442695, %v2355_v24 }
 0x9a0   :  { %v3502_v60 = vpop.eup %3501  ;;  %v2288_v25 = vpop.f32.mrf.mxu2 }
 0x9a1   :  { %v3504_v11 = vpop.eup %3503  ;;  %v2360_v13 = vadd.f32 %v3502_v60, %v3500_v55  ;;  %3507 = vpow2.f32 %v2346_v5  ;;  %v2384_v14 = vmax.f32 %v2382_v1, %v2288_v25 }
 0x9a2   :  { %v3506_v6 = vpop.eup %3505  ;;  %v2323_v7 = vmul.f32 %v3504_v11, %v3492_v54  ;;  %v2327_v10 = vmul.f32 %v3504_v11, %v3494_v40  ;;  %v2333_v38 = vmul.f32 %v3504_v11, %v3496_v12  ;;  %3509 = vpow2.f32 %v2352_v4 }
 0x9a3   :  { %v2362_v62 = vadd.f32 %v3506_v6, %v2360_v13  ;;  %v2386_v30 = vsub.f32 %v2226_v59, %v2384_v14  ;;  %v2392_v32 = vsub.f32 %v2257_v57, %v2384_v14  ;;  %3511 = vpow2.f32 %v2358_v56 }
 0x9a4   :  { %v2325_v8 = vmul.f32 %v2323_v7, %v5124_v39  ;;  %v2329_v47 = vmul.f32 %v2327_v10, %v5129_v43  ;;  %v2398_v23 = vsub.f32 %v2288_v25, %v2384_v14  ;;  %v2334_v54 = vmul.f32 %v2332_v53, %v5132_v22 }
 0x9a5   :  { %3513 = vrcp.f32 %v2362_v62  ;;  %v2388_v35 = vmul.f32 1.442695, %v2386_v30  ;;  %v2394_v26 = vmul.f32 1.442695, %v2392_v32  ;;  %v2335_v37 = vmul.f32 %v2333_v38, %v5134_v36 }
 0x9a6   :  { %v2331_v49 = vadd.f32 %v2329_v47, %v2325_v8  ;;  %v2400_v40 = vmul.f32 1.442695, %v2398_v23  ;;  %v2336_v12 = vadd.f32 %v2334_v54, %v2330_v21 }
 0x9a7   :  { %v3508_v42 = vpop.eup %3507  ;;  %3515 = vpow2.f32 %v2388_v35 }
 0x9a8   :  { %v3510_v50 = vpop.eup %3509  ;;  %v2337_v51 = vadd.f32 %v2335_v37, %v2331_v49  ;;  %3517 = vpow2.f32 %v2394_v26  ;;  %v2291_v52 = vpop.f32.mrf.mxu2 }
 0x9a9   :  { %v2361_v9 = vadd.f32 %v3510_v50, %v3508_v42  ;;  %v2385_v3 = vmax.f32 %v2383_v17, %v2291_v52  ;;  %v3512_v59 = vpop.eup %3511  ;;  %3519 = vpow2.f32 %v2400_v40 }
 0x9aa   :  { %v2426_v46 = vpack.c.bf16 %v2337_v51, %v2336_v12 }
 0x9ab   :  { %v3514_v27 = vpop.eup %3513  ;;  %v2363_v57 = vadd.f32 %v3512_v59, %v2361_v9  ;;  %v2387_v48 = vsub.f32 %v2229_v33, %v2385_v3  ;;  %v2393_v28 = vsub.f32 %v2260_v34, %v2385_v3  ;;  %v2399_v29 = vsub.f32 %v2291_v52, %v2385_v3 }
 0x9ac   :  { %3239 = vmatmul.msk.bf16.vlgmr.msra.gmra.mxu3 %vm596_vm3, %v2426_v46  ;;  %v2366_v1 = vmul.f32 %v3514_v27, %v3500_v55  ;;  %v2370_v31 = vmul.f32 %v3514_v27, %v3502_v60  ;;  %v2376_v13 = vmul.f32 %v3514_v27, %v3506_v6 }
 0x9ad   :  { %v3516_v45 = vpop.eup %3515  ;;  %3521 = vrcp.f32 %v2363_v57  ;;  %v2390_v19 = vmul.f32 1.442695, %v2387_v48  ;;  %v2396_v20 = vmul.f32 1.442695, %v2393_v28  ;;  %v2402_v2 = vmul.f32 1.442695, %v2399_v29 }
 0x9ae   :  { %v3518_v24 = vpop.eup %3517  ;;  %v2368_v25 = vmul.f32 %v2366_v1, %v5118_v44  ;;  %v2372_v11 = vmul.f32 %v2370_v31, %v5121_v61  ;;  %v2378_v47 = vmul.f32 %v2376_v13, %v5132_v22 }
 0x9af   :  { %v2404_v5 = vadd.f32 %v3518_v24, %v3516_v45  ;;  %3523 = vpow2.f32 %v2390_v19  ;;  %v3520_v4 = vpop.eup %3519 }
 0x9b0   :  { %3525 = vpow2.f32 %v2396_v20  ;;  %v2374_v62 = vadd.f32 %v2372_v11, %v2368_v25 }
 0x9b1   :  { %v2406_v56 = vadd.f32 %v3520_v4, %v2404_v5  ;;  %3527 = vpow2.f32 %v2402_v2 }
 0x9b2   :  { %v2380_v23 = vadd.f32 %v2378_v47, %v2374_v62 }
 0x9b3   :  { %v3522_v53 = vpop.eup %3521  ;;  %3529 = vrcp.f32 %v2406_v56 }
 0x9b4   :  { %v2367_v14 = vmul.f32 %v3522_v53, %v3508_v42  ;;  %v2371_v7 = vmul.f32 %v3522_v53, %v3510_v50  ;;  %v2377_v10 = vmul.f32 %v3522_v53, %v3512_v59 }
 0x9b5   :  { %v3524_v38 = vpop.eup %3523 }
 0x9b6   :  { %v3526_v55 = vpop.eup %3525  ;;  %v2369_v60 = vmul.f32 %v2367_v14, %v5124_v39  ;;  %v2373_v21 = vmul.f32 %v2371_v7, %v5129_v43  ;;  %v2379_v33 = vmul.f32 %v2377_v10, %v5134_v36 }
 0x9b7   :  { %v2405_v30 = vadd.f32 %v3526_v55, %v3524_v38  ;;  %v3528_v32 = vpop.eup %3527 }
 0x9b8   :  { %v2375_v8 = vadd.f32 %v2373_v21, %v2369_v60 }
 0x9b9   :  { %v2407_v34 = vadd.f32 %v3528_v32, %v2405_v30  ;;  %v3530_v6 = vpop.eup %3529 }
 0x9ba   :  { %v2381_v35 = vadd.f32 %v2379_v33, %v2375_v8  ;;  %v2410_v54 = vmul.f32 %v3530_v6, %v3516_v45  ;;  %v2414_v49 = vmul.f32 %v3530_v6, %v3518_v24  ;;  %v2420_v51 = vmul.f32 %v3530_v6, %v3520_v4 }
 0x9bb   :  { %3531 = vrcp.f32 %v2407_v34 }
 0x9bc   :  { %v2427_v26 = vpack.c.bf16 %v2381_v35, %v2380_v23  ;;  %v2412_v40 = vmul.f32 %v2410_v54, %v5118_v44  ;;  %v2416_v12 = vmul.f32 %v2414_v49, %v5121_v61  ;;  %v2422_v27 = vmul.f32 %v2420_v51, %v5132_v22  ;;  %v3392_v44 = vld [vmem:[#allocation29 + $0x1] ss:$0 sm:$0xff] }
 0x9be   :  { %3240 = vmatmul.msk.bf16.gmra.mxu3 %vm596_vm3, %v2427_v26  ;;  %v2418_v59 = vadd.f32 %v2416_v12, %v2412_v40 }
 0x9c0   :  { %v2424_v48 = vadd.f32 %v2422_v27, %v2418_v59  ;;  %v3304_v59 = vld [vmem:[#allocation34 + $0x18] sm:$0xff]  ;;  %v3303_v27 = vld [vmem:[#allocation34 + $0x10] sm:$0xff] }
 0x9c1   :  { %v3532_v37 = vpop.eup %3531  ;;  %2666 = vmatpush.bf16.msra.mxu0 %v3304_v59 }
 0x9c2   :  { %v2411_v42 = vmul.f32 %v3532_v37, %v3524_v38  ;;  %v2415_v17 = vmul.f32 %v3532_v37, %v3526_v55  ;;  %v2421_v50 = vmul.f32 %v3532_v37, %v3528_v32 }
 0x9c4   :  { %v2413_v52 = vmul.f32 %v2411_v42, %v5124_v39  ;;  %v2417_v9 = vmul.f32 %v2415_v17, %v5129_v43  ;;  %v2423_v3 = vmul.f32 %v2421_v50, %v5134_v36 }
 0x9c5   :  { %2667 = vmatpush.bf16.msra.mxu0 %v3303_v27 }
 0x9c6   :  { %v2419_v46 = vadd.f32 %v2417_v9, %v2413_v52 }
 0x9c8   :  { %v2425_v57 = vadd.f32 %v2423_v3, %v2419_v46 }
 0x9ca   :  { %v2428_v28 = vpack.c.bf16 %v2425_v57, %v2424_v48 }
 0x9ce   :  { %3241 = vmatmul.msk.bf16.gmra.mxu3 %vm596_vm3, %v2428_v28 }
 0xa2f   :  { %v2462_v29 = vpop.f32.mrf.mxu3 }
 0xa30   :  { %v2463_v45 = vadd.f32 %v3392_v44, %v2462_v29 }
 0xa32   :  { %v2477_v61 = vadd.f32 %v2463_v45, %v5031_v15 }
 0xa34   :  { %v2483_v39 = vsel %vm596_vm3, %v2477_v61, 0.0 }
 0xa35   :  { %2484 = vadd.xlane.f32.xlu0 %v2483_v39 }
 0xa37   :  { %v2464_v43 = vpop.f32.mrf.mxu3 }
 0xa38   :  { %v2465_v19 = vadd.f32 %v3392_v44, %v2464_v43 }
 0xa3a   :  { %v2478_v36 = vadd.f32 %v2465_v19, %v5034_v16 }
 0xa3c   :  { %v2486_v20 = vsel %vm596_vm3, %v2478_v36, 0.0 }
 0xa3d   :  { %2487 = vadd.xlane.f32.xlu1 %v2486_v20 }
 0xa41   :  { %v2467_v22 = vpop.f32.mrf.mxu3 }
 0xa42   :  { %v2468_v24 = vadd.f32 %v3392_v44, %v2467_v22 }
 0xa44   :  { %v2479_v1 = vadd.f32 %v2468_v24, %v5051_v58 }
 0xa46   :  { %v2489_v31 = vsel %vm596_vm3, %v2479_v1, 0.0 }
 0xa47   :  { %2490 = vadd.xlane.f32.xlu2 %v2489_v31 }
 0xa49   :  { %v2469_v2 = vpop.f32.mrf.mxu3 }
 0xa4a   :  { %v2470_v5 = vadd.f32 %v3392_v44, %v2469_v2 }
 0xa4c   :  { %v2480_v15 = vadd.f32 %v2470_v5, %v5054_v41 }
 0xa4e   :  { %v2492_v4 = vsel %vm596_vm3, %v2480_v15, 0.0 }
 0xa4f   :  { %2493 = vadd.xlane.f32.xlu0 %v2492_v4  ;;  %v5206_v4 = vld [vmem:[#allocation31 + $0x1] ss:$0 sm:$0xff] }
 0xa51   :  { %v2472_v56 = vpop.f32.mrf.mxu3 }
 0xa52   :  { %v2473_v25 = vadd.f32 %v3392_v44, %v2472_v56 }
 0xa54   :  { %v2481_v16 = vadd.f32 %v2473_v25, %v5066_v63 }
 0xa56   :  { %v2495_v11 = vsel %vm596_vm3, %v2481_v16, 0.0 }
 0xa57   :  { %2496 = vadd.xlane.f32.xlu1 %v2495_v11 }
 0xa59   :  { %v2474_v53 = vpop.f32.mrf.mxu3 }
 0xa5a   :  { %v2475_v13 = vadd.f32 %v3392_v44, %v2474_v53 }
 0xa5c   :  { %v2482_v58 = vadd.f32 %v2475_v13, %v5069_v0 }
 0xa5e   :  { %v2498_v14 = vsel %vm596_vm3, %v2482_v58, 0.0 }
 0xa5f   :  { %2499 = vadd.xlane.f32.xlu2 %v2498_v14  ;;  %v5210_v14 = vld [vmem:[#allocation32 + $0x1] ss:$0 sm:$0xff] }
 0xaa8   :  { %v2485_v7 = vpop.xlane.xlu0 %2484 }
 0xaa9   :  { %v2501_v41 = vmul.f32 %v2485_v7, %v4830_v18 }
 0xaab   :  { %v5168_v10 = vsub.f32 %v2477_v61, %v2501_v41 }
 0xaad   :  { %v2513_v38 = vmul.f32 %v5168_v10, %v5168_v10 }
 0xaaf   :  { %v2519_v63 = vsel %vm596_vm3, %v2513_v38, 0.0 }
 0xab0   :  { %v2488_v55 = vpop.xlane.xlu1 %2487  ;;  %2520 = vadd.xlane.f32.xlu0 %v2519_v63 }
 0xab1   :  { %v2502_v60 = vmul.f32 %v2488_v55, %v4830_v18 }
 0xab3   :  { %v5174_v21 = vsub.f32 %v2478_v36, %v2502_v60 }
 0xab5   :  { %v2514_v0 = vmul.f32 %v5174_v21, %v5174_v21 }
 0xab7   :  { %v2522_v62 = vsel %vm596_vm3, %v2514_v0, 0.0 }
 0xab8   :  { %2523 = vadd.xlane.f32.xlu1 %v2522_v62 }
 0xaba   :  { %v2491_v30 = vpop.xlane.xlu2 %2490 }
 0xabb   :  { %v2503_v32 = vmul.f32 %v2491_v30, %v4830_v18 }
 0xabd   :  { %v5180_v8 = vsub.f32 %v2479_v1, %v2503_v32 }
 0xabf   :  { %v2515_v47 = vmul.f32 %v5180_v8, %v5180_v8 }
 0xac1   :  { %v2525_v33 = vsel %vm596_vm3, %v2515_v47, 0.0 }
 0xac2   :  { %v2494_v34 = vpop.xlane.xlu0 %2493  ;;  %2526 = vadd.xlane.f32.xlu2 %v2525_v33 }
 0xac3   :  { %v2504_v6 = vmul.f32 %v2494_v34, %v4830_v18 }
 0xac5   :  { %v5186_v23 = vsub.f32 %v2480_v15, %v2504_v6 }
 0xac7   :  { %v2516_v35 = vmul.f32 %v5186_v23, %v5186_v23 }
 0xac9   :  { %v2528_v26 = vsel %vm596_vm3, %v2516_v35, 0.0 }
 0xaca   :  { %2529 = vadd.xlane.f32.xlu0 %v2528_v26  ;;  %v2497_v54 = vpop.xlane.xlu1 %2496 }
 0xacb   :  { %v2505_v49 = vmul.f32 %v2497_v54, %v4830_v18 }
 0xacd   :  { %v5192_v37 = vsub.f32 %v2481_v16, %v2505_v49 }
 0xacf   :  { %v2517_v40 = vmul.f32 %v5192_v37, %v5192_v37 }
 0xad1   :  { %v2531_v42 = vsel %vm596_vm3, %v2517_v40, 0.0 }
 0xad2   :  { %v2500_v17 = vpop.xlane.xlu2 %2499  ;;  %2532 = vadd.xlane.f32.xlu1 %v2531_v42 }
 0xad3   :  { %v2506_v50 = vmul.f32 %v2500_v17, %v4830_v18 }
 0xad5   :  { %v5198_v12 = vsub.f32 %v2482_v58, %v2506_v50 }
 0xad7   :  { %v2518_v51 = vmul.f32 %v5198_v12, %v5198_v12 }
 0xad9   :  { %v2534_v52 = vsel %vm596_vm3, %v2518_v51, 0.0 }
 0xada   :  { %2535 = vadd.xlane.f32.xlu2 %v2534_v52 }
 0xb23   :  { %v2521_v9 = vpop.xlane.xlu0 %2520 }
 0xb24   :  { %v2537_v3 = vmul.f32 %v2521_v9, %v4830_v18 }
 0xb26   :  { %v2543_v46 = vadd.f32 1e-05, %v2537_v3 }
 0xb28   :  { %3533 = vrsqrt.f32 %v2543_v46  ;;  %vm2555_vm14 = vweird.f32 %v2543_v46 }
 0xb2b   :  { %v2524_v57 = vpop.xlane.xlu1 %2523 }
 0xb2c   :  { %v2538_v48 = vmul.f32 %v2524_v57, %v4830_v18 }
 0xb2e   :  { %v3534_v28 = vpop.eup %3533  ;;  %v2544_v44 = vadd.f32 1e-05, %v2538_v48 }
 0xb2f   :  { %v2550_v29 = vmul.f32 %v3534_v28, %v2543_v46  ;;  %vm2556_vm13 = vweird.f32 %v3534_v28 }
 0xb30   :  { %3535 = vrsqrt.f32 %v2544_v44  ;;  %vm2557_vm15 = vmor %vm2555_vm14, %vm2556_vm13  ;;  %vm2565_vm1 = vweird.f32 %v2544_v44 }
 0xb31   :  { %v2551_v45 = vmul.f32 %v3534_v28, %v2550_v29 }
 0xb33   :  { %v2552_v61 = vmul.f32 0.5, %v2551_v45 }
 0xb35   :  { %v2553_v39 = vsub.f32 1.5, %v2552_v61  ;;  %v2527_v43 = vpop.xlane.xlu2 %2526 }
 0xb36   :  { %v3536_v19 = vpop.eup %3535  ;;  %v2539_v36 = vmul.f32 %v2527_v43, %v4830_v18 }
 0xb37   :  { %v2554_v20 = vmul.f32 %v3534_v28, %v2553_v39  ;;  %v2560_v22 = vmul.f32 %v3536_v19, %v2544_v44  ;;  %vm2566_vm0 = vweird.f32 %v3536_v19 }
 0xb38   :  { %v2545_v24 = vadd.f32 1e-05, %v2539_v36  ;;  %vm2567_vm2 = vmor %vm2565_vm1, %vm2566_vm0 }
 0xb39   :  { %v2561_v1 = vmul.f32 %v3536_v19, %v2560_v22  ;;  %v2558_v31 = vsel %vm2557_vm15, %v3534_v28, %v2554_v20 }
 0xb3a   :  { %3537 = vrsqrt.f32 %v2545_v24  ;;  %v2609_v56 = vmul.f32 %v2558_v31, %v5168_v10  ;;  %vm2575_vm5 = vweird.f32 %v2545_v24 }
 0xb3b   :  { %v2562_v2 = vmul.f32 0.5, %v2561_v1 }
 0xb3c   :  { %v2618_v7 = vmul.f32 %v5206_v4, %v2609_v56  ;;  %v3307_v56 = vld [vmem:[%s5386_s17 + $0x30] sm:$0xff] }
 0xb3d   :  { %v2563_v5 = vsub.f32 1.5, %v2562_v2  ;;  %v2530_v15 = vpop.xlane.xlu0 %2529 }
 0xb3e   :  { %v2540_v25 = vmul.f32 %v2530_v15, %v4830_v18  ;;  %v5216_v60 = vadd.f32 %v5210_v14, %v2618_v7  ;;  %v3308_v15 = vld [vmem:[%s5386_s17 + $0x38] sm:$0xff] }
 0xb3f   :  { %v2564_v16 = vmul.f32 %v3536_v19, %v2563_v5  ;;  %2781 = vmatpush.bf16.msra.mxu1 %v3308_v15 }
 0xb40   :  { %v3538_v11 = vpop.eup %3537  ;;  %v2546_v53 = vadd.f32 1e-05, %v2540_v25  ;;  %v3306_v25 = vld [vmem:[%s5386_s17 + $0x28] sm:$0xff] }
 0xb41   :  { %v2568_v13 = vsel %vm2567_vm2, %v3536_v19, %v2564_v16  ;;  %v2570_v58 = vmul.f32 %v3538_v11, %v2545_v24  ;;  %vm2576_vm4 = vweird.f32 %v3538_v11 }
 0xb42   :  { %v2610_v41 = vmul.f32 %v2568_v13, %v5174_v21  ;;  %3539 = vrsqrt.f32 %v2546_v53  ;;  %vm2577_vm6 = vmor %vm2575_vm5, %vm2576_vm4  ;;  %vm2585_vm9 = vweird.f32 %v2546_v53 }
 0xb43   :  { %v2571_v38 = vmul.f32 %v3538_v11, %v2570_v58  ;;  %2782 = vmatpush.bf16.msra.mxu1 %v3307_v56 }
 0xb44   :  { %v2619_v63 = vmul.f32 %v5206_v4, %v2610_v41 }
 0xb45   :  { %v2572_v10 = vmul.f32 0.5, %v2571_v38  ;;  %v2533_v55 = vpop.xlane.xlu1 %2532 }
 0xb46   :  { %v5219_v0 = vadd.f32 %v5210_v14, %v2619_v63  ;;  %v2541_v62 = vmul.f32 %v2533_v55, %v4830_v18 }
 0xb47   :  { %v2573_v30 = vsub.f32 1.5, %v2572_v10  ;;  %2783 = vmatpush.bf16.msra.mxu1 %v3306_v25 }
 0xb48   :  { %v3540_v32 = vpop.eup %3539  ;;  %v2633_v47 = vpack.c.bf16 %v5219_v0, %v5216_v60  ;;  %v2547_v21 = vadd.f32 1e-05, %v2541_v62 }
 0xb49   :  { %v2574_v33 = vmul.f32 %v3538_v11, %v2573_v30  ;;  %v2580_v34 = vmul.f32 %v3540_v32, %v2546_v53  ;;  %vm2586_vm7 = vweird.f32 %v3540_v32  ;;  %v3305_v53 = vld [vmem:[%s5386_s17 + $0x20] sm:$0xff] }
 0xb4a   :  { %3541 = vrsqrt.f32 %v2547_v21  ;;  %3250 = vmatmul.msk.bf16.vlgmr.msra.gmra.mxu0 %vm596_vm3, %v2633_v47  ;;  %vm2587_vm10 = vmor %vm2585_vm9, %vm2586_vm7  ;;  %vm2595_vm12 = vweird.f32 %v2547_v21 }
 0xb4b   :  { %v2581_v6 = vmul.f32 %v3540_v32, %v2580_v34  ;;  %v2578_v35 = vsel %vm2577_vm6, %v3538_v11, %v2574_v33  ;;  %2784 = vmatpush.bf16.msra.mxu1 %v3305_v53 }
 0xb4c   :  { %v2611_v17 = vmul.f32 %v2578_v35, %v5180_v8 }
 0xb4d   :  { %v2582_v26 = vmul.f32 0.5, %v2581_v6  ;;  %v2536_v54 = vpop.xlane.xlu2 %2535 }
 0xb4e   :  { %v2542_v49 = vmul.f32 %v2536_v54, %v4830_v18  ;;  %v2620_v46 = vmul.f32 %v5206_v4, %v2611_v17 }
 0xb4f   :  { %v2583_v40 = vsub.f32 1.5, %v2582_v26 }
 0xb50   :  { %v3542_v42 = vpop.eup %3541  ;;  %v2548_v50 = vadd.f32 1e-05, %v2542_v49  ;;  %v5231_v44 = vadd.f32 %v5210_v14, %v2620_v46 }
 0xb51   :  { %v2584_v51 = vmul.f32 %v3540_v32, %v2583_v40  ;;  %v2590_v52 = vmul.f32 %v3542_v42, %v2547_v21  ;;  %vm2596_vm11 = vweird.f32 %v3542_v42 }
 0xb52   :  { %3543 = vrsqrt.f32 %v2548_v50  ;;  %vm2597_vm13 = vmor %vm2595_vm12, %vm2596_vm11  ;;  %vm2605_vm15 = vweird.f32 %v2548_v50 }
 0xb53   :  { %v2588_v9 = vsel %vm2587_vm10, %v3540_v32, %v2584_v51  ;;  %v2591_v3 = vmul.f32 %v3542_v42, %v2590_v52 }
 0xb54   :  { %v2612_v59 = vmul.f32 %v2588_v9, %v5186_v23 }
 0xb55   :  { %v2592_v27 = vmul.f32 0.5, %v2591_v3 }
 0xb56   :  { %v2621_v57 = vmul.f32 %v5206_v4, %v2612_v59 }
 0xb57   :  { %v2593_v48 = vsub.f32 1.5, %v2592_v27 }
 0xb58   :  { %v3544_v28 = vpop.eup %3543  ;;  %v5234_v8 = vadd.f32 %v5210_v14, %v2621_v57 }
 0xb59   :  { %v2594_v29 = vmul.f32 %v3542_v42, %v2593_v48  ;;  %v2600_v45 = vmul.f32 %v3544_v28, %v2548_v50  ;;  %vm2606_vm14 = vweird.f32 %v3544_v28 }
 0xb5a   :  { %v2634_v61 = vpack.c.bf16 %v5234_v8, %v5231_v44  ;;  %vm2607_vm0 = vmor %vm2605_vm15, %vm2606_vm14 }
 0xb5b   :  { %v2601_v23 = vmul.f32 %v3544_v28, %v2600_v45  ;;  %v2598_v39 = vsel %vm2597_vm13, %v3542_v42, %v2594_v29 }
 0xb5c   :  { %3251 = vmatmul.msk.bf16.gmra.mxu0 %vm596_vm3, %v2634_v61  ;;  %v2613_v36 = vmul.f32 %v2598_v39, %v5192_v37 }
 0xb5d   :  { %v2602_v43 = vmul.f32 0.5, %v2601_v23 }
 0xb5e   :  { %v2622_v1 = vmul.f32 %v5206_v4, %v2613_v36 }
 0xb5f   :  { %v2603_v19 = vsub.f32 1.5, %v2602_v43 }
 0xb60   :  { %v5244_v2 = vadd.f32 %v5210_v14, %v2622_v1 }
 0xb61   :  { %v2604_v20 = vmul.f32 %v3544_v28, %v2603_v19 }
 0xb63   :  { %v2608_v22 = vsel %vm2607_vm0, %v3544_v28, %v2604_v20 }
 0xb64   :  { %v2614_v24 = vmul.f32 %v2608_v22, %v5198_v12  ;;  %v3395_v12 = vld [vmem:[#allocation35 + $0x1] ss:$0 sm:$0xff] }
 0xb66   :  { %v2623_v31 = vmul.f32 %v5206_v4, %v2614_v24 }
 0xb68   :  { %v5247_v5 = vadd.f32 %v5210_v14, %v2623_v31 }
 0xb6a   :  { %v2635_v37 = vpack.c.bf16 %v5247_v5, %v5244_v2 }
 0xb6c   :  { %3252 = vmatmul.msk.bf16.gmra.mxu0 %vm596_vm3, %v2635_v37 }
 0xbc7   :  { %v2669_v16 = vpop.f32.mrf.mxu0 }
 0xbc8   :  { %v2670_v11 = vadd.f32 %v3395_v12, %v2669_v16 }
 0xbca   :  { %v2684_v4 = vmul.f32 %v2670_v11, %v2670_v11 }
 0xbcc   :  { %v2690_v13 = vmul.f32 %v2684_v4, %v2670_v11 }
 0xbce   :  { %v2696_v58 = vmul.f32 0.044715, %v2690_v13 }
 0xbcf   :  { %v2671_v14 = vpop.f32.mrf.mxu0 }
 0xbd0   :  { %v2702_v7 = vadd.f32 %v2696_v58, %v2670_v11  ;;  %v2672_v41 = vadd.f32 %v3395_v12, %v2671_v14 }
 0xbd2   :  { %v2708_v38 = vmul.f32 0.7978846, %v2702_v7  ;;  %v2685_v63 = vmul.f32 %v2672_v41, %v2672_v41 }
 0xbd4   :  { %v2691_v10 = vmul.f32 %v2685_v63, %v2672_v41  ;;  %3545 = vtanh.f32 %v2708_v38 }
 0xbd6   :  { %v2697_v55 = vmul.f32 0.044715, %v2691_v10 }
 0xbd8   :  { %v2703_v62 = vadd.f32 %v2697_v55, %v2672_v41 }
 0xbd9   :  { %v2674_v30 = vpop.f32.mrf.mxu0 }
 0xbda   :  { %v2709_v32 = vmul.f32 0.7978846, %v2703_v62  ;;  %v2675_v47 = vadd.f32 %v3395_v12, %v2674_v30  ;;  %v3546_v21 = vpop.eup %3545  ;;  %v3396_v62 = vld [vmem:[#allocation37 + $0x1] ss:$0 sm:$0xff] }
 0xbdb   :  { %v2720_v6 = vadd.f32 1.0, %v3546_v21 }
 0xbdc   :  { %3547 = vtanh.f32 %v2709_v32  ;;  %v2686_v33 = vmul.f32 %v2675_v47, %v2675_v47 }
 0xbdd   :  { %v2726_v42 = vmul.f32 0.5, %v2720_v6 }
 0xbde   :  { %v2692_v34 = vmul.f32 %v2686_v33, %v2675_v47 }
 0xbdf   :  { %v2732_v3 = vmul.f32 %v2726_v42, %v2670_v11 }
 0xbe0   :  { %v2698_v35 = vmul.f32 0.044715, %v2692_v34 }
 0xbe1   :  { %v2676_v26 = vpop.f32.mrf.mxu0 }
 0xbe2   :  { %v3548_v54 = vpop.eup %3547  ;;  %v2704_v49 = vadd.f32 %v2698_v35, %v2675_v47  ;;  %v2677_v40 = vadd.f32 %v3395_v12, %v2676_v26 }
 0xbe3   :  { %v2721_v17 = vadd.f32 1.0, %v3548_v54 }
 0xbe4   :  { %v2710_v50 = vmul.f32 0.7978846, %v2704_v49  ;;  %v2687_v51 = vmul.f32 %v2677_v40, %v2677_v40 }
 0xbe5   :  { %v2727_v52 = vmul.f32 0.5, %v2721_v17 }
 0xbe6   :  { %v2693_v9 = vmul.f32 %v2687_v51, %v2677_v40  ;;  %3549 = vtanh.f32 %v2710_v50 }
 0xbe7   :  { %v2733_v59 = vmul.f32 %v2727_v52, %v2672_v41 }
 0xbe8   :  { %v2699_v46 = vmul.f32 0.044715, %v2693_v9 }
 0xbe9   :  { %v2738_v27 = vpack.c.bf16 %v2733_v59, %v2732_v3  ;;  %v2679_v57 = vpop.f32.mrf.mxu0 }
 0xbea   :  { %v2705_v48 = vadd.f32 %v2699_v46, %v2677_v40  ;;  %v2680_v28 = vadd.f32 %v3395_v12, %v2679_v57 }
 0xbeb   :  { %3269 = vmatmul.msk.bf16.vlgmr.msra.gmra.mxu1 %vm1642_vm8, %v2738_v27 }
 0xbec   :  { %v2711_v29 = vmul.f32 0.7978846, %v2705_v48  ;;  %v2688_v45 = vmul.f32 %v2680_v28, %v2680_v28  ;;  %v3550_v61 = vpop.eup %3549 }
 0xbed   :  { %v2722_v43 = vadd.f32 1.0, %v3550_v61 }
 0xbee   :  { %3551 = vtanh.f32 %v2711_v29  ;;  %v2694_v23 = vmul.f32 %v2688_v45, %v2680_v28 }
 0xbef   :  { %v2728_v31 = vmul.f32 0.5, %v2722_v43 }
 0xbf0   :  { %v2700_v39 = vmul.f32 0.044715, %v2694_v23 }
 0xbf1   :  { %v2681_v19 = vpop.f32.mrf.mxu0  ;;  %v2734_v16 = vmul.f32 %v2728_v31, %v2675_v47 }
 0xbf2   :  { %v2706_v36 = vadd.f32 %v2700_v39, %v2680_v28  ;;  %v2682_v20 = vadd.f32 %v3395_v12, %v2681_v19 }
 0xbf4   :  { %v3552_v22 = vpop.eup %3551  ;;  %v2712_v24 = vmul.f32 0.7978846, %v2706_v36  ;;  %v2689_v1 = vmul.f32 %v2682_v20, %v2682_v20 }
 0xbf5   :  { %v2723_v37 = vadd.f32 1.0, %v3552_v22 }
 0xbf6   :  { %v2695_v15 = vmul.f32 %v2689_v1, %v2682_v20  ;;  %3553 = vtanh.f32 %v2712_v24 }
 0xbf7   :  { %v2729_v56 = vmul.f32 0.5, %v2723_v37 }
 0xbf8   :  { %v2701_v25 = vmul.f32 0.044715, %v2695_v15 }
 0xbf9   :  { %v2735_v11 = vmul.f32 %v2729_v56, %v2677_v40 }
 0xbfa   :  { %v2707_v4 = vadd.f32 %v2701_v25, %v2682_v20 }
 0xbfb   :  { %v2739_v53 = vpack.c.bf16 %v2735_v11, %v2734_v16 }
 0xbfc   :  { %v2713_v13 = vmul.f32 0.7978846, %v2707_v4  ;;  %v3554_v58 = vpop.eup %3553 }
 0xbfd   :  { %3270 = vmatmul.msk.bf16.gmra.mxu1 %vm1642_vm8, %v2739_v53  ;;  %v2724_v14 = vadd.f32 1.0, %v3554_v58 }
 0xbfe   :  { %3555 = vtanh.f32 %v2713_v13 }
 0xbff   :  { %v2730_v7 = vmul.f32 0.5, %v2724_v14 }
 0xc01   :  { %v2736_v63 = vmul.f32 %v2730_v7, %v2680_v28 }
 0xc04   :  { %v3556_v12 = vpop.eup %3555 }
 0xc05   :  { %v2725_v41 = vadd.f32 1.0, %v3556_v12 }
 0xc07   :  { %v2731_v38 = vmul.f32 0.5, %v2725_v41 }
 0xc09   :  { %v2737_v10 = vmul.f32 %v2731_v38, %v2682_v20 }
 0xc0b   :  { %v2740_v55 = vpack.c.bf16 %v2737_v10, %v2736_v63 }
 0xc0d   :  { %3271 = vmatmul.msk.bf16.gmra.mxu1 %vm1642_vm8, %v2740_v55 }
 0xc68   :  { %v2786_v30 = vpop.f32.mrf.mxu1 }
 0xc69   :  { %v2787_v32 = vadd.f32 %v3396_v62, %v2786_v30 }
 0xc6b   :  { %v2801_v47 = vadd.f32 %v2787_v32, %v5216_v60 }
 0xc6d   :  { %v2807_v21 = vsel %vm596_vm3, %v2801_v47, 0.0 }
 0xc6e   :  { %2808 = vadd.xlane.f32.xlu0 %v2807_v21 }
 0xc70   :  { %v2788_v33 = vpop.f32.mrf.mxu1 }
 0xc71   :  { %v2789_v34 = vadd.f32 %v3396_v62, %v2788_v33 }
 0xc73   :  { %v2802_v6 = vadd.f32 %v2789_v34, %v5219_v0 }
 0xc75   :  { %v2810_v35 = vsel %vm596_vm3, %v2802_v6, 0.0 }
 0xc76   :  { %2811 = vadd.xlane.f32.xlu1 %v2810_v35 }
 0xc7a   :  { %v2791_v26 = vpop.f32.mrf.mxu1 }
 0xc7b   :  { %v2792_v54 = vadd.f32 %v3396_v62, %v2791_v26 }
 0xc7d   :  { %v2803_v49 = vadd.f32 %v2792_v54, %v5231_v44 }
 0xc7f   :  { %v2813_v40 = vsel %vm596_vm3, %v2803_v49, 0.0 }
 0xc80   :  { %2814 = vadd.xlane.f32.xlu2 %v2813_v40 }
 0xc82   :  { %v2793_v42 = vpop.f32.mrf.mxu1 }
 0xc83   :  { %v2794_v17 = vadd.f32 %v3396_v62, %v2793_v42 }
 0xc85   :  { %v2804_v60 = vadd.f32 %v2794_v17, %v5234_v8 }
 0xc87   :  { %v2816_v50 = vsel %vm596_vm3, %v2804_v60, 0.0 }
 0xc88   :  { %2817 = vadd.xlane.f32.xlu0 %v2816_v50 }
 0xc8a   :  { %v2796_v51 = vpop.f32.mrf.mxu1 }
 0xc8b   :  { %v2797_v52 = vadd.f32 %v3396_v62, %v2796_v51 }
 0xc8d   :  { %v2805_v0 = vadd.f32 %v2797_v52, %v5244_v2 }
 0xc8f   :  { %v2819_v9 = vsel %vm596_vm3, %v2805_v0, 0.0 }
 0xc90   :  { %2820 = vadd.xlane.f32.xlu1 %v2819_v9 }
 0xc92   :  { %v2798_v3 = vpop.f32.mrf.mxu1 }
 0xc93   :  { %v2799_v59 = vadd.f32 %v3396_v62, %v2798_v3 }
 0xc95   :  { %v2806_v44 = vadd.f32 %v2799_v59, %v5247_v5 }
 0xc97   :  { %v2822_v46 = vsel %vm596_vm3, %v2806_v44, 0.0 }
 0xc98   :  { %2823 = vadd.xlane.f32.xlu2 %v2822_v46 }
 0xce1   :  { %v2809_v27 = vpop.xlane.xlu0 %2808 }
 0xce2   :  { %v2825_v8 = vmul.f32 %v2809_v27, %v4830_v18 }
 0xce4   :  { %v5272_v57 = vsub.f32 %v2801_v47, %v2825_v8 }
 0xce6   :  { %v2837_v48 = vmul.f32 %v5272_v57, %v5272_v57 }
 0xce8   :  { %v2843_v2 = vsel %vm596_vm3, %v2837_v48, 0.0 }
 0xce9   :  { %2844 = vadd.xlane.f32.xlu0 %v2843_v2  ;;  %v2812_v28 = vpop.xlane.xlu1 %2811 }
 0xcea   :  { %v2826_v29 = vmul.f32 %v2812_v28, %v4830_v18 }
 0xcec   :  { %v5278_v45 = vsub.f32 %v2802_v6, %v2826_v29 }
 0xcee   :  { %v2838_v5 = vmul.f32 %v5278_v45, %v5278_v45 }
 0xcf0   :  { %v2846_v61 = vsel %vm596_vm3, %v2838_v5, 0.0 }
 0xcf1   :  { %2847 = vadd.xlane.f32.xlu1 %v2846_v61 }
 0xcf3   :  { %v2815_v23 = vpop.xlane.xlu2 %2814 }
 0xcf4   :  { %v2827_v39 = vmul.f32 %v2815_v23, %v4830_v18 }
 0xcf6   :  { %v5284_v43 = vsub.f32 %v2803_v49, %v2827_v39 }
 0xcf8   :  { %v2839_v19 = vmul.f32 %v5284_v43, %v5284_v43 }
 0xcfa   :  { %v2849_v36 = vsel %vm596_vm3, %v2839_v19, 0.0 }
 0xcfb   :  { %v2818_v20 = vpop.xlane.xlu0 %2817  ;;  %2850 = vadd.xlane.f32.xlu2 %v2849_v36 }
 0xcfc   :  { %v2828_v22 = vmul.f32 %v2818_v20, %v4830_v18 }
 0xcfe   :  { %v5290_v24 = vsub.f32 %v2804_v60, %v2828_v22 }
 0xd00   :  { %v2840_v1 = vmul.f32 %v5290_v24, %v5290_v24 }
 0xd02   :  { %v2852_v31 = vsel %vm596_vm3, %v2840_v1, 0.0  ;;  %v3397_v1 = vld [vmem:[%s4423_s13 + $0x1] ss:$0 sm:$0xff]  ;;  %s4262_s13 = smov [#allocation40]  }
 0xd03   :  { %2853 = vadd.xlane.f32.xlu0 %v2852_v31  ;;  %v2821_v37 = vpop.xlane.xlu1 %2820  ;;  %s2969_s10 = sshll.u32 %s4262_s13, 4  ;;  %s2970_s10 = int_to_ptr.vmem [resolvable:$true] %s2969_s10 }
 0xd04   :  { %v2829_v15 = vmul.f32 %v2821_v37, %v4830_v18 }
 0xd06   :  { %v5296_v56 = vsub.f32 %v2805_v0, %v2829_v15 }
 0xd08   :  { %v2841_v25 = vmul.f32 %v5296_v56, %v5296_v56 }
 0xd0a   :  { %v2855_v16 = vsel %vm596_vm3, %v2841_v25, 0.0 }
 0xd0b   :  { %v2824_v11 = vpop.xlane.xlu2 %2823  ;;  %2856 = vadd.xlane.f32.xlu1 %v2855_v16 }
 0xd0c   :  { %v2830_v4 = vmul.f32 %v2824_v11, %v4830_v18 }
 0xd0e   :  { %v5302_v53 = vsub.f32 %v2806_v44, %v2830_v4 }
 0xd10   :  { %v2842_v13 = vmul.f32 %v5302_v53, %v5302_v53 }
 0xd12   :  { %v2858_v58 = vsel %vm596_vm3, %v2842_v13, 0.0  ;;  %v3398_v13 = vld [vmem:[#allocation38 + $0x1] ss:$0 sm:$0xff] }
 0xd13   :  { %2859 = vadd.xlane.f32.xlu2 %v2858_v58 }
 0xd5c   :  { %v2845_v14 = vpop.xlane.xlu0 %2844 }
 0xd5d   :  { %v2861_v12 = vmul.f32 %v2845_v14, %v4830_v18 }
 0xd5f   :  { %v2867_v7 = vadd.f32 1e-05, %v2861_v12 }
 0xd61   :  { %3557 = vrsqrt.f32 %v2867_v7  ;;  %vm2879_vm5 = vweird.f32 %v2867_v7 }
 0xd64   :  { %v2848_v41 = vpop.xlane.xlu1 %2847 }
 0xd65   :  { %v2862_v63 = vmul.f32 %v2848_v41, %v4830_v18 }
 0xd67   :  { %v5310_v62 = vadd.f32 1e-05, %v2862_v63  ;;  %v3558_v30 = vpop.eup %3557 }
 0xd68   :  { %v2874_v21 = vmul.f32 %v3558_v30, %v2867_v7  ;;  %vm2880_vm1 = vweird.f32 %v3558_v30 }
 0xd69   :  { %vm2881_vm6 = vmor %vm2879_vm5, %vm2880_vm1  ;;  %vm2889_vm12 = vweird.f32 %v5310_v62 }
 0xd6a   :  { %v2875_v35 = vmul.f32 %v3558_v30, %v2874_v21 }
 0xd6c   :  { %v2876_v17 = vmul.f32 0.5, %v2875_v35 }
 0xd6e   :  { %v2851_v38 = vpop.xlane.xlu2 %2850  ;;  %v2877_v9 = vsub.f32 1.5, %v2876_v17 }
 0xd6f   :  { %v2863_v10 = vmul.f32 %v2851_v38, %v4830_v18 }
 0xd70   :  { %v2878_v48 = vmul.f32 %v3558_v30, %v2877_v9 }
 0xd71   :  { %v2869_v55 = vadd.f32 1e-05, %v2863_v10 }
 0xd72   :  { %v2882_v39 = vsel %vm2881_vm6, %v3558_v30, %v2878_v48 }
 0xd73   :  { %3559 = vrsqrt.f32 %v2869_v55  ;;  %vm2899_vm2 = vweird.f32 %v2869_v55  ;;  %v2933_v31 = vmul.f32 %v2882_v39, %v5272_v57 }
 0xd74   :  { %3561 = vrsqrt.f32 %v5310_v62 }
 0xd75   :  { %v2942_v58 = vmul.f32 %v3397_v1, %v2933_v31 }
 0xd76   :  { %v2854_v32 = vpop.xlane.xlu0 %2853 }
 0xd77   :  { %v2864_v47 = vmul.f32 %v2854_v32, %v4830_v18 }
 0xd79   :  { %v3560_v33 = vpop.eup %3559  ;;  %v2870_v34 = vadd.f32 1e-05, %v2864_v47 }
 0xd7a   :  { %v2894_v6 = vmul.f32 %v3560_v33, %v2869_v55  ;;  %v5314_v54 = vpop.eup %3561  ;;  %vm2900_vm8 = vweird.f32 %v3560_v33  ;;  %v2951_v55 = vadd.f32 %v3398_v13, %v2942_v58 }
 0xd7b   :  { %3563 = vrsqrt.f32 %v2870_v34  ;;  %v2884_v60 = vmul.f32 %v5314_v54, %v5310_v62  ;;  %vm2901_vm4 = vmor %vm2899_vm2, %vm2900_vm8  ;;  %vm2890_vm9 = vweird.f32 %v5314_v54  ;;  %vm2909_vm10 = vweird.f32 %v2870_v34 }
 0xd7c   :  { %v2895_v26 = vmul.f32 %v3560_v33, %v2894_v6  ;;  %vm5327_vm14 = vmor %vm2889_vm12, %vm2890_vm9 }
 0xd7d   :  { %v2885_v3 = vmul.f32 %v5314_v54, %v2884_v60 }
 0xd7e   :  { %v2896_v49 = vmul.f32 0.5, %v2895_v26  ;;  %v2857_v40 = vpop.xlane.xlu1 %2856 }
 0xd7f   :  { %v2865_v42 = vmul.f32 %v2857_v40, %v4830_v18  ;;  %v2886_v2 = vmul.f32 0.5, %v2885_v3 }
 0xd80   :  { %v2897_v52 = vsub.f32 1.5, %v2896_v49 }
 0xd81   :  { %v3564_v50 = vpop.eup %3563  ;;  %v2871_v51 = vadd.f32 1e-05, %v2865_v42  ;;  %v2887_v19 = vsub.f32 1.5, %v2886_v2 }
 0xd82   :  { %v2904_v0 = vmul.f32 %v3564_v50, %v2870_v34  ;;  %v2898_v44 = vmul.f32 %v3560_v33, %v2897_v52  ;;  %vm2910_vm7 = vweird.f32 %v3564_v50 }
 0xd83   :  { %3565 = vrsqrt.f32 %v2871_v51  ;;  %v2888_v37 = vmul.f32 %v5314_v54, %v2887_v19  ;;  %vm2911_vm13 = vmor %vm2909_vm10, %vm2910_vm7  ;;  %vm2919_vm15 = vweird.f32 %v2871_v51 }
 0xd84   :  { %v2905_v59 = vmul.f32 %v3564_v50, %v2904_v0  ;;  %v2902_v5 = vsel %vm2901_vm4, %v3560_v33, %v2898_v44 }
 0xd85   :  { %v2935_v20 = vmul.f32 %v2902_v5, %v5284_v43  ;;  %v2892_v14 = vsel %vm5327_vm14, %v5314_v54, %v2888_v37 }
 0xd86   :  { %v2906_v46 = vmul.f32 0.5, %v2905_v59  ;;  %v2860_v27 = vpop.xlane.xlu2 %2859  ;;  %v2934_v62 = vmul.f32 %v2892_v14, %v5278_v45 }
 0xd87   :  { %v2866_v8 = vmul.f32 %v2860_v27, %v4830_v18  ;;  %v2944_v16 = vmul.f32 %v3397_v1, %v2935_v20 }
 0xd88   :  { %v2907_v61 = vsub.f32 1.5, %v2906_v46  ;;  %v2943_v6 = vmul.f32 %v3397_v1, %v2934_v62 }
 0xd89   :  { %v3566_v28 = vpop.eup %3565  ;;  %v2872_v29 = vadd.f32 1e-05, %v2866_v8  ;;  %v2953_v41 = vadd.f32 %v3398_v13, %v2944_v16 }
 0xd8a   :  { %v2914_v23 = vmul.f32 %v3566_v28, %v2871_v51  ;;  %v2908_v18 = vmul.f32 %v3564_v50, %v2907_v61  ;;  %vm2920_vm11 = vweird.f32 %v3566_v28  ;;  %v2952_v49 = vadd.f32 %v3398_v13, %v2943_v6 }
 0xd8b   :  { %3567 = vrsqrt.f32 %v2872_v29  ;;  %vm2921_vm0 = vmor %vm2919_vm15, %vm2920_vm11  ;;  %v2957_v47 = vadd.f32 %v2953_v41, %v2951_v55  ;;  %vm2929_vm1 = vweird.f32 %v2872_v29 }
 0xd8c   :  { %v2915_v36 = vmul.f32 %v3566_v28, %v2914_v23  ;;  %v2912_v11 = vsel %vm2911_vm13, %v3564_v50, %v2908_v18 }
 0xd8d   :  { %v2936_v38 = vmul.f32 %v2912_v11, %v5290_v24 }
 0xd8e   :  { %v2916_v22 = vmul.f32 0.5, %v2915_v36 }
 0xd8f   :  { %v2945_v21 = vmul.f32 %v3397_v1, %v2936_v38 }
 0xd90   :  { %v2917_v15 = vsub.f32 1.5, %v2916_v22 }
 0xd91   :  { %v3568_v25 = vpop.eup %3567  ;;  %v2954_v24 = vadd.f32 %v3398_v13, %v2945_v21 }
 0xd92   :  { %v2918_v4 = vmul.f32 %v3566_v28, %v2917_v15  ;;  %v2924_v57 = vmul.f32 %v3568_v25, %v2872_v29  ;;  %vm2930_vm8 = vweird.f32 %v3568_v25 }
 0xd93   :  { %vm2931_vm2 = vmor %vm2929_vm1, %vm2930_vm8  ;;  %v2958_v45 = vadd.f32 %v2954_v24, %v2952_v49 }
 0xd94   :  { %v2922_v12 = vsel %vm2921_vm0, %v3566_v28, %v2918_v4  ;;  %v2925_v7 = vmul.f32 %v3568_v25, %v2924_v57 }
 0xd95   :  { %v2937_v63 = vmul.f32 %v2922_v12, %v5296_v56 }
 0xd96   :  { %v2926_v10 = vmul.f32 0.5, %v2925_v7 }
 0xd97   :  { %v2946_v30 = vmul.f32 %v3397_v1, %v2937_v63 }
 0xd98   :  { %v2927_v32 = vsub.f32 1.5, %v2926_v10 }
 0xd99   :  { %v2955_v33 = vadd.f32 %v3398_v13, %v2946_v30 }
 0xd9a   :  { %v2928_v34 = vmul.f32 %v3568_v25, %v2927_v32 }
 0xd9b   :  { %v2959_v35 = vadd.f32 %v2957_v47, %v2955_v33 }
 0xd9c   :  { %v2932_v26 = vsel %vm2931_vm2, %v3568_v25, %v2928_v34 }
 0xd9d   :  { %v2938_v56 = vmul.f32 %v2932_v26, %v5302_v53  ;;  %v2961_v54 = vmul.f32 0.33333334, %v2959_v35 }
 0xd9f   :  { %v2947_v40 = vmul.f32 %v3397_v1, %v2938_v56  ;;  %2963 = vst.msk [vmem:[#allocation40] sm:$0xff] %vm596_vm3, %v2961_v54 }
 0xda1   :  { %v2956_v42 = vadd.f32 %v3398_v13, %v2947_v40 }
 0xda3   :  { %v2960_v17 = vadd.f32 %v2958_v45, %v2956_v42 }
 0xda5   :  { %v2962_v60 = vmul.f32 0.33333334, %v2960_v17 }
 0xda7   :  { %2964 = vst.msk [vmem:[#allocation40 + $0x8] sm:$0xff] %vm596_vm3, %v2962_v60 }
 0xda8   :  { %4172 = shalt.err (!%p4169_p12)
}
 0xda9   :  { %s4263_s0 = smov 128   ;;  %s4264_s25 = smov 8  }
 0xdaa   :  { %2977 = dma.vmem_to_hbm [thread:$0]  %s2970_s10, 256, %s2972_s11, [#allocation4], %s4263_s0, %s4263_s0, %s4264_s25  }
 0xdab   :  { %4199 = dma.done.wait [#allocation4], 256  }
 0xdac   :  { %4200 = vsyncadd [#allocation4], 4294967040 }
 0xdad   :  { %2982 = vsyncpa [#allocation3], 1 }
 0xdae   :  { %2983 = vsyncpa [#allocation6], 1 }
 0xdaf   :  { %2984 = vsyncpa [#allocation9], 1 }
 0xdb0   :  { %2985 = vsyncpa [#allocation12], 1 }
 0xdb1   :  { %2986 = vsyncpa [#allocation15], 1 }
 0xdb2   :  { %2987 = vsyncpa [#allocation18], 1 }
 0xdb3   :  { %2988 = vsyncpa [#allocation21], 1 }
 0xdb4   :  { %2989 = vsyncpa [#allocation24], 1 }
 0xdb5   :  { %2990 = vsyncpa [#allocation27], 1 }
 0xdb6   :  { %2991 = vsyncpa [#allocation30], 1 }
 0xdb7   :  { %2992 = vsyncpa [#allocation33], 1 }
 0xdb8   :  { %2993 = vsyncpa [#allocation36], 1 }
 0xdb9   :  { %2994 = vsyncpa [#allocation39], 1 }
 0xdba   :  { %2995 = vsyncpa [#allocation4], 1 }

// kernel: tpu_custom_call.1
= control target key start
LH: loop header
LB: loop body
LE: loop exit
PB: predicated region body
PF: predicated region fallthrough
CT: control target
= control target key end

     0   :  { %s4201_s6 = smov 1   ;;  %s4202_s10 = smov 2   ;;  %s5343_s0 = inlined_call_operand.smem [shape: u32[33], index: -1, kind: input, shape index: {}] }
   0x1   :  { %s4273_s5 = sld [smem:[%s5343_s0]]   ;;  %s4203_s14 = smov 3  }
   0x2   :  { %s4278_s9 = sld [smem:[%s5343_s0 + %s4201_s6]]   ;;  %s4204_s18 = smov 4  }
   0x3   :  { %s4283_s13 = sld [smem:[%s5343_s0 + %s4202_s10]]   ;;  %s4205_s22 = smov 5  }
   0x4   :  { %s4288_s17 = sld [smem:[%s5343_s0 + %s4203_s14]]   ;;  %s4206_s26 = smov 6  }
   0x5   :  { %s4293_s21 = sld [smem:[%s5343_s0 + %s4204_s18]]   ;;  %s4207_s30 = smov 7  }
   0x6   :  { %s4298_s25 = sld [smem:[%s5343_s0 + %s4205_s22]]   ;;  %s4208_s4 = smov 8  }
   0x7   :  { %s4303_s29 = sld [smem:[%s5343_s0 + %s4206_s26]]   ;;  %s4209_s10 = smov 9  }
   0x8   :  { %s4308_s3 = sld [smem:[%s5343_s0 + %s4207_s30]]   ;;  %s4210_s15 = smov 10  }
   0x9   :  { %5357 = sst [smem:[#allocation55_spill]] %s4283_s13  ;;  %s4211_s20 = smov 11  }
   0xa   :  { %s4313_s8 = sld [smem:[%s5343_s0 + %s4208_s4]]   ;;  %s4212_s26 = smov 12  }
   0xb   :  { %s4318_s14 = sld [smem:[%s5343_s0 + %s4209_s10]]   ;;  %s4213_s1 = smov 13  }
   0xc   :  { %s4323_s19 = sld [smem:[%s5343_s0 + %s4210_s15]]   ;;  %s4214_s7 = smov 14  }
   0xd   :  { %s4328_s24 = sld [smem:[%s5343_s0 + %s4211_s20]]   ;;  %s4215_s15 = smov 15  }
   0xe   :  { %5358 = sst [smem:[#allocation56_spill]] %s4308_s3  ;;  %s4216_s22 = smov 16  }
   0xf   :  { %s4333_s30 = sld [smem:[%s5343_s0 + %s4212_s26]]   ;;  %s4217_s28 = smov 17  }
  0x10   :  { %s4338_s6 = sld [smem:[%s5343_s0 + %s4213_s1]]  }
  0x11   :  { %5359 = sst [smem:[#allocation57_spill]] %s4318_s14 }
  0x12   :  { %s4343_s12 = sld [smem:[%s5343_s0 + %s4214_s7]]   ;;  %s4218_s7 = smov 18  }
  0x13   :  { %5360 = sst [smem:[#allocation58_spill]] %s4328_s24 }
  0x14   :  { %s4348_s20 = sld [smem:[%s5343_s0 + %s4215_s15]]   ;;  %s4219_s15 = smov 19  }
  0x15   :  { %5361 = sst [smem:[#allocation59_spill]] %s4333_s30 }
  0x16   :  { %s4353_s27 = sld [smem:[%s5343_s0 + %s4216_s22]]   ;;  %s4220_s22 = smov 20  }
  0x17   :  { %s4358_s4 = sld [smem:[%s5343_s0 + %s4217_s28]]   ;;  %s4221_s28 = smov 21  }
  0x18   :  { %5362 = sst [smem:[#allocation60_spill]] %s4343_s12 }
  0x19   :  { %s4363_s13 = sld [smem:[%s5343_s0 + %s4218_s7]]   ;;  %s4222_s7 = smov 22  }
  0x1a   :  { %5363 = sst [smem:[#allocation61_spill]] %s4348_s20 }
  0x1b   :  { %s4368_s20 = sld [smem:[%s5343_s0 + %s4219_s15]]   ;;  %s4223_s15 = smov 23  }
  0x1c   :  { %5364 = sst [smem:[#allocation62_spill]] %s4353_s27 }
  0x1d   :  { %5365 = sst [smem:[#allocation63_spill]] %s4358_s4 }
  0x1e   :  { %s4373_s27 = sld [smem:[%s5343_s0 + %s4220_s22]]   ;;  %s4224_s22 = smov 24  }
  0x1f   :  { %5366 = sst [smem:[#allocation64_spill]] %s4363_s13 }
  0x20   :  { %s4378_s4 = sld [smem:[%s5343_s0 + %s4221_s28]]   ;;  %s4225_s28 = smov 25  }
  0x21   :  { %s4383_s13 = sld [smem:[%s5343_s0 + %s4222_s7]]   ;;  %s4226_s7 = smov 26  }
  0x22   :  { %s4388_s24 = sld [smem:[%s5343_s0 + %s4223_s15]]   ;;  %s4227_s15 = smov 27  }
  0x23   :  { %s4398_s12 = sld [smem:[%s5343_s0 + %s4225_s28]]   ;;  %s4229_s28 = smov 29  }
  0x24   :  { %5367 = sst [smem:[#allocation65_spill]] %s4373_s27 }
  0x25   :  { %s4393_s27 = sld [smem:[%s5343_s0 + %s4224_s22]]   ;;  %s4228_s22 = smov 28  }
  0x26   :  { %s4408_s30 = sld [smem:[%s5343_s0 + %s4227_s15]]   ;;  %s4231_s15 = smov 31  }
  0x27   :  { %5368 = sst [smem:[#allocation66_spill]] %s4383_s13 }
  0x28   :  { %s4403_s13 = sld [smem:[%s5343_s0 + %s4226_s7]]   ;;  %s4230_s7 = smov 30  }
  0x29   :  { %s4418_s14 = sld [smem:[%s5343_s0 + %s4229_s28]]  }
  0x2a   :  { %s4428_s3 = sld [smem:[%s5343_s0 + %s4231_s15]]  }
  0x2b   :  { %5369 = sst [smem:[#allocation67_spill]] %s4393_s27 }
  0x2c   :  { %s4413_s27 = sld [smem:[%s5343_s0 + %s4228_s22]]   ;;  %s4232_s22 = smov 32  }
  0x2e   :  { %5370 = sst [smem:[#allocation68_spill]] %s4403_s13 }
  0x2f   :  { %s4423_s13 = sld [smem:[%s5343_s0 + %s4230_s7]]  }
  0x32   :  { %5371 = sst [smem:[#allocation69_spill]] %s4413_s27 }
  0x33   :  { %s4433_s27 = sld [smem:[%s5343_s0 + %s4232_s22]]  }
  0x34   :  { %70 = vsyncpa [#allocation3], 0 }
  0x35   :  { %71 = vsyncpa [#allocation6], 0 }
  0x36   :  { %72 = vsyncpa [#allocation9], 0 }
  0x37   :  { %73 = vsyncpa [#allocation12], 0 }
  0x38   :  { %74 = vsyncpa [#allocation15], 0 }
  0x39   :  { %75 = vsyncpa [#allocation18], 0 }
  0x3a   :  { %76 = vsyncpa [#allocation21], 0 }
  0x3b   :  { %77 = vsyncpa [#allocation24], 0 }
  0x3c   :  { %78 = vsyncpa [#allocation27], 0 }
  0x3d   :  { %79 = vsyncpa [#allocation30], 0 }
  0x3e   :  { %80 = vsyncpa [#allocation33], 0 }
  0x3f   :  { %81 = vsyncpa [#allocation36], 0 }
  0x40   :  { %82 = vsyncpa [#allocation39], 0 }
  0x41   :  { %83 = vsyncpa [#allocation4], 0  ;;  %s101_s0 = sshll.u32 %s4278_s9, 4  ;;  %s4233_s28 = smov [#allocation5]   ;;  %s102_s0 = int_to_ptr.hbm [resolvable:$true] %s101_s0 }
  0x42   :  { %s103_s1 = sshll.u32 %s4233_s28, 4  ;;  %s130_s2 = sshll.u32 %s4293_s21, 4  ;;  %s104_s1 = int_to_ptr.vmem [resolvable:$true] %s103_s1  ;;  %s131_s2 = int_to_ptr.hbm [resolvable:$true] %s130_s2 }
  0x43   :  { %s3573_s7 = sshra.s32 %s102_s0, 4  ;;  %s3577_s11 = scalar_lea.hbm %s4278_s9, 8  ;;  %s3574_s7 = int_to_ptr.hbm [resolvable:$true] %s3573_s7 }
  0x44   :  { %s3575_s10 = scalar_lea.hbm %s3574_s7, 8  ;;  %p3578_p1 = scmp.lt.s32.totalorder %s3574_s7, %s4278_s9 }
  0x45   :  { %p3576_p0 = scmp.ne.s32.totalorder %s3574_s7, %s3575_s10  ;;  %p3579_p2 = scmp.lt.s32.totalorder %s3577_s11, %s3575_s10 }
  0x47   :  { %p3580_p3 = por %p3579_p2, %p3578_p1 }
  0x49   :  { %p3581_p4 = pnand %p3580_p3, %p3576_p0 }
  0x4b   :  { %3584 = shalt.err (!%p3581_p4)
}
  0x4c   :  { %s4234_s15 = smov 64   ;;  %s4235_s16 = smov 4  }
  0x4d   :  { %109 = dma.hbm_to_vmem [thread:$0]  %s102_s0, 128, %s104_s1, [#allocation6], %s4234_s15, %s4234_s15, %s4235_s16  }
  0x4e   :  { %s4236_s18 = smov [#allocation8]   ;;  %s154_s23 = sshll.u32 %s4303_s29, 4  ;;  %s155_s23 = int_to_ptr.hbm [resolvable:$true] %s154_s23 }
  0x4f   :  { %s132_s22 = sshll.u32 %s4236_s18, 4  ;;  %s3597_s9 = sshra.s32 %s131_s2, 4  ;;  %s133_s22 = int_to_ptr.vmem [resolvable:$true] %s132_s22  ;;  %s3598_s9 = int_to_ptr.hbm [resolvable:$true] %s3597_s9 }
  0x50   :  { %s3599_s26 = scalar_lea.hbm %s3598_s9, 1  ;;  %s3601_s28 = scalar_lea.hbm %s4293_s21, 1 }
  0x51   :  { %p3600_p5 = scmp.ne.s32.totalorder %s3598_s9, %s3599_s26  ;;  %p3602_p6 = scmp.lt.s32.totalorder %s3598_s9, %s4293_s21 }
  0x52   :  { %p3603_p7 = scmp.lt.s32.totalorder %s3601_s28, %s3599_s26 }
  0x54   :  { %p3604_p8 = por %p3603_p7, %p3602_p6 }
  0x56   :  { %p3605_p9 = pnand %p3604_p8, %p3600_p5 }
  0x58   :  { %3608 = shalt.err (!%p3605_p9)
}
  0x59   :  { %135 = dma.hbm_to_vmem [thread:$0]  %s131_s2, 16, %s133_s22, [#allocation9]  }
  0x5a   :  { %s178_s0 = sshll.u32 %s4313_s8, 4  ;;  %s4237_s1 = smov [#allocation11]   ;;  %s179_s0 = int_to_ptr.hbm [resolvable:$true] %s178_s0 }
  0x5b   :  { %s156_s7 = sshll.u32 %s4237_s1, 4  ;;  %s3621_s10 = sshra.s32 %s155_s23, 4  ;;  %s157_s7 = int_to_ptr.vmem [resolvable:$true] %s156_s7  ;;  %s3622_s10 = int_to_ptr.hbm [resolvable:$true] %s3621_s10 }
  0x5c   :  { %s3623_s11 = scalar_lea.hbm %s3622_s10, 1  ;;  %s3625_s18 = scalar_lea.hbm %s4303_s29, 1 }
  0x5d   :  { %p3624_p10 = scmp.ne.s32.totalorder %s3622_s10, %s3623_s11  ;;  %p3626_p11 = scmp.lt.s32.totalorder %s3622_s10, %s4303_s29 }
  0x5e   :  { %p3627_p12 = scmp.lt.s32.totalorder %s3625_s18, %s3623_s11 }
  0x60   :  { %p3628_p13 = por %p3627_p12, %p3626_p11 }
  0x62   :  { %p3629_p0 = pnand %p3628_p13, %p3624_p10 }
  0x64   :  { %3632 = shalt.err (!%p3629_p0)
}
  0x65   :  { %159 = dma.hbm_to_vmem [thread:$0]  %s155_s23, 16, %s157_s7, [#allocation12]  }
  0x66   :  { %s4238_s21 = smov [#allocation14]   ;;  %s202_s22 = sshll.u32 %s4323_s19, 4  ;;  %s203_s22 = int_to_ptr.hbm [resolvable:$true] %s202_s22 }
  0x67   :  { %s180_s2 = sshll.u32 %s4238_s21, 4  ;;  %s3645_s9 = sshra.s32 %s179_s0, 4  ;;  %s181_s2 = int_to_ptr.vmem [resolvable:$true] %s180_s2  ;;  %s3646_s9 = int_to_ptr.hbm [resolvable:$true] %s3645_s9 }
  0x68   :  { %s3647_s26 = scalar_lea.hbm %s3646_s9, 1  ;;  %s3649_s28 = scalar_lea.hbm %s4313_s8, 1 }
  0x69   :  { %p3648_p1 = scmp.ne.s32.totalorder %s3646_s9, %s3647_s26  ;;  %p3650_p2 = scmp.lt.s32.totalorder %s3646_s9, %s4313_s8 }
  0x6a   :  { %p3651_p3 = scmp.lt.s32.totalorder %s3649_s28, %s3647_s26 }
  0x6c   :  { %p3652_p4 = por %p3651_p3, %p3650_p2 }
  0x6e   :  { %p3653_p5 = pnand %p3652_p4, %p3648_p1 }
  0x70   :  { %3656 = shalt.err (!%p3653_p5)
}
  0x71   :  { %183 = dma.hbm_to_vmem [thread:$0]  %s179_s0, 16, %s181_s2, [#allocation15]  }
  0x72   :  { %s226_s29 = sshll.u32 %s4338_s6, 4  ;;  %s4239_s23 = smov [#allocation17]   ;;  %s227_s29 = int_to_ptr.hbm [resolvable:$true] %s226_s29 }
  0x73   :  { %s204_s1 = sshll.u32 %s4239_s23, 4  ;;  %s3669_s7 = sshra.s32 %s203_s22, 4  ;;  %s205_s1 = int_to_ptr.vmem [resolvable:$true] %s204_s1  ;;  %s3670_s7 = int_to_ptr.hbm [resolvable:$true] %s3669_s7 }
  0x74   :  { %s3671_s10 = scalar_lea.hbm %s3670_s7, 1  ;;  %s3673_s11 = scalar_lea.hbm %s4323_s19, 1 }
  0x75   :  { %p3672_p6 = scmp.ne.s32.totalorder %s3670_s7, %s3671_s10  ;;  %p3674_p7 = scmp.lt.s32.totalorder %s3670_s7, %s4323_s19 }
  0x76   :  { %p3675_p8 = scmp.lt.s32.totalorder %s3673_s11, %s3671_s10 }
  0x78   :  { %p3676_p9 = por %p3675_p8, %p3674_p7 }
  0x7a   :  { %p3677_p10 = pnand %p3676_p9, %p3672_p6 }
  0x7c   :  { %3680 = shalt.err (!%p3677_p10)
}
  0x7d   :  { %207 = dma.hbm_to_vmem [thread:$0]  %s203_s22, 16, %s205_s1, [#allocation18]  }
  0x7e   :  { %s4240_s8 = smov [#allocation20]   ;;  %s255_s18 = sshll.u32 %s4368_s20, 4  ;;  %s4455_s18 = int_to_ptr.hbm [resolvable:$true] %s255_s18 }
  0x7f   :  { %s228_s0 = sshll.u32 %s4240_s8, 4  ;;  %s3693_s21 = sshra.s32 %s227_s29, 4  ;;  %s229_s0 = int_to_ptr.vmem [resolvable:$true] %s228_s0  ;;  %s3694_s21 = int_to_ptr.hbm [resolvable:$true] %s3693_s21 }
  0x80   :  { %s3695_s2 = scalar_lea.hbm %s3694_s21, 4  ;;  %s3697_s9 = scalar_lea.hbm %s4338_s6, 4 }
  0x81   :  { %p3696_p11 = scmp.ne.s32.totalorder %s3694_s21, %s3695_s2  ;;  %p3698_p12 = scmp.lt.s32.totalorder %s3694_s21, %s4338_s6 }
  0x82   :  { %p3699_p13 = scmp.lt.s32.totalorder %s3697_s9, %s3695_s2 }
  0x84   :  { %p3700_p0 = por %p3699_p13, %p3698_p12 }
  0x86   :  { %p3701_p1 = pnand %p3700_p0, %p3696_p11 }
  0x88   :  { %3704 = shalt.err (!%p3701_p1)
}
  0x89   :  { %231 = dma.hbm_to_vmem [thread:$0]  %s227_s29, 64, %s229_s0, [#allocation21]  }
  0x8a   :  { %s4241_s19 = smov [#allocation23]   ;;  %s281_s26 = sshll.u32 %s4378_s4, 4  ;;  %s282_s26 = int_to_ptr.hbm [resolvable:$true] %s281_s26 }
  0x8b   :  { %s257_s22 = sshll.u32 %s4241_s19, 4  ;;  %s3717_s28 = sshra.s32 %s4455_s18, 4  ;;  %s258_s22 = int_to_ptr.vmem [resolvable:$true] %s257_s22  ;;  %s3718_s28 = int_to_ptr.hbm [resolvable:$true] %s3717_s28 }
  0x8c   :  { %s3719_s23 = scalar_lea.hbm %s3718_s28, 2  ;;  %s3721_s1 = scalar_lea.hbm %s4368_s20, 2 }
  0x8d   :  { %p3720_p2 = scmp.ne.s32.totalorder %s3718_s28, %s3719_s23  ;;  %p3722_p3 = scmp.lt.s32.totalorder %s3718_s28, %s4368_s20 }
  0x8e   :  { %p3723_p4 = scmp.lt.s32.totalorder %s3721_s1, %s3719_s23 }
  0x90   :  { %p3724_p5 = por %p3723_p4, %p3722_p3 }
  0x92   :  { %p3725_p6 = pnand %p3724_p5, %p3720_p2 }
  0x94   :  { %3728 = shalt.err (!%p3725_p6)
}
  0x95   :  { %s4242_s6 = smov 16   ;;  %s4243_s29 = smov 1  }
  0x96   :  { %263 = dma.hbm_to_vmem [thread:$0]  %s4455_s18, 32, %s258_s22, [#allocation24], %s4242_s6, %s4242_s6, %s4243_s29  }
  0x97   :  { %s4244_s7 = smov [#allocation26]   ;;  %s307_s11 = sshll.u32 %s4388_s24, 4  ;;  %s4468_s11 = int_to_ptr.hbm [resolvable:$true] %s307_s11 }
  0x98   :  { %s283_s10 = sshll.u32 %s4244_s7, 4  ;;  %s3741_s20 = sshra.s32 %s282_s26, 4  ;;  %s284_s10 = int_to_ptr.vmem [resolvable:$true] %s283_s10  ;;  %s3742_s20 = int_to_ptr.hbm [resolvable:$true] %s3741_s20 }
  0x99   :  { %s3743_s8 = scalar_lea.hbm %s3742_s20, 2  ;;  %s3745_s0 = scalar_lea.hbm %s4378_s4, 2 }
  0x9a   :  { %p3744_p7 = scmp.ne.s32.totalorder %s3742_s20, %s3743_s8  ;;  %p3746_p8 = scmp.lt.s32.totalorder %s3742_s20, %s4378_s4 }
  0x9b   :  { %p3747_p9 = scmp.lt.s32.totalorder %s3745_s0, %s3743_s8 }
  0x9d   :  { %p3748_p10 = por %p3747_p9, %p3746_p8 }
  0x9f   :  { %p3749_p11 = pnand %p3748_p10, %p3744_p7 }
  0xa1   :  { %3752 = shalt.err (!%p3749_p11)
}
  0xa2   :  { %289 = dma.hbm_to_vmem [thread:$0]  %s282_s26, 32, %s284_s10, [#allocation27], %s4242_s6, %s4242_s6, %s4243_s29  }
  0xa3   :  { %s333_s18 = sshll.u32 %s4398_s12, 4  ;;  %s4245_s21 = smov [#allocation29]   ;;  %s4476_s18 = int_to_ptr.hbm [resolvable:$true] %s333_s18 }
  0xa4   :  { %s309_s2 = sshll.u32 %s4245_s21, 4  ;;  %s3765_s9 = sshra.s32 %s4468_s11, 4  ;;  %s310_s2 = int_to_ptr.vmem [resolvable:$true] %s309_s2  ;;  %s3766_s9 = int_to_ptr.hbm [resolvable:$true] %s3765_s9 }
  0xa5   :  { %s3767_s4 = scalar_lea.hbm %s3766_s9, 2  ;;  %s3769_s19 = scalar_lea.hbm %s4388_s24, 2 }
  0xa6   :  { %p3768_p12 = scmp.ne.s32.totalorder %s3766_s9, %s3767_s4  ;;  %p3770_p13 = scmp.lt.s32.totalorder %s3766_s9, %s4388_s24 }
  0xa7   :  { %p3771_p0 = scmp.lt.s32.totalorder %s3769_s19, %s3767_s4 }
  0xa9   :  { %p3772_p1 = por %p3771_p0, %p3770_p13 }
  0xab   :  { %p3773_p2 = pnand %p3772_p1, %p3768_p12 }
  0xad   :  { %3776 = shalt.err (!%p3773_p2)
}
  0xae   :  { %315 = dma.hbm_to_vmem [thread:$0]  %s4468_s11, 32, %s310_s2, [#allocation30], %s4242_s6, %s4242_s6, %s4243_s29  }
  0xaf   :  { %s4246_s22 = smov [#allocation32]   ;;  %s359_s28 = sshll.u32 %s4408_s30, 4  ;;  %s4486_s28 = int_to_ptr.hbm [resolvable:$true] %s359_s28 }
  0xb0   :  { %s335_s26 = sshll.u32 %s4246_s22, 4  ;;  %s3789_s24 = sshra.s32 %s4476_s18, 4  ;;  %s336_s26 = int_to_ptr.vmem [resolvable:$true] %s335_s26  ;;  %s3790_s24 = int_to_ptr.hbm [resolvable:$true] %s3789_s24 }
  0xb1   :  { %s3791_s23 = scalar_lea.hbm %s3790_s24, 2  ;;  %s3793_s1 = scalar_lea.hbm %s4398_s12, 2 }
  0xb2   :  { %p3792_p3 = scmp.ne.s32.totalorder %s3790_s24, %s3791_s23  ;;  %p3794_p4 = scmp.lt.s32.totalorder %s3790_s24, %s4398_s12 }
  0xb3   :  { %p3795_p5 = scmp.lt.s32.totalorder %s3793_s1, %s3791_s23 }
  0xb5   :  { %p3796_p6 = por %p3795_p5, %p3794_p4 }
  0xb7   :  { %p3797_p7 = pnand %p3796_p6, %p3792_p3 }
  0xb9   :  { %3800 = shalt.err (!%p3797_p7)
}
  0xba   :  { %341 = dma.hbm_to_vmem [thread:$0]  %s4476_s18, 32, %s336_s26, [#allocation33], %s4242_s6, %s4242_s6, %s4243_s29  }
  0xbb   :  { %s88_s7 = sshll.u32 %s4273_s5, 4  ;;  %s4247_s10 = smov [#allocation35]   ;;  %s4496_s7 = int_to_ptr.hbm [resolvable:$true] %s88_s7 }
  0xbc   :  { %s361_s11 = sshll.u32 %s4247_s10, 4  ;;  %s3813_s12 = sshra.s32 %s4486_s28, 4  ;;  %s362_s11 = int_to_ptr.vmem [resolvable:$true] %s361_s11  ;;  %s3814_s12 = int_to_ptr.hbm [resolvable:$true] %s3813_s12 }
  0xbd   :  { %s3815_s20 = scalar_lea.hbm %s3814_s12, 2  ;;  %s3817_s8 = scalar_lea.hbm %s4408_s30, 2 }
  0xbe   :  { %p3816_p8 = scmp.ne.s32.totalorder %s3814_s12, %s3815_s20  ;;  %p3818_p9 = scmp.lt.s32.totalorder %s3814_s12, %s4408_s30 }
  0xbf   :  { %p3819_p10 = scmp.lt.s32.totalorder %s3817_s8, %s3815_s20 }
  0xc1   :  { %p3820_p11 = por %p3819_p10, %p3818_p9 }
  0xc3   :  { %p3821_p12 = pnand %p3820_p11, %p3816_p8 }
  0xc5   :  { %3824 = shalt.err (!%p3821_p12)
}
  0xc6   :  { %367 = dma.hbm_to_vmem [thread:$0]  %s4486_s28, 32, %s362_s11, [#allocation36], %s4242_s6, %s4242_s6, %s4243_s29  }
  0xc7   :  { %s4248_s0 = smov [#allocation2]   ;;  %s116_s21 = sshll.u32 %s4288_s17, 4  ;;  %s4506_s21 = int_to_ptr.hbm [resolvable:$true] %s116_s21 }
  0xc8   :  { %s90_s18 = sshll.u32 %s4248_s0, 4  ;;  %s3837_s30 = sshra.s32 %s4496_s7, 4  ;;  %s91_s18 = int_to_ptr.vmem [resolvable:$true] %s90_s18  ;;  %s3838_s30 = int_to_ptr.hbm [resolvable:$true] %s3837_s30 }
  0xc9   :  { %s3839_s2 = scalar_lea.hbm %s3838_s30, 8  ;;  %s3841_s9 = scalar_lea.hbm %s4273_s5, 8 }
  0xca   :  { %p3840_p13 = scmp.ne.s32.totalorder %s3838_s30, %s3839_s2  ;;  %p3842_p0 = scmp.lt.s32.totalorder %s3838_s30, %s4273_s5 }
  0xcb   :  { %p3843_p1 = scmp.lt.s32.totalorder %s3841_s9, %s3839_s2 }
  0xcd   :  { %p3844_p2 = por %p3843_p1, %p3842_p0 }
  0xcf   :  { %p3845_p3 = pnand %p3844_p2, %p3840_p13 }
  0xd1   :  { %3848 = shalt.err (!%p3845_p3)
}
  0xd2   :  { %96 = dma.hbm_to_vmem [thread:$0]  %s4496_s7, 128, %s91_s18, [#allocation3], %s4234_s15, %s4234_s15, %s4235_s16  }
  0xd3   :  { %s140_s4 = sshll.u32 %s4298_s25, 4  ;;  %s4249_s19 = smov [#allocation7]   ;;  %s4516_s4 = int_to_ptr.hbm [resolvable:$true] %s140_s4 }
  0xd4   :  { %s118_s22 = sshll.u32 %s4249_s19, 4  ;;  %s3861_s5 = sshra.s32 %s4506_s21, 4  ;;  %s119_s22 = int_to_ptr.vmem [resolvable:$true] %s118_s22  ;;  %s3862_s5 = int_to_ptr.hbm [resolvable:$true] %s3861_s5 }
  0xd5   :  { %s3863_s26 = scalar_lea.hbm %s3862_s5, 8  ;;  %s3865_s28 = scalar_lea.hbm %s4288_s17, 8 }
  0xd6   :  { %p3864_p4 = scmp.ne.s32.totalorder %s3862_s5, %s3863_s26  ;;  %p3866_p5 = scmp.lt.s32.totalorder %s3862_s5, %s4288_s17 }
  0xd7   :  { %p3867_p6 = scmp.lt.s32.totalorder %s3865_s28, %s3863_s26 }
  0xd9   :  { %p3868_p7 = por %p3867_p6, %p3866_p5 }
  0xdb   :  { %p3869_p8 = pnand %p3868_p7, %p3864_p4 }
  0xdd   :  { %3872 = shalt.err (!%p3869_p8)
}
  0xde   :  { %s5372_s24 = sld [smem:[#allocation56_spill]]  ;;  %s4250_s23 = smov [#allocation10]  }
  0xdf   :  { %124 = dma.hbm_to_vmem [thread:$0]  %s4506_s21, 128, %s119_s22, [#allocation6], %s4234_s15, %s4234_s15, %s4235_s16  }
  0xe0   :  { %s142_s1 = sshll.u32 %s4250_s23, 4  ;;  %s3885_s17 = sshra.s32 %s4516_s4, 4  ;;  %s143_s1 = int_to_ptr.vmem [resolvable:$true] %s142_s1  ;;  %s3886_s17 = int_to_ptr.hbm [resolvable:$true] %s3885_s17 }
  0xe1   :  { %s3887_s10 = scalar_lea.hbm %s3886_s17, 8  ;;  %s3889_s11 = scalar_lea.hbm %s4298_s25, 8 }
  0xe2   :  { %p3888_p9 = scmp.ne.s32.totalorder %s3886_s17, %s3887_s10  ;;  %p3890_p10 = scmp.lt.s32.totalorder %s3886_s17, %s4298_s25 }
  0xe3   :  { %p3891_p11 = scmp.lt.s32.totalorder %s3889_s11, %s3887_s10 }
  0xe4   :  { %s164_s7 = sshll.u32 %s5372_s24, 4  ;;  %s4526_s7 = int_to_ptr.hbm [resolvable:$true] %s164_s7 }
  0xe5   :  { %p3892_p12 = por %p3891_p11, %p3890_p10 }
  0xe7   :  { %p3893_p13 = pnand %p3892_p12, %p3888_p9 }
  0xe9   :  { %3896 = shalt.err (!%p3893_p13)
}
  0xea   :  { %s5373_s12 = sld [smem:[#allocation57_spill]]  ;;  %s4251_s8 = smov [#allocation13]  }
  0xeb   :  { %148 = dma.hbm_to_vmem [thread:$0]  %s4516_s4, 128, %s143_s1, [#allocation9], %s4234_s15, %s4234_s15, %s4235_s16  }
  0xec   :  { %s166_s0 = sshll.u32 %s4251_s8, 4  ;;  %s3909_s25 = sshra.s32 %s4526_s7, 4  ;;  %s167_s0 = int_to_ptr.vmem [resolvable:$true] %s166_s0  ;;  %s3910_s25 = int_to_ptr.hbm [resolvable:$true] %s3909_s25 }
  0xed   :  { %s3911_s18 = scalar_lea.hbm %s3910_s25, 16  ;;  %s3913_s21 = scalar_lea.hbm %s5372_s24, 16 }
  0xee   :  { %p3912_p0 = scmp.ne.s32.totalorder %s3910_s25, %s3911_s18  ;;  %p3914_p1 = scmp.lt.s32.totalorder %s3910_s25, %s5372_s24 }
  0xef   :  { %p3915_p2 = scmp.lt.s32.totalorder %s3913_s21, %s3911_s18 }
  0xf0   :  { %s188_s20 = sshll.u32 %s5373_s12, 4  ;;  %s4536_s20 = int_to_ptr.hbm [resolvable:$true] %s188_s20 }
  0xf1   :  { %p3916_p3 = por %p3915_p2, %p3914_p1 }
  0xf3   :  { %p3917_p4 = pnand %p3916_p3, %p3912_p0 }
  0xf5   :  { %3920 = shalt.err (!%p3917_p4)
}
  0xf6   :  { %s5374_s30 = sld [smem:[#allocation59_spill]]  ;;  %s4252_s2 = smov [#allocation16]  }
  0xf7   :  { %172 = dma.hbm_to_vmem [thread:$0]  %s4526_s7, 256, %s167_s0, [#allocation12], %s4234_s15, %s4234_s15, %s4235_s16  }
  0xf8   :  { %s190_s9 = sshll.u32 %s4252_s2, 4  ;;  %s3933_s19 = sshra.s32 %s4536_s20, 4  ;;  %s191_s9 = int_to_ptr.vmem [resolvable:$true] %s190_s9  ;;  %s3934_s19 = int_to_ptr.hbm [resolvable:$true] %s3933_s19 }
  0xf9   :  { %s3935_s22 = scalar_lea.hbm %s3934_s19, 16  ;;  %s3937_s5 = scalar_lea.hbm %s5373_s12, 16 }
  0xfa   :  { %p3936_p5 = scmp.ne.s32.totalorder %s3934_s19, %s3935_s22  ;;  %p3938_p6 = scmp.lt.s32.totalorder %s3934_s19, %s5373_s12 }
  0xfb   :  { %p3939_p7 = scmp.lt.s32.totalorder %s3937_s5, %s3935_s22 }
  0xfc   :  { %s215_s4 = sshll.u32 %s5374_s30, 4  ;;  %s216_s4 = int_to_ptr.hbm [resolvable:$true] %s215_s4 }
  0xfd   :  { %p3940_p8 = por %p3939_p7, %p3938_p6 }
  0xff   :  { %p3941_p9 = pnand %p3940_p8, %p3936_p5 }
 0x101   :  { %3944 = shalt.err (!%p3941_p9)
}
 0x102   :  { %s5375_s26 = sld [smem:[#allocation60_spill]]  ;;  %s4253_s24 = smov [#allocation19]  }
 0x103   :  { %196 = dma.hbm_to_vmem [thread:$0]  %s4536_s20, 256, %s191_s9, [#allocation15], %s4234_s15, %s4234_s15, %s4235_s16  }
 0x104   :  { %s217_s23 = sshll.u32 %s4253_s24, 4  ;;  %s3957_s1 = sshra.s32 %s216_s4, 4  ;;  %s218_s23 = int_to_ptr.vmem [resolvable:$true] %s217_s23  ;;  %s3958_s1 = int_to_ptr.hbm [resolvable:$true] %s3957_s1 }
 0x105   :  { %s3959_s7 = scalar_lea.hbm %s3958_s1, 1  ;;  %s3961_s17 = scalar_lea.hbm %s5374_s30, 1 }
 0x106   :  { %p3960_p10 = scmp.ne.s32.totalorder %s3958_s1, %s3959_s7  ;;  %p3962_p11 = scmp.lt.s32.totalorder %s3958_s1, %s5374_s30 }
 0x107   :  { %p3963_p12 = scmp.lt.s32.totalorder %s3961_s17, %s3959_s7 }
 0x108   :  { %s237_s28 = sshll.u32 %s5375_s26, 4  ;;  %s238_s28 = int_to_ptr.hbm [resolvable:$true] %s237_s28 }
 0x109   :  { %p3964_p13 = por %p3963_p12, %p3962_p11 }
 0x10b   :  { %p3965_p0 = pnand %p3964_p13, %p3960_p10 }
 0x10d   :  { %3968 = shalt.err (!%p3965_p0)
}
 0x10e   :  { %220 = dma.hbm_to_vmem [thread:$0]  %s216_s4, 16, %s218_s23, [#allocation18]  }
 0x10f   :  { %s5376_s10 = sld [smem:[#allocation65_spill]]  ;;  %s4254_s11 = smov [#allocation22]  }
 0x110   :  { %s239_s12 = sshll.u32 %s4254_s11, 4  ;;  %s3981_s8 = sshra.s32 %s238_s28, 4  ;;  %s240_s12 = int_to_ptr.vmem [resolvable:$true] %s239_s12  ;;  %s3982_s8 = int_to_ptr.hbm [resolvable:$true] %s3981_s8 }
 0x111   :  { %s3983_s0 = scalar_lea.hbm %s3982_s8, 1  ;;  %s3985_s25 = scalar_lea.hbm %s5375_s26, 1 }
 0x112   :  { %p3984_p1 = scmp.ne.s32.totalorder %s3982_s8, %s3983_s0  ;;  %p3986_p2 = scmp.lt.s32.totalorder %s3982_s8, %s5375_s26 }
 0x113   :  { %p3987_p3 = scmp.lt.s32.totalorder %s3985_s25, %s3983_s0 }
 0x115   :  { %s268_s20 = sshll.u32 %s5376_s10, 4  ;;  %p3988_p4 = por %p3987_p3, %p3986_p2  ;;  %s4557_s20 = int_to_ptr.hbm [resolvable:$true] %s268_s20 }
 0x117   :  { %p3989_p5 = pnand %p3988_p4, %p3984_p1 }
 0x119   :  { %3992 = shalt.err (!%p3989_p5)
}
 0x11a   :  { %242 = dma.hbm_to_vmem [thread:$0]  %s238_s28, 16, %s240_s12, [#allocation21]  }
 0x11b   :  { %s5377_s18 = sld [smem:[#allocation66_spill]]  ;;  %s4255_s30 = smov [#allocation25]  }
 0x11c   :  { %s270_s2 = sshll.u32 %s4255_s30, 4  ;;  %s4005_s9 = sshra.s32 %s4557_s20, 4  ;;  %s271_s2 = int_to_ptr.vmem [resolvable:$true] %s270_s2  ;;  %s4006_s9 = int_to_ptr.hbm [resolvable:$true] %s4005_s9 }
 0x11d   :  { %s4007_s4 = scalar_lea.hbm %s4006_s9, 32  ;;  %s4009_s19 = scalar_lea.hbm %s5376_s10, 32 }
 0x11e   :  { %p4008_p6 = scmp.ne.s32.totalorder %s4006_s9, %s4007_s4  ;;  %p4010_p7 = scmp.lt.s32.totalorder %s4006_s9, %s5376_s10 }
 0x11f   :  { %p4011_p8 = scmp.lt.s32.totalorder %s4009_s19, %s4007_s4 }
 0x121   :  { %s294_s21 = sshll.u32 %s5377_s18, 4  ;;  %p4012_p9 = por %p4011_p8, %p4010_p7  ;;  %s4562_s21 = int_to_ptr.hbm [resolvable:$true] %s294_s21 }
 0x123   :  { %p4013_p10 = pnand %p4012_p9, %p4008_p6 }
 0x125   :  { %4016 = shalt.err (!%p4013_p10)
}
 0x126   :  { %s5378_s22 = sld [smem:[#allocation67_spill]]  ;;  %s4256_s5 = smov [#allocation28]  }
 0x127   :  { %276 = dma.hbm_to_vmem [thread:$0]  %s4557_s20, 512, %s271_s2, [#allocation24], %s4234_s15, %s4234_s15, %s4235_s16  }
 0x128   :  { %s296_s26 = sshll.u32 %s4256_s5, 4  ;;  %s4029_s24 = sshra.s32 %s4562_s21, 4  ;;  %s297_s26 = int_to_ptr.vmem [resolvable:$true] %s296_s26  ;;  %s4030_s24 = int_to_ptr.hbm [resolvable:$true] %s4029_s24 }
 0x129   :  { %s4031_s23 = scalar_lea.hbm %s4030_s24, 32  ;;  %s4033_s1 = scalar_lea.hbm %s5377_s18, 32 }
 0x12a   :  { %p4032_p11 = scmp.ne.s32.totalorder %s4030_s24, %s4031_s23  ;;  %p4034_p12 = scmp.lt.s32.totalorder %s4030_s24, %s5377_s18 }
 0x12b   :  { %p4035_p13 = scmp.lt.s32.totalorder %s4033_s1, %s4031_s23 }
 0x12c   :  { %s320_s28 = sshll.u32 %s5378_s22, 4  ;;  %s4572_s28 = int_to_ptr.hbm [resolvable:$true] %s320_s28 }
 0x12d   :  { %p4036_p0 = por %p4035_p13, %p4034_p12 }
 0x12f   :  { %p4037_p1 = pnand %p4036_p0, %p4032_p11 }
 0x131   :  { %4040 = shalt.err (!%p4037_p1)
}
 0x132   :  { %s5379_s7 = sld [smem:[#allocation68_spill]]  ;;  %s4257_s10 = smov [#allocation31]  }
 0x133   :  { %302 = dma.hbm_to_vmem [thread:$0]  %s4562_s21, 512, %s297_s26, [#allocation27], %s4234_s15, %s4234_s15, %s4235_s16  }
 0x134   :  { %s322_s11 = sshll.u32 %s4257_s10, 4  ;;  %s4053_s12 = sshra.s32 %s4572_s28, 4  ;;  %s323_s11 = int_to_ptr.vmem [resolvable:$true] %s322_s11  ;;  %s4054_s12 = int_to_ptr.hbm [resolvable:$true] %s4053_s12 }
 0x135   :  { %s4055_s20 = scalar_lea.hbm %s4054_s12, 2  ;;  %s4057_s8 = scalar_lea.hbm %s5378_s22, 2 }
 0x136   :  { %p4056_p2 = scmp.ne.s32.totalorder %s4054_s12, %s4055_s20  ;;  %p4058_p3 = scmp.lt.s32.totalorder %s4054_s12, %s5378_s22 }
 0x137   :  { %p4059_p4 = scmp.lt.s32.totalorder %s4057_s8, %s4055_s20 }
 0x138   :  { %s346_s17 = sshll.u32 %s5379_s7, 4  ;;  %s4582_s17 = int_to_ptr.hbm [resolvable:$true] %s346_s17 }
 0x139   :  { %p4060_p5 = por %p4059_p4, %p4058_p3 }
 0x13b   :  { %p4061_p6 = pnand %p4060_p5, %p4056_p2 }
 0x13d   :  { %4064 = shalt.err (!%p4061_p6)
}
 0x13e   :  { %328 = dma.hbm_to_vmem [thread:$0]  %s4572_s28, 32, %s323_s11, [#allocation30], %s4242_s6, %s4242_s6, %s4243_s29  }
 0x13f   :  { %s4258_s0 = smov [#allocation34]   ;;  %s374_s18 = sshll.u32 %s4418_s14, 4  ;;  %s4592_s18 = int_to_ptr.hbm [resolvable:$true] %s374_s18 }
 0x140   :  { %s348_s25 = sshll.u32 %s4258_s0, 4  ;;  %s4077_s21 = sshra.s32 %s4582_s17, 4  ;;  %s349_s25 = int_to_ptr.vmem [resolvable:$true] %s348_s25  ;;  %s4078_s21 = int_to_ptr.hbm [resolvable:$true] %s4077_s21 }
 0x141   :  { %s4079_s30 = scalar_lea.hbm %s4078_s21, 32  ;;  %s4081_s2 = scalar_lea.hbm %s5379_s7, 32 }
 0x142   :  { %p4080_p7 = scmp.ne.s32.totalorder %s4078_s21, %s4079_s30  ;;  %p4082_p8 = scmp.lt.s32.totalorder %s4078_s21, %s5379_s7 }
 0x143   :  { %p4083_p9 = scmp.lt.s32.totalorder %s4081_s2, %s4079_s30 }
 0x145   :  { %p4084_p10 = por %p4083_p9, %p4082_p8 }
 0x147   :  { %p4085_p11 = pnand %p4084_p10, %p4080_p7 }
 0x149   :  { %4088 = shalt.err (!%p4085_p11)
}
 0x14a   :  { %354 = dma.hbm_to_vmem [thread:$0]  %s4582_s17, 512, %s349_s25, [#allocation33], %s4234_s15, %s4234_s15, %s4235_s16  }
 0x14b   :  { %s389_s9 = sshll.u32 %s4428_s3, 4  ;;  %s4259_s4 = smov [#allocation37]   ;;  %s4602_s9 = int_to_ptr.hbm [resolvable:$true] %s389_s9 }
 0x14c   :  { %s376_s19 = sshll.u32 %s4259_s4, 4  ;;  %s4101_s22 = sshra.s32 %s4592_s18, 4  ;;  %s377_s19 = int_to_ptr.vmem [resolvable:$true] %s376_s19  ;;  %s4102_s22 = int_to_ptr.hbm [resolvable:$true] %s4101_s22 }
 0x14d   :  { %s4103_s5 = scalar_lea.hbm %s4102_s22, 2  ;;  %s4105_s26 = scalar_lea.hbm %s4418_s14, 2 }
 0x14e   :  { %p4104_p12 = scmp.ne.s32.totalorder %s4102_s22, %s4103_s5  ;;  %p4106_p13 = scmp.lt.s32.totalorder %s4102_s22, %s4418_s14 }
 0x14f   :  { %p4107_p0 = scmp.lt.s32.totalorder %s4105_s26, %s4103_s5 }
 0x151   :  { %p4108_p1 = por %p4107_p0, %p4106_p13 }
 0x153   :  { %p4109_p2 = pnand %p4108_p1, %p4104_p12 }
 0x155   :  { %4112 = shalt.err (!%p4109_p2)
}
 0x156   :  { %382 = dma.hbm_to_vmem [thread:$0]  %s4592_s18, 32, %s377_s19, [#allocation36], %s4242_s6, %s4242_s6, %s4243_s29  }
 0x157   :  { %s4260_s15 = smov [#allocation38]   ;;  %s4125_s28 = sshra.s32 %s4602_s9, 4  ;;  %s4126_s28 = int_to_ptr.hbm [resolvable:$true] %s4125_s28 }
 0x158   :  { %s391_s16 = sshll.u32 %s4260_s15, 4  ;;  %s4127_s24 = scalar_lea.hbm %s4126_s28, 2  ;;  %s392_s16 = int_to_ptr.vmem [resolvable:$true] %s391_s16 }
 0x159   :  { %p4128_p3 = scmp.ne.s32.totalorder %s4126_s28, %s4127_s24  ;;  %s4129_s14 = scalar_lea.hbm %s4428_s3, 2 }
 0x15a   :  { %p4130_p4 = scmp.lt.s32.totalorder %s4126_s28, %s4428_s3  ;;  %p4131_p5 = scmp.lt.s32.totalorder %s4129_s14, %s4127_s24 }
 0x15c   :  { %p4132_p6 = por %p4131_p5, %p4130_p4 }
 0x15e   :  { %p4133_p7 = pnand %p4132_p6, %p4128_p3 }
 0x160   :  { %4136 = shalt.err (!%p4133_p7)
}
 0x161   :  { %397 = dma.hbm_to_vmem [thread:$0]  %s4602_s9, 32, %s392_s16, [#allocation39], %s4242_s6, %s4242_s6, %s4243_s29  }
 0x162   :  { %4173 = dma.done.wait [#allocation3], 128  }
 0x163   :  { %4174 = vsyncadd [#allocation3], 4294967168 }
 0x164   :  { %4175 = dma.done.wait [#allocation6], 256  }
 0x165   :  { %4176 = vsyncadd [#allocation6], 4294967040 }
 0x166   :  { %4177 = dma.done.wait [#allocation9], 144  }
 0x167   :  { %4178 = vsyncadd [#allocation9], 4294967152 }
 0x168   :  { %4179 = dma.done.wait [#allocation12], 272  }
 0x169   :  { %4180 = vsyncadd [#allocation12], 4294967024 }
 0x16a   :  { %4181 = dma.done.wait [#allocation15], 272  }
 0x16b   :  { %4182 = vsyncadd [#allocation15], 4294967024 }
 0x16c   :  { %4183 = dma.done.wait [#allocation18], 32  }
 0x16d   :  { %4184 = vsyncadd [#allocation18], 4294967264 }
 0x16e   :  { %4185 = dma.done.wait [#allocation21], 80  }
 0x16f   :  { %4186 = vsyncadd [#allocation21], 4294967216 }
 0x170   :  { %4187 = dma.done.wait [#allocation24], 544  }
 0x171   :  { %4188 = vsyncadd [#allocation24], 4294966752 }
 0x172   :  { %4189 = dma.done.wait [#allocation27], 544  }
 0x173   :  { %4190 = vsyncadd [#allocation27], 4294966752 }
 0x174   :  { %4191 = dma.done.wait [#allocation30], 64  }
 0x175   :  { %4192 = vsyncadd [#allocation30], 4294967232 }
 0x176   :  { %4193 = dma.done.wait [#allocation33], 544  }
 0x177   :  { %4194 = vsyncadd [#allocation33], 4294966752 }
 0x178   :  { %4195 = dma.done.wait [#allocation36], 64  }
 0x179   :  { %4196 = vsyncadd [#allocation36], 4294967232 }
 0x17a   :  { %4197 = dma.done.wait [#allocation39], 32  }
 0x17b   :  { %4198 = vsyncadd [#allocation39], 4294967264  ;;  %s5380_s3 = sld [smem:[#allocation58_spill]]  ;;  %v3273_v0 = vld [vmem:[#allocation7] sm:$0xff]  ;;  %v3274_v1 = vld [vmem:[#allocation10] sm:$0xff]  ;;  %vm517_vm0 = vcmask 130048  }
 0x17c   :  { %s5381_s6 = sld [smem:[#allocation55_spill]]  ;;  %v3272_v2 = vld [vmem:[#allocation2] sm:$0xff]  ;;  %528 = vmatpush.bf16.msra.mxu2 %v3273_v0  ;;  %v3277_v3 = vld [vmem:[#allocation13 + $0x8] sm:$0xff]  ;;  %vm667_vm1 = vcmask 1043456   ;;  %vm663_vm2 = vcmask 64512   ;;  %vm596_vm3 = vcmask 261120  }
 0x17d   :  { %v3276_v4 = vld [vmem:[#allocation13] sm:$0xff]  ;;  %s5382_s29 = sld [smem:[#allocation62_spill]]  ;;  %v3373_v9 = vld [vmem:[#allocation8] ss:$0 sm:$0xff]  ;;  %v3286_v18 = vld [vmem:[#allocation25 + $0x8] sm:$0xff]  ;;  %s2971_s11 = sshll.u32 %s4433_s27, 4  ;;  %s2972_s11 = int_to_ptr.hbm [resolvable:$true] %s2971_s11 }
 0x17e   :  { %v3275_v16 = vld [vmem:[#allocation5] sm:$0xff]  ;;  %s5383_s23 = sld [smem:[#allocation64_spill]]  ;;  %v3285_v20 = vld [vmem:[#allocation25] sm:$0xff]  ;;  %v3279_v23 = vld [vmem:[#allocation16 + $0x8] sm:$0xff]  ;;  %s4161_s12 = sshra.s32 %s2972_s11, 4  ;;  %s4162_s12 = int_to_ptr.hbm [resolvable:$true] %s4161_s12 }
 0x17f   :  { %3036 = vmatmul.msk.bf16.vlgmr.msra.gmra.mxu2 %vm517_vm0, %v3272_v2  ;;  %v3376_v22 = vld [vmem:[#allocation19] ss:$0 sm:$0xff]  ;;  %641 = vmatpush.bf16.msra.mxu3 %v3279_v23  ;;  %v3278_v25 = vld [vmem:[#allocation16] sm:$0xff]  ;;  %v653_v30 = vld [vmem:[#allocation20] sm:$0xf]  ;;  %s5384_s1 = sld [smem:[#allocation61_spill]]  ;;  %p4166_p9 = scmp.lt.s32.totalorder %s4162_s12, %s4433_s27 }
 0x180   :  { %557 = vmatpush.bf16.msrb.mxu2 %v3274_v1  ;;  %v695_v33 = vsel %vm667_vm1, %v653_v30, 0  ;;  %v3374_v36 = vld [vmem:[#allocation11] ss:$0 sm:$0xff]  ;;  %v3375_v42 = vld [vmem:[#allocation14] ss:$0 sm:$0xff]  ;;  %s5385_s7 = sld [smem:[#allocation63_spill]] }
 0x181   :  { %v651_v5 = vld [vmem:[%s5380_s3] sm:$0xf]  ;;  %704 = vmatpush.bf16.msra.mxu1 %v695_v33  ;;  %v3379_v54 = vld [vmem:[#allocation17] ss:$0 sm:$0xff]  ;;  %v4692_v62 = vld [vmem:[#allocation23] ss:$0 sm:$0xff] }
 0x182   :  { %v669_v7 = vsel %vm667_vm1, %v651_v5, 0  ;;  %v3280_v8 = vld [vmem:[%s5381_s6] sm:$0xff]  ;;  %v3380_v2 = vld [vmem:[#allocation22] ss:$0 sm:$0xff]  ;;  %s5386_s17 = sld [smem:[#allocation69_spill]]  ;;  %s4163_s20 = scalar_lea.hbm %s4162_s12, 16 }
 0x183   :  { %678 = vmatpush.bf16.msra.mxu0 %v669_v7  ;;  %v3282_v17 = vld [vmem:[%s5382_s29 + $0x8] sm:$0xff]  ;;  %v3281_v19 = vld [vmem:[%s5382_s29] sm:$0xff]  ;;  %642 = vmatpush.bf16.msra.mxu3 %v3278_v25  ;;  %p4164_p8 = scmp.ne.s32.totalorder %s4162_s12, %s4163_s20  ;;  %s4165_s8 = scalar_lea.hbm %s4433_s27, 16 }
 0x184   :  { %606 = vmatpush.bf16.msra.mxu2 %v3277_v3  ;;  %v3284_v31 = vld [vmem:[%s5383_s23 + $0x8] sm:$0xff]  ;;  %v3283_v35 = vld [vmem:[%s5383_s23] sm:$0xff]  ;;  %p4167_p10 = scmp.lt.s32.totalorder %s4165_s8, %s4163_s20 }
 0x185   :  { %v4642_v49 = vld [vmem:[%s5384_s1 + $0x18] sm:$0xff]  ;;  %v4647_v50 = vld [vmem:[%s5384_s1 + $0x10] sm:$0xff]  ;;  %v4654_v51 = vld [vmem:[%s5384_s1 + $0x8] sm:$0xff] }
 0x186   :  { %3068 = vmatmul.msk.bf16.vlgmr.msra.gmra.mxu0 %vm663_vm2, %v3280_v8  ;;  %902 = vmatpush.msrb.mxu1 %v4642_v49  ;;  %v4660_v52 = vld [vmem:[%s5384_s1] sm:$0xff]  ;;  %p4168_p11 = por %p4167_p10, %p4166_p9 }
 0x187   :  { %864 = vmatpush.bf16.msrb.mxu0 %v3286_v18  ;;  %825 = vmatpush.bf16.msrb.mxu3 %v3284_v31  ;;  %v4688_v61 = vld [vmem:[%s5385_s7] ss:$0 sm:$0xff] }
 0x188   :  { %607 = vmatpush.bf16.msra.mxu2 %v3276_v4  ;;  %903 = vmatpush.msrb.mxu1 %v4647_v50  ;;  %p4169_p12 = pnand %p4168_p11, %p4164_p8 }
 0x18a   :  { %904 = vmatpush.msrb.mxu1 %v4654_v51 }
 0x18b   :  { %865 = vmatpush.bf16.msrb.mxu0 %v3285_v20  ;;  %826 = vmatpush.bf16.msrb.mxu3 %v3283_v35 }
 0x18c   :  { %905 = vmatpush.msrb.mxu1 %v4660_v52 }
 0x18f   :  { %1057 = vmatpush.msra.mxu0 %v4642_v49 }
 0x191   :  { %1058 = vmatpush.msra.mxu0 %v4647_v50 }
 0x193   :  { %1059 = vmatpush.msra.mxu0 %v4654_v51 }
 0x195   :  { %1060 = vmatpush.msra.mxu0 %v4660_v52 }
 0x202   :  { %v530_v6 = vpop.f32.mrf.mxu2 }
 0x203   :  { %v531_v10 = vadd.f32 %v3373_v9, %v530_v6  ;;  %v680_v21 = vpop.f32.mrf.mxu0 }
 0x204   :  { %v681_v24 = vadd.f32 %v3376_v22, %v680_v21 }
 0x205   :  { %v535_v13 = vmax.f32 %v531_v10, 0.0 }
 0x206   :  { %v685_v27 = vmax.f32 %v681_v24, 0.0 }
 0x20a   :  { %v532_v11 = vpop.f32.mrf.mxu2 }
 0x20b   :  { %v533_v12 = vadd.f32 %v3373_v9, %v532_v11  ;;  %v682_v26 = vpop.f32.mrf.mxu0 }
 0x20c   :  { %v683_v28 = vadd.f32 %v3376_v22, %v682_v26 }
 0x20d   :  { %v536_v14 = vmax.f32 %v533_v12, 0.0 }
 0x20e   :  { %v686_v29 = vmax.f32 %v683_v28, 0.0 }
 0x20f   :  { %v537_v15 = vpack.c.bf16 %v536_v14, %v535_v13 }
 0x210   :  { %v687_v34 = vpack.c.bf16 %v686_v29, %v685_v27 }
 0x211   :  { %3041 = vmatmul.msk.bf16.vlgmr.msrb.gmra.mxu2 %vm517_vm0, %v537_v15 }
 0x212   :  { %786 = vmatpush.bf16.msrb.mxu2 %v3282_v17  ;;  %3069 = vmatmul.msk.bf16.vlgmr.msra.gmra.mxu1 %vm663_vm2, %v687_v34 }
 0x213   :  { %933 = vmatpush.msra.mxu1 %v4642_v49 }
 0x215   :  { %934 = vmatpush.msra.mxu1 %v4647_v50 }
 0x216   :  { %787 = vmatpush.bf16.msrb.mxu2 %v3281_v19 }
 0x217   :  { %935 = vmatpush.msra.mxu1 %v4654_v51 }
 0x219   :  { %936 = vmatpush.msra.mxu1 %v4660_v52 }
 0x221   :  { %3054 = vmatmul.msk.bf16.vlgmr.msra.gmra.mxu2 %vm596_vm3, %v3275_v16 }
 0x222   :  { %995 = vmatpush.msra.mxu2 %v4642_v49 }
 0x224   :  { %996 = vmatpush.msra.mxu2 %v4647_v50 }
 0x226   :  { %997 = vmatpush.msra.mxu2 %v4654_v51 }
 0x228   :  { %998 = vmatpush.msra.mxu2 %v4660_v52 }
 0x28f   :  { %v706_v58 = vpop.f32.mrf.mxu1 }
 0x290   :  { %v4702_v6 = vadd.f32 %v3380_v2, %v706_v58 }
 0x294   :  { %v559_v32 = vpop.f32.mrf.mxu2 }
 0x295   :  { %v4631_v38 = vadd.f32 %v3374_v36, %v559_v32 }
 0x297   :  { %v708_v4 = vpop.f32.mrf.mxu1 }
 0x298   :  { %v4704_v7 = vadd.f32 %v3380_v2, %v708_v4 }
 0x29a   :  { %v755_v11 = vpack.c.bf16 %v4704_v7, %v4702_v6 }
 0x29c   :  { %v561_v37 = vpop.f32.mrf.mxu2 }
 0x29d   :  { %v4633_v39 = vadd.f32 %v3374_v36, %v561_v37 }
 0x29f   :  { %v753_v40 = vpack.c.bf16 %v4633_v39, %v4631_v38 }
 0x2a1   :  { %3078 = vmatmul.msk.bf16.vlgmr.msrb.gmra.mxu2 %vm596_vm3, %v753_v40  ;;  %3100 = vmatmul.msk.bf16.vlgmr.msrb.gmra.mxu0 %vm596_vm3, %v753_v40 }
 0x2a2   :  { %1119 = vmatpush.msrb.mxu2 %v4642_v49 }
 0x2a4   :  { %v609_v41 = vpop.f32.mrf.mxu2  ;;  %1120 = vmatpush.msrb.mxu2 %v4647_v50 }
 0x2a5   :  { %v610_v43 = vadd.f32 %v3375_v42, %v609_v41 }
 0x2a6   :  { %1121 = vmatpush.msrb.mxu2 %v4654_v51 }
 0x2a7   :  { %v614_v46 = vmax.f32 %v610_v43, 0.0 }
 0x2a8   :  { %1122 = vmatpush.msrb.mxu2 %v4660_v52 }
 0x2ac   :  { %v611_v44 = vpop.f32.mrf.mxu2 }
 0x2ad   :  { %v612_v45 = vadd.f32 %v3375_v42, %v611_v44 }
 0x2af   :  { %v615_v47 = vmax.f32 %v612_v45, 0.0 }
 0x2b1   :  { %v616_v48 = vpack.c.bf16 %v615_v47, %v614_v46 }
 0x2b3   :  { %3063 = vmatmul.msk.bf16.vlgmr.msra.gmra.mxu3 %vm596_vm3, %v616_v48 }
 0x2b4   :  { %1026 = vmatpush.msra.mxu3 %v4642_v49 }
 0x2b6   :  { %1027 = vmatpush.msra.mxu3 %v4647_v50 }
 0x2b8   :  { %1028 = vmatpush.msra.mxu3 %v4654_v51 }
 0x2ba   :  { %1029 = vmatpush.msra.mxu3 %v4660_v52 }
 0x2c3   :  { %3089 = vmatmul.msk.bf16.vlgmr.msrb.gmra.mxu3 %vm596_vm3, %v753_v40 }
 0x2c4   :  { %1150 = vmatpush.msrb.mxu3 %v4642_v49 }
 0x2c6   :  { %1151 = vmatpush.msrb.mxu3 %v4647_v50 }
 0x2c8   :  { %1152 = vmatpush.msrb.mxu3 %v4654_v51 }
 0x2ca   :  { %1153 = vmatpush.msrb.mxu3 %v4660_v52 }
 0x31e   :  { %v4747_v47 = vpop.f32.mrf.mxu0 }
 0x324   :  { %v789_v60 = vpop.f32.mrf.mxu2 }
 0x325   :  { %v790_v0 = vadd.f32 %v4688_v61, %v789_v60 }
 0x326   :  { %v4749_v48 = vpop.f32.mrf.mxu0 }
 0x32c   :  { %v791_v5 = vpop.f32.mrf.mxu2 }
 0x32d   :  { %v792_v9 = vadd.f32 %v4688_v61, %v791_v5 }
 0x336   :  { %v644_v53 = vpop.f32.mrf.mxu3 }
 0x337   :  { %v4681_v56 = vadd.f32 %v3379_v54, %v644_v53 }
 0x33e   :  { %v646_v55 = vpop.f32.mrf.mxu3 }
 0x33f   :  { %v4683_v57 = vadd.f32 %v3379_v54, %v646_v55 }
 0x341   :  { %v754_v59 = vpack.c.bf16 %v4683_v57, %v4681_v56 }
 0x343   :  { %3079 = vmatmul.msk.bf16.gmra.mxu2 %vm596_vm3, %v754_v59  ;;  %3090 = vmatmul.msk.bf16.gmra.mxu3 %vm596_vm3, %v754_v59 }
 0x344   :  { %3101 = vmatmul.msk.bf16.gmra.mxu0 %vm596_vm3, %v754_v59 }
 0x346   :  { %v828_v63 = vpop.f32.mrf.mxu3 }
 0x347   :  { %v4697_v1 = vadd.f32 %v4692_v62, %v828_v63 }
 0x349   :  { %v882_v3 = vmul.f32 %v4697_v1, %v790_v0 }
 0x34b   :  { %3103 = vmatmul.msk.f32.vlgmr.msrb.gmra.mxu1 %vm596_vm3, %v882_v3 }
 0x34c   :  { %964 = vmatpush.msrb.mxu1 %v4642_v49 }
 0x34e   :  { %v830_v8 = vpop.f32.mrf.mxu3  ;;  %965 = vmatpush.msrb.mxu1 %v4647_v50 }
 0x34f   :  { %v831_v10 = vadd.f32 %v4692_v62, %v830_v8 }
 0x350   :  { %966 = vmatpush.msrb.mxu1 %v4654_v51 }
 0x351   :  { %v883_v12 = vmul.f32 %v831_v10, %v792_v9 }
 0x352   :  { %967 = vmatpush.msrb.mxu1 %v4660_v52 }
 0x353   :  { %3080 = vmatmul.msk.bf16.gmra.mxu2 %vm596_vm3, %v755_v11  ;;  %3091 = vmatmul.msk.bf16.gmra.mxu3 %vm596_vm3, %v755_v11 }
 0x354   :  { %3102 = vmatmul.msk.bf16.gmra.mxu0 %vm596_vm3, %v755_v11  ;;  %3104 = vmatmul.msk.f32.gmra.mxu1 %vm596_vm3, %v883_v12 }
 0x3c6   :  { %v794_v13 = vpop.f32.mrf.mxu2  ;;  %v833_v14 = vpop.f32.mrf.mxu3 }
 0x3c7   :  { %v795_v15 = vadd.f32 %v4688_v61, %v794_v13  ;;  %v834_v16 = vadd.f32 %v4692_v62, %v833_v14 }
 0x3c9   :  { %v975_v17 = vmul.f32 %v4697_v1, %v795_v15  ;;  %v913_v18 = vmul.f32 %v834_v16, %v790_v0  ;;  %v1006_v19 = vmul.f32 %v834_v16, %v795_v15 }
 0x3cb   :  { %3105 = vmatmul.msk.f32.vlgmr.msra.gmra.mxu1 %vm596_vm3, %v913_v18  ;;  %3109 = vmatmul.msk.f32.vlgmr.msra.gmra.mxu2 %vm596_vm3, %v975_v17 }
 0x3cc   :  { %3111 = vmatmul.msk.f32.vlgmr.msra.gmra.mxu3 %vm596_vm3, %v1006_v19  ;;  %1088 = vmatpush.msra.mxu1 %v4642_v49  ;;  %v4751_v49 = vpop.f32.mrf.mxu0  ;;  %v3288_v19 = vld [vmem:[#allocation28 + $0x8] sm:$0xff] }
 0x3cd   :  { %1326 = vmatpush.bf16.msrb.mxu0 %v3288_v19 }
 0x3ce   :  { %v796_v20 = vpop.f32.mrf.mxu2  ;;  %v835_v21 = vpop.f32.mrf.mxu3  ;;  %1089 = vmatpush.msra.mxu1 %v4647_v50 }
 0x3cf   :  { %v797_v22 = vadd.f32 %v4688_v61, %v796_v20  ;;  %v836_v23 = vadd.f32 %v4692_v62, %v835_v21  ;;  %v907_v50 = vpop.f32.mrf.mxu1 }
 0x3d0   :  { %1090 = vmatpush.msra.mxu1 %v4654_v51 }
 0x3d1   :  { %v914_v24 = vmul.f32 %v836_v23, %v792_v9  ;;  %v976_v25 = vmul.f32 %v831_v10, %v797_v22  ;;  %v1007_v26 = vmul.f32 %v836_v23, %v797_v22 }
 0x3d2   :  { %1091 = vmatpush.msra.mxu1 %v4660_v52 }
 0x3d3   :  { %3106 = vmatmul.msk.f32.gmra.mxu1 %vm596_vm3, %v914_v24  ;;  %3110 = vmatmul.msk.f32.gmra.mxu2 %vm596_vm3, %v976_v25 }
 0x3d4   :  { %3112 = vmatmul.msk.f32.gmra.mxu3 %vm596_vm3, %v1007_v26  ;;  %v4753_v51 = vpop.f32.mrf.mxu0 }
 0x3d6   :  { %v799_v27 = vpop.f32.mrf.mxu2  ;;  %v838_v28 = vpop.f32.mrf.mxu3 }
 0x3d7   :  { %v800_v29 = vadd.f32 %v4688_v61, %v799_v27  ;;  %v839_v30 = vadd.f32 %v4692_v62, %v838_v28  ;;  %v910_v52 = vpop.f32.mrf.mxu1 }
 0x3d9   :  { %v1099_v31 = vmul.f32 %v834_v16, %v800_v29  ;;  %v944_v32 = vmul.f32 %v839_v30, %v790_v0  ;;  %v1037_v33 = vmul.f32 %v839_v30, %v795_v15  ;;  %v1130_v34 = vmul.f32 %v839_v30, %v800_v29 }
 0x3da   :  { %v1068_v45 = vmul.f32 %v4697_v1, %v800_v29  ;;  %v3287_v29 = vld [vmem:[#allocation28] sm:$0xff] }
 0x3db   :  { %3107 = vmatmul.msk.f32.vlgmr.msrb.gmra.mxu1 %vm596_vm3, %v944_v32  ;;  %3113 = vmatmul.msk.f32.vlgmr.msra.gmra.mxu0 %vm596_vm3, %v1037_v33 }
 0x3dc   :  { %3117 = vmatmul.msk.f32.vlgmr.msrb.gmra.mxu2 %vm596_vm3, %v1099_v31  ;;  %3119 = vmatmul.msk.f32.vlgmr.msrb.gmra.mxu3 %vm596_vm3, %v1130_v34  ;;  %v4755_v53 = vpop.f32.mrf.mxu0 }
 0x3dd   :  { %1327 = vmatpush.bf16.msrb.mxu0 %v3287_v29 }
 0x3de   :  { %v801_v35 = vpop.f32.mrf.mxu2  ;;  %v840_v36 = vpop.f32.mrf.mxu3 }
 0x3df   :  { %v802_v37 = vadd.f32 %v4688_v61, %v801_v35  ;;  %v841_v40 = vadd.f32 %v4692_v62, %v840_v36 }
 0x3e1   :  { %v945_v41 = vmul.f32 %v841_v40, %v792_v9  ;;  %v1038_v42 = vmul.f32 %v841_v40, %v797_v22  ;;  %v1100_v43 = vmul.f32 %v836_v23, %v802_v37  ;;  %v1131_v44 = vmul.f32 %v841_v40, %v802_v37 }
 0x3e2   :  { %v1069_v46 = vmul.f32 %v831_v10, %v802_v37 }
 0x3e3   :  { %3108 = vmatmul.msk.f32.gmra.mxu1 %vm596_vm3, %v945_v41  ;;  %3114 = vmatmul.msk.f32.gmra.mxu0 %vm596_vm3, %v1038_v42 }
 0x3e4   :  { %3118 = vmatmul.msk.f32.gmra.mxu2 %vm596_vm3, %v1100_v43  ;;  %3120 = vmatmul.msk.f32.gmra.mxu3 %vm596_vm3, %v1131_v44  ;;  %v4757_v55 = vpop.f32.mrf.mxu0 }
 0x3eb   :  { %3115 = vmatmul.msk.f32.vlgmr.msra.gmra.mxu1 %vm596_vm3, %v1068_v45 }
 0x3f3   :  { %3116 = vmatmul.msk.f32.gmra.mxu1 %vm596_vm3, %v1069_v46 }
 0x448   :  { %v938_v54 = vpop.f32.mrf.mxu1 }
 0x449   :  { %v1161_v61 = vmax.f32 %v907_v50, %v938_v54 }
 0x44e   :  { %v1000_v59 = vpop.f32.mrf.mxu2 }
 0x44f   :  { %v1031_v60 = vpop.f32.mrf.mxu3 }
 0x450   :  { %v941_v58 = vpop.f32.mrf.mxu1  ;;  %v1205_v62 = vmax.f32 %v1000_v59, %v1031_v60 }
 0x451   :  { %v1162_v15 = vmax.f32 %v910_v52, %v941_v58 }
 0x456   :  { %v1003_v8 = vpop.f32.mrf.mxu2 }
 0x457   :  { %v1034_v9 = vpop.f32.mrf.mxu3 }
 0x458   :  { %v969_v63 = vpop.f32.mrf.mxu1  ;;  %v1062_v0 = vpop.f32.mrf.mxu0  ;;  %v1206_v16 = vmax.f32 %v1003_v8, %v1034_v9 }
 0x459   :  { %v1163_v1 = vmax.f32 %v1161_v61, %v969_v63  ;;  %v1207_v2 = vmax.f32 %v1205_v62, %v1062_v0 }
 0x45b   :  { %v1165_v3 = vsub.f32 %v907_v50, %v1163_v1  ;;  %v1171_v4 = vsub.f32 %v938_v54, %v1163_v1  ;;  %v1177_v5 = vsub.f32 %v969_v63, %v1163_v1  ;;  %v1209_v12 = vsub.f32 %v1000_v59, %v1207_v2 }
 0x45c   :  { %v1215_v14 = vsub.f32 %v1031_v60, %v1207_v2  ;;  %v1221_v42 = vsub.f32 %v1062_v0, %v1207_v2 }
 0x45d   :  { %v1167_v10 = vmul.f32 1.442695, %v1165_v3  ;;  %v1173_v11 = vmul.f32 1.442695, %v1171_v4  ;;  %v1179_v13 = vmul.f32 1.442695, %v1177_v5 }
 0x45e   :  { %v1211_v20 = vmul.f32 1.442695, %v1209_v12  ;;  %v1217_v23 = vmul.f32 1.442695, %v1215_v14  ;;  %v1223_v60 = vmul.f32 1.442695, %v1221_v42 }
 0x45f   :  { %3399 = vpow2.f32 %v1167_v10  ;;  %v1124_v35 = vpop.f32.mrf.mxu2  ;;  %v4759_v43 = vpop.f32.mrf.mxu3 }
 0x460   :  { %3401 = vpow2.f32 %v1173_v11  ;;  %v972_v17 = vpop.f32.mrf.mxu1  ;;  %v1065_v18 = vpop.f32.mrf.mxu0 }
 0x461   :  { %v1164_v21 = vmax.f32 %v1162_v15, %v972_v17  ;;  %v1208_v22 = vmax.f32 %v1206_v16, %v1065_v18  ;;  %3403 = vpow2.f32 %v1179_v13 }
 0x462   :  { %3405 = vpow2.f32 %v1211_v20 }
 0x463   :  { %v1166_v24 = vsub.f32 %v910_v52, %v1164_v21  ;;  %v1172_v25 = vsub.f32 %v941_v58, %v1164_v21  ;;  %v1178_v26 = vsub.f32 %v972_v17, %v1164_v21  ;;  %v1210_v27 = vsub.f32 %v1003_v8, %v1208_v22 }
 0x464   :  { %v1216_v28 = vsub.f32 %v1034_v9, %v1208_v22  ;;  %3407 = vpow2.f32 %v1217_v23  ;;  %v1222_v37 = vsub.f32 %v1065_v18, %v1208_v22  ;;  %v3377_v9 = vld [vmem:[#allocation26] ss:$0 sm:$0xff] }
 0x465   :  { %v3400_v30 = vpop.eup %3399  ;;  %v1169_v31 = vmul.f32 1.442695, %v1166_v24  ;;  %v1175_v32 = vmul.f32 1.442695, %v1172_v25  ;;  %v1181_v33 = vmul.f32 1.442695, %v1178_v26  ;;  %v4778_v22 = vadd.f32 %v3377_v9, %v4747_v47 }
 0x466   :  { %v3402_v34 = vpop.eup %3401  ;;  %v1213_v36 = vmul.f32 1.442695, %v1210_v27  ;;  %v1219_v44 = vmul.f32 1.442695, %v1216_v28  ;;  %v1225_v52 = vmul.f32 1.442695, %v1222_v37  ;;  %v4782_v27 = vadd.f32 %v3377_v9, %v4749_v48 }
 0x467   :  { %v1183_v40 = vadd.f32 %v3402_v34, %v3400_v30  ;;  %3409 = vpow2.f32 %v1169_v31  ;;  %v3404_v41 = vpop.eup %3403  ;;  %v1127_v4 = vpop.f32.mrf.mxu2  ;;  %v4785_v28 = vadd.f32 %v3377_v9, %v4751_v49  ;;  %v4792_v48 = vadd.f32 %v3377_v9, %v4753_v51 }
 0x468   :  { %3411 = vpow2.f32 %v1175_v32  ;;  %v1093_v45 = vpop.f32.mrf.mxu1  ;;  %v4761_v54 = vpop.eup %3405 }
 0x469   :  { %v1185_v46 = vadd.f32 %v3404_v41, %v1183_v40  ;;  %3413 = vpow2.f32 %v1181_v33  ;;  %v1249_v50 = vmax.f32 %v1093_v45, %v1124_v35  ;;  %v1158_v14 = vpop.f32.mrf.mxu3 }
 0x46a   :  { %3415 = vpow2.f32 %v1213_v36  ;;  %v4766_v59 = vpop.eup %3407 }
 0x46b   :  { %3417 = vrcp.f32 %v1185_v46  ;;  %v4764_v58 = vmax.f32 %v1249_v50, %v4759_v43  ;;  %v1227_v13 = vadd.f32 %v4766_v59, %v4761_v54 }
 0x46c   :  { %3419 = vpow2.f32 %v1219_v44  ;;  %v4795_v44 = vadd.f32 %v3377_v9, %v4755_v53 }
 0x46d   :  { %v3410_v61 = vpop.eup %3409  ;;  %3421 = vpow2.f32 %v1225_v52  ;;  %v1253_v63 = vsub.f32 %v1093_v45, %v4764_v58  ;;  %v1259_v2 = vsub.f32 %v1124_v35, %v4764_v58  ;;  %v880_v45 = vadd.f32 %v3377_v9, %v4757_v55 }
 0x46e   :  { %v3412_v62 = vpop.eup %3411  ;;  %3423 = vpow2.f32 %v1223_v60 }
 0x46f   :  { %v3414_v0 = vpop.eup %3413  ;;  %v1184_v1 = vadd.f32 %v3412_v62, %v3410_v61  ;;  %v1255_v15 = vmul.f32 1.442695, %v1253_v63  ;;  %v1261_v17 = vmul.f32 1.442695, %v1259_v2 }
 0x470   :  { %v4770_v3 = vpop.eup %3415  ;;  %v1096_v5 = vpop.f32.mrf.mxu1 }
 0x471   :  { %v3418_v8 = vpop.eup %3417  ;;  %v1186_v10 = vadd.f32 %v3414_v0, %v1184_v1  ;;  %v1250_v11 = vmax.f32 %v1096_v5, %v1127_v4 }
 0x472   :  { %v3420_v12 = vpop.eup %3419  ;;  %v1189_v20 = vmul.f32 %v3418_v8, %v3400_v30  ;;  %v1193_v21 = vmul.f32 %v3418_v8, %v3402_v34  ;;  %v1265_v34 = vsub.f32 %v4759_v43, %v4764_v58  ;;  %v1199_v49 = vmul.f32 %v3418_v8, %v3404_v41 }
 0x473   :  { %3425 = vrcp.f32 %v1186_v10  ;;  %v1228_v16 = vadd.f32 %v3420_v12, %v4770_v3  ;;  %v1252_v18 = vmax.f32 %v1250_v11, %v1158_v14  ;;  %v4775_v19 = vpop.eup %3421 }
 0x474   :  { %v3424_v26 = vpop.eup %3423  ;;  %3427 = vpow2.f32 %v1255_v15  ;;  %v1191_v47 = vmul.f32 %v1189_v20, %v4778_v22  ;;  %v1195_v33 = vmul.f32 %v1193_v21, %v4785_v28  ;;  %v1267_v52 = vmul.f32 1.442695, %v1265_v34 }
 0x475   :  { %v1230_v23 = vadd.f32 %v4775_v19, %v1228_v16  ;;  %v1254_v24 = vsub.f32 %v1096_v5, %v1252_v18  ;;  %v1260_v25 = vsub.f32 %v1127_v4, %v1252_v18  ;;  %v1266_v29 = vsub.f32 %v1158_v14, %v1252_v18 }
 0x476   :  { %v1229_v31 = vadd.f32 %v3424_v26, %v1227_v13  ;;  %3429 = vpow2.f32 %v1261_v17  ;;  %v1197_v50 = vadd.f32 %v1195_v33, %v1191_v47  ;;  %v1201_v60 = vmul.f32 %v1199_v49, %v4795_v44 }
 0x477   :  { %v1257_v30 = vmul.f32 1.442695, %v1254_v24  ;;  %v1263_v32 = vmul.f32 1.442695, %v1260_v25  ;;  %3431 = vrcp.f32 %v1230_v23  ;;  %v1269_v36 = vmul.f32 1.442695, %v1266_v29 }
 0x479   :  { %v3426_v35 = vpop.eup %3425  ;;  %3433 = vpow2.f32 %v1257_v30 }
 0x47a   :  { %v1190_v37 = vmul.f32 %v3426_v35, %v3410_v61  ;;  %v1194_v40 = vmul.f32 %v3426_v35, %v3412_v62  ;;  %v1200_v42 = vmul.f32 %v3426_v35, %v3414_v0  ;;  %3435 = vpow2.f32 %v1263_v32  ;;  %v3428_v46 = vpop.eup %3427 }
 0x47b   :  { %3437 = vrcp.f32 %v1229_v31  ;;  %v1203_v0 = vadd.f32 %v1201_v60, %v1197_v50 }
 0x47c   :  { %v1192_v43 = vmul.f32 %v1190_v37, %v4782_v27  ;;  %v1196_v51 = vmul.f32 %v1194_v40, %v4792_v48  ;;  %v3430_v41 = vpop.eup %3429  ;;  %v1202_v62 = vmul.f32 %v1200_v42, %v880_v45  ;;  %3439 = vpow2.f32 %v1269_v36 }
 0x47d   :  { %v3432_v58 = vpop.eup %3431  ;;  %3441 = vpow2.f32 %v1267_v52  ;;  %v1271_v9 = vadd.f32 %v3430_v41, %v3428_v46 }
 0x47e   :  { %v1198_v61 = vadd.f32 %v1196_v51, %v1192_v43  ;;  %v1234_v5 = vmul.f32 %v3432_v58, %v4770_v3  ;;  %v1238_v8 = vmul.f32 %v3432_v58, %v3420_v12  ;;  %v1244_v20 = vmul.f32 %v3432_v58, %v4775_v19 }
 0x47f   :  { %v3434_v63 = vpop.eup %3433 }
 0x480   :  { %v3436_v53 = vpop.eup %3435  ;;  %v1204_v1 = vadd.f32 %v1202_v62, %v1198_v61  ;;  %v1236_v16 = vmul.f32 %v1234_v5, %v4782_v27  ;;  %v1240_v17 = vmul.f32 %v1238_v8, %v4792_v48  ;;  %v1246_v24 = vmul.f32 %v1244_v20, %v880_v45 }
 0x481   :  { %v3438_v55 = vpop.eup %3437  ;;  %v1272_v2 = vadd.f32 %v3436_v53, %v3434_v63 }
 0x482   :  { %v1293_v4 = vpack.c.bf16 %v1204_v1, %v1203_v0  ;;  %v3440_v10 = vpop.eup %3439  ;;  %v1233_v11 = vmul.f32 %v3438_v55, %v4761_v54  ;;  %v1237_v13 = vmul.f32 %v3438_v55, %v4766_v59  ;;  %v1243_v21 = vmul.f32 %v3438_v55, %v3424_v26 }
 0x483   :  { %v1274_v14 = vadd.f32 %v3440_v10, %v1272_v2  ;;  %v3442_v15 = vpop.eup %3441  ;;  %v1242_v23 = vadd.f32 %v1240_v17, %v1236_v16 }
 0x484   :  { %3129 = vmatmul.msk.bf16.vlgmr.msrb.gmra.mxu0 %vm596_vm3, %v1293_v4  ;;  %v1273_v18 = vadd.f32 %v3442_v15, %v1271_v9  ;;  %v1235_v3 = vmul.f32 %v1233_v11, %v4778_v22  ;;  %v1239_v12 = vmul.f32 %v1237_v13, %v4785_v28  ;;  %v1245_v59 = vmul.f32 %v1243_v21, %v4795_v44 }
 0x485   :  { %3443 = vrcp.f32 %v1274_v14  ;;  %v1248_v25 = vadd.f32 %v1246_v24, %v1242_v23  ;;  %v4261_v13 = vmov 32.0  }
 0x486   :  { %3445 = vrcp.f32 %v1273_v18  ;;  %v1241_v54 = vadd.f32 %v1239_v12, %v1235_v3 }
 0x487   :  { %3447 = vrcp.f32 %v4261_v13 }
 0x488   :  { %v1247_v31 = vadd.f32 %v1245_v59, %v1241_v54 }
 0x48a   :  { %v1294_v47 = vpack.c.bf16 %v1248_v25, %v1247_v31 }
 0x48b   :  { %v3444_v29 = vpop.eup %3443 }
 0x48c   :  { %v3446_v30 = vpop.eup %3445  ;;  %v1278_v32 = vmul.f32 %v3444_v29, %v3434_v63  ;;  %v1282_v33 = vmul.f32 %v3444_v29, %v3436_v53  ;;  %v1288_v37 = vmul.f32 %v3444_v29, %v3440_v10 }
 0x48d   :  { %v1277_v19 = vmul.f32 %v3446_v30, %v3428_v46  ;;  %v1281_v34 = vmul.f32 %v3446_v30, %v3430_v41  ;;  %v1287_v42 = vmul.f32 %v3446_v30, %v3442_v15  ;;  %v3382_v41 = vld [vmem:[#allocation29] ss:$0 sm:$0xff] }
 0x48e   :  { %v1280_v35 = vmul.f32 %v1278_v32, %v4782_v27  ;;  %v1284_v26 = vmul.f32 %v1282_v33, %v4792_v48  ;;  %v1290_v43 = vmul.f32 %v1288_v37, %v880_v45 }
 0x48f   :  { %v1279_v49 = vmul.f32 %v1277_v19, %v4778_v22  ;;  %v1283_v36 = vmul.f32 %v1281_v34, %v4785_v28  ;;  %v1289_v51 = vmul.f32 %v1287_v42, %v4795_v44 }
 0x490   :  { %v1286_v40 = vadd.f32 %v1284_v26, %v1280_v35 }
 0x491   :  { %v1285_v50 = vadd.f32 %v1283_v36, %v1279_v49 }
 0x492   :  { %v1292_v52 = vadd.f32 %v1290_v43, %v1286_v40 }
 0x493   :  { %v1291_v46 = vadd.f32 %v1289_v51, %v1285_v50 }
 0x494   :  { %3130 = vmatmul.msk.bf16.gmra.mxu0 %vm596_vm3, %v1294_v47 }
 0x495   :  { %v1295_v58 = vpack.c.bf16 %v1292_v52, %v1291_v46 }
 0x4a4   :  { %3131 = vmatmul.msk.bf16.gmra.mxu0 %vm596_vm3, %v1295_v58 }
 0x501   :  { %v1329_v27 = vpop.f32.mrf.mxu0 }
 0x502   :  { %v1330_v60 = vadd.f32 %v3382_v41, %v1329_v27  ;;  %v3290_v27 = vld [vmem:[#allocation34 + $0x8] sm:$0xff] }
 0x503   :  { %1540 = vmatpush.bf16.msrb.mxu1 %v3290_v27 }
 0x504   :  { %v1344_v48 = vadd.f32 %v1330_v60, %v4631_v38  ;;  %v3289_v60 = vld [vmem:[#allocation34] sm:$0xff] }
 0x506   :  { %v1350_v22 = vsel %vm596_vm3, %v1344_v48, 0.0 }
 0x507   :  { %1351 = vadd.xlane.f32.xlu0 %v1350_v22  ;;  %1541 = vmatpush.bf16.msrb.mxu1 %v3289_v60 }
 0x509   :  { %v1331_v28 = vpop.f32.mrf.mxu0 }
 0x50a   :  { %v1332_v61 = vadd.f32 %v3382_v41, %v1331_v28 }
 0x50c   :  { %v1345_v62 = vadd.f32 %v1332_v61, %v4633_v39 }
 0x50e   :  { %v1353_v45 = vsel %vm596_vm3, %v1345_v62, 0.0 }
 0x50f   :  { %1354 = vadd.xlane.f32.xlu0 %v1353_v45 }
 0x511   :  { %v1334_v44 = vpop.f32.mrf.mxu0 }
 0x512   :  { %v1335_v63 = vadd.f32 %v3382_v41, %v1334_v44 }
 0x514   :  { %v1346_v53 = vadd.f32 %v1335_v63, %v4681_v56 }
 0x516   :  { %v1356_v0 = vsel %vm596_vm3, %v1346_v53, 0.0 }
 0x517   :  { %1357 = vadd.xlane.f32.xlu1 %v1356_v0 }
 0x519   :  { %v1336_v1 = vpop.f32.mrf.mxu0 }
 0x51a   :  { %v1337_v55 = vadd.f32 %v3382_v41, %v1336_v1 }
 0x51c   :  { %v1347_v38 = vadd.f32 %v1337_v55, %v4683_v57  ;;  %v3448_v57 = vpop.eup %3447 }
 0x51d   :  { %v1369_v14 = vmul.f32 32.0, %v3448_v57  ;;  %vm1373_vm4 = vweird.f32 %v3448_v57 }
 0x51e   :  { %v1359_v2 = vsel %vm596_vm3, %v1347_v38, 0.0 }
 0x51f   :  { %1360 = vadd.xlane.f32.xlu1 %v1359_v2  ;;  %v1370_v15 = vsub.f32 1.0, %v1369_v14 }
 0x521   :  { %v1339_v4 = vpop.f32.mrf.mxu0  ;;  %v1371_v16 = vmul.f32 %v3448_v57, %v1370_v15 }
 0x522   :  { %v1340_v5 = vadd.f32 %v3382_v41, %v1339_v4 }
 0x523   :  { %v1372_v17 = vadd.f32 %v3448_v57, %v1371_v16 }
 0x524   :  { %v1348_v39 = vadd.f32 %v1340_v5, %v4702_v6 }
 0x525   :  { %v4830_v18 = vsel %vm1373_vm4, %v3448_v57, %v1372_v17 }
 0x526   :  { %v1362_v8 = vsel %vm596_vm3, %v1348_v39, 0.0 }
 0x527   :  { %1363 = vadd.xlane.f32.xlu2 %v1362_v8 }
 0x529   :  { %v1341_v9 = vpop.f32.mrf.mxu0 }
 0x52a   :  { %v1342_v10 = vadd.f32 %v3382_v41, %v1341_v9 }
 0x52c   :  { %v1349_v56 = vadd.f32 %v1342_v10, %v4704_v7 }
 0x52e   :  { %v1365_v11 = vsel %vm596_vm3, %v1349_v56, 0.0 }
 0x52f   :  { %1366 = vadd.xlane.f32.xlu2 %v1365_v11  ;;  %v4872_v11 = vld [vmem:[#allocation31] ss:$0 sm:$0xff] }
 0x57a   :  { %v1352_v6 = vpop.xlane.xlu0 %1351 }
 0x57b   :  { %v1375_v20 = vmul.f32 %v4830_v18, %v1352_v6  ;;  %v4875_v6 = vld [vmem:[#allocation32] ss:$0 sm:$0xff] }
 0x57d   :  { %v4833_v3 = vsub.f32 %v1344_v48, %v1375_v20 }
 0x57f   :  { %v1387_v7 = vmul.f32 %v4833_v3, %v4833_v3 }
 0x581   :  { %v1393_v12 = vsel %vm596_vm3, %v1387_v7, 0.0 }
 0x582   :  { %1394 = vadd.xlane.f32.xlu0 %v1393_v12  ;;  %v1355_v21 = vpop.xlane.xlu0 %1354 }
 0x583   :  { %v1376_v23 = vmul.f32 %v4830_v18, %v1355_v21 }
 0x585   :  { %v4839_v54 = vsub.f32 %v1345_v62, %v1376_v23 }
 0x587   :  { %v1388_v24 = vmul.f32 %v4839_v54, %v4839_v54 }
 0x589   :  { %v1396_v59 = vsel %vm596_vm3, %v1388_v24, 0.0 }
 0x58a   :  { %v1358_v25 = vpop.xlane.xlu1 %1357  ;;  %1397 = vadd.xlane.f32.xlu1 %v1396_v59 }
 0x58b   :  { %v1377_v29 = vmul.f32 %v4830_v18, %v1358_v25 }
 0x58d   :  { %v4845_v31 = vsub.f32 %v1346_v53, %v1377_v29 }
 0x58f   :  { %v1389_v30 = vmul.f32 %v4845_v31, %v4845_v31 }
 0x591   :  { %v1399_v32 = vsel %vm596_vm3, %v1389_v30, 0.0 }
 0x592   :  { %v1361_v47 = vpop.xlane.xlu1 %1360  ;;  %1400 = vadd.xlane.f32.xlu2 %v1399_v32 }
 0x593   :  { %v1378_v33 = vmul.f32 %v4830_v18, %v1361_v47 }
 0x595   :  { %v4851_v19 = vsub.f32 %v1347_v38, %v1378_v33 }
 0x597   :  { %v1390_v34 = vmul.f32 %v4851_v19, %v4851_v19 }
 0x599   :  { %v1402_v35 = vsel %vm596_vm3, %v1390_v34, 0.0 }
 0x59a   :  { %1403 = vadd.xlane.f32.xlu0 %v1402_v35  ;;  %v1364_v26 = vpop.xlane.xlu2 %1363 }
 0x59b   :  { %v1379_v49 = vmul.f32 %v4830_v18, %v1364_v26 }
 0x59d   :  { %v4857_v36 = vsub.f32 %v1348_v39, %v1379_v49 }
 0x59f   :  { %v1391_v37 = vmul.f32 %v4857_v36, %v4857_v36 }
 0x5a1   :  { %v1405_v40 = vsel %vm596_vm3, %v1391_v37, 0.0 }
 0x5a2   :  { %1406 = vadd.xlane.f32.xlu1 %v1405_v40  ;;  %v1367_v42 = vpop.xlane.xlu2 %1366 }
 0x5a3   :  { %v1380_v50 = vmul.f32 %v4830_v18, %v1367_v42 }
 0x5a5   :  { %v4863_v43 = vsub.f32 %v1349_v56, %v1380_v50 }
 0x5a7   :  { %v1392_v51 = vmul.f32 %v4863_v43, %v4863_v43 }
 0x5a9   :  { %v1408_v52 = vsel %vm596_vm3, %v1392_v51, 0.0 }
 0x5aa   :  { %1409 = vadd.xlane.f32.xlu2 %v1408_v52 }
 0x5f5   :  { %v1395_v46 = vpop.xlane.xlu0 %1394 }
 0x5f6   :  { %v1411_v58 = vmul.f32 %v1395_v46, %v4830_v18 }
 0x5f8   :  { %v1417_v41 = vadd.f32 1e-05, %v1411_v58 }
 0x5fa   :  { %3449 = vrsqrt.f32 %v1417_v41  ;;  %vm1429_vm6 = vweird.f32 %v1417_v41 }
 0x5fd   :  { %v1398_v48 = vpop.xlane.xlu1 %1397 }
 0x5fe   :  { %v1412_v22 = vmul.f32 %v1398_v48, %v4830_v18 }
 0x600   :  { %v3450_v28 = vpop.eup %3449  ;;  %v1418_v61 = vadd.f32 1e-05, %v1412_v22 }
 0x601   :  { %v1424_v62 = vmul.f32 %v3450_v28, %v1417_v41  ;;  %vm1430_vm5 = vweird.f32 %v3450_v28 }
 0x602   :  { %3451 = vrsqrt.f32 %v1418_v61  ;;  %vm1431_vm7 = vmor %vm1429_vm6, %vm1430_vm5  ;;  %vm1439_vm9 = vweird.f32 %v1418_v61 }
 0x603   :  { %v1425_v45 = vmul.f32 %v3450_v28, %v1424_v62 }
 0x605   :  { %v1426_v44 = vmul.f32 0.5, %v1425_v45  ;;  %v1401_v63 = vpop.xlane.xlu2 %1400 }
 0x606   :  { %v1413_v53 = vmul.f32 %v1401_v63, %v4830_v18 }
 0x607   :  { %v1427_v0 = vsub.f32 1.5, %v1426_v44 }
 0x608   :  { %v3452_v1 = vpop.eup %3451  ;;  %v1419_v55 = vadd.f32 1e-05, %v1413_v53 }
 0x609   :  { %v1428_v38 = vmul.f32 %v3450_v28, %v1427_v0  ;;  %v1434_v2 = vmul.f32 %v3452_v1, %v1418_v61  ;;  %vm1440_vm8 = vweird.f32 %v3452_v1 }
 0x60a   :  { %3453 = vrsqrt.f32 %v1419_v55  ;;  %vm1441_vm10 = vmor %vm1439_vm9, %vm1440_vm8  ;;  %vm1449_vm12 = vweird.f32 %v1419_v55  ;;  %vm1642_vm8 = vcmask 523264  }
 0x60b   :  { %v1435_v4 = vmul.f32 %v3452_v1, %v1434_v2  ;;  %v1432_v5 = vsel %vm1431_vm7, %v3450_v28, %v1428_v38 }
 0x60c   :  { %v1483_v13 = vmul.f32 %v1432_v5, %v4833_v3 }
 0x60d   :  { %v1436_v39 = vmul.f32 0.5, %v1435_v4  ;;  %v1404_v8 = vpop.xlane.xlu0 %1403 }
 0x60e   :  { %v1414_v9 = vmul.f32 %v1404_v8, %v4830_v18  ;;  %v1492_v20 = vmul.f32 %v4872_v11, %v1483_v13 }
 0x60f   :  { %v1437_v10 = vsub.f32 1.5, %v1436_v39 }
 0x610   :  { %v3454_v56 = vpop.eup %3453  ;;  %v1420_v57 = vadd.f32 1e-05, %v1414_v9  ;;  %v4882_v25 = vadd.f32 %v4875_v6, %v1492_v20  ;;  %v3294_v9 = vld [vmem:[%s5386_s17 + $0x18] sm:$0xff] }
 0x611   :  { %v1438_v14 = vmul.f32 %v3452_v1, %v1437_v10  ;;  %v1444_v15 = vmul.f32 %v3454_v56, %v1419_v55  ;;  %vm1450_vm11 = vweird.f32 %v3454_v56  ;;  %1656 = vmatpush.bf16.msra.mxu2 %v3294_v9  ;;  %v4919_v10 = vld [vmem:[#allocation35] ss:$0 sm:$0xff] }
 0x612   :  { %3455 = vrsqrt.f32 %v1420_v57  ;;  %vm1451_vm13 = vmor %vm1449_vm12, %vm1450_vm11  ;;  %vm1459_vm15 = vweird.f32 %v1420_v57 }
 0x613   :  { %v1442_v16 = vsel %vm1441_vm10, %v3452_v1, %v1438_v14  ;;  %v1445_v17 = vmul.f32 %v3454_v56, %v1444_v15  ;;  %v3291_v14 = vld [vmem:[%s5386_s17] sm:$0xff] }
 0x614   :  { %v1484_v7 = vmul.f32 %v1442_v16, %v4839_v54 }
 0x615   :  { %v1446_v12 = vmul.f32 0.5, %v1445_v17  ;;  %v1407_v21 = vpop.xlane.xlu1 %1406  ;;  %v4925_v17 = vld [vmem:[%s5384_s1 + $0x18] sm:$0xff] }
 0x616   :  { %v1493_v23 = vmul.f32 %v4872_v11, %v1484_v7  ;;  %v1415_v3 = vmul.f32 %v1407_v21, %v4830_v18 }
 0x617   :  { %v1447_v24 = vsub.f32 1.5, %v1446_v12  ;;  %v4930_v12 = vld [vmem:[%s5384_s1 + $0x10] sm:$0xff] }
 0x618   :  { %v3456_v59 = vpop.eup %3455  ;;  %v4885_v29 = vadd.f32 %v4875_v6, %v1493_v23  ;;  %v1421_v30 = vadd.f32 1e-05, %v1415_v3  ;;  %v4934_v3 = vld [vmem:[%s5384_s1 + $0x8] sm:$0xff] }
 0x619   :  { %v1448_v32 = vmul.f32 %v3454_v56, %v1447_v24  ;;  %v1454_v47 = vmul.f32 %v3456_v59, %v1420_v57  ;;  %vm1460_vm14 = vweird.f32 %v3456_v59 }
 0x61a   :  { %3457 = vrsqrt.f32 %v1421_v30  ;;  %v1507_v54 = vpack.c.bf16 %v4885_v29, %v4882_v25  ;;  %vm1461_vm0 = vmor %vm1459_vm15, %vm1460_vm14  ;;  %vm1469_vm2 = vweird.f32 %v1421_v30 }
 0x61b   :  { %v1455_v33 = vmul.f32 %v3456_v59, %v1454_v47  ;;  %v1452_v34 = vsel %vm1451_vm13, %v3454_v56, %v1448_v32 }
 0x61c   :  { %3140 = vmatmul.msk.bf16.vlgmr.msrb.gmra.mxu1 %vm596_vm3, %v1507_v54  ;;  %v1485_v42 = vmul.f32 %v1452_v34, %v4845_v31 }
 0x61d   :  { %v1456_v35 = vmul.f32 0.5, %v1455_v33  ;;  %v1410_v26 = vpop.xlane.xlu2 %1409 }
 0x61e   :  { %v1416_v49 = vmul.f32 %v1410_v26, %v4830_v18  ;;  %v1494_v27 = vmul.f32 %v4872_v11, %v1485_v42 }
 0x61f   :  { %v1457_v37 = vsub.f32 1.5, %v1456_v35 }
 0x620   :  { %v3458_v40 = vpop.eup %3457  ;;  %v1422_v50 = vadd.f32 1e-05, %v1416_v49  ;;  %v4896_v61 = vadd.f32 %v4875_v6, %v1494_v27 }
 0x621   :  { %v1458_v51 = vmul.f32 %v3456_v59, %v1457_v37  ;;  %v1464_v52 = vmul.f32 %v3458_v40, %v1421_v30  ;;  %vm1470_vm1 = vweird.f32 %v3458_v40 }
 0x622   :  { %3459 = vrsqrt.f32 %v1422_v50  ;;  %vm1471_vm4 = vmor %vm1469_vm2, %vm1470_vm1  ;;  %vm1479_vm6 = vweird.f32 %v1422_v50 }
 0x623   :  { %v1462_v46 = vsel %vm1461_vm0, %v3456_v59, %v1458_v51  ;;  %v1465_v58 = vmul.f32 %v3458_v40, %v1464_v52  ;;  %v4938_v59 = vld [vmem:[%s5384_s1] sm:$0xff] }
 0x624   :  { %v1486_v41 = vmul.f32 %v1462_v46, %v4851_v19 }
 0x625   :  { %v1466_v60 = vmul.f32 0.5, %v1465_v58 }
 0x626   :  { %v1495_v48 = vmul.f32 %v4872_v11, %v1486_v41 }
 0x627   :  { %v1467_v22 = vsub.f32 1.5, %v1466_v60 }
 0x628   :  { %v3460_v28 = vpop.eup %3459  ;;  %v4899_v31 = vadd.f32 %v4875_v6, %v1495_v48 }
 0x629   :  { %v1468_v62 = vmul.f32 %v3458_v40, %v1467_v22  ;;  %v1474_v45 = vmul.f32 %v3460_v28, %v1422_v50  ;;  %vm1480_vm5 = vweird.f32 %v3460_v28 }
 0x62a   :  { %v1508_v44 = vpack.c.bf16 %v4899_v31, %v4896_v61  ;;  %vm1481_vm7 = vmor %vm1479_vm6, %vm1480_vm5 }
 0x62b   :  { %v1475_v19 = vmul.f32 %v3460_v28, %v1474_v45  ;;  %v1472_v63 = vsel %vm1471_vm4, %v3458_v40, %v1468_v62 }
 0x62c   :  { %3141 = vmatmul.msk.bf16.gmra.mxu1 %vm596_vm3, %v1508_v44  ;;  %v1487_v1 = vmul.f32 %v1472_v63, %v4857_v36 }
 0x62d   :  { %v1476_v53 = vmul.f32 0.5, %v1475_v19 }
 0x62e   :  { %v1496_v4 = vmul.f32 %v4872_v11, %v1487_v1 }
 0x62f   :  { %v1477_v0 = vsub.f32 1.5, %v1476_v53 }
 0x630   :  { %v4909_v39 = vadd.f32 %v4875_v6, %v1496_v4 }
 0x631   :  { %v1478_v55 = vmul.f32 %v3460_v28, %v1477_v0 }
 0x633   :  { %v1482_v38 = vsel %vm1481_vm7, %v3460_v28, %v1478_v55 }
 0x634   :  { %v1488_v2 = vmul.f32 %v1482_v38, %v4863_v43  ;;  %v3293_v43 = vld [vmem:[%s5386_s17 + $0x10] sm:$0xff] }
 0x635   :  { %1657 = vmatpush.bf16.msra.mxu2 %v3293_v43 }
 0x636   :  { %v1497_v5 = vmul.f32 %v4872_v11, %v1488_v2  ;;  %v3292_v11 = vld [vmem:[%s5386_s17 + $0x8] sm:$0xff] }
 0x638   :  { %v4912_v8 = vadd.f32 %v4875_v6, %v1497_v5 }
 0x639   :  { %1658 = vmatpush.bf16.msra.mxu2 %v3292_v11 }
 0x63a   :  { %v1509_v36 = vpack.c.bf16 %v4912_v8, %v4909_v39 }
 0x63c   :  { %3142 = vmatmul.msk.bf16.gmra.mxu1 %vm596_vm3, %v1509_v36 }
 0x63d   :  { %1659 = vmatpush.bf16.msra.mxu2 %v3291_v14 }
 0x641   :  { %2035 = vmatpush.msrb.mxu2 %v4925_v17 }
 0x643   :  { %2036 = vmatpush.msrb.mxu2 %v4930_v12 }
 0x645   :  { %2037 = vmatpush.msrb.mxu2 %v4934_v3 }
 0x647   :  { %2038 = vmatpush.msrb.mxu2 %v4938_v59 }
 0x699   :  { %v1543_v56 = vpop.f32.mrf.mxu1 }
 0x69a   :  { %v1544_v13 = vadd.f32 %v4919_v10, %v1543_v56 }
 0x69c   :  { %v1558_v57 = vmul.f32 %v1544_v13, %v1544_v13 }
 0x69e   :  { %v1564_v15 = vmul.f32 %v1558_v57, %v1544_v13 }
 0x6a0   :  { %v1570_v16 = vmul.f32 0.044715, %v1564_v15 }
 0x6a1   :  { %v1545_v6 = vpop.f32.mrf.mxu1 }
 0x6a2   :  { %v1576_v20 = vadd.f32 %v1570_v16, %v1544_v13  ;;  %v1546_v7 = vadd.f32 %v4919_v10, %v1545_v6 }
 0x6a4   :  { %v1582_v21 = vmul.f32 0.7978846, %v1576_v20  ;;  %v1559_v23 = vmul.f32 %v1546_v7, %v1546_v7 }
 0x6a6   :  { %v1565_v24 = vmul.f32 %v1559_v23, %v1546_v7  ;;  %3461 = vtanh.f32 %v1582_v21 }
 0x6a8   :  { %v1571_v30 = vmul.f32 0.044715, %v1565_v24 }
 0x6a9   :  { %v1548_v32 = vpop.f32.mrf.mxu1 }
 0x6aa   :  { %v1577_v47 = vadd.f32 %v1571_v30, %v1546_v7  ;;  %v1549_v54 = vadd.f32 %v4919_v10, %v1548_v32 }
 0x6ac   :  { %v1583_v33 = vmul.f32 0.7978846, %v1577_v47  ;;  %v1560_v34 = vmul.f32 %v1549_v54, %v1549_v54  ;;  %v3462_v35 = vpop.eup %3461 }
 0x6ad   :  { %v1594_v37 = vadd.f32 1.0, %v3462_v35  ;;  %v3386_v35 = vld [vmem:[#allocation37] ss:$0 sm:$0xff] }
 0x6ae   :  { %3463 = vtanh.f32 %v1583_v33  ;;  %v1566_v26 = vmul.f32 %v1560_v34, %v1549_v54 }
 0x6af   :  { %v1600_v58 = vmul.f32 0.5, %v1594_v37 }
 0x6b0   :  { %v1572_v49 = vmul.f32 0.044715, %v1566_v26 }
 0x6b1   :  { %v1550_v40 = vpop.f32.mrf.mxu1  ;;  %v1606_v22 = vmul.f32 %v1600_v58, %v1544_v13 }
 0x6b2   :  { %v1578_v42 = vadd.f32 %v1572_v49, %v1549_v54  ;;  %v1551_v50 = vadd.f32 %v4919_v10, %v1550_v40 }
 0x6b4   :  { %v3464_v51 = vpop.eup %3463  ;;  %v1584_v52 = vmul.f32 0.7978846, %v1578_v42  ;;  %v1561_v46 = vmul.f32 %v1551_v50, %v1551_v50 }
 0x6b5   :  { %v1595_v41 = vadd.f32 1.0, %v3464_v51 }
 0x6b6   :  { %v1567_v27 = vmul.f32 %v1561_v46, %v1551_v50  ;;  %3465 = vtanh.f32 %v1584_v52 }
 0x6b7   :  { %v1601_v60 = vmul.f32 0.5, %v1595_v41 }
 0x6b8   :  { %v1573_v48 = vmul.f32 0.044715, %v1567_v27 }
 0x6b9   :  { %v1607_v28 = vmul.f32 %v1601_v60, %v1546_v7  ;;  %v1553_v62 = vpop.f32.mrf.mxu1 }
 0x6ba   :  { %v1579_v45 = vadd.f32 %v1573_v48, %v1551_v50  ;;  %v1554_v44 = vadd.f32 %v4919_v10, %v1553_v62 }
 0x6bb   :  { %v1612_v19 = vpack.c.bf16 %v1607_v28, %v1606_v22 }
 0x6bc   :  { %v1585_v63 = vmul.f32 0.7978846, %v1579_v45  ;;  %v1562_v53 = vmul.f32 %v1554_v44, %v1554_v44  ;;  %v3466_v0 = vpop.eup %3465 }
 0x6bd   :  { %3159 = vmatmul.msk.bf16.vlgmr.msra.gmra.mxu2 %vm1642_vm8, %v1612_v19  ;;  %v1596_v2 = vadd.f32 1.0, %v3466_v0 }
 0x6be   :  { %3467 = vtanh.f32 %v1585_v63  ;;  %v1568_v1 = vmul.f32 %v1562_v53, %v1554_v44  ;;  %2097 = vmatpush.msra.mxu2 %v4925_v17 }
 0x6bf   :  { %v1602_v11 = vmul.f32 0.5, %v1596_v2 }
 0x6c0   :  { %v1574_v55 = vmul.f32 0.044715, %v1568_v1  ;;  %2098 = vmatpush.msra.mxu2 %v4930_v12 }
 0x6c1   :  { %v1555_v38 = vpop.f32.mrf.mxu1  ;;  %v1608_v15 = vmul.f32 %v1602_v11, %v1549_v54 }
 0x6c2   :  { %v1580_v4 = vadd.f32 %v1574_v55, %v1554_v44  ;;  %v1556_v5 = vadd.f32 %v4919_v10, %v1555_v38  ;;  %2099 = vmatpush.msra.mxu2 %v4934_v3 }
 0x6c4   :  { %v3468_v36 = vpop.eup %3467  ;;  %v1586_v9 = vmul.f32 0.7978846, %v1580_v4  ;;  %v1563_v43 = vmul.f32 %v1556_v5, %v1556_v5  ;;  %2100 = vmatpush.msra.mxu2 %v4938_v59 }
 0x6c5   :  { %v1597_v56 = vadd.f32 1.0, %v3468_v36 }
 0x6c6   :  { %v1569_v13 = vmul.f32 %v1563_v43, %v1556_v5  ;;  %3469 = vtanh.f32 %v1586_v9 }
 0x6c7   :  { %v1603_v57 = vmul.f32 0.5, %v1597_v56 }
 0x6c8   :  { %v1575_v14 = vmul.f32 0.044715, %v1569_v13 }
 0x6c9   :  { %v1609_v16 = vmul.f32 %v1603_v57, %v1551_v50 }
 0x6ca   :  { %v1581_v6 = vadd.f32 %v1575_v14, %v1556_v5 }
 0x6cb   :  { %v1613_v20 = vpack.c.bf16 %v1609_v16, %v1608_v15 }
 0x6cc   :  { %v1587_v7 = vmul.f32 0.7978846, %v1581_v6  ;;  %v3470_v10 = vpop.eup %3469 }
 0x6cd   :  { %3160 = vmatmul.msk.bf16.gmra.mxu2 %vm1642_vm8, %v1613_v20  ;;  %v1598_v21 = vadd.f32 1.0, %v3470_v10 }
 0x6ce   :  { %3471 = vtanh.f32 %v1587_v7 }
 0x6cf   :  { %v1604_v30 = vmul.f32 0.5, %v1598_v21 }
 0x6d1   :  { %v1610_v47 = vmul.f32 %v1604_v30, %v1554_v44 }
 0x6d4   :  { %v3472_v23 = vpop.eup %3471 }
 0x6d5   :  { %v1599_v24 = vadd.f32 1.0, %v3472_v23 }
 0x6d7   :  { %v1605_v32 = vmul.f32 0.5, %v1599_v24 }
 0x6d9   :  { %v1611_v33 = vmul.f32 %v1605_v32, %v1556_v5  ;;  %v3298_v5 = vld [vmem:[%s5383_s23 + $0x18] sm:$0xff] }
 0x6da   :  { %1958 = vmatpush.bf16.msra.mxu0 %v3298_v5 }
 0x6db   :  { %v1614_v34 = vpack.c.bf16 %v1611_v33, %v1610_v47 }
 0x6dd   :  { %3161 = vmatmul.msk.bf16.gmra.mxu2 %vm1642_vm8, %v1614_v34 }
 0x740   :  { %v1661_v54 = vpop.f32.mrf.mxu2 }
 0x741   :  { %v1662_v26 = vadd.f32 %v3386_v35, %v1661_v54  ;;  %v3296_v54 = vld [vmem:[%s5382_s29 + $0x18] sm:$0xff] }
 0x742   :  { %1919 = vmatpush.bf16.msra.mxu3 %v3296_v54 }
 0x743   :  { %v1676_v49 = vadd.f32 %v1662_v26, %v4882_v25  ;;  %v3300_v26 = vld [vmem:[#allocation25 + $0x18] sm:$0xff] }
 0x744   :  { %1997 = vmatpush.bf16.msra.mxu1 %v3300_v26 }
 0x745   :  { %v1682_v37 = vsel %vm596_vm3, %v1676_v49, 0.0 }
 0x746   :  { %1683 = vadd.xlane.f32.xlu0 %v1682_v37  ;;  %v3299_v37 = vld [vmem:[#allocation25 + $0x10] sm:$0xff] }
 0x748   :  { %v1663_v40 = vpop.f32.mrf.mxu2  ;;  %1998 = vmatpush.bf16.msra.mxu1 %v3299_v37 }
 0x749   :  { %v1664_v42 = vadd.f32 %v3386_v35, %v1663_v40 }
 0x74b   :  { %v1677_v50 = vadd.f32 %v1664_v42, %v4885_v29 }
 0x74c   :  { %2252 = vmatpush.msrb.mxu1 %v4925_v17 }
 0x74d   :  { %v1685_v51 = vsel %vm596_vm3, %v1677_v50, 0.0 }
 0x74e   :  { %1686 = vadd.xlane.f32.xlu1 %v1685_v51  ;;  %2253 = vmatpush.msrb.mxu1 %v4930_v12 }
 0x750   :  { %v1666_v52 = vpop.f32.mrf.mxu2  ;;  %2254 = vmatpush.msrb.mxu1 %v4934_v3 }
 0x751   :  { %v1667_v46 = vadd.f32 %v3386_v35, %v1666_v52 }
 0x752   :  { %2255 = vmatpush.msrb.mxu1 %v4938_v59 }
 0x753   :  { %v1678_v58 = vadd.f32 %v1667_v46, %v4896_v61 }
 0x755   :  { %v1688_v41 = vsel %vm596_vm3, %v1678_v58, 0.0 }
 0x756   :  { %1689 = vadd.xlane.f32.xlu2 %v1688_v41 }
 0x758   :  { %v1668_v27 = vpop.f32.mrf.mxu2 }
 0x759   :  { %v1669_v60 = vadd.f32 %v3386_v35, %v1668_v27 }
 0x75b   :  { %v1679_v25 = vadd.f32 %v1669_v60, %v4899_v31 }
 0x75d   :  { %v1691_v48 = vsel %vm596_vm3, %v1679_v25, 0.0 }
 0x75e   :  { %1692 = vadd.xlane.f32.xlu0 %v1691_v48 }
 0x760   :  { %v1671_v22 = vpop.f32.mrf.mxu2 }
 0x761   :  { %v1672_v28 = vadd.f32 %v3386_v35, %v1671_v22 }
 0x763   :  { %v1680_v29 = vadd.f32 %v1672_v28, %v4909_v39 }
 0x765   :  { %v1694_v62 = vsel %vm596_vm3, %v1680_v29, 0.0 }
 0x766   :  { %1695 = vadd.xlane.f32.xlu1 %v1694_v62 }
 0x768   :  { %v1673_v45 = vpop.f32.mrf.mxu2 }
 0x769   :  { %v1674_v44 = vadd.f32 %v3386_v35, %v1673_v45  ;;  %v3297_v35 = vld [vmem:[%s5383_s23 + $0x10] sm:$0xff] }
 0x76a   :  { %1959 = vmatpush.bf16.msra.mxu0 %v3297_v35 }
 0x76b   :  { %v1681_v61 = vadd.f32 %v1674_v44, %v4912_v8 }
 0x76d   :  { %v1697_v19 = vsel %vm596_vm3, %v1681_v61, 0.0 }
 0x76e   :  { %1698 = vadd.xlane.f32.xlu2 %v1697_v19  ;;  %2221 = vmatpush.msrb.mxu0 %v4925_v17 }
 0x770   :  { %2222 = vmatpush.msrb.mxu0 %v4930_v12 }
 0x772   :  { %2223 = vmatpush.msrb.mxu0 %v4934_v3 }
 0x774   :  { %2224 = vmatpush.msrb.mxu0 %v4938_v59 }
 0x7b9   :  { %v1684_v63 = vpop.xlane.xlu0 %1683 }
 0x7ba   :  { %v1700_v31 = vmul.f32 %v1684_v63, %v4830_v18 }
 0x7bc   :  { %v4965_v53 = vsub.f32 %v1676_v49, %v1700_v31  ;;  %v3295_v49 = vld [vmem:[%s5382_s29 + $0x10] sm:$0xff]  ;;  %v5021_v31 = vld [vmem:[%s4423_s13] ss:$0 sm:$0xff] }
 0x7bd   :  { %1920 = vmatpush.bf16.msra.mxu3 %v3295_v49 }
 0x7be   :  { %v1712_v0 = vmul.f32 %v4965_v53, %v4965_v53 }
 0x7c0   :  { %v1718_v39 = vsel %vm596_vm3, %v1712_v0, 0.0 }
 0x7c1   :  { %v1687_v1 = vpop.xlane.xlu1 %1686  ;;  %1719 = vadd.xlane.f32.xlu0 %v1718_v39  ;;  %2066 = vmatpush.msrb.mxu3 %v4925_v17 }
 0x7c2   :  { %v1701_v55 = vmul.f32 %v1687_v1, %v4830_v18 }
 0x7c3   :  { %2067 = vmatpush.msrb.mxu3 %v4930_v12 }
 0x7c4   :  { %v4971_v38 = vsub.f32 %v1677_v50, %v1701_v55 }
 0x7c5   :  { %2068 = vmatpush.msrb.mxu3 %v4934_v3 }
 0x7c6   :  { %v1713_v8 = vmul.f32 %v4971_v38, %v4971_v38 }
 0x7c7   :  { %2069 = vmatpush.msrb.mxu3 %v4938_v59 }
 0x7c8   :  { %v1721_v2 = vsel %vm596_vm3, %v1713_v8, 0.0 }
 0x7c9   :  { %1722 = vadd.xlane.f32.xlu1 %v1721_v2  ;;  %v1690_v4 = vpop.xlane.xlu2 %1689 }
 0x7ca   :  { %v1702_v36 = vmul.f32 %v1690_v4, %v4830_v18  ;;  %v5024_v4 = vld [vmem:[#allocation38] ss:$0 sm:$0xff] }
 0x7cc   :  { %v4978_v9 = vsub.f32 %v1678_v58, %v1702_v36 }
 0x7ce   :  { %v1714_v43 = vmul.f32 %v4978_v9, %v4978_v9 }
 0x7d0   :  { %v1724_v56 = vsel %vm596_vm3, %v1714_v43, 0.0 }
 0x7d1   :  { %v1693_v11 = vpop.xlane.xlu0 %1692  ;;  %1725 = vadd.xlane.f32.xlu2 %v1724_v56 }
 0x7d2   :  { %v1703_v13 = vmul.f32 %v1693_v11, %v4830_v18 }
 0x7d4   :  { %v4984_v57 = vsub.f32 %v1679_v25, %v1703_v13 }
 0x7d6   :  { %v1715_v14 = vmul.f32 %v4984_v57, %v4984_v57 }
 0x7d8   :  { %v1727_v15 = vsel %vm596_vm3, %v1715_v14, 0.0 }
 0x7d9   :  { %1728 = vadd.xlane.f32.xlu0 %v1727_v15  ;;  %v1696_v16 = vpop.xlane.xlu1 %1695 }
 0x7da   :  { %v1704_v6 = vmul.f32 %v1696_v16, %v4830_v18 }
 0x7dc   :  { %v4990_v20 = vsub.f32 %v1680_v29, %v1704_v6 }
 0x7de   :  { %v1716_v7 = vmul.f32 %v4990_v20, %v4990_v20 }
 0x7e0   :  { %v1730_v10 = vsel %vm596_vm3, %v1716_v7, 0.0 }
 0x7e1   :  { %1731 = vadd.xlane.f32.xlu1 %v1730_v10  ;;  %v1699_v21 = vpop.xlane.xlu2 %1698 }
 0x7e2   :  { %v1705_v23 = vmul.f32 %v1699_v21, %v4830_v18 }
 0x7e4   :  { %v4996_v24 = vsub.f32 %v1681_v61, %v1705_v23 }
 0x7e6   :  { %v1717_v30 = vmul.f32 %v4996_v24, %v4996_v24 }
 0x7e8   :  { %v1733_v32 = vsel %vm596_vm3, %v1717_v30, 0.0 }
 0x7e9   :  { %1734 = vadd.xlane.f32.xlu2 %v1733_v32 }
 0x834   :  { %v1720_v47 = vpop.xlane.xlu0 %1719 }
 0x835   :  { %v1736_v33 = vmul.f32 %v1720_v47, %v4830_v18 }
 0x837   :  { %v1742_v34 = vadd.f32 1e-05, %v1736_v33 }
 0x839   :  { %3473 = vrsqrt.f32 %v1742_v34  ;;  %vm1754_vm10 = vweird.f32 %v1742_v34 }
 0x83c   :  { %v1723_v40 = vpop.xlane.xlu1 %1722 }
 0x83d   :  { %v1737_v42 = vmul.f32 %v1723_v40, %v4830_v18 }
 0x83f   :  { %v3474_v50 = vpop.eup %3473  ;;  %v1743_v51 = vadd.f32 1e-05, %v1737_v42 }
 0x840   :  { %v1749_v52 = vmul.f32 %v3474_v50, %v1742_v34  ;;  %vm1755_vm9 = vweird.f32 %v3474_v50 }
 0x841   :  { %3475 = vrsqrt.f32 %v1743_v51  ;;  %vm1756_vm11 = vmor %vm1754_vm10, %vm1755_vm9  ;;  %vm1764_vm13 = vweird.f32 %v1743_v51 }
 0x842   :  { %v1750_v46 = vmul.f32 %v3474_v50, %v1749_v52 }
 0x844   :  { %v1751_v58 = vmul.f32 0.5, %v1750_v46  ;;  %v1726_v41 = vpop.xlane.xlu2 %1725 }
 0x845   :  { %v1738_v27 = vmul.f32 %v1726_v41, %v4830_v18 }
 0x846   :  { %v1752_v60 = vsub.f32 1.5, %v1751_v58 }
 0x847   :  { %v3476_v25 = vpop.eup %3475  ;;  %v1744_v48 = vadd.f32 1e-05, %v1738_v27 }
 0x848   :  { %v1753_v22 = vmul.f32 %v3474_v50, %v1752_v60  ;;  %v1759_v28 = vmul.f32 %v3476_v25, %v1743_v51  ;;  %vm1765_vm12 = vweird.f32 %v3476_v25 }
 0x849   :  { %3477 = vrsqrt.f32 %v1744_v48  ;;  %vm1766_vm14 = vmor %vm1764_vm13, %vm1765_vm12  ;;  %vm1774_vm0 = vweird.f32 %v1744_v48 }
 0x84a   :  { %v1760_v29 = vmul.f32 %v3476_v25, %v1759_v28  ;;  %v1757_v62 = vsel %vm1756_vm11, %v3474_v50, %v1753_v22 }
 0x84b   :  { %v1808_v0 = vmul.f32 %v1757_v62, %v4965_v53 }
 0x84c   :  { %v1761_v45 = vmul.f32 0.5, %v1760_v29  ;;  %v1729_v44 = vpop.xlane.xlu0 %1728 }
 0x84d   :  { %v1739_v61 = vmul.f32 %v1729_v44, %v4830_v18  ;;  %v1817_v5 = vmul.f32 %v5021_v31, %v1808_v0 }
 0x84e   :  { %v1762_v19 = vsub.f32 1.5, %v1761_v45 }
 0x84f   :  { %v3478_v63 = vpop.eup %3477  ;;  %v1745_v39 = vadd.f32 1e-05, %v1739_v61  ;;  %v5031_v15 = vadd.f32 %v5024_v4, %v1817_v5 }
 0x850   :  { %v1763_v1 = vmul.f32 %v3476_v25, %v1762_v19  ;;  %v1769_v55 = vmul.f32 %v3478_v63, %v1744_v48  ;;  %vm1775_vm15 = vweird.f32 %v3478_v63 }
 0x851   :  { %3479 = vrsqrt.f32 %v1745_v39  ;;  %vm1776_vm1 = vmor %vm1774_vm0, %vm1775_vm15  ;;  %vm1784_vm4 = vweird.f32 %v1745_v39 }
 0x852   :  { %v1767_v8 = vsel %vm1766_vm14, %v3476_v25, %v1763_v1  ;;  %v1770_v2 = vmul.f32 %v3478_v63, %v1769_v55  ;;  %v3391_v1 = vld [vmem:[%s5385_s7 + $0x1] ss:$0 sm:$0xff] }
 0x853   :  { %v1809_v36 = vmul.f32 %v1767_v8, %v4971_v38 }
 0x854   :  { %v1771_v43 = vmul.f32 0.5, %v1770_v2  ;;  %v1732_v56 = vpop.xlane.xlu1 %1731 }
 0x855   :  { %v1818_v11 = vmul.f32 %v5021_v31, %v1809_v36  ;;  %v1740_v53 = vmul.f32 %v1732_v56, %v4830_v18 }
 0x856   :  { %v1772_v13 = vsub.f32 1.5, %v1771_v43 }
 0x857   :  { %v3480_v14 = vpop.eup %3479  ;;  %v5034_v16 = vadd.f32 %v5024_v4, %v1818_v11  ;;  %v1746_v6 = vadd.f32 1e-05, %v1740_v53 }
 0x858   :  { %v1773_v7 = vmul.f32 %v3478_v63, %v1772_v13  ;;  %v1779_v10 = vmul.f32 %v3480_v14, %v1745_v39  ;;  %vm1785_vm2 = vweird.f32 %v3480_v14  ;;  %v3389_v39 = vld [vmem:[#allocation23 + $0x1] ss:$0 sm:$0xff] }
 0x859   :  { %3481 = vrsqrt.f32 %v1746_v6  ;;  %v1886_v38 = vpack.c.bf16 %v5034_v16, %v5031_v15  ;;  %vm1786_vm5 = vmor %vm1784_vm4, %vm1785_vm2  ;;  %vm1794_vm7 = vweird.f32 %v1746_v6 }
 0x85a   :  { %v1780_v21 = vmul.f32 %v3480_v14, %v1779_v10  ;;  %v1777_v23 = vsel %vm1776_vm1, %v3478_v63, %v1773_v7 }
 0x85b   :  { %3188 = vmatmul.msk.bf16.vlgmr.msra.gmra.mxu3 %vm596_vm3, %v1886_v38  ;;  %3199 = vmatmul.msk.bf16.vlgmr.msra.gmra.mxu0 %vm596_vm3, %v1886_v38  ;;  %v1810_v35 = vmul.f32 %v1777_v23, %v4978_v9 }
 0x85c   :  { %v1781_v30 = vmul.f32 0.5, %v1780_v21  ;;  %3210 = vmatmul.msk.bf16.vlgmr.msra.gmra.mxu1 %vm596_vm3, %v1886_v38  ;;  %v1735_v32 = vpop.xlane.xlu2 %1734  ;;  %2128 = vmatpush.msra.mxu3 %v4925_v17 }
 0x85d   :  { %v1741_v47 = vmul.f32 %v1735_v32, %v4830_v18  ;;  %v1819_v50 = vmul.f32 %v5021_v31, %v1810_v35 }
 0x85e   :  { %v1782_v33 = vsub.f32 1.5, %v1781_v30  ;;  %2129 = vmatpush.msra.mxu3 %v4930_v12 }
 0x85f   :  { %v3482_v34 = vpop.eup %3481  ;;  %v1747_v54 = vadd.f32 1e-05, %v1741_v47  ;;  %v5051_v58 = vadd.f32 %v5024_v4, %v1819_v50 }
 0x860   :  { %v1783_v26 = vmul.f32 %v3480_v14, %v1782_v33  ;;  %v1789_v49 = vmul.f32 %v3482_v34, %v1746_v6  ;;  %2130 = vmatpush.msra.mxu3 %v4934_v3  ;;  %vm1795_vm6 = vweird.f32 %v3482_v34 }
 0x861   :  { %3483 = vrsqrt.f32 %v1747_v54  ;;  %vm1796_vm9 = vmor %vm1794_vm7, %vm1795_vm6  ;;  %vm1804_vm11 = vweird.f32 %v1747_v54 }
 0x862   :  { %v1787_v37 = vsel %vm1786_vm5, %v3480_v14, %v1783_v26  ;;  %v1790_v40 = vmul.f32 %v3482_v34, %v1789_v49  ;;  %2131 = vmatpush.msra.mxu3 %v4938_v59 }
 0x863   :  { %v1811_v42 = vmul.f32 %v1787_v37, %v4984_v57 }
 0x864   :  { %v1791_v51 = vmul.f32 0.5, %v1790_v40 }
 0x865   :  { %v1820_v52 = vmul.f32 %v5021_v31, %v1811_v42 }
 0x866   :  { %v1792_v9 = vsub.f32 1.5, %v1791_v51 }
 0x867   :  { %v3484_v46 = vpop.eup %3483  ;;  %v5054_v41 = vadd.f32 %v5024_v4, %v1820_v52 }
 0x868   :  { %v1793_v27 = vmul.f32 %v3482_v34, %v1792_v9  ;;  %v1799_v60 = vmul.f32 %v3484_v46, %v1747_v54  ;;  %vm1805_vm10 = vweird.f32 %v3484_v46 }
 0x869   :  { %v1887_v25 = vpack.c.bf16 %v5054_v41, %v5051_v58  ;;  %vm1806_vm12 = vmor %vm1804_vm11, %vm1805_vm10 }
 0x86a   :  { %v1800_v57 = vmul.f32 %v3484_v46, %v1799_v60  ;;  %v1797_v48 = vsel %vm1796_vm9, %v3482_v34, %v1793_v27 }
 0x86b   :  { %3189 = vmatmul.msk.bf16.gmra.mxu3 %vm596_vm3, %v1887_v25  ;;  %3200 = vmatmul.msk.bf16.gmra.mxu0 %vm596_vm3, %v1887_v25  ;;  %v1812_v29 = vmul.f32 %v1797_v48, %v4990_v20 }
 0x86c   :  { %v1801_v22 = vmul.f32 0.5, %v1800_v57  ;;  %3211 = vmatmul.msk.bf16.gmra.mxu1 %vm596_vm3, %v1887_v25 }
 0x86d   :  { %v1821_v61 = vmul.f32 %v5021_v31, %v1812_v29 }
 0x86e   :  { %v1802_v28 = vsub.f32 1.5, %v1801_v22 }
 0x86f   :  { %v5066_v63 = vadd.f32 %v5024_v4, %v1821_v61 }
 0x870   :  { %v1803_v62 = vmul.f32 %v3484_v46, %v1802_v28 }
 0x872   :  { %v1807_v45 = vsel %vm1806_vm12, %v3484_v46, %v1803_v62 }
 0x873   :  { %v1813_v44 = vmul.f32 %v1807_v45, %v4996_v24 }
 0x875   :  { %v1822_v19 = vmul.f32 %v5021_v31, %v1813_v44 }
 0x877   :  { %v5069_v0 = vadd.f32 %v5024_v4, %v1822_v19 }
 0x879   :  { %v1888_v20 = vpack.c.bf16 %v5069_v0, %v5066_v63 }
 0x87b   :  { %3190 = vmatmul.msk.bf16.gmra.mxu3 %vm596_vm3, %v1888_v20  ;;  %3201 = vmatmul.msk.bf16.gmra.mxu0 %vm596_vm3, %v1888_v20 }
 0x87c   :  { %3212 = vmatmul.msk.bf16.gmra.mxu1 %vm596_vm3, %v1888_v20 }
 0x8d8   :  { %v1961_v24 = vpop.f32.mrf.mxu0 }
 0x8d9   :  { %v1962_v31 = vadd.f32 %v3389_v39, %v1961_v24  ;;  %v5107_v60 = vpop.f32.mrf.mxu1 }
 0x8de   :  { %v1922_v55 = vpop.f32.mrf.mxu3 }
 0x8df   :  { %v1923_v8 = vadd.f32 %v3391_v1, %v1922_v55 }
 0x8e0   :  { %v1963_v2 = vpop.f32.mrf.mxu0 }
 0x8e1   :  { %v2015_v5 = vmul.f32 %v1962_v31, %v1923_v8  ;;  %v1964_v36 = vadd.f32 %v3389_v39, %v1963_v2  ;;  %v5109_v25 = vpop.f32.mrf.mxu1 }
 0x8e3   :  { %3213 = vmatmul.msk.f32.vlgmr.msrb.gmra.mxu2 %vm596_vm3, %v2015_v5  ;;  %v3302_v5 = vld [vmem:[#allocation28 + $0x18] sm:$0xff] }
 0x8e4   :  { %2159 = vmatpush.msrb.mxu2 %v4925_v17 }
 0x8e6   :  { %v1924_v4 = vpop.f32.mrf.mxu3  ;;  %2160 = vmatpush.msrb.mxu2 %v4930_v12 }
 0x8e7   :  { %v1925_v43 = vadd.f32 %v3391_v1, %v1924_v4 }
 0x8e8   :  { %v1966_v56 = vpop.f32.mrf.mxu0  ;;  %2161 = vmatpush.msrb.mxu2 %v4934_v3 }
 0x8e9   :  { %v1967_v11 = vadd.f32 %v3389_v39, %v1966_v56  ;;  %v2016_v53 = vmul.f32 %v1964_v36, %v1925_v43  ;;  %v5111_v22 = vpop.f32.mrf.mxu1 }
 0x8ea   :  { %2162 = vmatpush.msrb.mxu2 %v4938_v59 }
 0x8eb   :  { %v2046_v13 = vmul.f32 %v1967_v11, %v1923_v8  ;;  %3214 = vmatmul.msk.f32.gmra.mxu2 %vm596_vm3, %v2016_v53 }
 0x8ed   :  { %3215 = vmatmul.msk.f32.vlgmr.msrb.gmra.mxu3 %vm596_vm3, %v2046_v13  ;;  %v3301_v13 = vld [vmem:[#allocation28 + $0x10] sm:$0xff] }
 0x8ee   :  { %v1927_v14 = vpop.f32.mrf.mxu3  ;;  %2190 = vmatpush.msrb.mxu3 %v4925_v17 }
 0x8ef   :  { %v1928_v21 = vadd.f32 %v3391_v1, %v1927_v14 }
 0x8f0   :  { %v1968_v6 = vpop.f32.mrf.mxu0  ;;  %2191 = vmatpush.msrb.mxu3 %v4930_v12 }
 0x8f1   :  { %v1969_v7 = vadd.f32 %v3389_v39, %v1968_v6  ;;  %v2108_v32 = vmul.f32 %v1962_v31, %v1928_v21  ;;  %v2139_v52 = vmul.f32 %v1967_v11, %v1928_v21  ;;  %v5113_v62 = vpop.f32.mrf.mxu1 }
 0x8f2   :  { %2192 = vmatpush.msrb.mxu3 %v4934_v3 }
 0x8f3   :  { %v2047_v10 = vmul.f32 %v1969_v7, %v1925_v43 }
 0x8f4   :  { %2193 = vmatpush.msrb.mxu3 %v4938_v59 }
 0x8f5   :  { %3216 = vmatmul.msk.f32.gmra.mxu3 %vm596_vm3, %v2047_v10 }
 0x8f6   :  { %v1929_v38 = vpop.f32.mrf.mxu3 }
 0x8f7   :  { %v1930_v34 = vadd.f32 %v3391_v1, %v1929_v38 }
 0x8f8   :  { %v1971_v23 = vpop.f32.mrf.mxu0 }
 0x8f9   :  { %v1972_v30 = vadd.f32 %v3389_v39, %v1971_v23  ;;  %v2109_v42 = vmul.f32 %v1964_v36, %v1930_v34 }
 0x8fb   :  { %v2077_v47 = vmul.f32 %v1972_v30, %v1923_v8  ;;  %v2170_v9 = vmul.f32 %v1972_v30, %v1928_v21  ;;  %v5115_v8 = vpop.f32.mrf.mxu1 }
 0x8fd   :  { %3217 = vmatmul.msk.f32.vlgmr.msra.gmra.mxu2 %vm596_vm3, %v2077_v47  ;;  %3219 = vmatmul.msk.f32.vlgmr.msra.gmra.mxu3 %vm596_vm3, %v2108_v32 }
 0x8fe   :  { %v1932_v33 = vpop.f32.mrf.mxu3  ;;  %2283 = vmatpush.msra.mxu2 %v4925_v17  ;;  %2459 = vmatpush.bf16.msra.mxu3 %v3302_v5 }
 0x8ff   :  { %v1933_v35 = vadd.f32 %v3391_v1, %v1932_v33 }
 0x900   :  { %v1973_v54 = vpop.f32.mrf.mxu0  ;;  %2284 = vmatpush.msra.mxu2 %v4930_v12 }
 0x901   :  { %v2201_v26 = vmul.f32 %v1962_v31, %v1933_v35  ;;  %v2232_v49 = vmul.f32 %v1967_v11, %v1933_v35  ;;  %v1974_v37 = vadd.f32 %v3389_v39, %v1973_v54  ;;  %v2263_v46 = vmul.f32 %v1972_v30, %v1933_v35 }
 0x902   :  { %2285 = vmatpush.msra.mxu2 %v4934_v3  ;;  %v2140_v3 = vmul.f32 %v1969_v7, %v1930_v34  ;;  %2460 = vmatpush.bf16.msra.mxu3 %v3301_v13 }
 0x903   :  { %v2078_v40 = vmul.f32 %v1974_v37, %v1925_v43  ;;  %3225 = vmatmul.msk.f32.vlgmr.msrb.gmra.mxu0 %vm596_vm3, %v2201_v26  ;;  %3227 = vmatmul.msk.f32.vlgmr.msrb.gmra.mxu1 %vm596_vm3, %v2232_v49 }
 0x904   :  { %2286 = vmatpush.msra.mxu2 %v4938_v59  ;;  %v2171_v59 = vmul.f32 %v1974_v37, %v1930_v34  ;;  %v2012_v34 = vpop.f32.mrf.mxu1 }
 0x905   :  { %3218 = vmatmul.msk.f32.gmra.mxu2 %vm596_vm3, %v2078_v40  ;;  %3220 = vmatmul.msk.f32.gmra.mxu3 %vm596_vm3, %v2109_v42 }
 0x906   :  { %v1934_v17 = vpop.f32.mrf.mxu3 }
 0x907   :  { %v1935_v50 = vadd.f32 %v3391_v1, %v1934_v17 }
 0x909   :  { %v2202_v12 = vmul.f32 %v1964_v36, %v1935_v50  ;;  %v2233_v51 = vmul.f32 %v1969_v7, %v1935_v50  ;;  %v2264_v27 = vmul.f32 %v1974_v37, %v1935_v50 }
 0x90b   :  { %3226 = vmatmul.msk.f32.gmra.mxu0 %vm596_vm3, %v2202_v12  ;;  %3228 = vmatmul.msk.f32.gmra.mxu1 %vm596_vm3, %v2233_v51  ;;  %v3390_v51 = vld [vmem:[#allocation26 + $0x1] ss:$0 sm:$0xff] }
 0x90d   :  { %3221 = vmatmul.msk.f32.vlgmr.msrb.gmra.mxu2 %vm596_vm3, %v2139_v52  ;;  %3223 = vmatmul.msk.f32.vlgmr.msrb.gmra.mxu3 %vm596_vm3, %v2170_v9 }
 0x915   :  { %3222 = vmatmul.msk.f32.gmra.mxu2 %vm596_vm3, %v2140_v3  ;;  %3224 = vmatmul.msk.f32.gmra.mxu3 %vm596_vm3, %v2171_v59 }
 0x91d   :  { %3229 = vmatmul.msk.f32.vlgmr.msra.gmra.mxu2 %vm596_vm3, %v2263_v46 }
 0x925   :  { %3230 = vmatmul.msk.f32.gmra.mxu2 %vm596_vm3, %v2264_v27 }
 0x966   :  { %v2040_v57 = vpop.f32.mrf.mxu2 }
 0x96e   :  { %v2043_v28 = vpop.f32.mrf.mxu2 }
 0x970   :  { %v2071_v48 = vpop.f32.mrf.mxu3 }
 0x971   :  { %v2294_v45 = vmax.f32 %v2040_v57, %v2071_v48 }
 0x978   :  { %v2074_v29 = vpop.f32.mrf.mxu3 }
 0x979   :  { %v2295_v2 = vmax.f32 %v2043_v28, %v2074_v29 }
 0x980   :  { %v2102_v44 = vpop.f32.mrf.mxu2  ;;  %v2133_v61 = vpop.f32.mrf.mxu3 }
 0x981   :  { %v2296_v19 = vmax.f32 %v2294_v45, %v2102_v44  ;;  %v2226_v59 = vpop.f32.mrf.mxu0 }
 0x983   :  { %v2298_v20 = vsub.f32 %v2040_v57, %v2296_v19  ;;  %v2304_v24 = vsub.f32 %v2071_v48, %v2296_v19  ;;  %v2310_v39 = vsub.f32 %v2102_v44, %v2296_v19  ;;  %v2257_v57 = vpop.f32.mrf.mxu1  ;;  %v5118_v44 = vadd.f32 %v3390_v51, %v5107_v60 }
 0x985   :  { %v2300_v1 = vmul.f32 1.442695, %v2298_v20  ;;  %v2306_v55 = vmul.f32 1.442695, %v2304_v24  ;;  %v2312_v31 = vmul.f32 1.442695, %v2310_v39  ;;  %v5124_v39 = vadd.f32 %v3390_v51, %v5109_v25 }
 0x987   :  { %3485 = vpow2.f32 %v2300_v1  ;;  %v2382_v1 = vmax.f32 %v2226_v59, %v2257_v57 }
 0x988   :  { %3487 = vpow2.f32 %v2306_v55  ;;  %v2105_v4 = vpop.f32.mrf.mxu2  ;;  %v2136_v36 = vpop.f32.mrf.mxu3 }
 0x989   :  { %v2297_v43 = vmax.f32 %v2295_v2, %v2105_v4  ;;  %3489 = vpow2.f32 %v2312_v31 }
 0x98b   :  { %v2299_v56 = vsub.f32 %v2043_v28, %v2297_v43  ;;  %v2305_v11 = vsub.f32 %v2074_v29, %v2297_v43  ;;  %v2311_v53 = vsub.f32 %v2105_v4, %v2297_v43  ;;  %v5129_v43 = vadd.f32 %v3390_v51, %v5113_v62 }
 0x98d   :  { %v3486_v14 = vpop.eup %3485  ;;  %v2302_v6 = vmul.f32 1.442695, %v2299_v56  ;;  %v2308_v7 = vmul.f32 1.442695, %v2305_v11  ;;  %v2314_v38 = vmul.f32 1.442695, %v2311_v53 }
 0x98e   :  { %v3488_v10 = vpop.eup %3487 }
 0x98f   :  { %v2316_v21 = vadd.f32 %v3488_v10, %v3486_v14  ;;  %3491 = vpow2.f32 %v2302_v6  ;;  %v3490_v23 = vpop.eup %3489 }
 0x990   :  { %3493 = vpow2.f32 %v2308_v7  ;;  %v2164_v30 = vpop.f32.mrf.mxu2  ;;  %v2195_v32 = vpop.f32.mrf.mxu3 }
 0x991   :  { %v2318_v47 = vadd.f32 %v3490_v23, %v2316_v21  ;;  %v2338_v33 = vmax.f32 %v2133_v61, %v2164_v30  ;;  %3495 = vpow2.f32 %v2314_v38 }
 0x993   :  { %3497 = vrcp.f32 %v2318_v47  ;;  %v2340_v35 = vmax.f32 %v2338_v33, %v2195_v32  ;;  %v2229_v33 = vpop.f32.mrf.mxu0 }
 0x995   :  { %v3492_v54 = vpop.eup %3491  ;;  %v2342_v26 = vsub.f32 %v2133_v61, %v2340_v35  ;;  %v2348_v49 = vsub.f32 %v2164_v30, %v2340_v35  ;;  %v2354_v37 = vsub.f32 %v2195_v32, %v2340_v35  ;;  %v5121_v61 = vadd.f32 %v3390_v51, %v5111_v22 }
 0x996   :  { %v3494_v40 = vpop.eup %3493  ;;  %v5132_v22 = vadd.f32 %v3390_v51, %v5115_v8 }
 0x997   :  { %v2317_v42 = vadd.f32 %v3494_v40, %v3492_v54  ;;  %v2344_v17 = vmul.f32 1.442695, %v2342_v26  ;;  %v2350_v50 = vmul.f32 1.442695, %v2348_v49  ;;  %v3496_v12 = vpop.eup %3495  ;;  %v2356_v52 = vmul.f32 1.442695, %v2354_v37 }
 0x998   :  { %v2167_v9 = vpop.f32.mrf.mxu2  ;;  %v2198_v48 = vpop.f32.mrf.mxu3 }
 0x999   :  { %v3498_v3 = vpop.eup %3497  ;;  %v2319_v46 = vadd.f32 %v3496_v12, %v2317_v42  ;;  %3499 = vpow2.f32 %v2344_v17  ;;  %v2339_v27 = vmax.f32 %v2136_v36, %v2167_v9 }
 0x99a   :  { %3501 = vpow2.f32 %v2350_v50  ;;  %v2322_v28 = vmul.f32 %v3498_v3, %v3486_v14  ;;  %v2326_v29 = vmul.f32 %v3498_v3, %v3488_v10  ;;  %v2332_v53 = vmul.f32 %v3498_v3, %v3490_v23 }
 0x99b   :  { %3503 = vrcp.f32 %v2319_v46  ;;  %v2341_v45 = vmax.f32 %v2339_v27, %v2198_v48 }
 0x99c   :  { %3505 = vpow2.f32 %v2356_v52  ;;  %v2324_v31 = vmul.f32 %v2322_v28, %v5118_v44  ;;  %v2328_v2 = vmul.f32 %v2326_v29, %v5121_v61 }
 0x99d   :  { %v2343_v19 = vsub.f32 %v2136_v36, %v2341_v45  ;;  %v2349_v20 = vsub.f32 %v2167_v9, %v2341_v45  ;;  %v2355_v24 = vsub.f32 %v2198_v48, %v2341_v45  ;;  %v5134_v36 = vadd.f32 %v3390_v51, %v2012_v34  ;;  %v2260_v34 = vpop.f32.mrf.mxu1 }
 0x99e   :  { %v2330_v21 = vadd.f32 %v2328_v2, %v2324_v31  ;;  %v2383_v17 = vmax.f32 %v2229_v33, %v2260_v34 }
 0x99f   :  { %v3500_v55 = vpop.eup %3499  ;;  %v2346_v5 = vmul.f32 1.442695, %v2343_v19  ;;  %v2352_v4 = vmul.f32 1.442695, %v2349_v20  ;;  %v2358_v56 = vmul.f32 1.442695, %v2355_v24 }
 0x9a0   :  { %v3502_v60 = vpop.eup %3501  ;;  %v2288_v25 = vpop.f32.mrf.mxu2 }
 0x9a1   :  { %v3504_v11 = vpop.eup %3503  ;;  %v2360_v13 = vadd.f32 %v3502_v60, %v3500_v55  ;;  %3507 = vpow2.f32 %v2346_v5  ;;  %v2384_v14 = vmax.f32 %v2382_v1, %v2288_v25 }
 0x9a2   :  { %v3506_v6 = vpop.eup %3505  ;;  %v2323_v7 = vmul.f32 %v3504_v11, %v3492_v54  ;;  %v2327_v10 = vmul.f32 %v3504_v11, %v3494_v40  ;;  %v2333_v38 = vmul.f32 %v3504_v11, %v3496_v12  ;;  %3509 = vpow2.f32 %v2352_v4 }
 0x9a3   :  { %v2362_v62 = vadd.f32 %v3506_v6, %v2360_v13  ;;  %v2386_v30 = vsub.f32 %v2226_v59, %v2384_v14  ;;  %v2392_v32 = vsub.f32 %v2257_v57, %v2384_v14  ;;  %3511 = vpow2.f32 %v2358_v56 }
 0x9a4   :  { %v2325_v8 = vmul.f32 %v2323_v7, %v5124_v39  ;;  %v2329_v47 = vmul.f32 %v2327_v10, %v5129_v43  ;;  %v2398_v23 = vsub.f32 %v2288_v25, %v2384_v14  ;;  %v2334_v54 = vmul.f32 %v2332_v53, %v5132_v22 }
 0x9a5   :  { %3513 = vrcp.f32 %v2362_v62  ;;  %v2388_v35 = vmul.f32 1.442695, %v2386_v30  ;;  %v2394_v26 = vmul.f32 1.442695, %v2392_v32  ;;  %v2335_v37 = vmul.f32 %v2333_v38, %v5134_v36 }
 0x9a6   :  { %v2331_v49 = vadd.f32 %v2329_v47, %v2325_v8  ;;  %v2400_v40 = vmul.f32 1.442695, %v2398_v23  ;;  %v2336_v12 = vadd.f32 %v2334_v54, %v2330_v21 }
 0x9a7   :  { %v3508_v42 = vpop.eup %3507  ;;  %3515 = vpow2.f32 %v2388_v35 }
 0x9a8   :  { %v3510_v50 = vpop.eup %3509  ;;  %v2337_v51 = vadd.f32 %v2335_v37, %v2331_v49  ;;  %3517 = vpow2.f32 %v2394_v26  ;;  %v2291_v52 = vpop.f32.mrf.mxu2 }
 0x9a9   :  { %v2361_v9 = vadd.f32 %v3510_v50, %v3508_v42  ;;  %v2385_v3 = vmax.f32 %v2383_v17, %v2291_v52  ;;  %v3512_v59 = vpop.eup %3511  ;;  %3519 = vpow2.f32 %v2400_v40 }
 0x9aa   :  { %v2426_v46 = vpack.c.bf16 %v2337_v51, %v2336_v12 }
 0x9ab   :  { %v3514_v27 = vpop.eup %3513  ;;  %v2363_v57 = vadd.f32 %v3512_v59, %v2361_v9  ;;  %v2387_v48 = vsub.f32 %v2229_v33, %v2385_v3  ;;  %v2393_v28 = vsub.f32 %v2260_v34, %v2385_v3  ;;  %v2399_v29 = vsub.f32 %v2291_v52, %v2385_v3 }
 0x9ac   :  { %3239 = vmatmul.msk.bf16.vlgmr.msra.gmra.mxu3 %vm596_vm3, %v2426_v46  ;;  %v2366_v1 = vmul.f32 %v3514_v27, %v3500_v55  ;;  %v2370_v31 = vmul.f32 %v3514_v27, %v3502_v60  ;;  %v2376_v13 = vmul.f32 %v3514_v27, %v3506_v6 }
 0x9ad   :  { %v3516_v45 = vpop.eup %3515  ;;  %3521 = vrcp.f32 %v2363_v57  ;;  %v2390_v19 = vmul.f32 1.442695, %v2387_v48  ;;  %v2396_v20 = vmul.f32 1.442695, %v2393_v28  ;;  %v2402_v2 = vmul.f32 1.442695, %v2399_v29 }
 0x9ae   :  { %v3518_v24 = vpop.eup %3517  ;;  %v2368_v25 = vmul.f32 %v2366_v1, %v5118_v44  ;;  %v2372_v11 = vmul.f32 %v2370_v31, %v5121_v61  ;;  %v2378_v47 = vmul.f32 %v2376_v13, %v5132_v22 }
 0x9af   :  { %v2404_v5 = vadd.f32 %v3518_v24, %v3516_v45  ;;  %3523 = vpow2.f32 %v2390_v19  ;;  %v3520_v4 = vpop.eup %3519 }
 0x9b0   :  { %3525 = vpow2.f32 %v2396_v20  ;;  %v2374_v62 = vadd.f32 %v2372_v11, %v2368_v25 }
 0x9b1   :  { %v2406_v56 = vadd.f32 %v3520_v4, %v2404_v5  ;;  %3527 = vpow2.f32 %v2402_v2 }
 0x9b2   :  { %v2380_v23 = vadd.f32 %v2378_v47, %v2374_v62 }
 0x9b3   :  { %v3522_v53 = vpop.eup %3521  ;;  %3529 = vrcp.f32 %v2406_v56 }
 0x9b4   :  { %v2367_v14 = vmul.f32 %v3522_v53, %v3508_v42  ;;  %v2371_v7 = vmul.f32 %v3522_v53, %v3510_v50  ;;  %v2377_v10 = vmul.f32 %v3522_v53, %v3512_v59 }
 0x9b5   :  { %v3524_v38 = vpop.eup %3523 }
 0x9b6   :  { %v3526_v55 = vpop.eup %3525  ;;  %v2369_v60 = vmul.f32 %v2367_v14, %v5124_v39  ;;  %v2373_v21 = vmul.f32 %v2371_v7, %v5129_v43  ;;  %v2379_v33 = vmul.f32 %v2377_v10, %v5134_v36 }
 0x9b7   :  { %v2405_v30 = vadd.f32 %v3526_v55, %v3524_v38  ;;  %v3528_v32 = vpop.eup %3527 }
 0x9b8   :  { %v2375_v8 = vadd.f32 %v2373_v21, %v2369_v60 }
 0x9b9   :  { %v2407_v34 = vadd.f32 %v3528_v32, %v2405_v30  ;;  %v3530_v6 = vpop.eup %3529 }
 0x9ba   :  { %v2381_v35 = vadd.f32 %v2379_v33, %v2375_v8  ;;  %v2410_v54 = vmul.f32 %v3530_v6, %v3516_v45  ;;  %v2414_v49 = vmul.f32 %v3530_v6, %v3518_v24  ;;  %v2420_v51 = vmul.f32 %v3530_v6, %v3520_v4 }
 0x9bb   :  { %3531 = vrcp.f32 %v2407_v34 }
 0x9bc   :  { %v2427_v26 = vpack.c.bf16 %v2381_v35, %v2380_v23  ;;  %v2412_v40 = vmul.f32 %v2410_v54, %v5118_v44  ;;  %v2416_v12 = vmul.f32 %v2414_v49, %v5121_v61  ;;  %v2422_v27 = vmul.f32 %v2420_v51, %v5132_v22  ;;  %v3392_v44 = vld [vmem:[#allocation29 + $0x1] ss:$0 sm:$0xff] }
 0x9be   :  { %3240 = vmatmul.msk.bf16.gmra.mxu3 %vm596_vm3, %v2427_v26  ;;  %v2418_v59 = vadd.f32 %v2416_v12, %v2412_v40 }
 0x9c0   :  { %v2424_v48 = vadd.f32 %v2422_v27, %v2418_v59  ;;  %v3304_v59 = vld [vmem:[#allocation34 + $0x18] sm:$0xff]  ;;  %v3303_v27 = vld [vmem:[#allocation34 + $0x10] sm:$0xff] }
 0x9c1   :  { %v3532_v37 = vpop.eup %3531  ;;  %2666 = vmatpush.bf16.msra.mxu0 %v3304_v59 }
 0x9c2   :  { %v2411_v42 = vmul.f32 %v3532_v37, %v3524_v38  ;;  %v2415_v17 = vmul.f32 %v3532_v37, %v3526_v55  ;;  %v2421_v50 = vmul.f32 %v3532_v37, %v3528_v32 }
 0x9c4   :  { %v2413_v52 = vmul.f32 %v2411_v42, %v5124_v39  ;;  %v2417_v9 = vmul.f32 %v2415_v17, %v5129_v43  ;;  %v2423_v3 = vmul.f32 %v2421_v50, %v5134_v36 }
 0x9c5   :  { %2667 = vmatpush.bf16.msra.mxu0 %v3303_v27 }
 0x9c6   :  { %v2419_v46 = vadd.f32 %v2417_v9, %v2413_v52 }
 0x9c8   :  { %v2425_v57 = vadd.f32 %v2423_v3, %v2419_v46 }
 0x9ca   :  { %v2428_v28 = vpack.c.bf16 %v2425_v57, %v2424_v48 }
 0x9ce   :  { %3241 = vmatmul.msk.bf16.gmra.mxu3 %vm596_vm3, %v2428_v28 }
 0xa2f   :  { %v2462_v29 = vpop.f32.mrf.mxu3 }
 0xa30   :  { %v2463_v45 = vadd.f32 %v3392_v44, %v2462_v29 }
 0xa32   :  { %v2477_v61 = vadd.f32 %v2463_v45, %v5031_v15 }
 0xa34   :  { %v2483_v39 = vsel %vm596_vm3, %v2477_v61, 0.0 }
 0xa35   :  { %2484 = vadd.xlane.f32.xlu0 %v2483_v39 }
 0xa37   :  { %v2464_v43 = vpop.f32.mrf.mxu3 }
 0xa38   :  { %v2465_v19 = vadd.f32 %v3392_v44, %v2464_v43 }
 0xa3a   :  { %v2478_v36 = vadd.f32 %v2465_v19, %v5034_v16 }
 0xa3c   :  { %v2486_v20 = vsel %vm596_vm3, %v2478_v36, 0.0 }
 0xa3d   :  { %2487 = vadd.xlane.f32.xlu1 %v2486_v20 }
 0xa41   :  { %v2467_v22 = vpop.f32.mrf.mxu3 }
 0xa42   :  { %v2468_v24 = vadd.f32 %v3392_v44, %v2467_v22 }
 0xa44   :  { %v2479_v1 = vadd.f32 %v2468_v24, %v5051_v58 }
 0xa46   :  { %v2489_v31 = vsel %vm596_vm3, %v2479_v1, 0.0 }
 0xa47   :  { %2490 = vadd.xlane.f32.xlu2 %v2489_v31 }
 0xa49   :  { %v2469_v2 = vpop.f32.mrf.mxu3 }
 0xa4a   :  { %v2470_v5 = vadd.f32 %v3392_v44, %v2469_v2 }
 0xa4c   :  { %v2480_v15 = vadd.f32 %v2470_v5, %v5054_v41 }
 0xa4e   :  { %v2492_v4 = vsel %vm596_vm3, %v2480_v15, 0.0 }
 0xa4f   :  { %2493 = vadd.xlane.f32.xlu0 %v2492_v4  ;;  %v5206_v4 = vld [vmem:[#allocation31 + $0x1] ss:$0 sm:$0xff] }
 0xa51   :  { %v2472_v56 = vpop.f32.mrf.mxu3 }
 0xa52   :  { %v2473_v25 = vadd.f32 %v3392_v44, %v2472_v56 }
 0xa54   :  { %v2481_v16 = vadd.f32 %v2473_v25, %v5066_v63 }
 0xa56   :  { %v2495_v11 = vsel %vm596_vm3, %v2481_v16, 0.0 }
 0xa57   :  { %2496 = vadd.xlane.f32.xlu1 %v2495_v11 }
 0xa59   :  { %v2474_v53 = vpop.f32.mrf.mxu3 }
 0xa5a   :  { %v2475_v13 = vadd.f32 %v3392_v44, %v2474_v53 }
 0xa5c   :  { %v2482_v58 = vadd.f32 %v2475_v13, %v5069_v0 }
 0xa5e   :  { %v2498_v14 = vsel %vm596_vm3, %v2482_v58, 0.0 }
 0xa5f   :  { %2499 = vadd.xlane.f32.xlu2 %v2498_v14  ;;  %v5210_v14 = vld [vmem:[#allocation32 + $0x1] ss:$0 sm:$0xff] }
 0xaa8   :  { %v2485_v7 = vpop.xlane.xlu0 %2484 }
 0xaa9   :  { %v2501_v41 = vmul.f32 %v2485_v7, %v4830_v18 }
 0xaab   :  { %v5168_v10 = vsub.f32 %v2477_v61, %v2501_v41 }
 0xaad   :  { %v2513_v38 = vmul.f32 %v5168_v10, %v5168_v10 }
 0xaaf   :  { %v2519_v63 = vsel %vm596_vm3, %v2513_v38, 0.0 }
 0xab0   :  { %v2488_v55 = vpop.xlane.xlu1 %2487  ;;  %2520 = vadd.xlane.f32.xlu0 %v2519_v63 }
 0xab1   :  { %v2502_v60 = vmul.f32 %v2488_v55, %v4830_v18 }
 0xab3   :  { %v5174_v21 = vsub.f32 %v2478_v36, %v2502_v60 }
 0xab5   :  { %v2514_v0 = vmul.f32 %v5174_v21, %v5174_v21 }
 0xab7   :  { %v2522_v62 = vsel %vm596_vm3, %v2514_v0, 0.0 }
 0xab8   :  { %2523 = vadd.xlane.f32.xlu1 %v2522_v62 }
 0xaba   :  { %v2491_v30 = vpop.xlane.xlu2 %2490 }
 0xabb   :  { %v2503_v32 = vmul.f32 %v2491_v30, %v4830_v18 }
 0xabd   :  { %v5180_v8 = vsub.f32 %v2479_v1, %v2503_v32 }
 0xabf   :  { %v2515_v47 = vmul.f32 %v5180_v8, %v5180_v8 }
 0xac1   :  { %v2525_v33 = vsel %vm596_vm3, %v2515_v47, 0.0 }
 0xac2   :  { %v2494_v34 = vpop.xlane.xlu0 %2493  ;;  %2526 = vadd.xlane.f32.xlu2 %v2525_v33 }
 0xac3   :  { %v2504_v6 = vmul.f32 %v2494_v34, %v4830_v18 }
 0xac5   :  { %v5186_v23 = vsub.f32 %v2480_v15, %v2504_v6 }
 0xac7   :  { %v2516_v35 = vmul.f32 %v5186_v23, %v5186_v23 }
 0xac9   :  { %v2528_v26 = vsel %vm596_vm3, %v2516_v35, 0.0 }
 0xaca   :  { %2529 = vadd.xlane.f32.xlu0 %v2528_v26  ;;  %v2497_v54 = vpop.xlane.xlu1 %2496 }
 0xacb   :  { %v2505_v49 = vmul.f32 %v2497_v54, %v4830_v18 }
 0xacd   :  { %v5192_v37 = vsub.f32 %v2481_v16, %v2505_v49 }
 0xacf   :  { %v2517_v40 = vmul.f32 %v5192_v37, %v5192_v37 }
 0xad1   :  { %v2531_v42 = vsel %vm596_vm3, %v2517_v40, 0.0 }
 0xad2   :  { %v2500_v17 = vpop.xlane.xlu2 %2499  ;;  %2532 = vadd.xlane.f32.xlu1 %v2531_v42 }
 0xad3   :  { %v2506_v50 = vmul.f32 %v2500_v17, %v4830_v18 }
 0xad5   :  { %v5198_v12 = vsub.f32 %v2482_v58, %v2506_v50 }
 0xad7   :  { %v2518_v51 = vmul.f32 %v5198_v12, %v5198_v12 }
 0xad9   :  { %v2534_v52 = vsel %vm596_vm3, %v2518_v51, 0.0 }
 0xada   :  { %2535 = vadd.xlane.f32.xlu2 %v2534_v52 }
 0xb23   :  { %v2521_v9 = vpop.xlane.xlu0 %2520 }
 0xb24   :  { %v2537_v3 = vmul.f32 %v2521_v9, %v4830_v18 }
 0xb26   :  { %v2543_v46 = vadd.f32 1e-05, %v2537_v3 }
 0xb28   :  { %3533 = vrsqrt.f32 %v2543_v46  ;;  %vm2555_vm14 = vweird.f32 %v2543_v46 }
 0xb2b   :  { %v2524_v57 = vpop.xlane.xlu1 %2523 }
 0xb2c   :  { %v2538_v48 = vmul.f32 %v2524_v57, %v4830_v18 }
 0xb2e   :  { %v3534_v28 = vpop.eup %3533  ;;  %v2544_v44 = vadd.f32 1e-05, %v2538_v48 }
 0xb2f   :  { %v2550_v29 = vmul.f32 %v3534_v28, %v2543_v46  ;;  %vm2556_vm13 = vweird.f32 %v3534_v28 }
 0xb30   :  { %3535 = vrsqrt.f32 %v2544_v44  ;;  %vm2557_vm15 = vmor %vm2555_vm14, %vm2556_vm13  ;;  %vm2565_vm1 = vweird.f32 %v2544_v44 }
 0xb31   :  { %v2551_v45 = vmul.f32 %v3534_v28, %v2550_v29 }
 0xb33   :  { %v2552_v61 = vmul.f32 0.5, %v2551_v45 }
 0xb35   :  { %v2553_v39 = vsub.f32 1.5, %v2552_v61  ;;  %v2527_v43 = vpop.xlane.xlu2 %2526 }
 0xb36   :  { %v3536_v19 = vpop.eup %3535  ;;  %v2539_v36 = vmul.f32 %v2527_v43, %v4830_v18 }
 0xb37   :  { %v2554_v20 = vmul.f32 %v3534_v28, %v2553_v39  ;;  %v2560_v22 = vmul.f32 %v3536_v19, %v2544_v44  ;;  %vm2566_vm0 = vweird.f32 %v3536_v19 }
 0xb38   :  { %v2545_v24 = vadd.f32 1e-05, %v2539_v36  ;;  %vm2567_vm2 = vmor %vm2565_vm1, %vm2566_vm0 }
 0xb39   :  { %v2561_v1 = vmul.f32 %v3536_v19, %v2560_v22  ;;  %v2558_v31 = vsel %vm2557_vm15, %v3534_v28, %v2554_v20 }
 0xb3a   :  { %3537 = vrsqrt.f32 %v2545_v24  ;;  %v2609_v56 = vmul.f32 %v2558_v31, %v5168_v10  ;;  %vm2575_vm5 = vweird.f32 %v2545_v24 }
 0xb3b   :  { %v2562_v2 = vmul.f32 0.5, %v2561_v1 }
 0xb3c   :  { %v2618_v7 = vmul.f32 %v5206_v4, %v2609_v56  ;;  %v3307_v56 = vld [vmem:[%s5386_s17 + $0x30] sm:$0xff] }
 0xb3d   :  { %v2563_v5 = vsub.f32 1.5, %v2562_v2  ;;  %v2530_v15 = vpop.xlane.xlu0 %2529 }
 0xb3e   :  { %v2540_v25 = vmul.f32 %v2530_v15, %v4830_v18  ;;  %v5216_v60 = vadd.f32 %v5210_v14, %v2618_v7  ;;  %v3308_v15 = vld [vmem:[%s5386_s17 + $0x38] sm:$0xff] }
 0xb3f   :  { %v2564_v16 = vmul.f32 %v3536_v19, %v2563_v5  ;;  %2781 = vmatpush.bf16.msra.mxu1 %v3308_v15 }
 0xb40   :  { %v3538_v11 = vpop.eup %3537  ;;  %v2546_v53 = vadd.f32 1e-05, %v2540_v25  ;;  %v3306_v25 = vld [vmem:[%s5386_s17 + $0x28] sm:$0xff] }
 0xb41   :  { %v2568_v13 = vsel %vm2567_vm2, %v3536_v19, %v2564_v16  ;;  %v2570_v58 = vmul.f32 %v3538_v11, %v2545_v24  ;;  %vm2576_vm4 = vweird.f32 %v3538_v11 }
 0xb42   :  { %v2610_v41 = vmul.f32 %v2568_v13, %v5174_v21  ;;  %3539 = vrsqrt.f32 %v2546_v53  ;;  %vm2577_vm6 = vmor %vm2575_vm5, %vm2576_vm4  ;;  %vm2585_vm9 = vweird.f32 %v2546_v53 }
 0xb43   :  { %v2571_v38 = vmul.f32 %v3538_v11, %v2570_v58  ;;  %2782 = vmatpush.bf16.msra.mxu1 %v3307_v56 }
 0xb44   :  { %v2619_v63 = vmul.f32 %v5206_v4, %v2610_v41 }
 0xb45   :  { %v2572_v10 = vmul.f32 0.5, %v2571_v38  ;;  %v2533_v55 = vpop.xlane.xlu1 %2532 }
 0xb46   :  { %v5219_v0 = vadd.f32 %v5210_v14, %v2619_v63  ;;  %v2541_v62 = vmul.f32 %v2533_v55, %v4830_v18 }
 0xb47   :  { %v2573_v30 = vsub.f32 1.5, %v2572_v10  ;;  %2783 = vmatpush.bf16.msra.mxu1 %v3306_v25 }
 0xb48   :  { %v3540_v32 = vpop.eup %3539  ;;  %v2633_v47 = vpack.c.bf16 %v5219_v0, %v5216_v60  ;;  %v2547_v21 = vadd.f32 1e-05, %v2541_v62 }
 0xb49   :  { %v2574_v33 = vmul.f32 %v3538_v11, %v2573_v30  ;;  %v2580_v34 = vmul.f32 %v3540_v32, %v2546_v53  ;;  %vm2586_vm7 = vweird.f32 %v3540_v32  ;;  %v3305_v53 = vld [vmem:[%s5386_s17 + $0x20] sm:$0xff] }
 0xb4a   :  { %3541 = vrsqrt.f32 %v2547_v21  ;;  %3250 = vmatmul.msk.bf16.vlgmr.msra.gmra.mxu0 %vm596_vm3, %v2633_v47  ;;  %vm2587_vm10 = vmor %vm2585_vm9, %vm2586_vm7  ;;  %vm2595_vm12 = vweird.f32 %v2547_v21 }
 0xb4b   :  { %v2581_v6 = vmul.f32 %v3540_v32, %v2580_v34  ;;  %v2578_v35 = vsel %vm2577_vm6, %v3538_v11, %v2574_v33  ;;  %2784 = vmatpush.bf16.msra.mxu1 %v3305_v53 }
 0xb4c   :  { %v2611_v17 = vmul.f32 %v2578_v35, %v5180_v8 }
 0xb4d   :  { %v2582_v26 = vmul.f32 0.5, %v2581_v6  ;;  %v2536_v54 = vpop.xlane.xlu2 %2535 }
 0xb4e   :  { %v2542_v49 = vmul.f32 %v2536_v54, %v4830_v18  ;;  %v2620_v46 = vmul.f32 %v5206_v4, %v2611_v17 }
 0xb4f   :  { %v2583_v40 = vsub.f32 1.5, %v2582_v26 }
 0xb50   :  { %v3542_v42 = vpop.eup %3541  ;;  %v2548_v50 = vadd.f32 1e-05, %v2542_v49  ;;  %v5231_v44 = vadd.f32 %v5210_v14, %v2620_v46 }
 0xb51   :  { %v2584_v51 = vmul.f32 %v3540_v32, %v2583_v40  ;;  %v2590_v52 = vmul.f32 %v3542_v42, %v2547_v21  ;;  %vm2596_vm11 = vweird.f32 %v3542_v42 }
 0xb52   :  { %3543 = vrsqrt.f32 %v2548_v50  ;;  %vm2597_vm13 = vmor %vm2595_vm12, %vm2596_vm11  ;;  %vm2605_vm15 = vweird.f32 %v2548_v50 }
 0xb53   :  { %v2588_v9 = vsel %vm2587_vm10, %v3540_v32, %v2584_v51  ;;  %v2591_v3 = vmul.f32 %v3542_v42, %v2590_v52 }
 0xb54   :  { %v2612_v59 = vmul.f32 %v2588_v9, %v5186_v23 }
 0xb55   :  { %v2592_v27 = vmul.f32 0.5, %v2591_v3 }
 0xb56   :  { %v2621_v57 = vmul.f32 %v5206_v4, %v2612_v59 }
 0xb57   :  { %v2593_v48 = vsub.f32 1.5, %v2592_v27 }
 0xb58   :  { %v3544_v28 = vpop.eup %3543  ;;  %v5234_v8 = vadd.f32 %v5210_v14, %v2621_v57 }
 0xb59   :  { %v2594_v29 = vmul.f32 %v3542_v42, %v2593_v48  ;;  %v2600_v45 = vmul.f32 %v3544_v28, %v2548_v50  ;;  %vm2606_vm14 = vweird.f32 %v3544_v28 }
 0xb5a   :  { %v2634_v61 = vpack.c.bf16 %v5234_v8, %v5231_v44  ;;  %vm2607_vm0 = vmor %vm2605_vm15, %vm2606_vm14 }
 0xb5b   :  { %v2601_v23 = vmul.f32 %v3544_v28, %v2600_v45  ;;  %v2598_v39 = vsel %vm2597_vm13, %v3542_v42, %v2594_v29 }
 0xb5c   :  { %3251 = vmatmul.msk.bf16.gmra.mxu0 %vm596_vm3, %v2634_v61  ;;  %v2613_v36 = vmul.f32 %v2598_v39, %v5192_v37 }
 0xb5d   :  { %v2602_v43 = vmul.f32 0.5, %v2601_v23 }
 0xb5e   :  { %v2622_v1 = vmul.f32 %v5206_v4, %v2613_v36 }
 0xb5f   :  { %v2603_v19 = vsub.f32 1.5, %v2602_v43 }
 0xb60   :  { %v5244_v2 = vadd.f32 %v5210_v14, %v2622_v1 }
 0xb61   :  { %v2604_v20 = vmul.f32 %v3544_v28, %v2603_v19 }
 0xb63   :  { %v2608_v22 = vsel %vm2607_vm0, %v3544_v28, %v2604_v20 }
 0xb64   :  { %v2614_v24 = vmul.f32 %v2608_v22, %v5198_v12  ;;  %v3395_v12 = vld [vmem:[#allocation35 + $0x1] ss:$0 sm:$0xff] }
 0xb66   :  { %v2623_v31 = vmul.f32 %v5206_v4, %v2614_v24 }
 0xb68   :  { %v5247_v5 = vadd.f32 %v5210_v14, %v2623_v31 }
 0xb6a   :  { %v2635_v37 = vpack.c.bf16 %v5247_v5, %v5244_v2 }
 0xb6c   :  { %3252 = vmatmul.msk.bf16.gmra.mxu0 %vm596_vm3, %v2635_v37 }
 0xbc7   :  { %v2669_v16 = vpop.f32.mrf.mxu0 }
 0xbc8   :  { %v2670_v11 = vadd.f32 %v3395_v12, %v2669_v16 }
 0xbca   :  { %v2684_v4 = vmul.f32 %v2670_v11, %v2670_v11 }
 0xbcc   :  { %v2690_v13 = vmul.f32 %v2684_v4, %v2670_v11 }
 0xbce   :  { %v2696_v58 = vmul.f32 0.044715, %v2690_v13 }
 0xbcf   :  { %v2671_v14 = vpop.f32.mrf.mxu0 }
 0xbd0   :  { %v2702_v7 = vadd.f32 %v2696_v58, %v2670_v11  ;;  %v2672_v41 = vadd.f32 %v3395_v12, %v2671_v14 }
 0xbd2   :  { %v2708_v38 = vmul.f32 0.7978846, %v2702_v7  ;;  %v2685_v63 = vmul.f32 %v2672_v41, %v2672_v41 }
 0xbd4   :  { %v2691_v10 = vmul.f32 %v2685_v63, %v2672_v41  ;;  %3545 = vtanh.f32 %v2708_v38 }
 0xbd6   :  { %v2697_v55 = vmul.f32 0.044715, %v2691_v10 }
 0xbd8   :  { %v2703_v62 = vadd.f32 %v2697_v55, %v2672_v41 }
 0xbd9   :  { %v2674_v30 = vpop.f32.mrf.mxu0 }
 0xbda   :  { %v2709_v32 = vmul.f32 0.7978846, %v2703_v62  ;;  %v2675_v47 = vadd.f32 %v3395_v12, %v2674_v30  ;;  %v3546_v21 = vpop.eup %3545  ;;  %v3396_v62 = vld [vmem:[#allocation37 + $0x1] ss:$0 sm:$0xff] }
 0xbdb   :  { %v2720_v6 = vadd.f32 1.0, %v3546_v21 }
 0xbdc   :  { %3547 = vtanh.f32 %v2709_v32  ;;  %v2686_v33 = vmul.f32 %v2675_v47, %v2675_v47 }
 0xbdd   :  { %v2726_v42 = vmul.f32 0.5, %v2720_v6 }
 0xbde   :  { %v2692_v34 = vmul.f32 %v2686_v33, %v2675_v47 }
 0xbdf   :  { %v2732_v3 = vmul.f32 %v2726_v42, %v2670_v11 }
 0xbe0   :  { %v2698_v35 = vmul.f32 0.044715, %v2692_v34 }
 0xbe1   :  { %v2676_v26 = vpop.f32.mrf.mxu0 }
 0xbe2   :  { %v3548_v54 = vpop.eup %3547  ;;  %v2704_v49 = vadd.f32 %v2698_v35, %v2675_v47  ;;  %v2677_v40 = vadd.f32 %v3395_v12, %v2676_v26 }
 0xbe3   :  { %v2721_v17 = vadd.f32 1.0, %v3548_v54 }
 0xbe4   :  { %v2710_v50 = vmul.f32 0.7978846, %v2704_v49  ;;  %v2687_v51 = vmul.f32 %v2677_v40, %v2677_v40 }
 0xbe5   :  { %v2727_v52 = vmul.f32 0.5, %v2721_v17 }
 0xbe6   :  { %v2693_v9 = vmul.f32 %v2687_v51, %v2677_v40  ;;  %3549 = vtanh.f32 %v2710_v50 }
 0xbe7   :  { %v2733_v59 = vmul.f32 %v2727_v52, %v2672_v41 }
 0xbe8   :  { %v2699_v46 = vmul.f32 0.044715, %v2693_v9 }
 0xbe9   :  { %v2738_v27 = vpack.c.bf16 %v2733_v59, %v2732_v3  ;;  %v2679_v57 = vpop.f32.mrf.mxu0 }
 0xbea   :  { %v2705_v48 = vadd.f32 %v2699_v46, %v2677_v40  ;;  %v2680_v28 = vadd.f32 %v3395_v12, %v2679_v57 }
 0xbeb   :  { %3269 = vmatmul.msk.bf16.vlgmr.msra.gmra.mxu1 %vm1642_vm8, %v2738_v27 }
 0xbec   :  { %v2711_v29 = vmul.f32 0.7978846, %v2705_v48  ;;  %v2688_v45 = vmul.f32 %v2680_v28, %v2680_v28  ;;  %v3550_v61 = vpop.eup %3549 }
 0xbed   :  { %v2722_v43 = vadd.f32 1.0, %v3550_v61 }
 0xbee   :  { %3551 = vtanh.f32 %v2711_v29  ;;  %v2694_v23 = vmul.f32 %v2688_v45, %v2680_v28 }
 0xbef   :  { %v2728_v31 = vmul.f32 0.5, %v2722_v43 }
 0xbf0   :  { %v2700_v39 = vmul.f32 0.044715, %v2694_v23 }
 0xbf1   :  { %v2681_v19 = vpop.f32.mrf.mxu0  ;;  %v2734_v16 = vmul.f32 %v2728_v31, %v2675_v47 }
 0xbf2   :  { %v2706_v36 = vadd.f32 %v2700_v39, %v2680_v28  ;;  %v2682_v20 = vadd.f32 %v3395_v12, %v2681_v19 }
 0xbf4   :  { %v3552_v22 = vpop.eup %3551  ;;  %v2712_v24 = vmul.f32 0.7978846, %v2706_v36  ;;  %v2689_v1 = vmul.f32 %v2682_v20, %v2682_v20 }
 0xbf5   :  { %v2723_v37 = vadd.f32 1.0, %v3552_v22 }
 0xbf6   :  { %v2695_v15 = vmul.f32 %v2689_v1, %v2682_v20  ;;  %3553 = vtanh.f32 %v2712_v24 }
 0xbf7   :  { %v2729_v56 = vmul.f32 0.5, %v2723_v37 }
 0xbf8   :  { %v2701_v25 = vmul.f32 0.044715, %v2695_v15 }
 0xbf9   :  { %v2735_v11 = vmul.f32 %v2729_v56, %v2677_v40 }
 0xbfa   :  { %v2707_v4 = vadd.f32 %v2701_v25, %v2682_v20 }
 0xbfb   :  { %v2739_v53 = vpack.c.bf16 %v2735_v11, %v2734_v16 }
 0xbfc   :  { %v2713_v13 = vmul.f32 0.7978846, %v2707_v4  ;;  %v3554_v58 = vpop.eup %3553 }
 0xbfd   :  { %3270 = vmatmul.msk.bf16.gmra.mxu1 %vm1642_vm8, %v2739_v53  ;;  %v2724_v14 = vadd.f32 1.0, %v3554_v58 }
 0xbfe   :  { %3555 = vtanh.f32 %v2713_v13 }
 0xbff   :  { %v2730_v7 = vmul.f32 0.5, %v2724_v14 }
 0xc01   :  { %v2736_v63 = vmul.f32 %v2730_v7, %v2680_v28 }
 0xc04   :  { %v3556_v12 = vpop.eup %3555 }
 0xc05   :  { %v2725_v41 = vadd.f32 1.0, %v3556_v12 }
 0xc07   :  { %v2731_v38 = vmul.f32 0.5, %v2725_v41 }
 0xc09   :  { %v2737_v10 = vmul.f32 %v2731_v38, %v2682_v20 }
 0xc0b   :  { %v2740_v55 = vpack.c.bf16 %v2737_v10, %v2736_v63 }
 0xc0d   :  { %3271 = vmatmul.msk.bf16.gmra.mxu1 %vm1642_vm8, %v2740_v55 }
 0xc68   :  { %v2786_v30 = vpop.f32.mrf.mxu1 }
 0xc69   :  { %v2787_v32 = vadd.f32 %v3396_v62, %v2786_v30 }
 0xc6b   :  { %v2801_v47 = vadd.f32 %v2787_v32, %v5216_v60 }
 0xc6d   :  { %v2807_v21 = vsel %vm596_vm3, %v2801_v47, 0.0 }
 0xc6e   :  { %2808 = vadd.xlane.f32.xlu0 %v2807_v21 }
 0xc70   :  { %v2788_v33 = vpop.f32.mrf.mxu1 }
 0xc71   :  { %v2789_v34 = vadd.f32 %v3396_v62, %v2788_v33 }
 0xc73   :  { %v2802_v6 = vadd.f32 %v2789_v34, %v5219_v0 }
 0xc75   :  { %v2810_v35 = vsel %vm596_vm3, %v2802_v6, 0.0 }
 0xc76   :  { %2811 = vadd.xlane.f32.xlu1 %v2810_v35 }
 0xc7a   :  { %v2791_v26 = vpop.f32.mrf.mxu1 }
 0xc7b   :  { %v2792_v54 = vadd.f32 %v3396_v62, %v2791_v26 }
 0xc7d   :  { %v2803_v49 = vadd.f32 %v2792_v54, %v5231_v44 }
 0xc7f   :  { %v2813_v40 = vsel %vm596_vm3, %v2803_v49, 0.0 }
 0xc80   :  { %2814 = vadd.xlane.f32.xlu2 %v2813_v40 }
 0xc82   :  { %v2793_v42 = vpop.f32.mrf.mxu1 }
 0xc83   :  { %v2794_v17 = vadd.f32 %v3396_v62, %v2793_v42 }
 0xc85   :  { %v2804_v60 = vadd.f32 %v2794_v17, %v5234_v8 }
 0xc87   :  { %v2816_v50 = vsel %vm596_vm3, %v2804_v60, 0.0 }
 0xc88   :  { %2817 = vadd.xlane.f32.xlu0 %v2816_v50 }
 0xc8a   :  { %v2796_v51 = vpop.f32.mrf.mxu1 }
 0xc8b   :  { %v2797_v52 = vadd.f32 %v3396_v62, %v2796_v51 }
 0xc8d   :  { %v2805_v0 = vadd.f32 %v2797_v52, %v5244_v2 }
 0xc8f   :  { %v2819_v9 = vsel %vm596_vm3, %v2805_v0, 0.0 }
 0xc90   :  { %2820 = vadd.xlane.f32.xlu1 %v2819_v9 }
 0xc92   :  { %v2798_v3 = vpop.f32.mrf.mxu1 }
 0xc93   :  { %v2799_v59 = vadd.f32 %v3396_v62, %v2798_v3 }
 0xc95   :  { %v2806_v44 = vadd.f32 %v2799_v59, %v5247_v5 }
 0xc97   :  { %v2822_v46 = vsel %vm596_vm3, %v2806_v44, 0.0 }
 0xc98   :  { %2823 = vadd.xlane.f32.xlu2 %v2822_v46 }
 0xce1   :  { %v2809_v27 = vpop.xlane.xlu0 %2808 }
 0xce2   :  { %v2825_v8 = vmul.f32 %v2809_v27, %v4830_v18 }
 0xce4   :  { %v5272_v57 = vsub.f32 %v2801_v47, %v2825_v8 }
 0xce6   :  { %v2837_v48 = vmul.f32 %v5272_v57, %v5272_v57 }
 0xce8   :  { %v2843_v2 = vsel %vm596_vm3, %v2837_v48, 0.0 }
 0xce9   :  { %2844 = vadd.xlane.f32.xlu0 %v2843_v2  ;;  %v2812_v28 = vpop.xlane.xlu1 %2811 }
 0xcea   :  { %v2826_v29 = vmul.f32 %v2812_v28, %v4830_v18 }
 0xcec   :  { %v5278_v45 = vsub.f32 %v2802_v6, %v2826_v29 }
 0xcee   :  { %v2838_v5 = vmul.f32 %v5278_v45, %v5278_v45 }
 0xcf0   :  { %v2846_v61 = vsel %vm596_vm3, %v2838_v5, 0.0 }
 0xcf1   :  { %2847 = vadd.xlane.f32.xlu1 %v2846_v61 }
 0xcf3   :  { %v2815_v23 = vpop.xlane.xlu2 %2814 }
 0xcf4   :  { %v2827_v39 = vmul.f32 %v2815_v23, %v4830_v18 }
 0xcf6   :  { %v5284_v43 = vsub.f32 %v2803_v49, %v2827_v39 }
 0xcf8   :  { %v2839_v19 = vmul.f32 %v5284_v43, %v5284_v43 }
 0xcfa   :  { %v2849_v36 = vsel %vm596_vm3, %v2839_v19, 0.0 }
 0xcfb   :  { %v2818_v20 = vpop.xlane.xlu0 %2817  ;;  %2850 = vadd.xlane.f32.xlu2 %v2849_v36 }
 0xcfc   :  { %v2828_v22 = vmul.f32 %v2818_v20, %v4830_v18 }
 0xcfe   :  { %v5290_v24 = vsub.f32 %v2804_v60, %v2828_v22 }
 0xd00   :  { %v2840_v1 = vmul.f32 %v5290_v24, %v5290_v24 }
 0xd02   :  { %v2852_v31 = vsel %vm596_vm3, %v2840_v1, 0.0  ;;  %v3397_v1 = vld [vmem:[%s4423_s13 + $0x1] ss:$0 sm:$0xff]  ;;  %s4262_s13 = smov [#allocation40]  }
 0xd03   :  { %2853 = vadd.xlane.f32.xlu0 %v2852_v31  ;;  %v2821_v37 = vpop.xlane.xlu1 %2820  ;;  %s2969_s10 = sshll.u32 %s4262_s13, 4  ;;  %s2970_s10 = int_to_ptr.vmem [resolvable:$true] %s2969_s10 }
 0xd04   :  { %v2829_v15 = vmul.f32 %v2821_v37, %v4830_v18 }
 0xd06   :  { %v5296_v56 = vsub.f32 %v2805_v0, %v2829_v15 }
 0xd08   :  { %v2841_v25 = vmul.f32 %v5296_v56, %v5296_v56 }
 0xd0a   :  { %v2855_v16 = vsel %vm596_vm3, %v2841_v25, 0.0 }
 0xd0b   :  { %v2824_v11 = vpop.xlane.xlu2 %2823  ;;  %2856 = vadd.xlane.f32.xlu1 %v2855_v16 }
 0xd0c   :  { %v2830_v4 = vmul.f32 %v2824_v11, %v4830_v18 }
 0xd0e   :  { %v5302_v53 = vsub.f32 %v2806_v44, %v2830_v4 }
 0xd10   :  { %v2842_v13 = vmul.f32 %v5302_v53, %v5302_v53 }
 0xd12   :  { %v2858_v58 = vsel %vm596_vm3, %v2842_v13, 0.0  ;;  %v3398_v13 = vld [vmem:[#allocation38 + $0x1] ss:$0 sm:$0xff] }
 0xd13   :  { %2859 = vadd.xlane.f32.xlu2 %v2858_v58 }
 0xd5c   :  { %v2845_v14 = vpop.xlane.xlu0 %2844 }
 0xd5d   :  { %v2861_v12 = vmul.f32 %v2845_v14, %v4830_v18 }
 0xd5f   :  { %v2867_v7 = vadd.f32 1e-05, %v2861_v12 }
 0xd61   :  { %3557 = vrsqrt.f32 %v2867_v7  ;;  %vm2879_vm5 = vweird.f32 %v2867_v7 }
 0xd64   :  { %v2848_v41 = vpop.xlane.xlu1 %2847 }
 0xd65   :  { %v2862_v63 = vmul.f32 %v2848_v41, %v4830_v18 }
 0xd67   :  { %v5310_v62 = vadd.f32 1e-05, %v2862_v63  ;;  %v3558_v30 = vpop.eup %3557 }
 0xd68   :  { %v2874_v21 = vmul.f32 %v3558_v30, %v2867_v7  ;;  %vm2880_vm1 = vweird.f32 %v3558_v30 }
 0xd69   :  { %vm2881_vm6 = vmor %vm2879_vm5, %vm2880_vm1  ;;  %vm2889_vm12 = vweird.f32 %v5310_v62 }
 0xd6a   :  { %v2875_v35 = vmul.f32 %v3558_v30, %v2874_v21 }
 0xd6c   :  { %v2876_v17 = vmul.f32 0.5, %v2875_v35 }
 0xd6e   :  { %v2851_v38 = vpop.xlane.xlu2 %2850  ;;  %v2877_v9 = vsub.f32 1.5, %v2876_v17 }
 0xd6f   :  { %v2863_v10 = vmul.f32 %v2851_v38, %v4830_v18 }
 0xd70   :  { %v2878_v48 = vmul.f32 %v3558_v30, %v2877_v9 }
 0xd71   :  { %v2869_v55 = vadd.f32 1e-05, %v2863_v10 }
 0xd72   :  { %v2882_v39 = vsel %vm2881_vm6, %v3558_v30, %v2878_v48 }
 0xd73   :  { %3559 = vrsqrt.f32 %v2869_v55  ;;  %vm2899_vm2 = vweird.f32 %v2869_v55  ;;  %v2933_v31 = vmul.f32 %v2882_v39, %v5272_v57 }
 0xd74   :  { %3561 = vrsqrt.f32 %v5310_v62 }
 0xd75   :  { %v2942_v58 = vmul.f32 %v3397_v1, %v2933_v31 }
 0xd76   :  { %v2854_v32 = vpop.xlane.xlu0 %2853 }
 0xd77   :  { %v2864_v47 = vmul.f32 %v2854_v32, %v4830_v18 }
 0xd79   :  { %v3560_v33 = vpop.eup %3559  ;;  %v2870_v34 = vadd.f32 1e-05, %v2864_v47 }
 0xd7a   :  { %v2894_v6 = vmul.f32 %v3560_v33, %v2869_v55  ;;  %v5314_v54 = vpop.eup %3561  ;;  %vm2900_vm8 = vweird.f32 %v3560_v33  ;;  %v2951_v55 = vadd.f32 %v3398_v13, %v2942_v58 }
 0xd7b   :  { %3563 = vrsqrt.f32 %v2870_v34  ;;  %v2884_v60 = vmul.f32 %v5314_v54, %v5310_v62  ;;  %vm2901_vm4 = vmor %vm2899_vm2, %vm2900_vm8  ;;  %vm2890_vm9 = vweird.f32 %v5314_v54  ;;  %vm2909_vm10 = vweird.f32 %v2870_v34 }
 0xd7c   :  { %v2895_v26 = vmul.f32 %v3560_v33, %v2894_v6  ;;  %vm5327_vm14 = vmor %vm2889_vm12, %vm2890_vm9 }
 0xd7d   :  { %v2885_v3 = vmul.f32 %v5314_v54, %v2884_v60 }
 0xd7e   :  { %v2896_v49 = vmul.f32 0.5, %v2895_v26  ;;  %v2857_v40 = vpop.xlane.xlu1 %2856 }
 0xd7f   :  { %v2865_v42 = vmul.f32 %v2857_v40, %v4830_v18  ;;  %v2886_v2 = vmul.f32 0.5, %v2885_v3 }
 0xd80   :  { %v2897_v52 = vsub.f32 1.5, %v2896_v49 }
 0xd81   :  { %v3564_v50 = vpop.eup %3563  ;;  %v2871_v51 = vadd.f32 1e-05, %v2865_v42  ;;  %v2887_v19 = vsub.f32 1.5, %v2886_v2 }
 0xd82   :  { %v2904_v0 = vmul.f32 %v3564_v50, %v2870_v34  ;;  %v2898_v44 = vmul.f32 %v3560_v33, %v2897_v52  ;;  %vm2910_vm7 = vweird.f32 %v3564_v50 }
 0xd83   :  { %3565 = vrsqrt.f32 %v2871_v51  ;;  %v2888_v37 = vmul.f32 %v5314_v54, %v2887_v19  ;;  %vm2911_vm13 = vmor %vm2909_vm10, %vm2910_vm7  ;;  %vm2919_vm15 = vweird.f32 %v2871_v51 }
 0xd84   :  { %v2905_v59 = vmul.f32 %v3564_v50, %v2904_v0  ;;  %v2902_v5 = vsel %vm2901_vm4, %v3560_v33, %v2898_v44 }
 0xd85   :  { %v2935_v20 = vmul.f32 %v2902_v5, %v5284_v43  ;;  %v2892_v14 = vsel %vm5327_vm14, %v5314_v54, %v2888_v37 }
 0xd86   :  { %v2906_v46 = vmul.f32 0.5, %v2905_v59  ;;  %v2860_v27 = vpop.xlane.xlu2 %2859  ;;  %v2934_v62 = vmul.f32 %v2892_v14, %v5278_v45 }
 0xd87   :  { %v2866_v8 = vmul.f32 %v2860_v27, %v4830_v18  ;;  %v2944_v16 = vmul.f32 %v3397_v1, %v2935_v20 }
 0xd88   :  { %v2907_v61 = vsub.f32 1.5, %v2906_v46  ;;  %v2943_v6 = vmul.f32 %v3397_v1, %v2934_v62 }
 0xd89   :  { %v3566_v28 = vpop.eup %3565  ;;  %v2872_v29 = vadd.f32 1e-05, %v2866_v8  ;;  %v2953_v41 = vadd.f32 %v3398_v13, %v2944_v16 }
 0xd8a   :  { %v2914_v23 = vmul.f32 %v3566_v28, %v2871_v51  ;;  %v2908_v18 = vmul.f32 %v3564_v50, %v2907_v61  ;;  %vm2920_vm11 = vweird.f32 %v3566_v28  ;;  %v2952_v49 = vadd.f32 %v3398_v13, %v2943_v6 }
 0xd8b   :  { %3567 = vrsqrt.f32 %v2872_v29  ;;  %vm2921_vm0 = vmor %vm2919_vm15, %vm2920_vm11  ;;  %v2957_v47 = vadd.f32 %v2953_v41, %v2951_v55  ;;  %vm2929_vm1 = vweird.f32 %v2872_v29 }
 0xd8c   :  { %v2915_v36 = vmul.f32 %v3566_v28, %v2914_v23  ;;  %v2912_v11 = vsel %vm2911_vm13, %v3564_v50, %v2908_v18 }
 0xd8d   :  { %v2936_v38 = vmul.f32 %v2912_v11, %v5290_v24 }
 0xd8e   :  { %v2916_v22 = vmul.f32 0.5, %v2915_v36 }
 0xd8f   :  { %v2945_v21 = vmul.f32 %v3397_v1, %v2936_v38 }
 0xd90   :  { %v2917_v15 = vsub.f32 1.5, %v2916_v22 }
 0xd91   :  { %v3568_v25 = vpop.eup %3567  ;;  %v2954_v24 = vadd.f32 %v3398_v13, %v2945_v21 }
 0xd92   :  { %v2918_v4 = vmul.f32 %v3566_v28, %v2917_v15  ;;  %v2924_v57 = vmul.f32 %v3568_v25, %v2872_v29  ;;  %vm2930_vm8 = vweird.f32 %v3568_v25 }
 0xd93   :  { %vm2931_vm2 = vmor %vm2929_vm1, %vm2930_vm8  ;;  %v2958_v45 = vadd.f32 %v2954_v24, %v2952_v49 }
 0xd94   :  { %v2922_v12 = vsel %vm2921_vm0, %v3566_v28, %v2918_v4  ;;  %v2925_v7 = vmul.f32 %v3568_v25, %v2924_v57 }
 0xd95   :  { %v2937_v63 = vmul.f32 %v2922_v12, %v5296_v56 }
 0xd96   :  { %v2926_v10 = vmul.f32 0.5, %v2925_v7 }
 0xd97   :  { %v2946_v30 = vmul.f32 %v3397_v1, %v2937_v63 }
 0xd98   :  { %v2927_v32 = vsub.f32 1.5, %v2926_v10 }
 0xd99   :  { %v2955_v33 = vadd.f32 %v3398_v13, %v2946_v30 }
 0xd9a   :  { %v2928_v34 = vmul.f32 %v3568_v25, %v2927_v32 }
 0xd9b   :  { %v2959_v35 = vadd.f32 %v2957_v47, %v2955_v33 }
 0xd9c   :  { %v2932_v26 = vsel %vm2931_vm2, %v3568_v25, %v2928_v34 }
 0xd9d   :  { %v2938_v56 = vmul.f32 %v2932_v26, %v5302_v53  ;;  %v2961_v54 = vmul.f32 0.33333334, %v2959_v35 }
 0xd9f   :  { %v2947_v40 = vmul.f32 %v3397_v1, %v2938_v56  ;;  %2963 = vst.msk [vmem:[#allocation40] sm:$0xff] %vm596_vm3, %v2961_v54 }
 0xda1   :  { %v2956_v42 = vadd.f32 %v3398_v13, %v2947_v40 }
 0xda3   :  { %v2960_v17 = vadd.f32 %v2958_v45, %v2956_v42 }
 0xda5   :  { %v2962_v60 = vmul.f32 0.33333334, %v2960_v17 }
 0xda7   :  { %2964 = vst.msk [vmem:[#allocation40 + $0x8] sm:$0xff] %vm596_vm3, %v2962_v60 }
 0xda8   :  { %4172 = shalt.err (!%p4169_p12)
}
 0xda9   :  { %s4263_s0 = smov 128   ;;  %s4264_s25 = smov 8  }
 0xdaa   :  { %2977 = dma.vmem_to_hbm [thread:$0]  %s2970_s10, 256, %s2972_s11, [#allocation4], %s4263_s0, %s4263_s0, %s4264_s25  }
 0xdab   :  { %4199 = dma.done.wait [#allocation4], 256  }
 0xdac   :  { %4200 = vsyncadd [#allocation4], 4294967040 }
 0xdad   :  { %2982 = vsyncpa [#allocation3], 1 }
 0xdae   :  { %2983 = vsyncpa [#allocation6], 1 }
 0xdaf   :  { %2984 = vsyncpa [#allocation9], 1 }
 0xdb0   :  { %2985 = vsyncpa [#allocation12], 1 }
 0xdb1   :  { %2986 = vsyncpa [#allocation15], 1 }
 0xdb2   :  { %2987 = vsyncpa [#allocation18], 1 }
 0xdb3   :  { %2988 = vsyncpa [#allocation21], 1 }
 0xdb4   :  { %2989 = vsyncpa [#allocation24], 1 }
 0xdb5   :  { %2990 = vsyncpa [#allocation27], 1 }
 0xdb6   :  { %2991 = vsyncpa [#allocation30], 1 }
 0xdb7   :  { %2992 = vsyncpa [#allocation33], 1 }
 0xdb8   :  { %2993 = vsyncpa [#allocation36], 1 }
 0xdb9   :  { %2994 = vsyncpa [#allocation39], 1 }
 0xdba   :  { %2995 = vsyncpa [#allocation4], 1 }

</bundles_post_ra>
